<compile_context>
chip_gen: v5e
topology: v5e:2x2
jax: 0.10.0
libtpu: 0.0.40
codegen_flags: <defaults>
</compile_context>

<pallas_src>
import jax
import jax.numpy as jnp
import numpy as np
from jax.experimental import pallas as pl
from jax.experimental.pallas import tpu as pltpu

BN_EPS = 1e-5
CP = 128  # lane-dense channel padding


def fused_basic_block_kernel(x_ref, w1_ref, g1_ref, b1_ref, w2_ref, g2_ref, b2_ref,
                             o_ref, pad_ref):
    N, H, W, C = x_ref.shape          # C == CP (lane-padded)
    M = N * H * W
    inv_m = 1.0 / M

    # ---- build the pad=1 halo in VMEM once; the zero border is shared by both stages ----
    pad_ref[...] = jnp.zeros_like(pad_ref)
    pad_ref[:, 1:H + 1, 1:W + 1, :] = x_ref[...]

    def conv3x3(w_ref):
        # im2col: nine shifted (M, C) windows -> one (M, 9*C) tile -> single MXU matmul
        patches = jnp.concatenate(
            [pad_ref[:, dy:dy + H, dx:dx + W, :].reshape(M, C)
             for dy in range(3) for dx in range(3)],
            axis=-1,
        )
        return jnp.dot(patches, w_ref[...], preferred_element_type=jnp.float32)

    def batchnorm(y, g_ref, b_ref):
        # training-mode biased batch stats over all N*H*W rows (two-pass, centered)
        mean = jnp.sum(y, axis=0, keepdims=True) * inv_m
        d = y - mean
        var = jnp.sum(d * d, axis=0, keepdims=True) * inv_m
        return d * jax.lax.rsqrt(var + BN_EPS) * g_ref[...] + b_ref[...]

    # ---- stage 1: conv1 -> bn1 -> relu (written back into the same halo buffer) ----
    a1 = jnp.maximum(batchnorm(conv3x3(w1_ref), g1_ref, b1_ref), 0.0)
    pad_ref[:, 1:H + 1, 1:W + 1, :] = a1.reshape(N, H, W, C)

    # ---- stage 2: conv2 -> bn2 -> +identity -> relu ----
    y2 = batchnorm(conv3x3(w2_ref), g2_ref, b2_ref) + x_ref[...].reshape(M, C)
    o_ref[...] = jnp.maximum(y2, 0.0)


def _full_spec(shape):
    zeros = (0,) * len(shape)
    return pl.BlockSpec(shape, lambda i, _z=zeros: _z)


def _taps_to_matrix(w_oihw):
    """(Cout, Cin, 3, 3) -> (9*CP, CP); row block k = tap (dy, dx), k = dy*3 + dx."""
    cout, cin = w_oihw.shape[0], w_oihw.shape[1]
    taps = jnp.transpose(w_oihw.astype(jnp.float32), (2, 3, 1, 0)).reshape(9, cin, cout)
    taps = jnp.pad(taps, ((0, 0), (0, CP - cin), (0, CP - cout)))
    return taps.reshape(9 * CP, CP)


def _pad_vec(v):
    return jnp.pad(v.astype(jnp.float32), (0, CP - v.shape[0])).reshape(1, CP)


@jax.jit
def basic_block_forward(x_nchw, w1_oihw, g1, b1, w2_oihw, g2, b2):
    """Pallas BasicBlock.forward (stride=1, no downsample, no CBAM)."""
    N, C, H, W = x_nchw.shape

    # NCHW -> NHWC, lane-pad channels to 128 (padded channels stay 0 end-to-end)
    x = jnp.transpose(x_nchw, (0, 2, 3, 1)).astype(jnp.float32)
    x = jnp.pad(x, ((0, 0), (0, 0), (0, 0), (0, CP - C)))

    w1f = _taps_to_matrix(w1_oihw)
    w2f = _taps_to_matrix(w2_oihw)
    g1p, b1p, g2p, b2p = _pad_vec(g1), _pad_vec(b1), _pad_vec(g2), _pad_vec(b2)

    inputs = [x, w1f, g1p, b1p, w2f, g2p, b2p]

    out_flat = pl.pallas_call(
        fused_basic_block_kernel,
        out_shape=jax.ShapeDtypeStruct((N * H * W, CP), jnp.float32),
        grid_spec=pltpu.PrefetchScalarGridSpec(
            num_scalar_prefetch=0,
            grid=(1,),
            in_specs=[_full_spec(a.shape) for a in inputs],
            out_specs=_full_spec((N * H * W, CP)),
            scratch_shapes=[
                pltpu.VMEM((N, H + 2, W + 2, CP), jnp.float32),  # shared halo buffer
            ],
        ),
        compiler_params=pltpu.CompilerParams(
            dimension_semantics=("arbitrary",),
            vmem_limit_bytes=32 * 1024 * 1024,
        ),
    )(*inputs)

    out = out_flat.reshape(N, H, W, CP)[..., :C]
    return jnp.transpose(out, (0, 3, 1, 2))  # NHWC -> NCHW


# ---------------- pure-JAX reference (matches PyTorch training-mode semantics) ----------------
def reference_forward(x_nchw, w1_oihw, g1, b1, w2_oihw, g2, b2):
    def conv(x, w):
        return jax.lax.conv_general_dilated(
            x, w, window_strides=(1, 1), padding=((1, 1), (1, 1)),
            dimension_numbers=("NCHW", "OIHW", "NCHW"),
        )

    def bn(x, g, b):
        mean = jnp.mean(x, axis=(0, 2, 3), keepdims=True)
        var = jnp.mean((x - mean) ** 2, axis=(0, 2, 3), keepdims=True)
        return (x - mean) * jax.lax.rsqrt(var + BN_EPS) * g.reshape(1, -1, 1, 1) \
            + b.reshape(1, -1, 1, 1)

    out = jax.nn.relu(bn(conv(x_nchw, w1_oihw), g1, b1))
    out = bn(conv(out, w2_oihw), g2, b2)
    out = out + x_nchw
    return jax.nn.relu(out)


if __name__ == "__main__":
    # small shapes: batch=2, inplanes=planes=8, spatial 16x16
    N, C, H, W = 2, 8, 16, 16

    key = jax.random.PRNGKey(0)
    k_x, k_w1, k_w2, k_g1, k_b1, k_g2, k_b2 = jax.random.split(key, 7)

    x = jax.random.normal(k_x, (N, C, H, W), dtype=jnp.float32)

    std = (2.0 / (9 * C)) ** 0.5
    w1 = jax.random.normal(k_w1, (C, C, 3, 3), dtype=jnp.float32) * std
    w2 = jax.random.normal(k_w2, (C, C, 3, 3), dtype=jnp.float32) * std
    g1 = 1.0 + 0.1 * jax.random.normal(k_g1, (C,), dtype=jnp.float32)
    b1 = 0.1 * jax.random.normal(k_b1, (C,), dtype=jnp.float32)
    g2 = 1.0 + 0.1 * jax.random.normal(k_g2, (C,), dtype=jnp.float32)
    b2 = 0.1 * jax.random.normal(k_b2, (C,), dtype=jnp.float32)

    out = jax.block_until_ready(basic_block_forward(x, w1, g1, b1, w2, g2, b2))
    ref = jax.block_until_ready(reference_forward(x, w1, g1, b1, w2, g2, b2))

    assert out.shape == (N, C, H, W), out.shape
    np.testing.assert_allclose(np.asarray(out), np.asarray(ref), rtol=1e-3, atol=1e-3)

    print("KERNEL_OK")
</pallas_src>

<mosaic_0001>
module attributes {stable_mosaic.version = 11 : i64} {
  func.func @fused_basic_block_kernel(%arg0: i32, %arg1: memref<2x16x16x128xf32, #tpu.memory_space<vmem>>, %arg2: memref<1152x128xf32, #tpu.memory_space<vmem>>, %arg3: memref<1x128xf32, #tpu.memory_space<vmem>>, %arg4: memref<1x128xf32, #tpu.memory_space<vmem>>, %arg5: memref<1152x128xf32, #tpu.memory_space<vmem>>, %arg6: memref<1x128xf32, #tpu.memory_space<vmem>>, %arg7: memref<1x128xf32, #tpu.memory_space<vmem>>, %arg8: memref<512x128xf32, #tpu.memory_space<vmem>>, %arg9: memref<2x18x18x128xf32, #tpu.memory_space<vmem>>) attributes {dimension_semantics = [#tpu.dimension_semantics<arbitrary>], iteration_bounds = array<i64: 1>, scalar_prefetch = 0 : i64, scratch_operands = 1 : i64, tpu.core_type = #tpu.core_type<tc>, window_params = [{pipeline_mode = #tpu.pipeline_mode<synchronous>, transform_indices = @transform_0, window_bounds = array<i64: 2, 16, 16, 128>}, {pipeline_mode = #tpu.pipeline_mode<synchronous>, transform_indices = @transform_1, window_bounds = array<i64: 1152, 128>}, {pipeline_mode = #tpu.pipeline_mode<synchronous>, transform_indices = @transform_2, window_bounds = array<i64: 1, 128>}, {pipeline_mode = #tpu.pipeline_mode<synchronous>, transform_indices = @transform_3, window_bounds = array<i64: 1, 128>}, {pipeline_mode = #tpu.pipeline_mode<synchronous>, transform_indices = @transform_4, window_bounds = array<i64: 1152, 128>}, {pipeline_mode = #tpu.pipeline_mode<synchronous>, transform_indices = @transform_5, window_bounds = array<i64: 1, 128>}, {pipeline_mode = #tpu.pipeline_mode<synchronous>, transform_indices = @transform_6, window_bounds = array<i64: 1, 128>}, {pipeline_mode = #tpu.pipeline_mode<synchronous>, transform_indices = @transform_7, window_bounds = array<i64: 512, 128>}]} {
    %cst = arith.constant 0.000000e+00 : f32
    %0 = vector.broadcast %cst : f32 to vector<2x18x18x128xf32>
    %c0 = arith.constant 0 : index
    %c0_0 = arith.constant 0 : index
    %c0_1 = arith.constant 0 : index
    %c0_2 = arith.constant 0 : index
    %1 = vector.load %arg9[%c0, %c0_0, %c0_1, %c0_2] : memref<2x18x18x128xf32, #tpu.memory_space<vmem>>, vector<2x18x18x128xf32>
    tpu.vector_store %arg9[%c0, %c0_0, %c0_1, %c0_2], %0 {strides = array<i32>} : memref<2x18x18x128xf32, #tpu.memory_space<vmem>>, vector<2x18x18x128xf32>,
    %c0_3 = arith.constant 0 : index
    %c0_4 = arith.constant 0 : index
    %c0_5 = arith.constant 0 : index
    %c0_6 = arith.constant 0 : index
    %2 = vector.load %arg1[%c0_3, %c0_4, %c0_5, %c0_6] : memref<2x16x16x128xf32, #tpu.memory_space<vmem>>, vector<2x16x16x128xf32>
    %c0_7 = arith.constant 0 : index
    %c1 = arith.constant 1 : index
    %c1_8 = arith.constant 1 : index
    %c0_9 = arith.constant 0 : index
    %3 = vector.load %arg9[%c0_7, %c1, %c1_8, %c0_9] : memref<2x18x18x128xf32, #tpu.memory_space<vmem>>, vector<2x16x16x128xf32>
    tpu.vector_store %arg9[%c0_7, %c1, %c1_8, %c0_9], %2 {strides = array<i32>} : memref<2x18x18x128xf32, #tpu.memory_space<vmem>>, vector<2x16x16x128xf32>,
    %c0_10 = arith.constant 0 : index
    %c0_11 = arith.constant 0 : index
    %c0_12 = arith.constant 0 : index
    %c0_13 = arith.constant 0 : index
    %4 = vector.load %arg9[%c0_10, %c0_11, %c0_12, %c0_13] : memref<2x18x18x128xf32, #tpu.memory_space<vmem>>, vector<2x16x16x128xf32>
    %5 = vector.shape_cast %4 : vector<2x16x16x128xf32> to vector<512x128xf32>
    %c0_14 = arith.constant 0 : index
    %c0_15 = arith.constant 0 : index
    %c1_16 = arith.constant 1 : index
    %c0_17 = arith.constant 0 : index
    %6 = vector.load %arg9[%c0_14, %c0_15, %c1_16, %c0_17] : memref<2x18x18x128xf32, #tpu.memory_space<vmem>>, vector<2x16x16x128xf32>
    %7 = vector.shape_cast %6 : vector<2x16x16x128xf32> to vector<512x128xf32>
    %c0_18 = arith.constant 0 : index
    %c0_19 = arith.constant 0 : index
    %c2 = arith.constant 2 : index
    %c0_20 = arith.constant 0 : index
    %8 = vector.load %arg9[%c0_18, %c0_19, %c2, %c0_20] : memref<2x18x18x128xf32, #tpu.memory_space<vmem>>, vector<2x16x16x128xf32>
    %9 = vector.shape_cast %8 : vector<2x16x16x128xf32> to vector<512x128xf32>
    %c0_21 = arith.constant 0 : index
    %c1_22 = arith.constant 1 : index
    %c0_23 = arith.constant 0 : index
    %c0_24 = arith.constant 0 : index
    %10 = vector.load %arg9[%c0_21, %c1_22, %c0_23, %c0_24] : memref<2x18x18x128xf32, #tpu.memory_space<vmem>>, vector<2x16x16x128xf32>
    %11 = vector.shape_cast %10 : vector<2x16x16x128xf32> to vector<512x128xf32>
    %c0_25 = arith.constant 0 : index
    %c1_26 = arith.constant 1 : index
    %c1_27 = arith.constant 1 : index
    %c0_28 = arith.constant 0 : index
    %12 = vector.load %arg9[%c0_25, %c1_26, %c1_27, %c0_28] : memref<2x18x18x128xf32, #tpu.memory_space<vmem>>, vector<2x16x16x128xf32>
    %13 = vector.shape_cast %12 : vector<2x16x16x128xf32> to vector<512x128xf32>
    %c0_29 = arith.constant 0 : index
    %c1_30 = arith.constant 1 : index
    %c2_31 = arith.constant 2 : index
    %c0_32 = arith.constant 0 : index
    %14 = vector.load %arg9[%c0_29, %c1_30, %c2_31, %c0_32] : memref<2x18x18x128xf32, #tpu.memory_space<vmem>>, vector<2x16x16x128xf32>
    %15 = vector.shape_cast %14 : vector<2x16x16x128xf32> to vector<512x128xf32>
    %c0_33 = arith.constant 0 : index
    %c2_34 = arith.constant 2 : index
    %c0_35 = arith.constant 0 : index
    %c0_36 = arith.constant 0 : index
    %16 = vector.load %arg9[%c0_33, %c2_34, %c0_35, %c0_36] : memref<2x18x18x128xf32, #tpu.memory_space<vmem>>, vector<2x16x16x128xf32>
    %17 = vector.shape_cast %16 : vector<2x16x16x128xf32> to vector<512x128xf32>
    %c0_37 = arith.constant 0 : index
    %c2_38 = arith.constant 2 : index
    %c1_39 = arith.constant 1 : index
    %c0_40 = arith.constant 0 : index
    %18 = vector.load %arg9[%c0_37, %c2_38, %c1_39, %c0_40] : memref<2x18x18x128xf32, #tpu.memory_space<vmem>>, vector<2x16x16x128xf32>
    %19 = vector.shape_cast %18 : vector<2x16x16x128xf32> to vector<512x128xf32>
    %c0_41 = arith.constant 0 : index
    %c2_42 = arith.constant 2 : index
    %c2_43 = arith.constant 2 : index
    %c0_44 = arith.constant 0 : index
    %20 = vector.load %arg9[%c0_41, %c2_42, %c2_43, %c0_44] : memref<2x18x18x128xf32, #tpu.memory_space<vmem>>, vector<2x16x16x128xf32>
    %21 = vector.shape_cast %20 : vector<2x16x16x128xf32> to vector<512x128xf32>
    %22 = tpu.concatenate %5, %7, %9, %11, %13, %15, %17, %19, %21 in 1 : vector<512x128xf32>, vector<512x128xf32>, vector<512x128xf32>, vector<512x128xf32>, vector<512x128xf32>, vector<512x128xf32>, vector<512x128xf32>, vector<512x128xf32>, vector<512x128xf32> -> vector<512x1152xf32>
    %c0_45 = arith.constant 0 : index
    %c0_46 = arith.constant 0 : index
    %23 = vector.load %arg2[%c0_45, %c0_46] : memref<1152x128xf32, #tpu.memory_space<vmem>>, vector<1152x128xf32>
    %cst_47 = arith.constant dense<0.000000e+00> : vector<512x128xf32>
    %24 = tpu.matmul %22, %23, %cst_47 {dimension_numbers = #tpu.dot_dimension_numbers<[1], [0], [0], [1], [0, 0, 1, 1], [], []>} : vector<512x1152xf32>, vector<1152x128xf32>, vector<512x128xf32> -> vector<512x128xf32>
    %cst_48 = arith.constant dense<0.000000e+00> : vector<128xf32>
    %25 = vector.multi_reduction <add>, %24, %cst_48 [0] : vector<512x128xf32> to vector<128xf32>
    %26 = vector.shape_cast %25 : vector<128xf32> to vector<1x128xf32>
    %cst_49 = arith.constant 0.001953125 : f32
    %27 = vector.broadcast %cst_49 : f32 to vector<1x128xf32>
    %28 = arith.mulf %26, %27 : vector<1x128xf32>
    %29 = vector.broadcast %28 : vector<1x128xf32> to vector<512x128xf32>
    %30 = arith.subf %24, %29 : vector<512x128xf32>
    %31 = arith.mulf %30, %30 : vector<512x128xf32>
    %cst_50 = arith.constant dense<0.000000e+00> : vector<128xf32>
    %32 = vector.multi_reduction <add>, %31, %cst_50 [0] : vector<512x128xf32> to vector<128xf32>
    %33 = vector.shape_cast %32 : vector<128xf32> to vector<1x128xf32>
    %cst_51 = arith.constant 0.001953125 : f32
    %34 = vector.broadcast %cst_51 : f32 to vector<1x128xf32>
    %35 = arith.mulf %33, %34 : vector<1x128xf32>
    %cst_52 = arith.constant 9.99999974E-6 : f32
    %36 = vector.broadcast %cst_52 : f32 to vector<1x128xf32>
    %37 = arith.addf %35, %36 : vector<1x128xf32>
    %38 = math.rsqrt %37 : vector<1x128xf32>
    %39 = vector.broadcast %38 : vector<1x128xf32> to vector<512x128xf32>
    %40 = arith.mulf %30, %39 : vector<512x128xf32>
    %c0_53 = arith.constant 0 : index
    %c0_54 = arith.constant 0 : index
    %41 = vector.load %arg3[%c0_53, %c0_54] : memref<1x128xf32, #tpu.memory_space<vmem>>, vector<1x128xf32>
    %42 = vector.broadcast %41 : vector<1x128xf32> to vector<512x128xf32>
    %43 = arith.mulf %40, %42 : vector<512x128xf32>
    %c0_55 = arith.constant 0 : index
    %c0_56 = arith.constant 0 : index
    %44 = vector.load %arg4[%c0_55, %c0_56] : memref<1x128xf32, #tpu.memory_space<vmem>>, vector<1x128xf32>
    %45 = vector.broadcast %44 : vector<1x128xf32> to vector<512x128xf32>
    %46 = arith.addf %43, %45 : vector<512x128xf32>
    %cst_57 = arith.constant 0.000000e+00 : f32
    %47 = vector.broadcast %cst_57 : f32 to vector<512x128xf32>
    %48 = arith.maximumf %46, %47 : vector<512x128xf32>
    %49 = vector.shape_cast %48 : vector<512x128xf32> to vector<2x16x16x128xf32>
    %c0_58 = arith.constant 0 : index
    %c1_59 = arith.constant 1 : index
    %c1_60 = arith.constant 1 : index
    %c0_61 = arith.constant 0 : index
    %50 = vector.load %arg9[%c0_58, %c1_59, %c1_60, %c0_61] : memref<2x18x18x128xf32, #tpu.memory_space<vmem>>, vector<2x16x16x128xf32>
    tpu.vector_store %arg9[%c0_58, %c1_59, %c1_60, %c0_61], %49 {strides = array<i32>} : memref<2x18x18x128xf32, #tpu.memory_space<vmem>>, vector<2x16x16x128xf32>,
    %c0_62 = arith.constant 0 : index
    %c0_63 = arith.constant 0 : index
    %c0_64 = arith.constant 0 : index
    %c0_65 = arith.constant 0 : index
    %51 = vector.load %arg9[%c0_62, %c0_63, %c0_64, %c0_65] : memref<2x18x18x128xf32, #tpu.memory_space<vmem>>, vector<2x16x16x128xf32>
    %52 = vector.shape_cast %51 : vector<2x16x16x128xf32> to vector<512x128xf32>
    %c0_66 = arith.constant 0 : index
    %c0_67 = arith.constant 0 : index
    %c1_68 = arith.constant 1 : index
    %c0_69 = arith.constant 0 : index
    %53 = vector.load %arg9[%c0_66, %c0_67, %c1_68, %c0_69] : memref<2x18x18x128xf32, #tpu.memory_space<vmem>>, vector<2x16x16x128xf32>
    %54 = vector.shape_cast %53 : vector<2x16x16x128xf32> to vector<512x128xf32>
    %c0_70 = arith.constant 0 : index
    %c0_71 = arith.constant 0 : index
    %c2_72 = arith.constant 2 : index
    %c0_73 = arith.constant 0 : index
    %55 = vector.load %arg9[%c0_70, %c0_71, %c2_72, %c0_73] : memref<2x18x18x128xf32, #tpu.memory_space<vmem>>, vector<2x16x16x128xf32>
    %56 = vector.shape_cast %55 : vector<2x16x16x128xf32> to vector<512x128xf32>
    %c0_74 = arith.constant 0 : index
    %c1_75 = arith.constant 1 : index
    %c0_76 = arith.constant 0 : index
    %c0_77 = arith.constant 0 : index
    %57 = vector.load %arg9[%c0_74, %c1_75, %c0_76, %c0_77] : memref<2x18x18x128xf32, #tpu.memory_space<vmem>>, vector<2x16x16x128xf32>
    %58 = vector.shape_cast %57 : vector<2x16x16x128xf32> to vector<512x128xf32>
    %c0_78 = arith.constant 0 : index
    %c1_79 = arith.constant 1 : index
    %c1_80 = arith.constant 1 : index
    %c0_81 = arith.constant 0 : index
    %59 = vector.load %arg9[%c0_78, %c1_79, %c1_80, %c0_81] : memref<2x18x18x128xf32, #tpu.memory_space<vmem>>, vector<2x16x16x128xf32>
    %60 = vector.shape_cast %59 : vector<2x16x16x128xf32> to vector<512x128xf32>
    %c0_82 = arith.constant 0 : index
    %c1_83 = arith.constant 1 : index
    %c2_84 = arith.constant 2 : index
    %c0_85 = arith.constant 0 : index
    %61 = vector.load %arg9[%c0_82, %c1_83, %c2_84, %c0_85] : memref<2x18x18x128xf32, #tpu.memory_space<vmem>>, vector<2x16x16x128xf32>
    %62 = vector.shape_cast %61 : vector<2x16x16x128xf32> to vector<512x128xf32>
    %c0_86 = arith.constant 0 : index
    %c2_87 = arith.constant 2 : index
    %c0_88 = arith.constant 0 : index
    %c0_89 = arith.constant 0 : index
    %63 = vector.load %arg9[%c0_86, %c2_87, %c0_88, %c0_89] : memref<2x18x18x128xf32, #tpu.memory_space<vmem>>, vector<2x16x16x128xf32>
    %64 = vector.shape_cast %63 : vector<2x16x16x128xf32> to vector<512x128xf32>
    %c0_90 = arith.constant 0 : index
    %c2_91 = arith.constant 2 : index
    %c1_92 = arith.constant 1 : index
    %c0_93 = arith.constant 0 : index
    %65 = vector.load %arg9[%c0_90, %c2_91, %c1_92, %c0_93] : memref<2x18x18x128xf32, #tpu.memory_space<vmem>>, vector<2x16x16x128xf32>
    %66 = vector.shape_cast %65 : vector<2x16x16x128xf32> to vector<512x128xf32>
    %c0_94 = arith.constant 0 : index
    %c2_95 = arith.constant 2 : index
    %c2_96 = arith.constant 2 : index
    %c0_97 = arith.constant 0 : index
    %67 = vector.load %arg9[%c0_94, %c2_95, %c2_96, %c0_97] : memref<2x18x18x128xf32, #tpu.memory_space<vmem>>, vector<2x16x16x128xf32>
    %68 = vector.shape_cast %67 : vector<2x16x16x128xf32> to vector<512x128xf32>
    %69 = tpu.concatenate %52, %54, %56, %58, %60, %62, %64, %66, %68 in 1 : vector<512x128xf32>, vector<512x128xf32>, vector<512x128xf32>, vector<512x128xf32>, vector<512x128xf32>, vector<512x128xf32>, vector<512x128xf32>, vector<512x128xf32>, vector<512x128xf32> -> vector<512x1152xf32>
    %c0_98 = arith.constant 0 : index
    %c0_99 = arith.constant 0 : index
    %70 = vector.load %arg5[%c0_98, %c0_99] : memref<1152x128xf32, #tpu.memory_space<vmem>>, vector<1152x128xf32>
    %cst_100 = arith.constant dense<0.000000e+00> : vector<512x128xf32>
    %71 = tpu.matmul %69, %70, %cst_100 {dimension_numbers = #tpu.dot_dimension_numbers<[1], [0], [0], [1], [0, 0, 1, 1], [], []>} : vector<512x1152xf32>, vector<1152x128xf32>, vector<512x128xf32> -> vector<512x128xf32>
    %cst_101 = arith.constant dense<0.000000e+00> : vector<128xf32>
    %72 = vector.multi_reduction <add>, %71, %cst_101 [0] : vector<512x128xf32> to vector<128xf32>
    %73 = vector.shape_cast %72 : vector<128xf32> to vector<1x128xf32>
    %cst_102 = arith.constant 0.001953125 : f32
    %74 = vector.broadcast %cst_102 : f32 to vector<1x128xf32>
    %75 = arith.mulf %73, %74 : vector<1x128xf32>
    %76 = vector.broadcast %75 : vector<1x128xf32> to vector<512x128xf32>
    %77 = arith.subf %71, %76 : vector<512x128xf32>
    %78 = arith.mulf %77, %77 : vector<512x128xf32>
    %cst_103 = arith.constant dense<0.000000e+00> : vector<128xf32>
    %79 = vector.multi_reduction <add>, %78, %cst_103 [0] : vector<512x128xf32> to vector<128xf32>
    %80 = vector.shape_cast %79 : vector<128xf32> to vector<1x128xf32>
    %cst_104 = arith.constant 0.001953125 : f32
    %81 = vector.broadcast %cst_104 : f32 to vector<1x128xf32>
    %82 = arith.mulf %80, %81 : vector<1x128xf32>
    %cst_105 = arith.constant 9.99999974E-6 : f32
    %83 = vector.broadcast %cst_105 : f32 to vector<1x128xf32>
    %84 = arith.addf %82, %83 : vector<1x128xf32>
    %85 = math.rsqrt %84 : vector<1x128xf32>
    %86 = vector.broadcast %85 : vector<1x128xf32> to vector<512x128xf32>
    %87 = arith.mulf %77, %86 : vector<512x128xf32>
    %c0_106 = arith.constant 0 : index
    %c0_107 = arith.constant 0 : index
    %88 = vector.load %arg6[%c0_106, %c0_107] : memref<1x128xf32, #tpu.memory_space<vmem>>, vector<1x128xf32>
    %89 = vector.broadcast %88 : vector<1x128xf32> to vector<512x128xf32>
    %90 = arith.mulf %87, %89 : vector<512x128xf32>
    %c0_108 = arith.constant 0 : index
    %c0_109 = arith.constant 0 : index
    %91 = vector.load %arg7[%c0_108, %c0_109] : memref<1x128xf32, #tpu.memory_space<vmem>>, vector<1x128xf32>
    %92 = vector.broadcast %91 : vector<1x128xf32> to vector<512x128xf32>
    %93 = arith.addf %90, %92 : vector<512x128xf32>
    %c0_110 = arith.constant 0 : index
    %c0_111 = arith.constant 0 : index
    %c0_112 = arith.constant 0 : index
    %c0_113 = arith.constant 0 : index
    %94 = vector.load %arg1[%c0_110, %c0_111, %c0_112, %c0_113] : memref<2x16x16x128xf32, #tpu.memory_space<vmem>>, vector<2x16x16x128xf32>
    %95 = vector.shape_cast %94 : vector<2x16x16x128xf32> to vector<512x128xf32>
    %96 = arith.addf %93, %95 : vector<512x128xf32>
    %cst_114 = arith.constant 0.000000e+00 : f32
    %97 = vector.broadcast %cst_114 : f32 to vector<512x128xf32>
    %98 = arith.maximumf %96, %97 : vector<512x128xf32>
    %c0_115 = arith.constant 0 : index
    %c0_116 = arith.constant 0 : index
    %99 = vector.load %arg8[%c0_115, %c0_116] : memref<512x128xf32, #tpu.memory_space<vmem>>, vector<512x128xf32>
    tpu.vector_store %arg8[%c0_115, %c0_116], %98 {strides = array<i32>} : memref<512x128xf32, #tpu.memory_space<vmem>>, vector<512x128xf32>,
    return
  }
  func.func @transform_0(%arg0: i32) -> (i32, i32, i32, i32) {
    %c0_i32 = arith.constant 0 : i32
    %c0_i32_0 = arith.constant 0 : i32
    %c0_i32_1 = arith.constant 0 : i32
    %c0_i32_2 = arith.constant 0 : i32
    %c0_i32_3 = arith.constant 0 : i32
    return %c0_i32, %c0_i32_0, %c0_i32_1, %c0_i32_2 : i32, i32, i32, i32
  }
  func.func @transform_1(%arg0: i32) -> (i32, i32) {
    %c0_i32 = arith.constant 0 : i32
    %c0_i32_0 = arith.constant 0 : i32
    %c0_i32_1 = arith.constant 0 : i32
    return %c0_i32, %c0_i32_0 : i32, i32
  }
  func.func @transform_2(%arg0: i32) -> (i32, i32) {
    %c0_i32 = arith.constant 0 : i32
    %c0_i32_0 = arith.constant 0 : i32
    %c0_i32_1 = arith.constant 0 : i32
    return %c0_i32, %c0_i32_0 : i32, i32
  }
  func.func @transform_3(%arg0: i32) -> (i32, i32) {
    %c0_i32 = arith.constant 0 : i32
    %c0_i32_0 = arith.constant 0 : i32
    %c0_i32_1 = arith.constant 0 : i32
    return %c0_i32, %c0_i32_0 : i32, i32
  }
  func.func @transform_4(%arg0: i32) -> (i32, i32) {
    %c0_i32 = arith.constant 0 : i32
    %c0_i32_0 = arith.constant 0 : i32
    %c0_i32_1 = arith.constant 0 : i32
    return %c0_i32, %c0_i32_0 : i32, i32
  }
  func.func @transform_5(%arg0: i32) -> (i32, i32) {
    %c0_i32 = arith.constant 0 : i32
    %c0_i32_0 = arith.constant 0 : i32
    %c0_i32_1 = arith.constant 0 : i32
    return %c0_i32, %c0_i32_0 : i32, i32
  }
  func.func @transform_6(%arg0: i32) -> (i32, i32) {
    %c0_i32 = arith.constant 0 : i32
    %c0_i32_0 = arith.constant 0 : i32
    %c0_i32_1 = arith.constant 0 : i32
    return %c0_i32, %c0_i32_0 : i32, i32
  }
  func.func @transform_7(%arg0: i32) -> (i32, i32) {
    %c0_i32 = arith.constant 0 : i32
    %c0_i32_0 = arith.constant 0 : i32
    %c0_i32_1 = arith.constant 0 : i32
    return %c0_i32, %c0_i32_0 : i32, i32
  }
}

</mosaic_0001>

<bundles_post_ra>
// kernel: basic_block_forward.1
= control target key start
LH: loop header
LB: loop body
LE: loop exit
PB: predicated region body
PF: predicated region fallthrough
CT: control target
= control target key end

     0   :  { %v6858_v3 = vmov 0.0   ;;  %s12817_s1 = inlined_call_operand.vmem [shape: f32[1152,128], index: 1, kind: input, shape index: {}]   ;;  %s12818_s0 = inlined_call_operand.vmem [shape: f32[2,16,16,128], index: 0, kind: input, shape index: {}]   ;;  %s12819_s2 = inlined_call_operand.vmem [shape: f32[1,128], index: 2, kind: input, shape index: {}]   ;;  %s12820_s3 = inlined_call_operand.vmem [shape: f32[1,128], index: 3, kind: input, shape index: {}]   ;;  %s12821_s4 = inlined_call_operand.vmem [shape: f32[1152,128], index: 4, kind: input, shape index: {}]   ;;  %s12822_s5 = inlined_call_operand.vmem [shape: f32[1,128], index: 5, kind: input, shape index: {}]   ;;  %s12823_s6 = inlined_call_operand.vmem [shape: f32[1,128], index: 6, kind: input, shape index: {}]   ;;  %s12824_s7 = inlined_call_operand.vmem [shape: f32[512,128], index: 7, kind: output, shape index: {}]  }
   0x1   :  { %v855_v0 = vld [vmem:[%s12817_s1 + $0x78] sm:$0xff]  ;;  %v854_v2 = vld [vmem:[%s12817_s1 + $0x70] sm:$0xff]  ;;  %80 = vst [vmem:[#allocation2 + $0x1b0] sm:$0xff] %v6858_v3  ;;  %v853_v5 = vld [vmem:[%s12817_s1 + $0x68] sm:$0xff] }
   0x2   :  { %v871_v1 = vld [vmem:[%s12817_s1 + $0xf8] sm:$0xff]  ;;  %6812 = vmatpush.msra.mxu2 %v855_v0  ;;  %v870_v4 = vld [vmem:[%s12817_s1 + $0xf0] sm:$0xff]  ;;  %26 = vst [vmem:[#allocation2] sm:$0xff] %v6858_v3  ;;  %v869_v6 = vld [vmem:[%s12817_s1 + $0xe8] sm:$0xff]  ;;  %984 = vmatpush.msra.mxu0 %v855_v0 }
   0x3   :  { %6828 = vmatpush.msra.mxu3 %v871_v1  ;;  %1193 = vmatpush.msra.mxu1 %v871_v1  ;;  %27 = vst [vmem:[#allocation2 + $0x8] sm:$0xff] %v6858_v3  ;;  %v852_v7 = vld [vmem:[%s12817_s1 + $0x60] sm:$0xff]  ;;  %v851_v9 = vld [vmem:[%s12817_s1 + $0x58] sm:$0xff]  ;;  %v850_v11 = vld [vmem:[%s12817_s1 + $0x50] sm:$0xff] }
   0x4   :  { %6813 = vmatpush.msra.mxu2 %v854_v2  ;;  %28 = vst [vmem:[#allocation2 + $0x10] sm:$0x3] %v6858_v3  ;;  %v868_v8 = vld [vmem:[%s12817_s1 + $0xe0] sm:$0xff]  ;;  %985 = vmatpush.msra.mxu0 %v854_v2  ;;  %v867_v10 = vld [vmem:[%s12817_s1 + $0xd8] sm:$0xff]  ;;  %v866_v12 = vld [vmem:[%s12817_s1 + $0xd0] sm:$0xff] }
   0x5   :  { %6829 = vmatpush.msra.mxu3 %v870_v4  ;;  %1194 = vmatpush.msra.mxu1 %v870_v4  ;;  %29 = vst [vmem:[#allocation2 + $0x18] sm:$0xff] %v6858_v3  ;;  %v849_v13 = vld [vmem:[%s12817_s1 + $0x48] sm:$0xff]  ;;  %v848_v15 = vld [vmem:[%s12817_s1 + $0x40] sm:$0xff]  ;;  %v847_v17 = vld [vmem:[%s12817_s1 + $0x38] sm:$0xff] }
   0x6   :  { %6814 = vmatpush.msra.mxu2 %v853_v5  ;;  %30 = vst [vmem:[#allocation2 + $0x20] sm:$0xff] %v6858_v3  ;;  %986 = vmatpush.msra.mxu0 %v853_v5  ;;  %v865_v14 = vld [vmem:[%s12817_s1 + $0xc8] sm:$0xff]  ;;  %v864_v16 = vld [vmem:[%s12817_s1 + $0xc0] sm:$0xff]  ;;  %v863_v18 = vld [vmem:[%s12817_s1 + $0xb8] sm:$0xff] }
   0x7   :  { %6830 = vmatpush.msra.mxu3 %v869_v6  ;;  %1195 = vmatpush.msra.mxu1 %v869_v6  ;;  %31 = vst [vmem:[#allocation2 + $0x28] sm:$0x3] %v6858_v3  ;;  %v846_v19 = vld [vmem:[%s12817_s1 + $0x30] sm:$0xff]  ;;  %v845_v21 = vld [vmem:[%s12817_s1 + $0x28] sm:$0xff]  ;;  %v844_v23 = vld [vmem:[%s12817_s1 + $0x20] sm:$0xff] }
   0x8   :  { %6815 = vmatpush.msra.mxu2 %v852_v7  ;;  %32 = vst [vmem:[#allocation2 + $0x30] sm:$0xff] %v6858_v3  ;;  %987 = vmatpush.msra.mxu0 %v852_v7  ;;  %v862_v20 = vld [vmem:[%s12817_s1 + $0xb0] sm:$0xff]  ;;  %v861_v22 = vld [vmem:[%s12817_s1 + $0xa8] sm:$0xff]  ;;  %v860_v24 = vld [vmem:[%s12817_s1 + $0xa0] sm:$0xff] }
   0x9   :  { %6831 = vmatpush.msra.mxu3 %v868_v8  ;;  %1196 = vmatpush.msra.mxu1 %v868_v8  ;;  %33 = vst [vmem:[#allocation2 + $0x38] sm:$0xff] %v6858_v3  ;;  %v843_v25 = vld [vmem:[%s12817_s1 + $0x18] sm:$0xff]  ;;  %v842_v27 = vld [vmem:[%s12817_s1 + $0x10] sm:$0xff]  ;;  %v841_v29 = vld [vmem:[%s12817_s1 + $0x8] sm:$0xff] }
   0xa   :  { %6816 = vmatpush.msra.mxu2 %v851_v9  ;;  %34 = vst [vmem:[#allocation2 + $0x40] sm:$0x3] %v6858_v3  ;;  %988 = vmatpush.msra.mxu0 %v851_v9  ;;  %v859_v26 = vld [vmem:[%s12817_s1 + $0x98] sm:$0xff]  ;;  %v858_v28 = vld [vmem:[%s12817_s1 + $0x90] sm:$0xff]  ;;  %v857_v30 = vld [vmem:[%s12817_s1 + $0x88] sm:$0xff] }
   0xb   :  { %6832 = vmatpush.msra.mxu3 %v867_v10  ;;  %1197 = vmatpush.msra.mxu1 %v867_v10  ;;  %35 = vst [vmem:[#allocation2 + $0x48] sm:$0xff] %v6858_v3  ;;  %v840_v31 = vld [vmem:[%s12817_s1] sm:$0xff]  ;;  %v887_v36 = vld [vmem:[%s12817_s1 + $0x178] sm:$0xff]  ;;  %v886_v40 = vld [vmem:[%s12817_s1 + $0x170] sm:$0xff] }
   0xc   :  { %6817 = vmatpush.msra.mxu2 %v850_v11  ;;  %36 = vst [vmem:[#allocation2 + $0x50] sm:$0xff] %v6858_v3  ;;  %989 = vmatpush.msra.mxu0 %v850_v11  ;;  %v856_v32 = vld [vmem:[%s12817_s1 + $0x80] sm:$0xff]  ;;  %v903_v37 = vld [vmem:[%s12817_s1 + $0x1f8] sm:$0xff]  ;;  %v328_v41 = vld [vmem:[#allocation2 + $0x9] sm:$0xff] }
   0xd   :  { %6833 = vmatpush.msra.mxu3 %v866_v12  ;;  %1198 = vmatpush.msra.mxu1 %v866_v12  ;;  %37 = vst [vmem:[#allocation2 + $0x58] sm:$0x3] %v6858_v3  ;;  %v327_v33 = vld [vmem:[#allocation2 + $0x1] sm:$0xff]  ;;  %v919_v38 = vld [vmem:[%s12817_s1 + $0x278] sm:$0xff]  ;;  %v902_v42 = vld [vmem:[%s12817_s1 + $0x1f0] sm:$0xff] }
   0xe   :  { %6818 = vmatpush.msra.mxu2 %v849_v13  ;;  %38 = vst [vmem:[#allocation2 + $0x60] sm:$0xff] %v6858_v3  ;;  %990 = vmatpush.msra.mxu0 %v849_v13  ;;  %v166_v39 = vld [vmem:[%s12818_s0 + $0x100] sm:$0xff]  ;;  %v167_v43 = vld [vmem:[%s12818_s0 + $0x108] sm:$0xff]  ;;  %v918_v45 = vld [vmem:[%s12817_s1 + $0x270] sm:$0xff] }
   0xf   :  { %6834 = vmatpush.msra.mxu3 %v865_v14  ;;  %1199 = vmatpush.msra.mxu1 %v865_v14  ;;  %39 = vst [vmem:[#allocation2 + $0x68] sm:$0xff] %v6858_v3  ;;  %v134_v44 = vld [vmem:[%s12818_s0] sm:$0xff]  ;;  %v168_v46 = vld [vmem:[%s12818_s0 + $0x110] sm:$0xff]  ;;  %v885_v47 = vld [vmem:[%s12817_s1 + $0x168] sm:$0xff] }
  0x10   :  { %6819 = vmatpush.msra.mxu2 %v848_v15  ;;  %40 = vst [vmem:[#allocation2 + $0x70] sm:$0x3] %v6858_v3  ;;  %991 = vmatpush.msra.mxu0 %v848_v15  ;;  %v135_v48 = vld [vmem:[%s12818_s0 + $0x8] sm:$0xff]  ;;  %v169_v50 = vld [vmem:[%s12818_s0 + $0x118] sm:$0xff]  ;;  %v136_v51 = vld [vmem:[%s12818_s0 + $0x10] sm:$0xff] }
  0x11   :  { %6835 = vmatpush.msra.mxu3 %v864_v16  ;;  %1200 = vmatpush.msra.mxu1 %v864_v16  ;;  %41 = vst [vmem:[#allocation2 + $0x78] sm:$0xff] %v6858_v3  ;;  %v901_v49 = vld [vmem:[%s12817_s1 + $0x1e8] sm:$0xff]  ;;  %v170_v53 = vld [vmem:[%s12818_s0 + $0x120] sm:$0xff]  ;;  %v137_v54 = vld [vmem:[%s12818_s0 + $0x18] sm:$0xff] }
  0x12   :  { %6820 = vmatpush.msra.mxu2 %v847_v17  ;;  %42 = vst [vmem:[#allocation2 + $0x80] sm:$0xff] %v6858_v3  ;;  %992 = vmatpush.msra.mxu0 %v847_v17  ;;  %v917_v52 = vld [vmem:[%s12817_s1 + $0x268] sm:$0xff]  ;;  %v884_v57 = vld [vmem:[%s12817_s1 + $0x160] sm:$0xff]  ;;  %v172_v63 = vld [vmem:[%s12818_s0 + $0x130] sm:$0xff] }
  0x13   :  { %6836 = vmatpush.msra.mxu3 %v863_v18  ;;  %1201 = vmatpush.msra.mxu1 %v863_v18  ;;  %43 = vst [vmem:[#allocation2 + $0x88] sm:$0x3] %v6858_v3  ;;  %v171_v56 = vld [vmem:[%s12818_s0 + $0x128] sm:$0xff]  ;;  %v900_v58 = vld [vmem:[%s12817_s1 + $0x1e0] sm:$0xff]  ;;  %v173_v4 = vld [vmem:[%s12818_s0 + $0x138] sm:$0xff] }
  0x14   :  { %6821 = vmatpush.msra.mxu2 %v846_v19  ;;  %44 = vst [vmem:[#allocation2 + $0x90] sm:$0xff] %v6858_v3  ;;  %993 = vmatpush.msra.mxu0 %v846_v19  ;;  %v138_v60 = vld [vmem:[%s12818_s0 + $0x20] sm:$0xff]  ;;  %v139_v1 = vld [vmem:[%s12818_s0 + $0x28] sm:$0xff]  ;;  %v883_v5 = vld [vmem:[%s12817_s1 + $0x158] sm:$0xff] }
  0x15   :  { %6837 = vmatpush.msra.mxu3 %v862_v20  ;;  %1202 = vmatpush.msra.mxu1 %v862_v20  ;;  %45 = vst [vmem:[#allocation2 + $0x98] sm:$0xff] %v6858_v3  ;;  %v916_v0 = vld [vmem:[%s12817_s1 + $0x260] sm:$0xff]  ;;  %v899_v6 = vld [vmem:[%s12817_s1 + $0x1d8] sm:$0xff]  ;;  %v140_v7 = vld [vmem:[%s12818_s0 + $0x30] sm:$0xff] }
  0x16   :  { %6822 = vmatpush.msra.mxu2 %v845_v21  ;;  %46 = vst [vmem:[#allocation2 + $0xa0] sm:$0x3] %v6858_v3  ;;  %994 = vmatpush.msra.mxu0 %v845_v21  ;;  %v174_v10 = vld [vmem:[%s12818_s0 + $0x140] sm:$0xff]  ;;  %v915_v11 = vld [vmem:[%s12817_s1 + $0x258] sm:$0xff]  ;;  %v175_v15 = vld [vmem:[%s12818_s0 + $0x148] sm:$0xff] }
  0x17   :  { %6838 = vmatpush.msra.mxu3 %v861_v22  ;;  %1203 = vmatpush.msra.mxu1 %v861_v22  ;;  %47 = vst [vmem:[#allocation2 + $0xa8] sm:$0xff] %v6858_v3  ;;  %v141_v12 = vld [vmem:[%s12818_s0 + $0x38] sm:$0xff]  ;;  %v882_v16 = vld [vmem:[%s12817_s1 + $0x150] sm:$0xff]  ;;  %v142_v18 = vld [vmem:[%s12818_s0 + $0x40] sm:$0xff] }
  0x18   :  { %6823 = vmatpush.msra.mxu2 %v844_v23  ;;  %48 = vst [vmem:[#allocation2 + $0xb0] sm:$0xff] %v6858_v3  ;;  %995 = vmatpush.msra.mxu0 %v844_v23  ;;  %v898_v17 = vld [vmem:[%s12817_s1 + $0x1d0] sm:$0xff]  ;;  %v143_v23 = vld [vmem:[%s12818_s0 + $0x48] sm:$0xff] }
  0x19   :  { %6839 = vmatpush.msra.mxu3 %v860_v24  ;;  %49 = vst [vmem:[#allocation2 + $0xb8] sm:$0x3] %v6858_v3  ;;  %1204 = vmatpush.msra.mxu1 %v860_v24  ;;  %v176_v21 = vld [vmem:[%s12818_s0 + $0x150] sm:$0xff] }
  0x1a   :  { %6824 = vmatpush.msra.mxu2 %v843_v25  ;;  %50 = vst [vmem:[#allocation2 + $0xc0] sm:$0xff] %v6858_v3  ;;  %996 = vmatpush.msra.mxu0 %v843_v25  ;;  %v914_v22 = vld [vmem:[%s12817_s1 + $0x250] sm:$0xff] }
  0x1b   :  { %6840 = vmatpush.msra.mxu3 %v859_v26  ;;  %51 = vst [vmem:[#allocation2 + $0xc8] sm:$0xff] %v6858_v3  ;;  %1205 = vmatpush.msra.mxu1 %v859_v26  ;;  %v177_v26 = vld [vmem:[%s12818_s0 + $0x158] sm:$0xff] }
  0x1c   :  { %6825 = vmatpush.msra.mxu2 %v842_v27  ;;  %52 = vst [vmem:[#allocation2 + $0xd0] sm:$0x3] %v6858_v3  ;;  %997 = vmatpush.msra.mxu0 %v842_v27  ;;  %v881_v27 = vld [vmem:[%s12817_s1 + $0x148] sm:$0xff] }
  0x1d   :  { %6841 = vmatpush.msra.mxu3 %v858_v28  ;;  %53 = vst [vmem:[#allocation2 + $0xd8] sm:$0xff] %v6858_v3  ;;  %1206 = vmatpush.msra.mxu1 %v858_v28  ;;  %v897_v28 = vld [vmem:[%s12817_s1 + $0x1c8] sm:$0xff] }
  0x1e   :  { %6826 = vmatpush.msra.mxu2 %v841_v29  ;;  %54 = vst [vmem:[#allocation2 + $0xe0] sm:$0xff] %v6858_v3  ;;  %998 = vmatpush.msra.mxu0 %v841_v29  ;;  %v144_v29 = vld [vmem:[%s12818_s0 + $0x50] sm:$0xff] }
  0x1f   :  { %6842 = vmatpush.msra.mxu3 %v857_v30  ;;  %55 = vst [vmem:[#allocation2 + $0xe8] sm:$0x3] %v6858_v3  ;;  %1207 = vmatpush.msra.mxu1 %v857_v30 }
  0x20   :  { %6827 = vmatpush.msra.mxu2 %v840_v31  ;;  %56 = vst [vmem:[#allocation2 + $0xf0] sm:$0xff] %v6858_v3  ;;  %999 = vmatpush.msra.mxu0 %v840_v31 }
  0x21   :  { %6843 = vmatpush.msra.mxu3 %v856_v32  ;;  %1096 = vmatmul.f32.vlgmr.msra.gmra.mxu2 %v6858_v3  ;;  %57 = vst [vmem:[#allocation2 + $0xf8] sm:$0xff] %v6858_v3 }
  0x22   :  { %58 = vst [vmem:[#allocation2 + $0x100] sm:$0x3] %v6858_v3  ;;  %1208 = vmatpush.msra.mxu1 %v856_v32  ;;  %1000 = vmatmul.f32.vlgmr.msra.gmra.mxu0 %v6858_v3  ;;  %v178_v32 = vld [vmem:[%s12818_s0 + $0x160] sm:$0xff] }
  0x23   :  { %59 = vst [vmem:[#allocation2 + $0x108] sm:$0xff] %v6858_v3  ;;  %1209 = vmatmul.f32.vlgmr.msra.gmra.mxu1 %v327_v33  ;;  %1402 = vmatpush.msrb.mxu2 %v887_v36  ;;  %v913_v33 = vld [vmem:[%s12817_s1 + $0x248] sm:$0xff] }
  0x24   :  { %60 = vst [vmem:[#allocation2 + $0x110] sm:$0xff] %v6858_v3  ;;  %1611 = vmatpush.msrb.mxu3 %v903_v37  ;;  %1820 = vmatpush.msrb.mxu0 %v919_v38  ;;  %v179_v37 = vld [vmem:[%s12818_s0 + $0x168] sm:$0xff]  ;;  %v880_v38 = vld [vmem:[%s12817_s1 + $0x140] sm:$0xff] }
  0x25   :  { %61 = vst [vmem:[#allocation2 + $0x118] sm:$0x3] %v6858_v3  ;;  %1403 = vmatpush.msrb.mxu2 %v886_v40  ;;  %v146_v40 = vld [vmem:[%s12818_s0 + $0x60] sm:$0xff] }
  0x26   :  { %62 = vst [vmem:[#allocation2 + $0x120] sm:$0xff] %v6858_v3  ;;  %1612 = vmatpush.msrb.mxu3 %v902_v42  ;;  %1821 = vmatpush.msrb.mxu0 %v918_v45  ;;  %v147_v45 = vld [vmem:[%s12818_s0 + $0x68] sm:$0xff] }
  0x27   :  { %63 = vst [vmem:[#allocation2 + $0x128] sm:$0xff] %v6858_v3  ;;  %1404 = vmatpush.msrb.mxu2 %v885_v47 }
  0x28   :  { %64 = vst [vmem:[#allocation2 + $0x130] sm:$0x3] %v6858_v3  ;;  %1613 = vmatpush.msrb.mxu3 %v901_v49  ;;  %1822 = vmatpush.msrb.mxu0 %v917_v52  ;;  %v879_v49 = vld [vmem:[%s12817_s1 + $0x138] sm:$0xff]  ;;  %v148_v52 = vld [vmem:[%s12818_s0 + $0x70] sm:$0xff] }
  0x29   :  { %65 = vst [vmem:[#allocation2 + $0x138] sm:$0xff] %v6858_v3  ;;  %1099 = vmatmul.f32.gmra.mxu2 %v6858_v3 }
  0x2a   :  { %66 = vst [vmem:[#allocation2 + $0x140] sm:$0xff] %v6858_v3  ;;  %1003 = vmatmul.f32.gmra.mxu0 %v6858_v3  ;;  %1405 = vmatpush.msrb.mxu2 %v884_v57  ;;  %v911_v57 = vld [vmem:[%s12817_s1 + $0x238] sm:$0xff] }
  0x2b   :  { %67 = vst [vmem:[#allocation2 + $0x148] sm:$0x3] %v6858_v3  ;;  %1212 = vmatmul.f32.gmra.mxu1 %v328_v41  ;;  %1614 = vmatpush.msrb.mxu3 %v900_v58 }
  0x2c   :  { %68 = vst [vmem:[#allocation2 + $0x150] sm:$0xff] %v6858_v3  ;;  %1823 = vmatpush.msrb.mxu0 %v916_v0  ;;  %1406 = vmatpush.msrb.mxu2 %v883_v5  ;;  %v878_v0 = vld [vmem:[%s12817_s1 + $0x130] sm:$0xff] }
  0x2d   :  { %69 = vst [vmem:[#allocation2 + $0x158] sm:$0xff] %v6858_v3  ;;  %1615 = vmatpush.msrb.mxu3 %v899_v6 }
  0x2e   :  { %70 = vst [vmem:[#allocation2 + $0x160] sm:$0x3] %v6858_v3  ;;  %1824 = vmatpush.msrb.mxu0 %v915_v11  ;;  %1407 = vmatpush.msrb.mxu2 %v882_v16  ;;  %v185_v16 = vld [vmem:[%s12818_s0 + $0x198] sm:$0xff] }
  0x2f   :  { %71 = vst [vmem:[#allocation2 + $0x168] sm:$0xff] %v6858_v3  ;;  %1616 = vmatpush.msrb.mxu3 %v898_v17  ;;  %v877_v17 = vld [vmem:[%s12817_s1 + $0x128] sm:$0xff] }
  0x30   :  { %72 = vst [vmem:[#allocation2 + $0x170] sm:$0xff] %v6858_v3  ;;  %1825 = vmatpush.msrb.mxu0 %v914_v22  ;;  %1408 = vmatpush.msrb.mxu2 %v881_v27 }
  0x31   :  { %73 = vst [vmem:[#allocation2 + $0x178] sm:$0x3] %v6858_v3  ;;  %1617 = vmatpush.msrb.mxu3 %v897_v28  ;;  %v153_v28 = vld [vmem:[%s12818_s0 + $0x98] sm:$0xff] }
  0x32   :  { %74 = vst [vmem:[#allocation2 + $0x180] sm:$0xff] %v6858_v3  ;;  %1826 = vmatpush.msrb.mxu0 %v913_v33  ;;  %1409 = vmatpush.msrb.mxu2 %v880_v38 }
  0x33   :  { %75 = vst [vmem:[#allocation2 + $0x188] sm:$0xff] %v6858_v3  ;;  %1215 = vmatmul.f32.gmra.mxu1 %v134_v44 }
  0x34   :  { %76 = vst [vmem:[#allocation2 + $0x190] sm:$0x3] %v6858_v3  ;;  %1410 = vmatpush.msrb.mxu2 %v879_v49 }
  0x35   :  { %77 = vst [vmem:[#allocation2 + $0x198] sm:$0xff] %v6858_v3 }
  0x36   :  { %78 = vst [vmem:[#allocation2 + $0x1a0] sm:$0xff] %v6858_v3  ;;  %1411 = vmatpush.msrb.mxu2 %v878_v0 }
  0x37   :  { %79 = vst [vmem:[#allocation2 + $0x1a8] sm:$0x3] %v6858_v3 }
  0x38   :  { %81 = vst [vmem:[#allocation2 + $0x1b8] sm:$0xff] %v6858_v3  ;;  %1412 = vmatpush.msrb.mxu2 %v877_v17 }
  0x39   :  { %82 = vst [vmem:[#allocation2 + $0x1c0] sm:$0x3] %v6858_v3 }
  0x3a   :  { %83 = vst [vmem:[#allocation2 + $0x1c8] sm:$0xff] %v6858_v3 }
  0x3b   :  { %84 = vst [vmem:[#allocation2 + $0x1d0] sm:$0xff] %v6858_v3  ;;  %1218 = vmatmul.f32.gmra.mxu1 %v135_v48 }
  0x3c   :  { %85 = vst [vmem:[#allocation2 + $0x1d8] sm:$0x3] %v6858_v3 }
  0x3d   :  { %86 = vst [vmem:[#allocation2 + $0x1e0] sm:$0xff] %v6858_v3 }
  0x3e   :  { %87 = vst [vmem:[#allocation2 + $0x1e8] sm:$0xff] %v6858_v3 }
  0x3f   :  { %88 = vst [vmem:[#allocation2 + $0x1f0] sm:$0x3] %v6858_v3  ;;  %v359_v34 = vld [vmem:[#allocation2 + $0x1b1] sm:$0xff] }
  0x40   :  { %89 = vst [vmem:[#allocation2 + $0x1f8] sm:$0xff] %v6858_v3  ;;  %1305 = vmatmul.f32.vlgmr.msra.gmra.mxu3 %v359_v34  ;;  %v360_v35 = vld [vmem:[#allocation2 + $0x1b9] sm:$0xff] }
  0x41   :  { %90 = vst [vmem:[#allocation2 + $0x200] sm:$0xff] %v6858_v3  ;;  %v145_v34 = vld [vmem:[%s12818_s0 + $0x58] sm:$0xff] }
  0x42   :  { %91 = vst [vmem:[#allocation2 + $0x208] sm:$0x3] %v6858_v3 }
  0x43   :  { %92 = vst [vmem:[#allocation2 + $0x210] sm:$0xff] %v6858_v3  ;;  %1221 = vmatmul.f32.gmra.mxu1 %v136_v51 }
  0x44   :  { %93 = vst [vmem:[#allocation2 + $0x218] sm:$0xff] %v6858_v3 }
  0x45   :  { %94 = vst [vmem:[#allocation2 + $0x220] sm:$0x3] %v6858_v3 }
  0x46   :  { %95 = vst [vmem:[#allocation2 + $0x228] sm:$0xff] %v6858_v3 }
  0x47   :  { %96 = vst [vmem:[#allocation2 + $0x230] sm:$0xff] %v6858_v3 }
  0x48   :  { %97 = vst [vmem:[#allocation2 + $0x238] sm:$0x3] %v6858_v3  ;;  %1308 = vmatmul.f32.gmra.mxu3 %v360_v35 }
  0x49   :  { %98 = vst [vmem:[#allocation2 + $0x240] sm:$0xff] %v6858_v3 }
  0x4a   :  { %99 = vst [vmem:[#allocation2 + $0x248] sm:$0xff] %v6858_v3 }
  0x4b   :  { %100 = vst [vmem:[#allocation2 + $0x250] sm:$0x3] %v6858_v3  ;;  %1224 = vmatmul.f32.gmra.mxu1 %v137_v54 }
  0x4c   :  { %101 = vst [vmem:[#allocation2 + $0x258] sm:$0xff] %v6858_v3 }
  0x4d   :  { %102 = vst [vmem:[#allocation2 + $0x260] sm:$0xff] %v6858_v3 }
  0x4e   :  { %103 = vst [vmem:[#allocation2 + $0x268] sm:$0x3] %v6858_v3 }
  0x4f   :  { %104 = vst [vmem:[#allocation2 + $0x270] sm:$0xff] %v6858_v3 }
  0x50   :  { %105 = vst [vmem:[#allocation2 + $0x278] sm:$0xff] %v6858_v3  ;;  %1311 = vmatmul.f32.gmra.mxu3 %v166_v39 }
  0x51   :  { %106 = vst [vmem:[#allocation2 + $0x280] sm:$0x3] %v6858_v3 }
  0x52   :  { %107 = vst [vmem:[#allocation2 + $0x288] sm:$0xff] %v6858_v3 }
  0x53   :  { %108 = vst [vmem:[#allocation2 + $0x290] sm:$0xff] %v6858_v3  ;;  %1227 = vmatmul.f32.gmra.mxu1 %v138_v60 }
  0x54   :  { %109 = vst [vmem:[#allocation2 + $0x298] sm:$0x3] %v6858_v3 }
  0x55   :  { %110 = vst [vmem:[#allocation2 + $0x2a0] sm:$0xff] %v6858_v3 }
  0x56   :  { %111 = vst [vmem:[#allocation2 + $0x2a8] sm:$0xff] %v6858_v3 }
  0x57   :  { %112 = vst [vmem:[#allocation2 + $0x2b0] sm:$0x3] %v6858_v3 }
  0x58   :  { %113 = vst [vmem:[#allocation2 + $0x2b8] sm:$0xff] %v6858_v3  ;;  %1314 = vmatmul.f32.gmra.mxu3 %v167_v43 }
  0x59   :  { %114 = vst [vmem:[#allocation2 + $0x2c0] sm:$0xff] %v6858_v3 }
  0x5a   :  { %115 = vst [vmem:[#allocation2 + $0x2c8] sm:$0x3] %v6858_v3 }
  0x5b   :  { %116 = vst [vmem:[#allocation2 + $0x2d0] sm:$0xff] %v6858_v3  ;;  %1230 = vmatmul.f32.gmra.mxu1 %v139_v1 }
  0x5c   :  { %117 = vst [vmem:[#allocation2 + $0x2d8] sm:$0xff] %v6858_v3 }
  0x5d   :  { %118 = vst [vmem:[#allocation2 + $0x2e0] sm:$0x3] %v6858_v3 }
  0x5e   :  { %119 = vst [vmem:[#allocation2 + $0x2e8] sm:$0xff] %v6858_v3 }
  0x5f   :  { %120 = vst [vmem:[#allocation2 + $0x2f0] sm:$0xff] %v6858_v3 }
  0x60   :  { %121 = vst [vmem:[#allocation2 + $0x2f8] sm:$0x3] %v6858_v3  ;;  %1317 = vmatmul.f32.gmra.mxu3 %v168_v46 }
  0x61   :  { %122 = vst [vmem:[#allocation2 + $0x300] sm:$0xff] %v6858_v3 }
  0x62   :  { %123 = vst [vmem:[#allocation2 + $0x308] sm:$0xff] %v6858_v3 }
  0x63   :  { %124 = vst [vmem:[#allocation2 + $0x310] sm:$0x3] %v6858_v3  ;;  %1233 = vmatmul.f32.gmra.mxu1 %v140_v7 }
  0x64   :  { %125 = vst [vmem:[#allocation2 + $0x318] sm:$0xff] %v6858_v3 }
  0x65   :  { %126 = vst [vmem:[#allocation2 + $0x320] sm:$0xff] %v6858_v3 }
  0x66   :  { %127 = vst [vmem:[#allocation2 + $0x328] sm:$0x3] %v6858_v3 }
  0x67   :  { %128 = vst [vmem:[#allocation2 + $0x330] sm:$0xff] %v6858_v3 }
  0x68   :  { %129 = vst [vmem:[#allocation2 + $0x338] sm:$0xff] %v6858_v3  ;;  %1320 = vmatmul.f32.gmra.mxu3 %v169_v50 }
  0x69   :  { %130 = vst [vmem:[#allocation2 + $0x340] sm:$0x3] %v6858_v3 }
  0x6a   :  { %131 = vst [vmem:[#allocation2 + $0x348] sm:$0xff] %v6858_v3 }
  0x6b   :  { %132 = vst [vmem:[#allocation2 + $0x350] sm:$0xff] %v6858_v3  ;;  %1236 = vmatmul.f32.gmra.mxu1 %v141_v12 }
  0x6c   :  { %133 = vst [vmem:[#allocation2 + $0x358] sm:$0x3] %v6858_v3 }
  0x6d   :  { %231 = vst [vmem:[#allocation2 + $0x1c9] sm:$0xff] %v166_v39  ;;  %v896_v39 = vld [vmem:[%s12817_s1 + $0x1c0] sm:$0xff] }
  0x6e   :  { %232 = vst [vmem:[#allocation2 + $0x1d1] sm:$0xff] %v167_v43  ;;  %1618 = vmatpush.msrb.mxu3 %v896_v39  ;;  %v180_v43 = vld [vmem:[%s12818_s0 + $0x170] sm:$0xff] }
  0x6f   :  { %199 = vst [vmem:[#allocation2 + $0x19] sm:$0xff] %v134_v44  ;;  %v912_v44 = vld [vmem:[%s12817_s1 + $0x240] sm:$0xff] }
  0x70   :  { %233 = vst [vmem:[#allocation2 + $0x1e1] sm:$0xff] %v168_v46  ;;  %1323 = vmatmul.f32.gmra.mxu3 %v170_v53  ;;  %1827 = vmatpush.msrb.mxu0 %v912_v44 }
  0x71   :  { %200 = vst [vmem:[#allocation2 + $0x21] sm:$0xff] %v135_v48  ;;  %v181_v48 = vld [vmem:[%s12818_s0 + $0x178] sm:$0xff] }
  0x72   :  { %234 = vst [vmem:[#allocation2 + $0x1e9] sm:$0xff] %v169_v50  ;;  %v895_v50 = vld [vmem:[%s12817_s1 + $0x1b8] sm:$0xff]  ;;  %1828 = vmatpush.msrb.mxu0 %v911_v57 }
  0x73   :  { %201 = vst [vmem:[#allocation2 + $0x31] sm:$0xff] %v136_v51  ;;  %1239 = vmatmul.f32.gmra.mxu1 %v142_v18  ;;  %1619 = vmatpush.msrb.mxu3 %v895_v50  ;;  %v189_v57 = vld [vmem:[%s12818_s0 + $0x1b8] sm:$0xff] }
  0x74   :  { %v297_v55 = vld [vmem:[#allocation2 + $0x1c8] sm:$0xff]  ;;  %235 = vst [vmem:[#allocation2 + $0x1f9] sm:$0xff] %v170_v53 }
  0x75   :  { %1102 = vmatmul.f32.gmra.mxu2 %v297_v55  ;;  %202 = vst [vmem:[#allocation2 + $0x39] sm:$0xff] %v137_v54  ;;  %v298_v61 = vld [vmem:[#allocation2 + $0x1d0] sm:$0xff] }
  0x76   :  { %v265_v59 = vld [vmem:[#allocation2 + $0x18] sm:$0xff]  ;;  %236 = vst [vmem:[#allocation2 + $0x201] sm:$0xff] %v171_v56 }
  0x77   :  { %1006 = vmatmul.f32.gmra.mxu0 %v265_v59  ;;  %203 = vst [vmem:[#allocation2 + $0x49] sm:$0xff] %v138_v60  ;;  %v299_v2 = vld [vmem:[#allocation2 + $0x1e0] sm:$0xff]  ;;  %v149_v59 = vld [vmem:[%s12818_s0 + $0x78] sm:$0xff] }
  0x78   :  { %1326 = vmatmul.f32.gmra.mxu3 %v171_v56  ;;  %v266_v62 = vld [vmem:[#allocation2 + $0x20] sm:$0xff]  ;;  %237 = vst [vmem:[#allocation2 + $0x211] sm:$0xff] %v172_v63 }
  0x79   :  { %204 = vst [vmem:[#allocation2 + $0x51] sm:$0xff] %v139_v1  ;;  %v300_v8 = vld [vmem:[#allocation2 + $0x1e8] sm:$0xff]  ;;  %v182_v56 = vld [vmem:[%s12818_s0 + $0x180] sm:$0xff]  ;;  %v894_v1 = vld [vmem:[%s12817_s1 + $0x1b0] sm:$0xff] }
  0x7a   :  { %v267_v3 = vld [vmem:[#allocation2 + $0x30] sm:$0xff]  ;;  %238 = vst [vmem:[#allocation2 + $0x219] sm:$0xff] %v173_v4  ;;  %1620 = vmatpush.msrb.mxu3 %v894_v1 }
  0x7b   :  { %205 = vst [vmem:[#allocation2 + $0x61] sm:$0xff] %v140_v7  ;;  %v301_v13 = vld [vmem:[#allocation2 + $0x1f8] sm:$0xff]  ;;  %1242 = vmatmul.f32.gmra.mxu1 %v143_v23  ;;  %v184_v7 = vld [vmem:[%s12818_s0 + $0x190] sm:$0xff] }
  0x7c   :  { %v268_v9 = vld [vmem:[#allocation2 + $0x38] sm:$0xff]  ;;  %239 = vst [vmem:[#allocation2 + $0x229] sm:$0xff] %v174_v10 }
  0x7d   :  { %1105 = vmatmul.f32.gmra.mxu2 %v298_v61  ;;  %206 = vst [vmem:[#allocation2 + $0x69] sm:$0xff] %v141_v12  ;;  %v302_v19 = vld [vmem:[#allocation2 + $0x200] sm:$0xff] }
  0x7e   :  { %v269_v14 = vld [vmem:[#allocation2 + $0x48] sm:$0xff]  ;;  %240 = vst [vmem:[#allocation2 + $0x231] sm:$0xff] %v175_v15 }
  0x7f   :  { %1009 = vmatmul.f32.gmra.mxu0 %v266_v62  ;;  %207 = vst [vmem:[#allocation2 + $0x79] sm:$0xff] %v142_v18  ;;  %v303_v24 = vld [vmem:[#allocation2 + $0x210] sm:$0xff]  ;;  %v893_v18 = vld [vmem:[%s12817_s1 + $0x1a8] sm:$0xff] }
  0x80   :  { %1329 = vmatmul.f32.gmra.mxu3 %v172_v63  ;;  %v270_v20 = vld [vmem:[#allocation2 + $0x50] sm:$0xff]  ;;  %241 = vst [vmem:[#allocation2 + $0x241] sm:$0xff] %v176_v21  ;;  %v183_v63 = vld [vmem:[%s12818_s0 + $0x188] sm:$0xff] }
  0x81   :  { %208 = vst [vmem:[#allocation2 + $0x81] sm:$0xff] %v143_v23  ;;  %v304_v30 = vld [vmem:[#allocation2 + $0x218] sm:$0xff]  ;;  %1621 = vmatpush.msrb.mxu3 %v893_v18 }
  0x82   :  { %v271_v25 = vld [vmem:[#allocation2 + $0x60] sm:$0xff]  ;;  %242 = vst [vmem:[#allocation2 + $0x249] sm:$0xff] %v177_v26 }
  0x83   :  { %209 = vst [vmem:[#allocation2 + $0x91] sm:$0xff] %v144_v29  ;;  %1245 = vmatmul.f32.gmra.mxu1 %v144_v29  ;;  %v305_v35 = vld [vmem:[#allocation2 + $0x228] sm:$0xff] }
  0x84   :  { %v272_v31 = vld [vmem:[#allocation2 + $0x68] sm:$0xff]  ;;  %243 = vst [vmem:[#allocation2 + $0x259] sm:$0xff] %v178_v32 }
  0x85   :  { %1108 = vmatmul.f32.gmra.mxu2 %v299_v2  ;;  %210 = vst [vmem:[#allocation2 + $0x99] sm:$0xff] %v145_v34  ;;  %v306_v41 = vld [vmem:[#allocation2 + $0x230] sm:$0xff]  ;;  %v150_v2 = vld [vmem:[%s12818_s0 + $0x80] sm:$0xff] }
  0x86   :  { %v273_v36 = vld [vmem:[#allocation2 + $0x78] sm:$0xff]  ;;  %244 = vst [vmem:[#allocation2 + $0x261] sm:$0xff] %v179_v37 }
  0x87   :  { %1012 = vmatmul.f32.gmra.mxu0 %v267_v3  ;;  %211 = vst [vmem:[#allocation2 + $0xa9] sm:$0xff] %v146_v40  ;;  %v307_v46 = vld [vmem:[#allocation2 + $0x240] sm:$0xff] }
  0x88   :  { %1332 = vmatmul.f32.gmra.mxu3 %v173_v4  ;;  %v274_v42 = vld [vmem:[#allocation2 + $0x80] sm:$0xff]  ;;  %245 = vst [vmem:[#allocation2 + $0x271] sm:$0xff] %v180_v43 }
  0x89   :  { %212 = vst [vmem:[#allocation2 + $0xb1] sm:$0xff] %v147_v45  ;;  %v308_v54 = vld [vmem:[#allocation2 + $0x248] sm:$0xff] }
  0x8a   :  { %v275_v47 = vld [vmem:[#allocation2 + $0x90] sm:$0xff]  ;;  %246 = vst [vmem:[#allocation2 + $0x279] sm:$0xff] %v181_v48 }
  0x8b   :  { %1248 = vmatmul.f32.gmra.mxu1 %v145_v34  ;;  %213 = vst [vmem:[#allocation2 + $0xc1] sm:$0xff] %v148_v52  ;;  %v309_v60 = vld [vmem:[#allocation2 + $0x258] sm:$0xff]  ;;  %v187_v34 = vld [vmem:[%s12818_s0 + $0x1a8] sm:$0xff] }
  0x8c   :  { %v276_v55 = vld [vmem:[#allocation2 + $0x98] sm:$0xff]  ;;  %247 = vst [vmem:[#allocation2 + $0x289] sm:$0xff] %v182_v56 }
  0x8d   :  { %1111 = vmatmul.f32.gmra.mxu2 %v300_v8  ;;  %214 = vst [vmem:[#allocation2 + $0xc9] sm:$0xff] %v149_v59  ;;  %v310_v4 = vld [vmem:[#allocation2 + $0x260] sm:$0xff]  ;;  %v910_v8 = vld [vmem:[%s12817_s1 + $0x230] sm:$0xff] }
  0x8e   :  { %v277_v62 = vld [vmem:[#allocation2 + $0xa8] sm:$0xff]  ;;  %248 = vst [vmem:[#allocation2 + $0x291] sm:$0xff] %v183_v63  ;;  %1829 = vmatpush.msrb.mxu0 %v910_v8  ;;  %v907_v8 = vld [vmem:[%s12817_s1 + $0x218] sm:$0xff] }
  0x8f   :  { %1015 = vmatmul.f32.gmra.mxu0 %v268_v9  ;;  %215 = vst [vmem:[#allocation2 + $0xd9] sm:$0xff] %v150_v2  ;;  %v151_v9 = vld [vmem:[%s12818_s0 + $0x88] sm:$0xff]  ;;  %v311_v12 = vld [vmem:[#allocation2 + $0x270] sm:$0xff] }
  0x90   :  { %1335 = vmatmul.f32.gmra.mxu3 %v174_v10  ;;  %v278_v6 = vld [vmem:[#allocation2 + $0xb0] sm:$0xff]  ;;  %249 = vst [vmem:[#allocation2 + $0x2a1] sm:$0xff] %v184_v7 }
  0x91   :  { %216 = vst [vmem:[#allocation2 + $0xe1] sm:$0xff] %v151_v9 }
  0x92   :  { %250 = vst [vmem:[#allocation2 + $0x2a9] sm:$0xff] %v185_v16 }
  0x93   :  { %1251 = vmatmul.f32.gmra.mxu1 %v146_v40  ;;  %218 = vst [vmem:[#allocation2 + $0xf9] sm:$0xff] %v153_v28 }
  0x94   :  { %252 = vst [vmem:[#allocation2 + $0x2c1] sm:$0xff] %v187_v34 }
  0x95   :  { %1114 = vmatmul.f32.gmra.mxu2 %v301_v13  ;;  %254 = vst [vmem:[#allocation2 + $0x2d9] sm:$0xff] %v189_v57 }
  0x96   :  { %v281_v33 = vld [vmem:[#allocation2 + $0xd8] sm:$0xff] }
  0x97   :  { %1018 = vmatmul.f32.gmra.mxu0 %v269_v14 }
  0x98   :  { %1338 = vmatmul.f32.gmra.mxu3 %v175_v15  ;;  %v279_v15 = vld [vmem:[#allocation2 + $0xc0] sm:$0xff] }
  0x99   :  { %v282_v44 = vld [vmem:[#allocation2 + $0xe0] sm:$0xff] }
  0x9b   :  { %1254 = vmatmul.f32.gmra.mxu1 %v147_v45  ;;  %v188_v45 = vld [vmem:[%s12818_s0 + $0x1b0] sm:$0xff] }
  0x9c   :  { %253 = vst [vmem:[#allocation2 + $0x2d1] sm:$0xff] %v188_v45 }
  0x9d   :  { %1117 = vmatmul.f32.gmra.mxu2 %v302_v19  ;;  %v152_v19 = vld [vmem:[%s12818_s0 + $0x90] sm:$0xff] }
  0x9e   :  { %217 = vst [vmem:[#allocation2 + $0xf1] sm:$0xff] %v152_v19 }
  0x9f   :  { %1021 = vmatmul.f32.gmra.mxu0 %v270_v20  ;;  %v7320_v10 = vpop.f32.mrf.mxu0 }
  0xa0   :  { %1341 = vmatmul.f32.gmra.mxu3 %v176_v21  ;;  %v7280_v53 = vpop.f32.mrf.mxu1  ;;  %v312_v21 = vld [vmem:[#allocation2 + $0x278] sm:$0xff] }
  0xa3   :  { %1257 = vmatmul.f32.gmra.mxu1 %v148_v52  ;;  %v315_v52 = vld [vmem:[#allocation2 + $0x2a0] sm:$0xff] }
  0xa4   :  { %v7326_v14 = vpop.f32.mrf.mxu2 }
  0xa5   :  { %1120 = vmatmul.f32.gmra.mxu2 %v303_v24  ;;  %12954 = vst [vmem:[#allocation5_spill] sm:$0xff] %v7326_v14  ;;  %v280_v24 = vld [vmem:[#allocation2 + $0xc8] sm:$0xff] }
  0xa7   :  { %1024 = vmatmul.f32.gmra.mxu0 %v271_v25  ;;  %v7342_v22 = vpop.f32.mrf.mxu0  ;;  %v186_v25 = vld [vmem:[%s12818_s0 + $0x1a0] sm:$0xff] }
  0xa8   :  { %1344 = vmatmul.f32.gmra.mxu3 %v177_v26  ;;  %v7293_v61 = vpop.f32.mrf.mxu1  ;;  %v909_v26 = vld [vmem:[%s12817_s1 + $0x228] sm:$0xff]  ;;  %251 = vst [vmem:[#allocation2 + $0x2b9] sm:$0xff] %v186_v25 }
  0xa9   :  { %1830 = vmatpush.msrb.mxu0 %v909_v26 }
  0xab   :  { %1260 = vmatmul.f32.gmra.mxu1 %v149_v59  ;;  %v875_v59 = vld [vmem:[%s12817_s1 + $0x118] sm:$0xff] }
  0xac   :  { %v7352_v27 = vpop.f32.mrf.mxu2 }
  0xad   :  { %1123 = vmatmul.f32.gmra.mxu2 %v304_v30  ;;  %12955 = vst [vmem:[#allocation6_spill] sm:$0xff] %v7352_v27  ;;  %v313_v30 = vld [vmem:[#allocation2 + $0x288] sm:$0xff] }
  0xaf   :  { %1027 = vmatmul.f32.gmra.mxu0 %v272_v31 }
  0xb0   :  { %1347 = vmatmul.f32.gmra.mxu3 %v178_v32  ;;  %v7309_v5 = vpop.f32.mrf.mxu1 }
  0xb3   :  { %1263 = vmatmul.f32.gmra.mxu1 %v150_v2  ;;  %v316_v2 = vld [vmem:[#allocation2 + $0x2a8] sm:$0xff] }
  0xb5   :  { %1126 = vmatmul.f32.gmra.mxu2 %v305_v35  ;;  %v876_v35 = vld [vmem:[%s12817_s1 + $0x120] sm:$0xff] }
  0xb6   :  { %1413 = vmatpush.msrb.mxu2 %v876_v35 }
  0xb7   :  { %1030 = vmatmul.f32.gmra.mxu0 %v273_v36  ;;  %v892_v36 = vld [vmem:[%s12817_s1 + $0x1a0] sm:$0xff] }
  0xb8   :  { %1350 = vmatmul.f32.gmra.mxu3 %v179_v37  ;;  %v7324_v13 = vpop.f32.mrf.mxu1  ;;  %v154_v37 = vld [vmem:[%s12818_s0 + $0xa0] sm:$0xff]  ;;  %1414 = vmatpush.msrb.mxu2 %v875_v59 }
  0xb9   :  { %1622 = vmatpush.msrb.mxu3 %v892_v36  ;;  %219 = vst [vmem:[#allocation2 + $0x109] sm:$0xff] %v154_v37  ;;  %v192_v36 = vld [vmem:[%s12818_s0 + $0x1d0] sm:$0xff] }
  0xba   :  { %257 = vst [vmem:[#allocation2 + $0x301] sm:$0xff] %v192_v36 }
  0xbb   :  { %1266 = vmatmul.f32.gmra.mxu1 %v151_v9  ;;  %v157_v9 = vld [vmem:[%s12818_s0 + $0xb8] sm:$0xff] }
  0xbc   :  { %222 = vst [vmem:[#allocation2 + $0x129] sm:$0xff] %v157_v9 }
  0xbd   :  { %1129 = vmatmul.f32.gmra.mxu2 %v306_v41  ;;  %v314_v41 = vld [vmem:[#allocation2 + $0x290] sm:$0xff] }
  0xbf   :  { %1033 = vmatmul.f32.gmra.mxu0 %v274_v42 }
  0xc0   :  { %1353 = vmatmul.f32.gmra.mxu3 %v180_v43  ;;  %v7344_v23 = vpop.f32.mrf.mxu1 }
  0xc3   :  { %v7275_v51 = vpop.f32.mrf.mxu3  ;;  %1269 = vmatmul.f32.gmra.mxu1 %v152_v19  ;;  %v285_v19 = vld [vmem:[#allocation2 + $0x108] sm:$0xff] }
  0xc4   :  { %12952 = vst [vmem:[#allocation3_spill] sm:$0xff] %v7275_v51 }
  0xc5   :  { %1132 = vmatmul.f32.gmra.mxu2 %v307_v46  ;;  %v908_v46 = vld [vmem:[%s12817_s1 + $0x220] sm:$0xff] }
  0xc6   :  { %1831 = vmatpush.msrb.mxu0 %v908_v46 }
  0xc7   :  { %1036 = vmatmul.f32.gmra.mxu0 %v275_v47  ;;  %v155_v47 = vld [vmem:[%s12818_s0 + $0xa8] sm:$0xff] }
  0xc8   :  { %1356 = vmatmul.f32.gmra.mxu3 %v181_v48  ;;  %v7359_v31 = vpop.f32.mrf.mxu1  ;;  %220 = vst [vmem:[#allocation2 + $0x111] sm:$0xff] %v155_v47  ;;  %1832 = vmatpush.msrb.mxu0 %v907_v8  ;;  %v194_v8 = vld [vmem:[%s12818_s0 + $0x1e0] sm:$0xff] }
  0xc9   :  { %259 = vst [vmem:[#allocation2 + $0x319] sm:$0xff] %v194_v8 }
  0xcb   :  { %v7288_v58 = vpop.f32.mrf.mxu3  ;;  %1272 = vmatmul.f32.gmra.mxu1 %v153_v28 }
  0xcc   :  { %12953 = vst [vmem:[#allocation4_spill] sm:$0xff] %v7288_v58  ;;  %v521_v58 = vld [vmem:[#allocation2 + $0x31] sm:$0xff] }
  0xcd   :  { %1135 = vmatmul.f32.gmra.mxu2 %v308_v54 }
  0xcf   :  { %1039 = vmatmul.f32.gmra.mxu0 %v276_v55  ;;  %v286_v35 = vld [vmem:[#allocation2 + $0x110] sm:$0xff] }
  0xd0   :  { %1359 = vmatmul.f32.gmra.mxu3 %v182_v56  ;;  %v7380_v42 = vpop.f32.mrf.mxu1  ;;  %v283_v56 = vld [vmem:[#allocation2 + $0xf0] sm:$0xff] }
  0xd3   :  { %v7307_v3 = vpop.f32.mrf.mxu3  ;;  %1275 = vmatmul.f32.gmra.mxu1 %v154_v37  ;;  %v906_v37 = vld [vmem:[%s12817_s1 + $0x210] sm:$0xff] }
  0xd4   :  { %1833 = vmatpush.msrb.mxu0 %v906_v37  ;;  %v888_v37 = vld [vmem:[%s12817_s1 + $0x180] sm:$0xff] }
  0xd5   :  { %1138 = vmatmul.f32.gmra.mxu2 %v309_v60  ;;  %v891_v60 = vld [vmem:[%s12817_s1 + $0x198] sm:$0xff] }
  0xd6   :  { %1623 = vmatpush.msrb.mxu3 %v891_v60 }
  0xd7   :  { %1042 = vmatmul.f32.gmra.mxu0 %v277_v62  ;;  %v156_v62 = vld [vmem:[%s12818_s0 + $0xb0] sm:$0xff] }
  0xd8   :  { %1362 = vmatmul.f32.gmra.mxu3 %v183_v63  ;;  %v7398_v54 = vpop.f32.mrf.mxu1  ;;  %221 = vst [vmem:[#allocation2 + $0x121] sm:$0xff] %v156_v62 }
  0xdb   :  { %v7322_v11 = vpop.f32.mrf.mxu3  ;;  %1278 = vmatmul.f32.gmra.mxu1 %v155_v47 }
  0xdd   :  { %1141 = vmatmul.f32.gmra.mxu2 %v310_v4 }
  0xdf   :  { %1045 = vmatmul.f32.gmra.mxu0 %v278_v6  ;;  %v284_v6 = vld [vmem:[#allocation2 + $0xf8] sm:$0xff] }
  0xe0   :  { %1365 = vmatmul.f32.gmra.mxu3 %v184_v7  ;;  %v190_v7 = vld [vmem:[%s12818_s0 + $0x1c0] sm:$0xff] }
  0xe1   :  { %255 = vst [vmem:[#allocation2 + $0x2e9] sm:$0xff] %v190_v7 }
  0xe3   :  { %v7340_v20 = vpop.f32.mrf.mxu3  ;;  %1281 = vmatmul.f32.gmra.mxu1 %v156_v62 }
  0xe5   :  { %1144 = vmatmul.f32.gmra.mxu2 %v311_v12 }
  0xe7   :  { %1048 = vmatmul.f32.gmra.mxu0 %v279_v15 }
  0xe8   :  { %1368 = vmatmul.f32.gmra.mxu3 %v185_v16  ;;  %v317_v16 = vld [vmem:[#allocation2 + $0x2b8] sm:$0xff] }
  0xeb   :  { %v7357_v29 = vpop.f32.mrf.mxu3  ;;  %1284 = vmatmul.f32.gmra.mxu1 %v157_v9  ;;  %v905_v9 = vld [vmem:[%s12817_s1 + $0x208] sm:$0xff] }
  0xec   :  { %1834 = vmatpush.msrb.mxu0 %v905_v9  ;;  %v163_v9 = vld [vmem:[%s12818_s0 + $0xe8] sm:$0xff] }
  0xed   :  { %1147 = vmatmul.f32.gmra.mxu2 %v312_v21  ;;  %v874_v21 = vld [vmem:[%s12817_s1 + $0x110] sm:$0xff]  ;;  %228 = vst [vmem:[#allocation2 + $0x171] sm:$0xff] %v163_v9 }
  0xee   :  { %1415 = vmatpush.msrb.mxu2 %v874_v21  ;;  %v934_v21 = vld [vmem:[%s12817_s1 + $0x2f0] sm:$0xff] }
  0xef   :  { %1051 = vmatmul.f32.gmra.mxu0 %v280_v24  ;;  %v890_v24 = vld [vmem:[%s12817_s1 + $0x190] sm:$0xff] }
  0xf0   :  { %1371 = vmatmul.f32.gmra.mxu3 %v186_v25  ;;  %v158_v25 = vld [vmem:[%s12818_s0 + $0xc0] sm:$0xff] }
  0xf1   :  { %1624 = vmatpush.msrb.mxu3 %v890_v24  ;;  %223 = vst [vmem:[#allocation2 + $0x139] sm:$0xff] %v158_v25  ;;  %v321_v24 = vld [vmem:[#allocation2 + $0x2e8] sm:$0xff] }
  0xf3   :  { %v7375_v39 = vpop.f32.mrf.mxu3  ;;  %1287 = vmatmul.f32.gmra.mxu1 %v158_v25 }
  0xf4   :  { %v7361_v32 = vpop.f32.mrf.mxu0 }
  0xf5   :  { %1150 = vmatmul.f32.gmra.mxu2 %v313_v30  ;;  %v318_v30 = vld [vmem:[#allocation2 + $0x2c0] sm:$0xff] }
  0xf7   :  { %1054 = vmatmul.f32.gmra.mxu0 %v281_v33 }
  0xf8   :  { %v1103_v38 = vpop.f32.mrf.mxu2  ;;  %1374 = vmatmul.f32.gmra.mxu3 %v187_v34 }
  0xf9   :  { %v7378_v40 = vadd.f32 %v7307_v3, %v1103_v38  ;;  %v7419_v3 = vpop.f32.mrf.mxu1  ;;  %v159_v38 = vld [vmem:[%s12818_s0 + $0xc8] sm:$0xff] }
  0xfa   :  { %224 = vst [vmem:[#allocation2 + $0x141] sm:$0xff] %v159_v38 }
  0xfb   :  { %12956 = vst [vmem:[#allocation7_spill] sm:$0xff] %v7378_v40  ;;  %v7393_v49 = vpop.f32.mrf.mxu3  ;;  %1290 = vmatmul.f32.gmra.mxu1 %v159_v38  ;;  %v162_v38 = vld [vmem:[%s12818_s0 + $0xe0] sm:$0xff] }
  0xfc   :  { %v7382_v43 = vpop.f32.mrf.mxu0  ;;  %227 = vst [vmem:[#allocation2 + $0x169] sm:$0xff] %v162_v38 }
  0xfd   :  { %1153 = vmatmul.f32.gmra.mxu2 %v314_v41 }
  0xff   :  { %1057 = vmatmul.f32.gmra.mxu0 %v282_v44 }
 0x100   :  { %v1106_v48 = vpop.f32.mrf.mxu2  ;;  %1377 = vmatmul.f32.gmra.mxu3 %v188_v45  ;;  %v319_v45 = vld [vmem:[#allocation2 + $0x2d0] sm:$0xff] }
 0x101   :  { %v7396_v50 = vadd.f32 %v7322_v11, %v1106_v48  ;;  %v7437_v17 = vpop.f32.mrf.mxu1  ;;  %v287_v48 = vld [vmem:[#allocation2 + $0x120] sm:$0xff] }
 0x103   :  { %12957 = vst [vmem:[#allocation8_spill] sm:$0xff] %v7396_v50  ;;  %v7414_v0 = vpop.f32.mrf.mxu3  ;;  %v460_v50 = vld [vmem:[#allocation2 + $0x50] sm:$0xff] }
 0x104   :  { %v7400_v55 = vpop.f32.mrf.mxu0 }
 0x105   :  { %1156 = vmatmul.f32.gmra.mxu2 %v315_v52  ;;  %v193_v52 = vld [vmem:[%s12818_s0 + $0x1d8] sm:$0xff] }
 0x106   :  { %258 = vst [vmem:[#allocation2 + $0x309] sm:$0xff] %v193_v52 }
 0x107   :  { %1060 = vmatmul.f32.gmra.mxu0 %v283_v56  ;;  %v873_v56 = vld [vmem:[%s12817_s1 + $0x108] sm:$0xff] }
 0x108   :  { %v1109_v63 = vpop.f32.mrf.mxu2  ;;  %1380 = vmatmul.f32.gmra.mxu3 %v189_v57  ;;  %1416 = vmatpush.msrb.mxu2 %v873_v56  ;;  %v160_v57 = vld [vmem:[%s12818_s0 + $0xd0] sm:$0xff]  ;;  %v931_v56 = vld [vmem:[%s12817_s1 + $0x2d8] sm:$0xff] }
 0x109   :  { %v7417_v1 = vadd.f32 %v7340_v20, %v1109_v63  ;;  %v191_v20 = vld [vmem:[%s12818_s0 + $0x1c8] sm:$0xff]  ;;  %v7458_v33 = vpop.f32.mrf.mxu1  ;;  %225 = vst [vmem:[#allocation2 + $0x151] sm:$0xff] %v160_v57  ;;  %v320_v63 = vld [vmem:[#allocation2 + $0x2d8] sm:$0xff]  ;;  %1293 = vmatmul.f32.gmra.mxu1 %v160_v57 }
 0x10a   :  { %256 = vst [vmem:[#allocation2 + $0x2f1] sm:$0xff] %v191_v20 }
 0x10b   :  { %12958 = vst [vmem:[#allocation9_spill] sm:$0xff] %v7417_v1  ;;  %v7432_v12 = vpop.f32.mrf.mxu3 }
 0x10c   :  { %v7421_v4 = vpop.f32.mrf.mxu0 }
 0x10d   :  { %1159 = vmatmul.f32.gmra.mxu2 %v316_v2 }
 0x10f   :  { %1063 = vmatmul.f32.gmra.mxu0 %v284_v6 }
 0x110   :  { %v1112_v11 = vpop.f32.mrf.mxu2  ;;  %1383 = vmatmul.f32.gmra.mxu3 %v190_v7  ;;  %v288_v7 = vld [vmem:[#allocation2 + $0x128] sm:$0xff] }
 0x111   :  { %v7435_v15 = vadd.f32 %v7357_v29, %v1112_v11  ;;  %v7476_v46 = vpop.f32.mrf.mxu1  ;;  %v322_v57 = vld [vmem:[#allocation2 + $0x2f0] sm:$0xff] }
 0x113   :  { %12959 = vst [vmem:[#allocation10_spill] sm:$0xff] %v7435_v15  ;;  %v7453_v28 = vpop.f32.mrf.mxu3 }
 0x114   :  { %v7439_v18 = vpop.f32.mrf.mxu0 }
 0x115   :  { %1162 = vmatmul.f32.gmra.mxu2 %v317_v16 }
 0x117   :  { %1066 = vmatmul.f32.gmra.mxu0 %v285_v19 }
 0x118   :  { %v1115_v26 = vpop.f32.mrf.mxu2  ;;  %1386 = vmatmul.f32.gmra.mxu3 %v191_v20  ;;  %v935_v20 = vld [vmem:[%s12817_s1 + $0x2f8] sm:$0xff] }
 0x119   :  { %v7456_v29 = vadd.f32 %v7375_v39, %v1115_v26  ;;  %v7497_v2 = vpop.f32.mrf.mxu1  ;;  %2029 = vmatpush.msrb.mxu1 %v935_v20 }
 0x11b   :  { %12960 = vst [vmem:[#allocation11_spill] sm:$0xff] %v7456_v29  ;;  %v7471_v41 = vpop.f32.mrf.mxu3  ;;  %2030 = vmatpush.msrb.mxu1 %v934_v21 }
 0x11c   :  { %v7460_v34 = vpop.f32.mrf.mxu0 }
 0x11d   :  { %1165 = vmatmul.f32.gmra.mxu2 %v318_v30  ;;  %v289_v30 = vld [vmem:[#allocation2 + $0x138] sm:$0xff] }
 0x11f   :  { %1069 = vmatmul.f32.gmra.mxu0 %v286_v35  ;;  %v872_v35 = vld [vmem:[%s12817_s1 + $0x100] sm:$0xff] }
 0x120   :  { %v1118_v39 = vpop.f32.mrf.mxu2  ;;  %1389 = vmatmul.f32.gmra.mxu3 %v192_v36  ;;  %v933_v36 = vld [vmem:[%s12817_s1 + $0x2e8] sm:$0xff]  ;;  %1417 = vmatpush.msrb.mxu2 %v872_v35 }
 0x121   :  { %v7474_v44 = vadd.f32 %v7393_v49, %v1118_v39  ;;  %v889_v49 = vld [vmem:[%s12817_s1 + $0x188] sm:$0xff]  ;;  %v7521_v25 = vpop.f32.mrf.mxu1  ;;  %2031 = vmatpush.msrb.mxu1 %v933_v36  ;;  %v932_v39 = vld [vmem:[%s12817_s1 + $0x2e0] sm:$0xff] }
 0x122   :  { %1625 = vmatpush.msrb.mxu3 %v889_v49  ;;  %v930_v49 = vld [vmem:[%s12817_s1 + $0x2d0] sm:$0xff] }
 0x123   :  { %12961 = vst [vmem:[#allocation12_spill] sm:$0xff] %v7474_v44  ;;  %v7492_v60 = vpop.f32.mrf.mxu3  ;;  %2032 = vmatpush.msrb.mxu1 %v932_v39  ;;  %v455_v39 = vld [vmem:[#allocation2 + $0x18] sm:$0xff]  ;;  %v459_v44 = vld [vmem:[#allocation2 + $0x48] sm:$0xff] }
 0x124   :  { %v7478_v47 = vpop.f32.mrf.mxu0  ;;  %1626 = vmatpush.msrb.mxu3 %v888_v37  ;;  %v291_v37 = vld [vmem:[#allocation2 + $0x150] sm:$0xff] }
 0x125   :  { %1168 = vmatmul.f32.gmra.mxu2 %v319_v45  ;;  %2033 = vmatpush.msrb.mxu1 %v931_v56  ;;  %v924_v56 = vld [vmem:[%s12817_s1 + $0x2a0] sm:$0xff] }
 0x127   :  { %1072 = vmatmul.f32.gmra.mxu0 %v287_v48  ;;  %2034 = vmatpush.msrb.mxu1 %v930_v49 }
 0x128   :  { %v1121_v59 = vpop.f32.mrf.mxu2  ;;  %1392 = vmatmul.f32.gmra.mxu3 %v193_v52 }
 0x129   :  { %v7495_v62 = vadd.f32 %v7414_v0, %v1121_v59  ;;  %v161_v0 = vld [vmem:[%s12818_s0 + $0xd8] sm:$0xff]  ;;  %v7554_v59 = vpop.f32.mrf.mxu1 }
 0x12a   :  { %226 = vst [vmem:[#allocation2 + $0x159] sm:$0xff] %v161_v0  ;;  %1296 = vmatmul.f32.gmra.mxu1 %v161_v0  ;;  %v928_v0 = vld [vmem:[%s12817_s1 + $0x2c0] sm:$0xff] }
 0x12b   :  { %12962 = vst [vmem:[#allocation13_spill] sm:$0xff] %v7495_v62  ;;  %v7510_v16 = vpop.f32.mrf.mxu3  ;;  %v519_v62 = vld [vmem:[#allocation2 + $0x19] sm:$0xff] }
 0x12c   :  { %v7499_v6 = vpop.f32.mrf.mxu0 }
 0x12d   :  { %1171 = vmatmul.f32.gmra.mxu2 %v320_v63 }
 0x12f   :  { %1075 = vmatmul.f32.gmra.mxu0 %v288_v7  ;;  %v290_v7 = vld [vmem:[#allocation2 + $0x140] sm:$0xff] }
 0x130   :  { %v1124_v11 = vpop.f32.mrf.mxu2  ;;  %1395 = vmatmul.f32.gmra.mxu3 %v194_v8  ;;  %v904_v8 = vld [vmem:[%s12817_s1 + $0x200] sm:$0xff] }
 0x131   :  { %v7513_v19 = vadd.f32 %v7432_v12, %v1124_v11  ;;  %v195_v12 = vld [vmem:[%s12818_s0 + $0x1e8] sm:$0xff]  ;;  %1835 = vmatpush.msrb.mxu0 %v904_v8  ;;  %v7581_v35 = vpop.f32.mrf.mxu1  ;;  %v922_v8 = vld [vmem:[%s12817_s1 + $0x290] sm:$0xff] }
 0x132   :  { %260 = vst [vmem:[#allocation2 + $0x321] sm:$0xff] %v195_v12  ;;  %1299 = vmatmul.f32.gmra.mxu1 %v162_v38  ;;  %v925_v38 = vld [vmem:[%s12817_s1 + $0x2a8] sm:$0xff] }
 0x133   :  { %12963 = vst [vmem:[#allocation14_spill] sm:$0xff] %v7513_v19  ;;  %v7543_v48 = vpop.f32.mrf.mxu3 }
 0x134   :  { %v7523_v26 = vpop.f32.mrf.mxu0 }
 0x135   :  { %1174 = vmatmul.f32.gmra.mxu2 %v321_v24  ;;  %v927_v24 = vld [vmem:[%s12817_s1 + $0x2b8] sm:$0xff] }
 0x137   :  { %1078 = vmatmul.f32.gmra.mxu0 %v289_v30  ;;  %v926_v30 = vld [vmem:[%s12817_s1 + $0x2b0] sm:$0xff] }
 0x138   :  { %v1127_v45 = vpop.f32.mrf.mxu2  ;;  %1398 = vmatmul.f32.gmra.mxu3 %v195_v12  ;;  %v323_v12 = vld [vmem:[#allocation2 + $0x300] sm:$0xff] }
 0x139   :  { %v7546_v52 = vadd.f32 %v7453_v28, %v1127_v45  ;;  %v929_v28 = vld [vmem:[%s12817_s1 + $0x2c8] sm:$0xff]  ;;  %v967_v45 = vld [vmem:[%s12817_s1 + $0x3f8] sm:$0xff] }
 0x13a   :  { %2035 = vmatpush.msrb.mxu1 %v929_v28  ;;  %2447 = vmatpush.msra.mxu3 %v967_v45  ;;  %v923_v28 = vld [vmem:[%s12817_s1 + $0x298] sm:$0xff] }
 0x13b   :  { %12964 = vst [vmem:[#allocation15_spill] sm:$0xff] %v7546_v52  ;;  %v7570_v20 = vpop.f32.mrf.mxu3  ;;  %1302 = vmatmul.f32.gmra.mxu1 %v163_v9  ;;  %v324_v9 = vld [vmem:[#allocation2 + $0x308] sm:$0xff]  ;;  %v585_v52 = vld [vmem:[#allocation2 + $0x32] sm:$0xff] }
 0x13c   :  { %v7556_v63 = vpop.f32.mrf.mxu0  ;;  %2036 = vmatpush.msrb.mxu1 %v928_v0  ;;  %v7608_v0 = vpop.f32.mrf.mxu1 }
 0x13d   :  { %1177 = vmatmul.f32.gmra.mxu2 %v322_v57 }
 0x13e   :  { %2037 = vmatpush.msrb.mxu1 %v927_v24  ;;  %v7612_v24 = vld [vmem:[#allocation2 + $0x158] sm:$0xff] }
 0x13f   :  { %1081 = vmatmul.f32.gmra.mxu0 %v290_v7 }
 0x140   :  { %v1130_v11 = vpop.f32.mrf.mxu2  ;;  %2038 = vmatpush.msrb.mxu1 %v926_v30  ;;  %1627 = vmatmul.f32.vlgmr.msrb.gmra.mxu3 %v455_v39  ;;  %v456_v30 = vld [vmem:[#allocation2 + $0x20] sm:$0xff] }
 0x141   :  { %v7573_v21 = vadd.f32 %v7471_v41, %v1130_v11  ;;  %v951_v41 = vld [vmem:[%s12817_s1 + $0x378] sm:$0xff] }
 0x142   :  { %2238 = vmatpush.msra.mxu2 %v951_v41  ;;  %2039 = vmatpush.msrb.mxu1 %v925_v38  ;;  %v7624_v39 = vld [vmem:[#allocation2 + $0x1a] sm:$0xff] }
 0x143   :  { %12965 = vst [vmem:[#allocation16_spill] sm:$0xff] %v7573_v21  ;;  %v7597_v57 = vpop.f32.mrf.mxu3 }
 0x144   :  { %v7583_v36 = vpop.f32.mrf.mxu0  ;;  %2040 = vmatpush.msrb.mxu1 %v924_v56  ;;  %v325_v56 = vld [vmem:[#allocation2 + $0x318] sm:$0xff] }
 0x145   :  { %1180 = vmatmul.f32.gmra.mxu2 %v323_v12  ;;  %v983_v12 = vld [vmem:[%s12817_s1 + $0x478] sm:$0xff] }
 0x146   :  { %2041 = vmatpush.msrb.mxu1 %v923_v28  ;;  %2656 = vmatpush.msra.mxu0 %v983_v12  ;;  %v584_v12 = vld [vmem:[#allocation2 + $0x22] sm:$0xff] }
 0x147   :  { %1084 = vmatmul.f32.gmra.mxu0 %v291_v37  ;;  %v920_v37 = vld [vmem:[%s12817_s1 + $0x280] sm:$0xff] }
 0x148   :  { %v1133_v49 = vpop.f32.mrf.mxu2  ;;  %2042 = vmatpush.msrb.mxu1 %v922_v8  ;;  %1630 = vmatmul.f32.gmra.mxu3 %v456_v30  ;;  %v7634_v8 = vld [vmem:[#allocation2 + $0x168] sm:$0xff] }
 0x149   :  { %v7600_v7 = vadd.f32 %v7492_v60, %v1133_v49  ;;  %v921_v60 = vld [vmem:[%s12817_s1 + $0x288] sm:$0xff]  ;;  %v7630_v49 = vpop.f32.mrf.mxu1 }
 0x14a   :  { %2043 = vmatpush.msrb.mxu1 %v921_v60 }
 0x14b   :  { %12966 = vst [vmem:[#allocation17_spill] sm:$0xff] %v7600_v7  ;;  %v1357_v38 = vpop.f32.mrf.mxu3  ;;  %v7644_v7 = vld [vmem:[#allocation2 + $0x170] sm:$0xff] }
 0x14c   :  { %v7610_v11 = vpop.f32.mrf.mxu0  ;;  %2044 = vmatpush.msrb.mxu1 %v920_v37  ;;  %v326_v37 = vld [vmem:[#allocation2 + $0x320] sm:$0xff] }
 0x14d   :  { %1183 = vmatmul.f32.gmra.mxu2 %v324_v9  ;;  %2045 = vmatmul.f32.vlgmr.msrb.gmra.mxu1 %v7624_v39  ;;  %v457_v9 = vld [vmem:[#allocation2 + $0x30] sm:$0xff] }
 0x14f   :  { %1087 = vmatmul.f32.gmra.mxu0 %v7612_v24 }
 0x150   :  { %v1136_v41 = vpop.f32.mrf.mxu2  ;;  %1633 = vmatmul.f32.gmra.mxu3 %v457_v9 }
 0x151   :  { %v7627_v45 = vadd.f32 %v7510_v16, %v1136_v41  ;;  %v7640_v41 = vpop.f32.mrf.mxu1 }
 0x152   :  { %12969 = vst [vmem:[#allocation20_spill] sm:$0xff] %v7640_v41  ;;  %v1214_v41 = vadd.f32 %v7293_v61, %v7342_v22  ;;  %v537_v22 = vld [vmem:[#allocation2 + $0xf1] sm:$0xff] }
 0x153   :  { %12967 = vst [vmem:[#allocation18_spill] sm:$0xff] %v7627_v45  ;;  %v1360_v30 = vpop.f32.mrf.mxu3 }
 0x154   :  { %v7632_v28 = vpop.f32.mrf.mxu0 }
 0x155   :  { %1186 = vmatmul.f32.gmra.mxu2 %v325_v56  ;;  %2048 = vmatmul.f32.gmra.mxu1 %v584_v12  ;;  %v458_v56 = vld [vmem:[#allocation2 + $0x38] sm:$0xff] }
 0x157   :  { %1090 = vmatmul.f32.gmra.mxu0 %v7634_v8 }
 0x158   :  { %v1139_v60 = vpop.f32.mrf.mxu2  ;;  %1636 = vmatmul.f32.gmra.mxu3 %v458_v56  ;;  %v966_v56 = vld [vmem:[%s12817_s1 + $0x3f0] sm:$0xff] }
 0x159   :  { %v7638_v16 = vadd.f32 %v7543_v48, %v1139_v60  ;;  %v391_v48 = vld [vmem:[#allocation2 + $0x2] sm:$0xff]  ;;  %v7650_v60 = vpop.f32.mrf.mxu1  ;;  %2448 = vmatpush.msra.mxu3 %v966_v56 }
 0x15a   :  { %12971 = vst [vmem:[#allocation22_spill] sm:$0xff] %v7650_v60 }
 0x15b   :  { %12968 = vst [vmem:[#allocation19_spill] sm:$0xff] %v7638_v16  ;;  %v1363_v9 = vpop.f32.mrf.mxu3 }
 0x15c   :  { %v7642_v45 = vpop.f32.mrf.mxu0 }
 0x15d   :  { %1189 = vmatmul.f32.gmra.mxu2 %v326_v37  ;;  %2051 = vmatmul.f32.gmra.mxu1 %v585_v52  ;;  %v950_v37 = vld [vmem:[%s12817_s1 + $0x370] sm:$0xff] }
 0x15e   :  { %2239 = vmatpush.msra.mxu2 %v950_v37  ;;  %v520_v37 = vld [vmem:[#allocation2 + $0x21] sm:$0xff] }
 0x15f   :  { %1093 = vmatmul.f32.gmra.mxu0 %v7644_v7 }
 0x160   :  { %v1142_v21 = vpop.f32.mrf.mxu2  ;;  %1639 = vmatmul.f32.gmra.mxu3 %v459_v44 }
 0x161   :  { %v7648_v19 = vadd.f32 %v7570_v20, %v1142_v21  ;;  %v7663_v15 = vpop.f32.mrf.mxu1 }
 0x162   :  { %12973 = vst [vmem:[#allocation24_spill] sm:$0xff] %v7663_v15  ;;  %v981_v15 = vld [vmem:[%s12817_s1 + $0x468] sm:$0xff] }
 0x163   :  { %12970 = vst [vmem:[#allocation21_spill] sm:$0xff] %v7648_v19  ;;  %v1366_v21 = vpop.f32.mrf.mxu3  ;;  %v586_v19 = vld [vmem:[#allocation2 + $0x3a] sm:$0xff] }
 0x164   :  { %v7652_v16 = vpop.f32.mrf.mxu0 }
 0x165   :  { %1418 = vmatmul.f32.vlgmr.msrb.gmra.mxu2 %v391_v48  ;;  %v392_v48 = vld [vmem:[#allocation2 + $0xa] sm:$0xff]  ;;  %2054 = vmatmul.f32.gmra.mxu1 %v586_v19 }
 0x167   :  { %1836 = vmatmul.f32.vlgmr.msrb.gmra.mxu0 %v519_v62  ;;  %v982_v62 = vld [vmem:[%s12817_s1 + $0x470] sm:$0xff] }
 0x168   :  { %v1145_v20 = vpop.f32.mrf.mxu2  ;;  %2657 = vmatpush.msra.mxu0 %v982_v62  ;;  %1642 = vmatmul.f32.gmra.mxu3 %v460_v50 }
 0x169   :  { %v7661_v29 = vadd.f32 %v7597_v57, %v1145_v20  ;;  %v587_v57 = vld [vmem:[#allocation2 + $0x4a] sm:$0xff] }
 0x16a   :  { %2658 = vmatpush.msra.mxu0 %v981_v15  ;;  %v592_v15 = vld [vmem:[#allocation2 + $0x82] sm:$0xff] }
 0x16b   :  { %12972 = vst [vmem:[#allocation23_spill] sm:$0xff] %v7661_v29  ;;  %v1369_v56 = vpop.f32.mrf.mxu3  ;;  %v7672_v29 = vpop.f32.mrf.mxu1 }
 0x16c   :  { %v7665_v1 = vpop.f32.mrf.mxu0  ;;  %12975 = vst [vmem:[#allocation26_spill] sm:$0xff] %v7672_v29  ;;  %v589_v29 = vld [vmem:[#allocation2 + $0x62] sm:$0xff] }
 0x16d   :  { %1421 = vmatmul.f32.gmra.mxu2 %v392_v48  ;;  %2057 = vmatmul.f32.gmra.mxu1 %v587_v57  ;;  %v461_v48 = vld [vmem:[#allocation2 + $0x60] sm:$0xff] }
 0x16f   :  { %1839 = vmatmul.f32.gmra.mxu0 %v520_v37  ;;  %v588_v37 = vld [vmem:[#allocation2 + $0x52] sm:$0xff] }
 0x170   :  { %v1148_v44 = vpop.f32.mrf.mxu2  ;;  %1645 = vmatmul.f32.gmra.mxu3 %v461_v48 }
 0x171   :  { %v7670_v20 = vadd.f32 %v1357_v38, %v1148_v44  ;;  %v522_v44 = vld [vmem:[#allocation2 + $0x39] sm:$0xff] }
 0x173   :  { %12974 = vst [vmem:[#allocation25_spill] sm:$0xff] %v7670_v20  ;;  %v1372_v62 = vpop.f32.mrf.mxu3  ;;  %v7679_v50 = vpop.f32.mrf.mxu1  ;;  %v462_v20 = vld [vmem:[#allocation2 + $0x68] sm:$0xff] }
 0x174   :  { %v7674_v40 = vpop.f32.mrf.mxu0  ;;  %12978 = vst [vmem:[#allocation29_spill] sm:$0xff] %v7679_v50  ;;  %v524_v50 = vld [vmem:[#allocation2 + $0x51] sm:$0xff] }
 0x175   :  { %12976 = vst [vmem:[#allocation27_spill] sm:$0xff] %v7674_v40  ;;  %1424 = vmatmul.f32.gmra.mxu2 %v7624_v39  ;;  %2060 = vmatmul.f32.gmra.mxu1 %v588_v37 }
 0x177   :  { %1842 = vmatmul.f32.gmra.mxu0 %v521_v58 }
 0x178   :  { %v1151_v27 = vpop.f32.mrf.mxu2  ;;  %1648 = vmatmul.f32.gmra.mxu3 %v462_v20  ;;  %v965_v20 = vld [vmem:[%s12817_s1 + $0x3e8] sm:$0xff] }
 0x179   :  { %v7677_v51 = vadd.f32 %v1360_v30, %v1151_v27  ;;  %v523_v30 = vld [vmem:[#allocation2 + $0x49] sm:$0xff]  ;;  %2449 = vmatpush.msra.mxu3 %v965_v20  ;;  %v591_v20 = vld [vmem:[#allocation2 + $0x7a] sm:$0xff] }
 0x17b   :  { %12977 = vst [vmem:[#allocation28_spill] sm:$0xff] %v7677_v51  ;;  %v1375_v39 = vpop.f32.mrf.mxu3  ;;  %v7685_v48 = vpop.f32.mrf.mxu1  ;;  %v949_v51 = vld [vmem:[%s12817_s1 + $0x368] sm:$0xff] }
 0x17c   :  { %v7681_v38 = vpop.f32.mrf.mxu0  ;;  %12981 = vst [vmem:[#allocation32_spill] sm:$0xff] %v7685_v48  ;;  %2240 = vmatpush.msra.mxu2 %v949_v51  ;;  %v464_v51 = vld [vmem:[#allocation2 + $0x80] sm:$0xff] }
 0x17d   :  { %12979 = vst [vmem:[#allocation30_spill] sm:$0xff] %v7681_v38  ;;  %1427 = vmatmul.f32.gmra.mxu2 %v584_v12  ;;  %2063 = vmatmul.f32.gmra.mxu1 %v589_v29  ;;  %v463_v12 = vld [vmem:[#allocation2 + $0x78] sm:$0xff] }
 0x17f   :  { %1845 = vmatmul.f32.gmra.mxu0 %v522_v44  ;;  %v590_v44 = vld [vmem:[#allocation2 + $0x6a] sm:$0xff] }
 0x180   :  { %v1154_v14 = vpop.f32.mrf.mxu2  ;;  %1651 = vmatmul.f32.gmra.mxu3 %v463_v12 }
 0x181   :  { %v7683_v58 = vadd.f32 %v1363_v9, %v1154_v14 }
 0x183   :  { %12980 = vst [vmem:[#allocation31_spill] sm:$0xff] %v7683_v58  ;;  %v1378_v9 = vpop.f32.mrf.mxu3 }
 0x184   :  { %v7687_v27 = vpop.f32.mrf.mxu0 }
 0x185   :  { %12982 = vst [vmem:[#allocation33_spill] sm:$0xff] %v7687_v27  ;;  %1430 = vmatmul.f32.gmra.mxu2 %v585_v52  ;;  %2066 = vmatmul.f32.gmra.mxu1 %v590_v44  ;;  %v7697_v52 = vpop.f32.mrf.mxu1 }
 0x186   :  { %12984 = vst [vmem:[#allocation35_spill] sm:$0xff] %v7697_v52  ;;  %v525_v52 = vld [vmem:[#allocation2 + $0x61] sm:$0xff] }
 0x187   :  { %1848 = vmatmul.f32.gmra.mxu0 %v523_v30 }
 0x188   :  { %v1157_v14 = vpop.f32.mrf.mxu2  ;;  %1654 = vmatmul.f32.gmra.mxu3 %v464_v51 }
 0x189   :  { %v7695_v58 = vadd.f32 %v1366_v21, %v1157_v14 }
 0x18b   :  { %12983 = vst [vmem:[#allocation34_spill] sm:$0xff] %v7695_v58  ;;  %v1381_v12 = vpop.f32.mrf.mxu3 }
 0x18c   :  { %v7699_v48 = vpop.f32.mrf.mxu0 }
 0x18d   :  { %12985 = vst [vmem:[#allocation36_spill] sm:$0xff] %v7699_v48  ;;  %1433 = vmatmul.f32.gmra.mxu2 %v586_v19  ;;  %2069 = vmatmul.f32.gmra.mxu1 %v591_v20  ;;  %v7706_v14 = vpop.f32.mrf.mxu1  ;;  %v465_v19 = vld [vmem:[#allocation2 + $0x90] sm:$0xff] }
 0x18e   :  { %12987 = vst [vmem:[#allocation38_spill] sm:$0xff] %v7706_v14 }
 0x18f   :  { %1851 = vmatmul.f32.gmra.mxu0 %v524_v50 }
 0x190   :  { %v1160_v30 = vpop.f32.mrf.mxu2  ;;  %1657 = vmatmul.f32.gmra.mxu3 %v465_v19 }
 0x191   :  { %v7704_v21 = vadd.f32 %v1369_v56, %v1160_v30  ;;  %v526_v30 = vld [vmem:[#allocation2 + $0x69] sm:$0xff] }
 0x193   :  { %12986 = vst [vmem:[#allocation37_spill] sm:$0xff] %v7704_v21  ;;  %v1384_v27 = vpop.f32.mrf.mxu3  ;;  %v466_v21 = vld [vmem:[#allocation2 + $0x98] sm:$0xff] }
 0x194   :  { %v7708_v58 = vpop.f32.mrf.mxu0 }
 0x195   :  { %12988 = vst [vmem:[#allocation39_spill] sm:$0xff] %v7708_v58  ;;  %1436 = vmatmul.f32.gmra.mxu2 %v587_v57  ;;  %2072 = vmatmul.f32.gmra.mxu1 %v592_v15  ;;  %v7712_v51 = vpop.f32.mrf.mxu1  ;;  %v593_v58 = vld [vmem:[#allocation2 + $0x92] sm:$0xff] }
 0x196   :  { %12990 = vst [vmem:[#allocation41_spill] sm:$0xff] %v7712_v51  ;;  %v528_v51 = vld [vmem:[#allocation2 + $0x81] sm:$0xff] }
 0x197   :  { %1854 = vmatmul.f32.gmra.mxu0 %v525_v52 }
 0x198   :  { %v1163_v48 = vpop.f32.mrf.mxu2  ;;  %1660 = vmatmul.f32.gmra.mxu3 %v466_v21  ;;  %v964_v21 = vld [vmem:[%s12817_s1 + $0x3e0] sm:$0xff] }
 0x199   :  { %v7710_v50 = vadd.f32 %v1372_v62, %v1163_v48  ;;  %v527_v48 = vld [vmem:[#allocation2 + $0x79] sm:$0xff]  ;;  %2450 = vmatpush.msra.mxu3 %v964_v21  ;;  %v595_v21 = vld [vmem:[#allocation2 + $0xaa] sm:$0xff] }
 0x19b   :  { %12989 = vst [vmem:[#allocation40_spill] sm:$0xff] %v7710_v50  ;;  %v1387_v57 = vpop.f32.mrf.mxu3  ;;  %v948_v50 = vld [vmem:[%s12817_s1 + $0x360] sm:$0xff] }
 0x19c   :  { %v7714_v56 = vpop.f32.mrf.mxu0  ;;  %2241 = vmatpush.msra.mxu2 %v948_v50  ;;  %v468_v50 = vld [vmem:[#allocation2 + $0xb0] sm:$0xff] }
 0x19d   :  { %12991 = vst [vmem:[#allocation42_spill] sm:$0xff] %v7714_v56  ;;  %1439 = vmatmul.f32.gmra.mxu2 %v588_v37  ;;  %2075 = vmatmul.f32.gmra.mxu1 %v593_v58  ;;  %v7718_v19 = vpop.f32.mrf.mxu1  ;;  %v467_v37 = vld [vmem:[#allocation2 + $0xa8] sm:$0xff]  ;;  %v596_v56 = vld [vmem:[#allocation2 + $0xb2] sm:$0xff] }
 0x19e   :  { %12993 = vst [vmem:[#allocation44_spill] sm:$0xff] %v7718_v19 }
 0x19f   :  { %1857 = vmatmul.f32.gmra.mxu0 %v526_v30  ;;  %v594_v30 = vld [vmem:[#allocation2 + $0x9a] sm:$0xff] }
 0x1a0   :  { %v1166_v14 = vpop.f32.mrf.mxu2  ;;  %1663 = vmatmul.f32.gmra.mxu3 %v467_v37 }
 0x1a1   :  { %v7716_v52 = vadd.f32 %v1375_v39, %v1166_v14 }
 0x1a3   :  { %12992 = vst [vmem:[#allocation43_spill] sm:$0xff] %v7716_v52  ;;  %v1390_v14 = vpop.f32.mrf.mxu3 }
 0x1a4   :  { %v7720_v62 = vpop.f32.mrf.mxu0 }
 0x1a5   :  { %12994 = vst [vmem:[#allocation45_spill] sm:$0xff] %v7720_v62  ;;  %1442 = vmatmul.f32.gmra.mxu2 %v589_v29  ;;  %2078 = vmatmul.f32.gmra.mxu1 %v594_v30  ;;  %v7730_v29 = vpop.f32.mrf.mxu1  ;;  %v980_v62 = vld [vmem:[%s12817_s1 + $0x460] sm:$0xff] }
 0x1a6   :  { %12996 = vst [vmem:[#allocation47_spill] sm:$0xff] %v7730_v29  ;;  %2659 = vmatpush.msra.mxu0 %v980_v62 }
 0x1a7   :  { %1860 = vmatmul.f32.gmra.mxu0 %v527_v48 }
 0x1a8   :  { %v1169_v39 = vpop.f32.mrf.mxu2  ;;  %1666 = vmatmul.f32.gmra.mxu3 %v468_v50 }
 0x1a9   :  { %v7728_v52 = vadd.f32 %v1378_v9, %v1169_v39 }
 0x1ab   :  { %12995 = vst [vmem:[#allocation46_spill] sm:$0xff] %v7728_v52  ;;  %v1393_v37 = vpop.f32.mrf.mxu3  ;;  %v529_v52 = vld [vmem:[#allocation2 + $0x91] sm:$0xff] }
 0x1ac   :  { %v7732_v19 = vpop.f32.mrf.mxu0 }
 0x1ad   :  { %12997 = vst [vmem:[#allocation48_spill] sm:$0xff] %v7732_v19  ;;  %1445 = vmatmul.f32.gmra.mxu2 %v590_v44  ;;  %2081 = vmatmul.f32.gmra.mxu1 %v595_v21  ;;  %v7741_v29 = vpop.f32.mrf.mxu1  ;;  %v469_v44 = vld [vmem:[#allocation2 + $0xc0] sm:$0xff] }
 0x1ae   :  { %13000 = vst [vmem:[#allocation51_spill] sm:$0xff] %v7741_v29 }
 0x1af   :  { %1863 = vmatmul.f32.gmra.mxu0 %v528_v51 }
 0x1b0   :  { %v1172_v48 = vpop.f32.mrf.mxu2  ;;  %1669 = vmatmul.f32.gmra.mxu3 %v469_v44 }
 0x1b1   :  { %v7737_v9 = vadd.f32 %v1381_v12, %v1172_v48  ;;  %v530_v12 = vld [vmem:[#allocation2 + $0x99] sm:$0xff] }
 0x1b3   :  { %12998 = vst [vmem:[#allocation49_spill] sm:$0xff] %v7737_v9  ;;  %v1396_v51 = vpop.f32.mrf.mxu3  ;;  %v470_v9 = vld [vmem:[#allocation2 + $0xc8] sm:$0xff] }
 0x1b4   :  { %v7739_v39 = vpop.f32.mrf.mxu0 }
 0x1b5   :  { %12999 = vst [vmem:[#allocation50_spill] sm:$0xff] %v7739_v39  ;;  %1448 = vmatmul.f32.gmra.mxu2 %v591_v20  ;;  %2084 = vmatmul.f32.gmra.mxu1 %v596_v56  ;;  %v7747_v48 = vpop.f32.mrf.mxu1  ;;  %v597_v20 = vld [vmem:[#allocation2 + $0xc2] sm:$0xff] }
 0x1b6   :  { %13003 = vst [vmem:[#allocation54_spill] sm:$0xff] %v7747_v48  ;;  %v472_v48 = vld [vmem:[#allocation2 + $0xe0] sm:$0xff] }
 0x1b7   :  { %1866 = vmatmul.f32.gmra.mxu0 %v529_v52 }
 0x1b8   :  { %v1175_v19 = vpop.f32.mrf.mxu2  ;;  %1672 = vmatmul.f32.gmra.mxu3 %v470_v9 }
 0x1b9   :  { %v7743_v62 = vadd.f32 %v1384_v27, %v1175_v19  ;;  %v531_v27 = vld [vmem:[#allocation2 + $0xa9] sm:$0xff]  ;;  %v947_v19 = vld [vmem:[%s12817_s1 + $0x358] sm:$0xff] }
 0x1ba   :  { %2242 = vmatpush.msra.mxu2 %v947_v19  ;;  %v532_v19 = vld [vmem:[#allocation2 + $0xb1] sm:$0xff] }
 0x1bb   :  { %13001 = vst [vmem:[#allocation52_spill] sm:$0xff] %v7743_v62  ;;  %v1399_v52 = vpop.f32.mrf.mxu3 }
 0x1bc   :  { %v7745_v50 = vpop.f32.mrf.mxu0 }
 0x1bd   :  { %13002 = vst [vmem:[#allocation53_spill] sm:$0xff] %v7745_v50  ;;  %1451 = vmatmul.f32.gmra.mxu2 %v592_v15  ;;  %2087 = vmatmul.f32.gmra.mxu1 %v597_v20  ;;  %v471_v15 = vld [vmem:[#allocation2 + $0xd8] sm:$0xff]  ;;  %v7759_v9 = vpop.f32.mrf.mxu1  ;;  %v7778_v50 = vld [vmem:[#allocation2 + $0xe2] sm:$0xff] }
 0x1be   :  { %13006 = vst [vmem:[#allocation57_spill] sm:$0xff] %v7759_v9 }
 0x1bf   :  { %1869 = vmatmul.f32.gmra.mxu0 %v530_v12  ;;  %v963_v12 = vld [vmem:[%s12817_s1 + $0x3d8] sm:$0xff] }
 0x1c0   :  { %v1178_v39 = vpop.f32.mrf.mxu2  ;;  %2451 = vmatpush.msra.mxu3 %v963_v12 }
 0x1c1   :  { %v7749_v29 = vadd.f32 %v1387_v57, %v1178_v39  ;;  %1675 = vmatmul.f32.gmra.mxu3 %v471_v15  ;;  %v7761_v39 = vld [vmem:[#allocation2 + $0xca] sm:$0xff]  ;;  %v7771_v15 = vld [vmem:[#allocation2 + $0xda] sm:$0xff] }
 0x1c3   :  { %13004 = vst [vmem:[#allocation55_spill] sm:$0xff] %v7749_v29 }
 0x1c4   :  { %v7751_v44 = vpop.f32.mrf.mxu0 }
 0x1c5   :  { %13005 = vst [vmem:[#allocation56_spill] sm:$0xff] %v7751_v44  ;;  %1454 = vmatmul.f32.gmra.mxu2 %v593_v58  ;;  %2090 = vmatmul.f32.gmra.mxu1 %v7761_v39  ;;  %v1628_v58 = vpop.f32.mrf.mxu3 }
 0x1c7   :  { %1872 = vmatmul.f32.gmra.mxu0 %v531_v27  ;;  %v979_v27 = vld [vmem:[%s12817_s1 + $0x458] sm:$0xff] }
 0x1c8   :  { %v1181_v57 = vpop.f32.mrf.mxu2  ;;  %2660 = vmatpush.msra.mxu0 %v979_v27 }
 0x1c9   :  { %v7763_v29 = vadd.f32 %v1390_v14, %v1181_v57  ;;  %1678 = vmatmul.f32.gmra.mxu3 %v472_v48 }
 0x1ca   :  { %v2046_v44 = vpop.f32.mrf.mxu1 }
 0x1cb   :  { %13007 = vst [vmem:[#allocation58_spill] sm:$0xff] %v7763_v29 }
 0x1cc   :  { %v7766_v62 = vpop.f32.mrf.mxu0 }
 0x1cd   :  { %13008 = vst [vmem:[#allocation59_spill] sm:$0xff] %v7766_v62  ;;  %1457 = vmatmul.f32.gmra.mxu2 %v594_v30  ;;  %2093 = vmatmul.f32.gmra.mxu1 %v7771_v15  ;;  %v1631_v57 = vpop.f32.mrf.mxu3  ;;  %v533_v30 = vld [vmem:[#allocation2 + $0xc1] sm:$0xff] }
 0x1cf   :  { %1875 = vmatmul.f32.gmra.mxu0 %v532_v19  ;;  %v473_v19 = vld [vmem:[#allocation2 + $0xf0] sm:$0xff] }
 0x1d0   :  { %v1184_v12 = vpop.f32.mrf.mxu2 }
 0x1d1   :  { %v7773_v14 = vadd.f32 %v1393_v37, %v1184_v12  ;;  %1681 = vmatmul.f32.gmra.mxu3 %v473_v19  ;;  %v534_v12 = vld [vmem:[#allocation2 + $0xc9] sm:$0xff] }
 0x1d2   :  { %v2049_v9 = vpop.f32.mrf.mxu1 }
 0x1d3   :  { %13009 = vst [vmem:[#allocation60_spill] sm:$0xff] %v7773_v14  ;;  %v474_v14 = vld [vmem:[#allocation2 + $0xf8] sm:$0xff] }
 0x1d4   :  { %v7776_v29 = vpop.f32.mrf.mxu0 }
 0x1d5   :  { %13010 = vst [vmem:[#allocation61_spill] sm:$0xff] %v7776_v29  ;;  %1460 = vmatmul.f32.gmra.mxu2 %v595_v21  ;;  %2096 = vmatmul.f32.gmra.mxu1 %v7778_v50  ;;  %v7783_v37 = vpop.f32.mrf.mxu3  ;;  %v7789_v29 = vld [vmem:[#allocation2 + $0xf2] sm:$0xff] }
 0x1d7   :  { %1878 = vmatmul.f32.gmra.mxu0 %v533_v30 }
 0x1d8   :  { %v1187_v62 = vpop.f32.mrf.mxu2 }
 0x1d9   :  { %v7780_v48 = vadd.f32 %v1396_v51, %v1187_v62  ;;  %1684 = vmatmul.f32.gmra.mxu3 %v474_v14  ;;  %v1211_v14 = vadd.f32 %v7280_v53, %v7320_v10  ;;  %v536_v53 = vld [vmem:[#allocation2 + $0xe1] sm:$0xff] }
 0x1da   :  { %v7787_v21 = vpop.f32.mrf.mxu1 }
 0x1db   :  { %13011 = vst [vmem:[#allocation62_spill] sm:$0xff] %v7780_v48  ;;  %v535_v48 = vld [vmem:[#allocation2 + $0xd9] sm:$0xff] }
 0x1dc   :  { %v7785_v27 = vpop.f32.mrf.mxu0 }
 0x1dd   :  { %13012 = vst [vmem:[#allocation63_spill] sm:$0xff] %v7785_v27  ;;  %1463 = vmatmul.f32.gmra.mxu2 %v596_v56  ;;  %2099 = vmatmul.f32.gmra.mxu1 %v7789_v29  ;;  %v7794_v62 = vpop.f32.mrf.mxu3  ;;  %v946_v56 = vld [vmem:[%s12817_s1 + $0x350] sm:$0xff] }
 0x1de   :  { %2243 = vmatpush.msra.mxu2 %v946_v56 }
 0x1df   :  { %1881 = vmatmul.f32.gmra.mxu0 %v534_v12  ;;  %v475_v12 = vld [vmem:[#allocation2 + $0x108] sm:$0xff] }
 0x1e0   :  { %v1190_v30 = vpop.f32.mrf.mxu2 }
 0x1e1   :  { %v7791_v19 = vadd.f32 %v1399_v52, %v1190_v30  ;;  %v962_v52 = vld [vmem:[%s12817_s1 + $0x3d0] sm:$0xff]  ;;  %1687 = vmatmul.f32.gmra.mxu3 %v475_v12 }
 0x1e2   :  { %v7801_v27 = vpop.f32.mrf.mxu1  ;;  %2452 = vmatpush.msra.mxu3 %v962_v52  ;;  %v7821_v52 = vld [vmem:[#allocation2 + $0x10a] sm:$0xff] }
 0x1e3   :  { %13013 = vst [vmem:[#allocation64_spill] sm:$0xff] %v7791_v19  ;;  %v7806_v19 = vld [vmem:[#allocation2 + $0xfa] sm:$0xff] }
 0x1e4   :  { %v1837_v51 = vpop.f32.mrf.mxu0 }
 0x1e5   :  { %1466 = vmatmul.f32.gmra.mxu2 %v597_v20  ;;  %2102 = vmatmul.f32.gmra.mxu1 %v7806_v19  ;;  %v7809_v60 = vpop.f32.mrf.mxu3 }
 0x1e7   :  { %1884 = vmatmul.f32.gmra.mxu0 %v535_v48  ;;  %v476_v48 = vld [vmem:[#allocation2 + $0x110] sm:$0xff] }
 0x1e8   :  { %v1419_v30 = vpop.f32.mrf.mxu2 }
 0x1e9   :  { %v1420_v20 = vadd.f32 %v1419_v30, %v1211_v14  ;;  %1690 = vmatmul.f32.gmra.mxu3 %v476_v48  ;;  %v7833_v48 = vld [vmem:[#allocation2 + $0x112] sm:$0xff] }
 0x1ea   :  { %v7816_v12 = vpop.f32.mrf.mxu1 }
 0x1eb   :  { %v1629_v56 = vadd.f32 %v1628_v58, %v1420_v20  ;;  %v978_v58 = vld [vmem:[%s12817_s1 + $0x450] sm:$0xff]  ;;  %v477_v20 = vld [vmem:[#allocation2 + $0x120] sm:$0xff] }
 0x1ec   :  { %v1840_v38 = vpop.f32.mrf.mxu0  ;;  %2661 = vmatpush.msra.mxu0 %v978_v58 }
 0x1ed   :  { %v1838_v10 = vadd.f32 %v1837_v51, %v1629_v56  ;;  %1469 = vmatmul.f32.gmra.mxu2 %v7761_v39  ;;  %2105 = vmatmul.f32.gmra.mxu1 %v7821_v52  ;;  %v7824_v30 = vpop.f32.mrf.mxu3  ;;  %v1217_v56 = vadd.f32 %v7309_v5, %v7361_v32  ;;  %v478_v5 = vld [vmem:[#allocation2 + $0x128] sm:$0xff]  ;;  %v1220_v32 = vadd.f32 %v7324_v13, %v7382_v43 }
 0x1ee   :  { %v945_v43 = vld [vmem:[%s12817_s1 + $0x348] sm:$0xff] }
 0x1ef   :  { %v7814_v40 = vadd.f32 %v2046_v44, %v1838_v10  ;;  %1887 = vmatmul.f32.gmra.mxu0 %v536_v53  ;;  %2244 = vmatpush.msra.mxu2 %v945_v43 }
 0x1f0   :  { %v1422_v14 = vpop.f32.mrf.mxu2 }
 0x1f1   :  { %v1423_v51 = vadd.f32 %v1422_v14, %v1214_v41  ;;  %1693 = vmatmul.f32.gmra.mxu3 %v477_v20  ;;  %v538_v14 = vld [vmem:[#allocation2 + $0xf9] sm:$0xff] }
 0x1f2   :  { %v7831_v10 = vpop.f32.mrf.mxu1 }
 0x1f3   :  { %v1632_v39 = vadd.f32 %v1631_v57, %v1423_v51 }
 0x1f4   :  { %v1843_v61 = vpop.f32.mrf.mxu0 }
 0x1f5   :  { %v1841_v44 = vadd.f32 %v1840_v38, %v1632_v39  ;;  %1472 = vmatmul.f32.gmra.mxu2 %v7771_v15  ;;  %2108 = vmatmul.f32.gmra.mxu1 %v7833_v48  ;;  %v7837_v58 = vpop.f32.mrf.mxu3 }
 0x1f7   :  { %v7829_v53 = vadd.f32 %v2049_v9, %v1841_v44  ;;  %1890 = vmatmul.f32.gmra.mxu0 %v537_v22 }
 0x1f8   :  { %v1425_v41 = vpop.f32.mrf.mxu2 }
 0x1f9   :  { %v1426_v57 = vadd.f32 %v1425_v41, %v1217_v56  ;;  %1696 = vmatmul.f32.gmra.mxu3 %v478_v5  ;;  %v539_v56 = vld [vmem:[#allocation2 + $0x109] sm:$0xff]  ;;  %v1223_v41 = vadd.f32 %v7344_v23, %v7400_v55 }
 0x1fa   :  { %v7845_v39 = vpop.f32.mrf.mxu1 }
 0x1fb   :  { %v1635_v38 = vadd.f32 %v7783_v37, %v1426_v57  ;;  %v7847_v37 = vld [vmem:[#allocation2 + $0x122] sm:$0xff] }
 0x1fc   :  { %v1846_v15 = vpop.f32.mrf.mxu0 }
 0x1fd   :  { %v1844_v51 = vadd.f32 %v1843_v61, %v1635_v38  ;;  %1475 = vmatmul.f32.gmra.mxu2 %v7778_v50  ;;  %2111 = vmatmul.f32.gmra.mxu1 %v7847_v37  ;;  %v7851_v50 = vpop.f32.mrf.mxu3  ;;  %v961_v38 = vld [vmem:[%s12817_s1 + $0x3c8] sm:$0xff] }
 0x1fe   :  { %2453 = vmatpush.msra.mxu3 %v961_v38 }
 0x1ff   :  { %v7843_v9 = vadd.f32 %v7787_v21, %v1844_v51  ;;  %1893 = vmatmul.f32.gmra.mxu0 %v538_v14  ;;  %v479_v21 = vld [vmem:[#allocation2 + $0x138] sm:$0xff] }
 0x200   :  { %v1428_v22 = vpop.f32.mrf.mxu2  ;;  %v540_v51 = vld [vmem:[#allocation2 + $0x111] sm:$0xff] }
 0x201   :  { %v1429_v44 = vadd.f32 %v1428_v22, %v1220_v32  ;;  %1699 = vmatmul.f32.gmra.mxu3 %v479_v21  ;;  %v480_v32 = vld [vmem:[#allocation2 + $0x140] sm:$0xff]  ;;  %v1226_v22 = vadd.f32 %v7359_v31, %v7421_v4  ;;  %v481_v21 = vld [vmem:[#allocation2 + $0x150] sm:$0xff] }
 0x203   :  { %v1638_v61 = vadd.f32 %v7794_v62, %v1429_v44  ;;  %v7862_v62 = vpop.f32.mrf.mxu1 }
 0x204   :  { %v1849_v20 = vpop.f32.mrf.mxu0 }
 0x205   :  { %v1847_v13 = vadd.f32 %v1846_v15, %v1638_v61  ;;  %1478 = vmatmul.f32.gmra.mxu2 %v7789_v29  ;;  %v7867_v15 = vld [vmem:[#allocation2 + $0x12a] sm:$0xff]  ;;  %v7871_v55 = vpop.f32.mrf.mxu3 }
 0x206   :  { %2114 = vmatmul.f32.gmra.mxu1 %v7867_v15 }
 0x207   :  { %v7860_v57 = vadd.f32 %v7801_v27, %v1847_v13  ;;  %1896 = vmatmul.f32.gmra.mxu0 %v539_v56  ;;  %v541_v13 = vld [vmem:[#allocation2 + $0x121] sm:$0xff] }
 0x208   :  { %v1431_v29 = vpop.f32.mrf.mxu2 }
 0x209   :  { %v1432_v14 = vadd.f32 %v1431_v29, %v1223_v41  ;;  %1702 = vmatmul.f32.gmra.mxu3 %v480_v32  ;;  %v1229_v41 = vadd.f32 %v7380_v42, %v7439_v18  ;;  %v1232_v18 = vadd.f32 %v7398_v54, %v7460_v34  ;;  %v543_v54 = vld [vmem:[#allocation2 + $0x139] sm:$0xff] }
 0x20b   :  { %v1641_v23 = vadd.f32 %v7809_v60, %v1432_v14  ;;  %v7879_v61 = vpop.f32.mrf.mxu1  ;;  %v977_v60 = vld [vmem:[%s12817_s1 + $0x448] sm:$0xff] }
 0x20c   :  { %v1852_v27 = vpop.f32.mrf.mxu0  ;;  %2662 = vmatpush.msra.mxu0 %v977_v60 }
 0x20d   :  { %v1850_v5 = vadd.f32 %v1849_v20, %v1641_v23  ;;  %1481 = vmatmul.f32.gmra.mxu2 %v7806_v19  ;;  %v7884_v20 = vld [vmem:[#allocation2 + $0x13a] sm:$0xff]  ;;  %v7888_v4 = vpop.f32.mrf.mxu3 }
 0x20e   :  { %2117 = vmatmul.f32.gmra.mxu1 %v7884_v20 }
 0x20f   :  { %v7877_v44 = vadd.f32 %v7816_v12, %v1850_v5  ;;  %1899 = vmatmul.f32.gmra.mxu0 %v540_v51  ;;  %v542_v5 = vld [vmem:[#allocation2 + $0x129] sm:$0xff] }
 0x210   :  { %v1434_v56 = vpop.f32.mrf.mxu2 }
 0x211   :  { %v1435_v19 = vadd.f32 %v1434_v56, %v1226_v22  ;;  %1705 = vmatmul.f32.gmra.mxu3 %v481_v21  ;;  %v544_v21 = vld [vmem:[#allocation2 + $0x141] sm:$0xff] }
 0x213   :  { %v1644_v31 = vadd.f32 %v7824_v30, %v1435_v19  ;;  %v7896_v29 = vpop.f32.mrf.mxu1  ;;  %v7898_v30 = vld [vmem:[#allocation2 + $0x142] sm:$0xff] }
 0x214   :  { %v1855_v12 = vpop.f32.mrf.mxu0 }
 0x215   :  { %v1853_v43 = vadd.f32 %v1852_v27, %v1644_v31  ;;  %1484 = vmatmul.f32.gmra.mxu2 %v7821_v52  ;;  %v7902_v52 = vpop.f32.mrf.mxu3 }
 0x216   :  { %2120 = vmatmul.f32.gmra.mxu1 %v7898_v30 }
 0x217   :  { %v7894_v38 = vadd.f32 %v7831_v10, %v1853_v43  ;;  %1902 = vmatmul.f32.gmra.mxu0 %v541_v13 }
 0x218   :  { %v1437_v14 = vpop.f32.mrf.mxu2 }
 0x219   :  { %v1438_v23 = vadd.f32 %v1437_v14, %v1229_v41  ;;  %1708 = vmatmul.f32.gmra.mxu3 %v7612_v24  ;;  %v1235_v24 = vadd.f32 %v7419_v3, %v7478_v47  ;;  %v7944_v14 = vld [vmem:[%s12818_s0 + $0xf0] sm:$0xff] }
 0x21a   :  { %229 = vst [vmem:[#allocation2 + $0x181] sm:$0xff] %v7944_v14 }
 0x21b   :  { %v1647_v27 = vadd.f32 %v7837_v58, %v1438_v23  ;;  %v7910_v32 = vpop.f32.mrf.mxu1  ;;  %v7913_v58 = vld [vmem:[#allocation2 + $0x152] sm:$0xff] }
 0x21c   :  { %v1858_v51 = vpop.f32.mrf.mxu0 }
 0x21d   :  { %v1856_v42 = vadd.f32 %v1855_v12, %v1647_v27  ;;  %1487 = vmatmul.f32.gmra.mxu2 %v7833_v48  ;;  %v7917_v48 = vpop.f32.mrf.mxu3  ;;  %v960_v12 = vld [vmem:[%s12817_s1 + $0x3c0] sm:$0xff] }
 0x21e   :  { %2123 = vmatmul.f32.gmra.mxu1 %v7913_v58  ;;  %2454 = vmatpush.msra.mxu3 %v960_v12  ;;  %v976_v27 = vld [vmem:[%s12817_s1 + $0x440] sm:$0xff]  ;;  %v1244_v12 = vadd.f32 %v7476_v46, %v7556_v63  ;;  %v943_v46 = vld [vmem:[%s12817_s1 + $0x338] sm:$0xff]  ;;  %v487_v63 = vld [vmem:[#allocation2 + $0x1c8] sm:$0xff] }
 0x21f   :  { %v7908_v10 = vadd.f32 %v7845_v39, %v1856_v42  ;;  %1905 = vmatmul.f32.gmra.mxu0 %v542_v5  ;;  %v944_v39 = vld [vmem:[%s12817_s1 + $0x340] sm:$0xff]  ;;  %v545_v42 = vld [vmem:[#allocation2 + $0x151] sm:$0xff] }
 0x220   :  { %v1440_v22 = vpop.f32.mrf.mxu2  ;;  %2245 = vmatpush.msra.mxu2 %v944_v39  ;;  %2663 = vmatpush.msra.mxu0 %v976_v27 }
 0x221   :  { %v1441_v60 = vadd.f32 %v1440_v22, %v1232_v18  ;;  %1711 = vmatmul.f32.gmra.mxu3 %v7634_v8  ;;  %v1238_v8 = vadd.f32 %v7437_v17, %v7499_v6  ;;  %v485_v22 = vld [vmem:[#allocation2 + $0x180] sm:$0xff] }
 0x222   :  { %2246 = vmatpush.msra.mxu2 %v943_v46 }
 0x223   :  { %v1650_v56 = vadd.f32 %v7851_v50, %v1441_v60  ;;  %v7928_v50 = vpop.f32.mrf.mxu1  ;;  %v1241_v60 = vadd.f32 %v7458_v33, %v7523_v26  ;;  %v546_v26 = vld [vmem:[#allocation2 + $0x159] sm:$0xff] }
 0x224   :  { %v1861_v19 = vpop.f32.mrf.mxu0 }
 0x225   :  { %v1859_v34 = vadd.f32 %v1858_v51, %v1650_v56  ;;  %1490 = vmatmul.f32.gmra.mxu2 %v7847_v37  ;;  %v7934_v37 = vld [vmem:[#allocation2 + $0x15a] sm:$0xff]  ;;  %v7938_v47 = vpop.f32.mrf.mxu3  ;;  %v7958_v51 = vld [vmem:[#allocation2 + $0x16a] sm:$0xff] }
 0x226   :  { %2126 = vmatmul.f32.gmra.mxu1 %v7934_v37 }
 0x227   :  { %v7926_v31 = vadd.f32 %v7862_v62, %v1859_v34  ;;  %1908 = vmatmul.f32.gmra.mxu0 %v543_v54 }
 0x228   :  { %v1443_v13 = vpop.f32.mrf.mxu2 }
 0x229   :  { %v1444_v43 = vadd.f32 %v1443_v13, %v1235_v24  ;;  %1714 = vmatmul.f32.gmra.mxu3 %v7644_v7  ;;  %v7968_v7 = vld [vmem:[%s12818_s0 + $0xf8] sm:$0xff] }
 0x22a   :  { %230 = vst [vmem:[#allocation2 + $0x189] sm:$0xff] %v7968_v7 }
 0x22b   :  { %v1653_v3 = vadd.f32 %v7871_v55, %v1444_v43  ;;  %v7951_v55 = vpop.f32.mrf.mxu1 }
 0x22c   :  { %v1864_v62 = vpop.f32.mrf.mxu0 }
 0x22d   :  { %v1862_v41 = vadd.f32 %v1861_v19, %v1653_v3  ;;  %1493 = vmatmul.f32.gmra.mxu2 %v7867_v15  ;;  %v7962_v6 = vpop.f32.mrf.mxu3 }
 0x22e   :  { %2129 = vmatmul.f32.gmra.mxu1 %v7958_v51 }
 0x22f   :  { %v7949_v23 = vadd.f32 %v7879_v61, %v1862_v41  ;;  %1911 = vmatmul.f32.gmra.mxu0 %v544_v21 }
 0x230   :  { %v1446_v15 = vpop.f32.mrf.mxu2 }
 0x231   :  { %v1447_v5 = vadd.f32 %v1446_v15, %v1238_v8  ;;  %1717 = vmatmul.f32.gmra.mxu3 %v485_v22  ;;  %v486_v24 = vld [vmem:[#allocation2 + $0x188] sm:$0xff]  ;;  %v1250_v22 = vadd.f32 %v7521_v25, %v7610_v11 }
 0x232   :  { %v547_v8 = vld [vmem:[#allocation2 + $0x169] sm:$0xff] }
 0x233   :  { %v1656_v17 = vadd.f32 %v7888_v4, %v1447_v5  ;;  %v7975_v4 = vpop.f32.mrf.mxu1  ;;  %v959_v5 = vld [vmem:[%s12817_s1 + $0x3b8] sm:$0xff] }
 0x234   :  { %v1867_v61 = vpop.f32.mrf.mxu0  ;;  %2455 = vmatpush.msra.mxu3 %v959_v5  ;;  %v491_v5 = vld [vmem:[#allocation2 + $0x1f8] sm:$0xff] }
 0x235   :  { %v1865_v18 = vadd.f32 %v1864_v62, %v1656_v17  ;;  %1496 = vmatmul.f32.gmra.mxu2 %v7884_v20  ;;  %v7978_v20 = vld [vmem:[#allocation2 + $0x172] sm:$0xff]  ;;  %v7982_v39 = vpop.f32.mrf.mxu3  ;;  %v614_v17 = vld [vmem:[#allocation2 + $0x18a] sm:$0xff] }
 0x236   :  { %2132 = vmatmul.f32.gmra.mxu1 %v7978_v20 }
 0x237   :  { %v7973_v56 = vadd.f32 %v7896_v29, %v1865_v18  ;;  %1914 = vmatmul.f32.gmra.mxu0 %v545_v42 }
 0x238   :  { %v1449_v19 = vpop.f32.mrf.mxu2 }
 0x239   :  { %v1450_v54 = vadd.f32 %v1449_v19, %v1241_v60  ;;  %1720 = vmatmul.f32.gmra.mxu3 %v486_v24  ;;  %v6853_v19 = vld [vmem:[#allocation2 + $0x171] sm:$0xff]  ;;  %v1253_v24 = vadd.f32 %v7554_v59, %v7632_v28  ;;  %v490_v28 = vld [vmem:[#allocation2 + $0x1e8] sm:$0xff] }
 0x23b   :  { %v1659_v34 = vadd.f32 %v7902_v52, %v1450_v54  ;;  %v7990_v43 = vpop.f32.mrf.mxu1  ;;  %v613_v52 = vld [vmem:[#allocation2 + $0x182] sm:$0xff] }
 0x23c   :  { %v1870_v33 = vpop.f32.mrf.mxu0 }
 0x23d   :  { %v1868_v29 = vadd.f32 %v1867_v61, %v1659_v34  ;;  %1499 = vmatmul.f32.gmra.mxu2 %v7898_v30  ;;  %v7993_v41 = vpop.f32.mrf.mxu3 }
 0x23e   :  { %2135 = vmatmul.f32.gmra.mxu1 %v613_v52 }
 0x23f   :  { %v7988_v13 = vadd.f32 %v7910_v32, %v1868_v29  ;;  %1917 = vmatmul.f32.gmra.mxu0 %v546_v26  ;;  %v1247_v32 = vadd.f32 %v7497_v2, %v7583_v36  ;;  %v489_v29 = vld [vmem:[#allocation2 + $0x1e0] sm:$0xff] }
 0x240   :  { %v1452_v3 = vpop.f32.mrf.mxu2 }
 0x241   :  { %v1453_v62 = vadd.f32 %v1452_v3, %v1244_v12  ;;  %1723 = vmatmul.f32.gmra.mxu3 %v487_v63  ;;  %v423_v63 = vld [vmem:[#allocation2 + $0x1b2] sm:$0xff] }
 0x243   :  { %v1662_v21 = vadd.f32 %v7917_v48, %v1453_v62  ;;  %v8004_v48 = vpop.f32.mrf.mxu1 }
 0x244   :  { %v1873_v30 = vpop.f32.mrf.mxu0 }
 0x245   :  { %v1871_v27 = vadd.f32 %v1870_v33, %v1662_v21  ;;  %1502 = vmatmul.f32.gmra.mxu2 %v7913_v58  ;;  %v8010_v18 = vpop.f32.mrf.mxu3  ;;  %v8023_v33 = vld [vmem:[#allocation2 + $0x1ca] sm:$0xff] }
 0x246   :  { %2138 = vmatmul.f32.gmra.mxu1 %v614_v17 }
 0x247   :  { %v8002_v15 = vadd.f32 %v7928_v50, %v1871_v27  ;;  %1920 = vmatmul.f32.gmra.mxu0 %v547_v8  ;;  %v488_v50 = vld [vmem:[#allocation2 + $0x1d0] sm:$0xff] }
 0x248   :  { %v1455_v58 = vpop.f32.mrf.mxu2 }
 0x249   :  { %v1456_v61 = vadd.f32 %v1455_v58, %v1247_v32  ;;  %1726 = vmatmul.f32.gmra.mxu3 %v488_v50  ;;  %v1259_v58 = vadd.f32 %v7608_v0, %v7652_v16  ;;  %v424_v50 = vld [vmem:[#allocation2 + $0x1ba] sm:$0xff] }
 0x24b   :  { %v1665_v42 = vadd.f32 %v7938_v47, %v1456_v61  ;;  %v8018_v54 = vpop.f32.mrf.mxu1  ;;  %v975_v47 = vld [vmem:[%s12817_s1 + $0x438] sm:$0xff]  ;;  %v958_v61 = vld [vmem:[%s12817_s1 + $0x3b0] sm:$0xff] }
 0x24c   :  { %v1876_v2 = vpop.f32.mrf.mxu0  ;;  %2664 = vmatpush.msra.mxu0 %v975_v47  ;;  %2456 = vmatpush.msra.mxu3 %v958_v61  ;;  %v492_v47 = vld [vmem:[#allocation2 + $0x200] sm:$0xff] }
 0x24d   :  { %v1874_v36 = vadd.f32 %v1873_v30, %v1665_v42  ;;  %1505 = vmatmul.f32.gmra.mxu2 %v7934_v37  ;;  %v8027_v11 = vpop.f32.mrf.mxu3 }
 0x24e   :  { %2141 = vmatmul.f32.gmra.mxu1 %v8023_v33 }
 0x24f   :  { %v8016_v60 = vadd.f32 %v7951_v55, %v1874_v36  ;;  %1923 = vmatmul.f32.gmra.mxu0 %v6853_v19 }
 0x250   :  { %v1458_v34 = vpop.f32.mrf.mxu2 }
 0x251   :  { %v1459_v37 = vadd.f32 %v1458_v34, %v1250_v22  ;;  %1729 = vmatmul.f32.gmra.mxu3 %v489_v29  ;;  %v552_v22 = vld [vmem:[#allocation2 + $0x1d1] sm:$0xff]  ;;  %v1262_v34 = vadd.f32 %v7630_v49, %v7665_v1 }
 0x253   :  { %v1668_v25 = vadd.f32 %v7962_v6, %v1459_v37  ;;  %v8036_v3 = vpop.f32.mrf.mxu1  ;;  %v8038_v6 = vld [vmem:[#allocation2 + $0x1d2] sm:$0xff] }
 0x254   :  { %v1879_v55 = vpop.f32.mrf.mxu0 }
 0x255   :  { %v1877_v26 = vadd.f32 %v1876_v2, %v1668_v25  ;;  %1508 = vmatmul.f32.gmra.mxu2 %v7958_v51  ;;  %v8042_v21 = vpop.f32.mrf.mxu3  ;;  %v8072_v2 = vld [vmem:[#allocation2 + $0x1ea] sm:$0xff] }
 0x256   :  { %2144 = vmatmul.f32.gmra.mxu1 %v8038_v6 }
 0x257   :  { %v8033_v12 = vadd.f32 %v7975_v4, %v1877_v26  ;;  %1926 = vmatmul.f32.gmra.mxu0 %v7944_v14  ;;  %v1256_v14 = vadd.f32 %v7581_v35, %v7642_v45  ;;  %v551_v45 = vld [vmem:[#allocation2 + $0x1c9] sm:$0xff]  ;;  %v8088_v26 = vld [vmem:[#allocation2 + $0x1fa] sm:$0xff] }
 0x258   :  { %v1461_v52 = vpop.f32.mrf.mxu2 }
 0x259   :  { %v1462_v62 = vadd.f32 %v1461_v52, %v1253_v24  ;;  %1732 = vmatmul.f32.gmra.mxu3 %v490_v28  ;;  %v553_v24 = vld [vmem:[#allocation2 + $0x1e1] sm:$0xff] }
 0x25b   :  { %v1671_v51 = vadd.f32 %v7982_v39, %v1462_v62  ;;  %v8051_v8 = vpop.f32.mrf.mxu1  ;;  %v8053_v39 = vld [vmem:[#allocation2 + $0x1e2] sm:$0xff]  ;;  %v493_v62 = vld [vmem:[#allocation2 + $0x210] sm:$0xff] }
 0x25c   :  { %v1882_v30 = vpop.f32.mrf.mxu0 }
 0x25d   :  { %v1880_v59 = vadd.f32 %v1879_v55, %v1671_v51  ;;  %1511 = vmatmul.f32.gmra.mxu2 %v7978_v20  ;;  %v8057_v32 = vpop.f32.mrf.mxu3  ;;  %v13014_v51 = vld [vmem:[#allocation27_spill] sm:$0xff] }
 0x25e   :  { %2147 = vmatmul.f32.gmra.mxu1 %v8053_v39 }
 0x25f   :  { %v8048_v4 = vadd.f32 %v7990_v43, %v1880_v59  ;;  %1929 = vmatmul.f32.gmra.mxu0 %v7968_v7  ;;  %v942_v7 = vld [vmem:[%s12817_s1 + $0x330] sm:$0xff] }
 0x260   :  { %v1464_v27 = vpop.f32.mrf.mxu2  ;;  %2247 = vmatpush.msra.mxu2 %v942_v7  ;;  %v13017_v7 = vld [vmem:[#allocation22_spill] sm:$0xff] }
 0x261   :  { %v1465_v46 = vadd.f32 %v1464_v27, %v1256_v14  ;;  %1735 = vmatmul.f32.gmra.mxu3 %v491_v5 }
 0x263   :  { %v1674_v20 = vadd.f32 %v7993_v41, %v1465_v46  ;;  %v8067_v41 = vpop.f32.mrf.mxu1 }
 0x264   :  { %v1885_v35 = vpop.f32.mrf.mxu0 }
 0x265   :  { %v1883_v43 = vadd.f32 %v1882_v30, %v1674_v20  ;;  %1514 = vmatmul.f32.gmra.mxu2 %v423_v63  ;;  %v8076_v16 = vpop.f32.mrf.mxu3  ;;  %v13015_v30 = vld [vmem:[#allocation20_spill] sm:$0xff] }
 0x266   :  { %2150 = vmatmul.f32.gmra.mxu1 %v8072_v2  ;;  %v1265_v59 = vadd.f32 %v13015_v30, %v13014_v51  ;;  %v496_v30 = vld [vmem:[#allocation2 + $0x230] sm:$0xff] }
 0x267   :  { %v8065_v17 = vadd.f32 %v8004_v48, %v1883_v43  ;;  %1932 = vmatmul.f32.gmra.mxu0 %v551_v45  ;;  %v13016_v43 = vld [vmem:[#allocation30_spill] sm:$0xff] }
 0x268   :  { %v1467_v42 = vpop.f32.mrf.mxu2  ;;  %v1268_v5 = vadd.f32 %v13017_v7, %v13016_v43  ;;  %v557_v7 = vld [vmem:[#allocation2 + $0x211] sm:$0xff] }
 0x269   :  { %v1468_v36 = vadd.f32 %v1467_v42, %v1259_v58  ;;  %1738 = vmatmul.f32.gmra.mxu3 %v492_v47  ;;  %v13018_v47 = vld [vmem:[#allocation33_spill] sm:$0xff] }
 0x26b   :  { %v1677_v0 = vadd.f32 %v8010_v18, %v1468_v36  ;;  %v8083_v25 = vpop.f32.mrf.mxu1  ;;  %v974_v18 = vld [vmem:[%s12817_s1 + $0x430] sm:$0xff] }
 0x26c   :  { %v1888_v48 = vpop.f32.mrf.mxu0  ;;  %2665 = vmatpush.msra.mxu0 %v974_v18 }
 0x26d   :  { %v1886_v19 = vadd.f32 %v1885_v35, %v1677_v0  ;;  %1517 = vmatmul.f32.gmra.mxu2 %v424_v50  ;;  %v8092_v49 = vpop.f32.mrf.mxu3  ;;  %v554_v35 = vld [vmem:[#allocation2 + $0x1e9] sm:$0xff] }
 0x26e   :  { %2153 = vmatmul.f32.gmra.mxu1 %v8088_v26 }
 0x26f   :  { %v8081_v37 = vadd.f32 %v8018_v54, %v1886_v19  ;;  %1935 = vmatmul.f32.gmra.mxu0 %v552_v22  ;;  %v495_v19 = vld [vmem:[#allocation2 + $0x228] sm:$0xff] }
 0x270   :  { %v1470_v55 = vpop.f32.mrf.mxu2 }
 0x271   :  { %v1471_v29 = vadd.f32 %v1470_v55, %v1262_v34  ;;  %1741 = vmatmul.f32.gmra.mxu3 %v493_v62  ;;  %v13019_v34 = vld [vmem:[#allocation24_spill] sm:$0xff] }
 0x272   :  { %v1271_v18 = vadd.f32 %v13019_v34, %v13018_v47  ;;  %v556_v62 = vld [vmem:[#allocation2 + $0x201] sm:$0xff] }
 0x273   :  { %v1680_v1 = vadd.f32 %v8027_v11, %v1471_v29  ;;  %v8100_v14 = vpop.f32.mrf.mxu1  ;;  %v8102_v11 = vld [vmem:[#allocation2 + $0x202] sm:$0xff] }
 0x274   :  { %v1891_v54 = vpop.f32.mrf.mxu0  ;;  %v957_v29 = vld [vmem:[%s12817_s1 + $0x3a8] sm:$0xff] }
 0x275   :  { %v1889_v52 = vadd.f32 %v1888_v48, %v1680_v1  ;;  %1520 = vmatmul.f32.gmra.mxu2 %v8023_v33  ;;  %v8106_v33 = vpop.f32.mrf.mxu3  ;;  %v555_v48 = vld [vmem:[#allocation2 + $0x1f9] sm:$0xff]  ;;  %2457 = vmatpush.msra.mxu3 %v957_v29 }
 0x276   :  { %2156 = vmatmul.f32.gmra.mxu1 %v8102_v11  ;;  %v8136_v1 = vld [vmem:[#allocation2 + $0x21a] sm:$0xff] }
 0x277   :  { %v8098_v28 = vadd.f32 %v8036_v3, %v1889_v52  ;;  %1938 = vmatmul.f32.gmra.mxu0 %v553_v24  ;;  %v494_v3 = vld [vmem:[#allocation2 + $0x218] sm:$0xff] }
 0x278   :  { %v1473_v27 = vpop.f32.mrf.mxu2 }
 0x279   :  { %v1474_v46 = vadd.f32 %v1473_v27, %v1265_v59  ;;  %1744 = vmatmul.f32.gmra.mxu3 %v494_v3  ;;  %v13020_v59 = vld [vmem:[#allocation36_spill] sm:$0xff]  ;;  %v13021_v27 = vld [vmem:[#allocation26_spill] sm:$0xff] }
 0x27b   :  { %v1683_v63 = vadd.f32 %v8042_v21, %v1474_v46  ;;  %v8114_v61 = vpop.f32.mrf.mxu1  ;;  %v8116_v21 = vld [vmem:[#allocation2 + $0x212] sm:$0xff]  ;;  %v1274_v46 = vadd.f32 %v13021_v27, %v13020_v59 }
 0x27c   :  { %v1894_v20 = vpop.f32.mrf.mxu0 }
 0x27d   :  { %v1892_v45 = vadd.f32 %v1891_v54, %v1683_v63  ;;  %1523 = vmatmul.f32.gmra.mxu2 %v8038_v6  ;;  %v8120_v6 = vpop.f32.mrf.mxu3 }
 0x27e   :  { %2159 = vmatmul.f32.gmra.mxu1 %v8116_v21 }
 0x27f   :  { %v8112_v58 = vadd.f32 %v8051_v8, %v1892_v45  ;;  %1941 = vmatmul.f32.gmra.mxu0 %v554_v35  ;;  %v941_v8 = vld [vmem:[%s12817_s1 + $0x328] sm:$0xff] }
 0x280   :  { %v1476_v42 = vpop.f32.mrf.mxu2  ;;  %2248 = vmatpush.msra.mxu2 %v941_v8  ;;  %v8153_v45 = vld [vmem:[#allocation2 + $0x22a] sm:$0xff] }
 0x281   :  { %v1477_v36 = vadd.f32 %v1476_v42, %v1268_v5  ;;  %1747 = vmatmul.f32.gmra.mxu3 %v495_v19  ;;  %v497_v42 = vld [vmem:[#allocation2 + $0x240] sm:$0xff] }
 0x283   :  { %v1686_v50 = vadd.f32 %v8057_v32, %v1477_v36  ;;  %v8131_v32 = vpop.f32.mrf.mxu1  ;;  %v13022_v36 = vld [vmem:[#allocation39_spill] sm:$0xff] }
 0x284   :  { %v1897_v0 = vpop.f32.mrf.mxu0 }
 0x285   :  { %v1895_v22 = vadd.f32 %v1894_v20, %v1686_v50  ;;  %1526 = vmatmul.f32.gmra.mxu2 %v8053_v39  ;;  %v8140_v52 = vpop.f32.mrf.mxu3  ;;  %v13023_v50 = vld [vmem:[#allocation29_spill] sm:$0xff] }
 0x286   :  { %2162 = vmatmul.f32.gmra.mxu1 %v8136_v1 }
 0x287   :  { %v8129_v55 = vadd.f32 %v8067_v41, %v1895_v22  ;;  %1944 = vmatmul.f32.gmra.mxu0 %v555_v48 }
 0x288   :  { %v1479_v39 = vpop.f32.mrf.mxu2 }
 0x289   :  { %v1480_v54 = vadd.f32 %v1479_v39, %v1271_v18  ;;  %1750 = vmatmul.f32.gmra.mxu3 %v496_v30  ;;  %v558_v18 = vld [vmem:[#allocation2 + $0x219] sm:$0xff] }
 0x28a   :  { %v13024_v39 = vld [vmem:[#allocation42_spill] sm:$0xff] }
 0x28b   :  { %v1689_v24 = vadd.f32 %v8076_v16, %v1480_v54  ;;  %v8148_v20 = vpop.f32.mrf.mxu1  ;;  %v973_v16 = vld [vmem:[%s12817_s1 + $0x428] sm:$0xff] }
 0x28c   :  { %v1900_v41 = vpop.f32.mrf.mxu0  ;;  %2666 = vmatpush.msra.mxu0 %v973_v16  ;;  %v13025_v54 = vld [vmem:[#allocation32_spill] sm:$0xff] }
 0x28d   :  { %v1898_v51 = vadd.f32 %v1897_v0, %v1689_v24  ;;  %1529 = vmatmul.f32.gmra.mxu2 %v8072_v2  ;;  %v8157_v43 = vpop.f32.mrf.mxu3  ;;  %v1277_v0 = vadd.f32 %v13023_v50, %v13022_v36  ;;  %v1280_v24 = vadd.f32 %v13025_v54, %v13024_v39  ;;  %v8214_v54 = vld [vmem:[#allocation2 + $0x25a] sm:$0xff] }
 0x28e   :  { %2165 = vmatmul.f32.gmra.mxu1 %v8153_v45 }
 0x28f   :  { %v8146_v63 = vadd.f32 %v8083_v25, %v1898_v51  ;;  %1947 = vmatmul.f32.gmra.mxu0 %v556_v62  ;;  %v8179_v51 = vld [vmem:[#allocation2 + $0x242] sm:$0xff] }
 0x290   :  { %v1482_v35 = vpop.f32.mrf.mxu2 }
 0x291   :  { %v1483_v2 = vadd.f32 %v1482_v35, %v1274_v46  ;;  %1753 = vmatmul.f32.gmra.mxu3 %v497_v42  ;;  %v559_v46 = vld [vmem:[#allocation2 + $0x229] sm:$0xff]  ;;  %v499_v35 = vld [vmem:[#allocation2 + $0x258] sm:$0xff] }
 0x293   :  { %v1692_v3 = vadd.f32 %v8092_v49, %v1483_v2  ;;  %v8165_v8 = vpop.f32.mrf.mxu1  ;;  %v8167_v49 = vld [vmem:[#allocation2 + $0x232] sm:$0xff] }
 0x294   :  { %v1903_v25 = vpop.f32.mrf.mxu0  ;;  %v13026_v2 = vld [vmem:[#allocation45_spill] sm:$0xff] }
 0x295   :  { %v1901_v5 = vadd.f32 %v1900_v41, %v1692_v3  ;;  %1532 = vmatmul.f32.gmra.mxu2 %v8088_v26  ;;  %v8171_v26 = vpop.f32.mrf.mxu3  ;;  %v13027_v3 = vld [vmem:[#allocation35_spill] sm:$0xff] }
 0x296   :  { %2168 = vmatmul.f32.gmra.mxu1 %v8167_v49 }
 0x297   :  { %v8163_v48 = vadd.f32 %v8100_v14, %v1901_v5  ;;  %1950 = vmatmul.f32.gmra.mxu0 %v557_v7  ;;  %v498_v14 = vld [vmem:[#allocation2 + $0x248] sm:$0xff] }
 0x298   :  { %v1485_v22 = vpop.f32.mrf.mxu2 }
 0x299   :  { %v1486_v19 = vadd.f32 %v1485_v22, %v1277_v0  ;;  %1756 = vmatmul.f32.gmra.mxu3 %v498_v14 }
 0x29b   :  { %v1695_v47 = vadd.f32 %v8106_v33, %v1486_v19  ;;  %v8181_v30 = vpop.f32.mrf.mxu1 }
 0x29c   :  { %v1906_v34 = vpop.f32.mrf.mxu0 }
 0x29d   :  { %v1904_v29 = vadd.f32 %v1903_v25, %v1695_v47  ;;  %1535 = vmatmul.f32.gmra.mxu2 %v8102_v11  ;;  %v8185_v11 = vpop.f32.mrf.mxu3  ;;  %v1283_v25 = vadd.f32 %v13027_v3, %v13026_v2  ;;  %v500_v47 = vld [vmem:[#allocation2 + $0x260] sm:$0xff] }
 0x29e   :  { %2171 = vmatmul.f32.gmra.mxu1 %v8179_v51 }
 0x29f   :  { %v8177_v41 = vadd.f32 %v8114_v61, %v1904_v29  ;;  %1953 = vmatmul.f32.gmra.mxu0 %v558_v18  ;;  %v940_v61 = vld [vmem:[%s12817_s1 + $0x320] sm:$0xff]  ;;  %v13029_v18 = vld [vmem:[#allocation38_spill] sm:$0xff] }
 0x2a0   :  { %v1488_v62 = vpop.f32.mrf.mxu2  ;;  %2249 = vmatpush.msra.mxu2 %v940_v61  ;;  %v13031_v61 = vld [vmem:[#allocation41_spill] sm:$0xff] }
 0x2a1   :  { %v1489_v33 = vadd.f32 %v1488_v62, %v1280_v24  ;;  %1759 = vmatmul.f32.gmra.mxu3 %v499_v35 }
 0x2a3   :  { %v1698_v59 = vadd.f32 %v8120_v6, %v1489_v33  ;;  %v956_v6 = vld [vmem:[%s12817_s1 + $0x3a0] sm:$0xff]  ;;  %v2127_v22 = vpop.f32.mrf.mxu1 }
 0x2a4   :  { %v1909_v27 = vpop.f32.mrf.mxu0  ;;  %2458 = vmatpush.msra.mxu3 %v956_v6 }
 0x2a5   :  { %v1907_v16 = vadd.f32 %v1906_v34, %v1698_v59  ;;  %1538 = vmatmul.f32.gmra.mxu2 %v8116_v21  ;;  %v8199_v21 = vld [vmem:[#allocation2 + $0x24a] sm:$0xff]  ;;  %v8203_v50 = vpop.f32.mrf.mxu3 }
 0x2a6   :  { %2174 = vmatmul.f32.gmra.mxu1 %v8199_v21  ;;  %v13028_v34 = vld [vmem:[#allocation48_spill] sm:$0xff] }
 0x2a7   :  { %v8194_v7 = vadd.f32 %v8131_v32, %v1907_v16  ;;  %1956 = vmatmul.f32.gmra.mxu0 %v559_v46  ;;  %v560_v32 = vld [vmem:[#allocation2 + $0x231] sm:$0xff]  ;;  %v1286_v29 = vadd.f32 %v13029_v18, %v13028_v34 }
 0x2a8   :  { %v1491_v5 = vpop.f32.mrf.mxu2  ;;  %v501_v46 = vld [vmem:[#allocation2 + $0x270] sm:$0xff]  ;;  %v13030_v16 = vld [vmem:[#allocation50_spill] sm:$0xff] }
 0x2a9   :  { %v1492_v42 = vadd.f32 %v1491_v5, %v1283_v25  ;;  %1762 = vmatmul.f32.gmra.mxu3 %v500_v47  ;;  %v1289_v35 = vadd.f32 %v13031_v61, %v13030_v16  ;;  %v8226_v25 = vld [vmem:[#allocation2 + $0x262] sm:$0xff] }
 0x2ab   :  { %v1701_v36 = vadd.f32 %v8140_v52, %v1492_v42  ;;  %v972_v52 = vld [vmem:[%s12817_s1 + $0x420] sm:$0xff]  ;;  %v562_v42 = vld [vmem:[#allocation2 + $0x249] sm:$0xff] }
 0x2ac   :  { %v1912_v0 = vpop.f32.mrf.mxu0  ;;  %2667 = vmatpush.msra.mxu0 %v972_v52 }
 0x2ad   :  { %v1910_v19 = vadd.f32 %v1909_v27, %v1701_v36  ;;  %1541 = vmatmul.f32.gmra.mxu2 %v8136_v1  ;;  %v8218_v62 = vpop.f32.mrf.mxu3  ;;  %v2130_v27 = vpop.f32.mrf.mxu1 }
 0x2ae   :  { %2177 = vmatmul.f32.gmra.mxu1 %v8214_v54 }
 0x2af   :  { %v8209_v14 = vadd.f32 %v8148_v20, %v1910_v19  ;;  %1959 = vmatmul.f32.gmra.mxu0 %v560_v32  ;;  %v561_v20 = vld [vmem:[#allocation2 + $0x241] sm:$0xff] }
 0x2b0   :  { %v1494_v39 = vpop.f32.mrf.mxu2  ;;  %v13033_v32 = vld [vmem:[#allocation44_spill] sm:$0xff] }
 0x2b1   :  { %v1495_v24 = vadd.f32 %v1494_v39, %v1286_v29  ;;  %1765 = vmatmul.f32.gmra.mxu3 %v501_v46  ;;  %v8238_v29 = vld [vmem:[#allocation2 + $0x272] sm:$0xff] }
 0x2b3   :  { %v1704_v1 = vadd.f32 %v8157_v43, %v1495_v24  ;;  %v563_v24 = vld [vmem:[#allocation2 + $0x259] sm:$0xff] }
 0x2b4   :  { %v1915_v33 = vpop.f32.mrf.mxu0 }
 0x2b5   :  { %v1913_v59 = vadd.f32 %v1912_v0, %v1704_v1  ;;  %1544 = vmatmul.f32.gmra.mxu2 %v8153_v45  ;;  %v8230_v5 = vpop.f32.mrf.mxu3  ;;  %v502_v0 = vld [vmem:[#allocation2 + $0x278] sm:$0xff]  ;;  %v2133_v18 = vpop.f32.mrf.mxu1 }
 0x2b6   :  { %2180 = vmatmul.f32.gmra.mxu1 %v8226_v25 }
 0x2b7   :  { %v8224_v2 = vadd.f32 %v8165_v8, %v1913_v59  ;;  %1962 = vmatmul.f32.gmra.mxu0 %v561_v20  ;;  %v13032_v8 = vld [vmem:[#allocation53_spill] sm:$0xff]  ;;  %v13034_v20 = vld [vmem:[#allocation56_spill] sm:$0xff]  ;;  %v13035_v59 = vld [vmem:[#allocation47_spill] sm:$0xff] }
 0x2b8   :  { %v1497_v3 = vpop.f32.mrf.mxu2  ;;  %v1292_v19 = vadd.f32 %v13033_v32, %v13032_v8  ;;  %v1295_v46 = vadd.f32 %v13035_v59, %v13034_v20  ;;  %v13037_v8 = vld [vmem:[#allocation51_spill] sm:$0xff]  ;;  %v13038_v20 = vld [vmem:[#allocation61_spill] sm:$0xff]  ;;  %v13039_v59 = vld [vmem:[#allocation54_spill] sm:$0xff] }
 0x2b9   :  { %v1498_v43 = vadd.f32 %v1497_v3, %v1289_v35  ;;  %1768 = vmatmul.f32.gmra.mxu3 %v502_v0  ;;  %v8255_v35 = vld [vmem:[#allocation2 + $0x27a] sm:$0xff] }
 0x2ba   :  { %v13036_v0 = vld [vmem:[#allocation59_spill] sm:$0xff] }
 0x2bb   :  { %v1707_v6 = vadd.f32 %v8171_v26, %v1498_v43  ;;  %v1298_v32 = vadd.f32 %v13037_v8, %v13036_v0  ;;  %v13040_v0 = vld [vmem:[#allocation63_spill] sm:$0xff]  ;;  %v13041_v8 = vld [vmem:[#allocation57_spill] sm:$0xff] }
 0x2bc   :  { %v1918_v45 = vpop.f32.mrf.mxu0 }
 0x2bd   :  { %v1916_v36 = vadd.f32 %v1915_v33, %v1707_v6  ;;  %1547 = vmatmul.f32.gmra.mxu2 %v8167_v49  ;;  %v8242_v39 = vpop.f32.mrf.mxu3  ;;  %v503_v33 = vld [vmem:[#allocation2 + $0x288] sm:$0xff]  ;;  %v2136_v3 = vpop.f32.mrf.mxu1 }
 0x2be   :  { %2183 = vmatmul.f32.gmra.mxu1 %v8238_v29 }
 0x2bf   :  { %v8236_v47 = vadd.f32 %v8181_v30, %v1916_v36  ;;  %1965 = vmatmul.f32.gmra.mxu0 %v562_v42  ;;  %v939_v30 = vld [vmem:[%s12817_s1 + $0x318] sm:$0xff]  ;;  %v504_v36 = vld [vmem:[#allocation2 + $0x290] sm:$0xff] }
 0x2c0   :  { %v1500_v34 = vpop.f32.mrf.mxu2  ;;  %2250 = vmatpush.msra.mxu2 %v939_v30 }
 0x2c1   :  { %v1501_v26 = vadd.f32 %v1500_v34, %v1292_v19  ;;  %1771 = vmatmul.f32.gmra.mxu3 %v503_v33  ;;  %v971_v34 = vld [vmem:[%s12817_s1 + $0x418] sm:$0xff]  ;;  %v505_v33 = vld [vmem:[#allocation2 + $0x2a0] sm:$0xff] }
 0x2c2   :  { %2668 = vmatpush.msra.mxu0 %v971_v34 }
 0x2c3   :  { %v1710_v52 = vadd.f32 %v8185_v11, %v1501_v26  ;;  %v955_v11 = vld [vmem:[%s12817_s1 + $0x398] sm:$0xff] }
 0x2c4   :  { %v1921_v49 = vpop.f32.mrf.mxu0  ;;  %2459 = vmatpush.msra.mxu3 %v955_v11 }
 0x2c5   :  { %v1919_v1 = vadd.f32 %v1918_v45, %v1710_v52  ;;  %1550 = vmatmul.f32.gmra.mxu2 %v8179_v51  ;;  %v8259_v6 = vpop.f32.mrf.mxu3  ;;  %v564_v45 = vld [vmem:[#allocation2 + $0x261] sm:$0xff] }
 0x2c6   :  { %2186 = vmatmul.f32.gmra.mxu1 %v8255_v35 }
 0x2c7   :  { %v8250_v16 = vadd.f32 %v2127_v22, %v1919_v1  ;;  %1968 = vmatmul.f32.gmra.mxu0 %v563_v24  ;;  %v2139_v1 = vpop.f32.mrf.mxu1 }
 0x2c8   :  { %v1503_v61 = vpop.f32.mrf.mxu2 }
 0x2c9   :  { %v1504_v51 = vadd.f32 %v1503_v61, %v1295_v46  ;;  %1774 = vmatmul.f32.gmra.mxu3 %v504_v36  ;;  %v1301_v46 = vadd.f32 %v13039_v59, %v13038_v20  ;;  %v13042_v20 = vld [vmem:[#allocation5_spill] sm:$0xff]  ;;  %v13043_v59 = vld [vmem:[#allocation3_spill] sm:$0xff] }
 0x2cb   :  { %v1713_v43 = vadd.f32 %v8203_v50, %v1504_v51  ;;  %v8269_v50 = vld [vmem:[#allocation2 + $0x28a] sm:$0xff]  ;;  %v8280_v51 = vld [vmem:[#allocation2 + $0x292] sm:$0xff] }
 0x2cc   :  { %v1924_v22 = vpop.f32.mrf.mxu0 }
 0x2cd   :  { %v1922_v42 = vadd.f32 %v1921_v49, %v1713_v43  ;;  %1553 = vmatmul.f32.gmra.mxu2 %v8199_v21  ;;  %v8273_v49 = vpop.f32.mrf.mxu3 }
 0x2ce   :  { %2189 = vmatmul.f32.gmra.mxu1 %v8269_v50 }
 0x2cf   :  { %v8264_v19 = vadd.f32 %v2130_v27, %v1922_v42  ;;  %1971 = vmatmul.f32.gmra.mxu0 %v564_v45  ;;  %v565_v27 = vld [vmem:[#allocation2 + $0x271] sm:$0xff]  ;;  %v2142_v36 = vpop.f32.mrf.mxu1 }
 0x2d0   :  { %v1506_v26 = vpop.f32.mrf.mxu2 }
 0x2d1   :  { %v1507_v52 = vadd.f32 %v1506_v26, %v1298_v32  ;;  %1777 = vmatmul.f32.gmra.mxu3 %v505_v33  ;;  %v1304_v32 = vadd.f32 %v13041_v8, %v13040_v0  ;;  %v507_v33 = vld [vmem:[#allocation2 + $0x2b8] sm:$0xff]  ;;  %v508_v8 = vld [vmem:[#allocation2 + $0x2c0] sm:$0xff] }
 0x2d3   :  { %v1716_v21 = vadd.f32 %v8218_v62, %v1507_v52  ;;  %v8291_v52 = vld [vmem:[#allocation2 + $0x2a2] sm:$0xff] }
 0x2d4   :  { %v1927_v24 = vpop.f32.mrf.mxu0 }
 0x2d5   :  { %v1925_v30 = vadd.f32 %v1924_v22, %v1716_v21  ;;  %1556 = vmatmul.f32.gmra.mxu2 %v8214_v54  ;;  %v8284_v45 = vpop.f32.mrf.mxu3  ;;  %v566_v54 = vld [vmem:[#allocation2 + $0x279] sm:$0xff] }
 0x2d6   :  { %2192 = vmatmul.f32.gmra.mxu1 %v8280_v51 }
 0x2d7   :  { %v8278_v11 = vadd.f32 %v2133_v18, %v1925_v30  ;;  %1974 = vmatmul.f32.gmra.mxu0 %v565_v27  ;;  %v506_v18 = vld [vmem:[#allocation2 + $0x2a8] sm:$0xff] }
 0x2d8   :  { %v1509_v61 = vpop.f32.mrf.mxu2  ;;  %v567_v27 = vld [vmem:[#allocation2 + $0x289] sm:$0xff] }
 0x2d9   :  { %v1510_v62 = vadd.f32 %v1509_v61, %v1301_v46  ;;  %1780 = vmatmul.f32.gmra.mxu3 %v506_v18  ;;  %v1307_v46 = vadd.f32 %v13043_v59, %v13042_v20  ;;  %v568_v18 = vld [vmem:[#allocation2 + $0x291] sm:$0xff]  ;;  %v569_v20 = vld [vmem:[#allocation2 + $0x2a1] sm:$0xff] }
 0x2db   :  { %v1719_v43 = vadd.f32 %v8230_v5, %v1510_v62 }
 0x2dc   :  { %v1930_v22 = vpop.f32.mrf.mxu0 }
 0x2dd   :  { %v1928_v42 = vadd.f32 %v1927_v24, %v1719_v43  ;;  %1559 = vmatmul.f32.gmra.mxu2 %v8226_v25  ;;  %v8295_v24 = vpop.f32.mrf.mxu3  ;;  %v2145_v43 = vpop.f32.mrf.mxu1 }
 0x2de   :  { %2195 = vmatmul.f32.gmra.mxu1 %v8291_v52 }
 0x2df   :  { %v8289_v34 = vadd.f32 %v2136_v3, %v1928_v42  ;;  %1977 = vmatmul.f32.gmra.mxu0 %v566_v54  ;;  %v938_v3 = vld [vmem:[%s12817_s1 + $0x310] sm:$0xff] }
 0x2e0   :  { %v1512_v26 = vpop.f32.mrf.mxu2  ;;  %2251 = vmatpush.msra.mxu2 %v938_v3 }
 0x2e1   :  { %v1513_v5 = vadd.f32 %v1512_v26, %v1304_v32  ;;  %1783 = vmatmul.f32.gmra.mxu3 %v507_v33  ;;  %v13044_v32 = vld [vmem:[#allocation6_spill] sm:$0xff]  ;;  %v13045_v26 = vld [vmem:[#allocation4_spill] sm:$0xff] }
 0x2e3   :  { %v1722_v21 = vadd.f32 %v8242_v39, %v1513_v5  ;;  %v954_v39 = vld [vmem:[%s12817_s1 + $0x390] sm:$0xff]  ;;  %v1310_v5 = vadd.f32 %v13045_v26, %v13044_v32 }
 0x2e4   :  { %v1933_v25 = vpop.f32.mrf.mxu0  ;;  %2460 = vmatpush.msra.mxu3 %v954_v39  ;;  %v570_v32 = vld [vmem:[#allocation2 + $0x2a9] sm:$0xff] }
 0x2e5   :  { %v1931_v30 = vadd.f32 %v1930_v22, %v1722_v21  ;;  %1562 = vmatmul.f32.gmra.mxu2 %v8238_v29  ;;  %v8308_v29 = vld [vmem:[#allocation2 + $0x2aa] sm:$0xff]  ;;  %v8312_v42 = vpop.f32.mrf.mxu3 }
 0x2e6   :  { %2198 = vmatmul.f32.gmra.mxu1 %v8308_v29 }
 0x2e7   :  { %v8303_v61 = vadd.f32 %v2139_v1, %v1931_v30  ;;  %1980 = vmatmul.f32.gmra.mxu0 %v567_v27  ;;  %v970_v27 = vld [vmem:[%s12817_s1 + $0x410] sm:$0xff] }
 0x2e8   :  { %v1515_v62 = vpop.f32.mrf.mxu2  ;;  %2669 = vmatpush.msra.mxu0 %v970_v27  ;;  %v8341_v27 = vld [vmem:[#allocation2 + $0x2d2] sm:$0xff] }
 0x2e9   :  { %v1516_v22 = vadd.f32 %v1515_v62, %v1307_v46  ;;  %1786 = vmatmul.f32.gmra.mxu3 %v508_v8  ;;  %v509_v46 = vld [vmem:[#allocation2 + $0x2d0] sm:$0xff] }
 0x2eb   :  { %v1725_v54 = vadd.f32 %v8259_v6, %v1516_v22  ;;  %v8322_v6 = vld [vmem:[#allocation2 + $0x2ba] sm:$0xff]  ;;  %v8331_v22 = vld [vmem:[#allocation2 + $0x2c2] sm:$0xff] }
 0x2ec   :  { %v1936_v1 = vpop.f32.mrf.mxu0 }
 0x2ed   :  { %v1934_v0 = vadd.f32 %v1933_v25, %v1725_v54  ;;  %1565 = vmatmul.f32.gmra.mxu2 %v8255_v35  ;;  %v2148_v25 = vpop.f32.mrf.mxu1  ;;  %v8326_v33 = vpop.f32.mrf.mxu3  ;;  %v13046_v54 = vld [vmem:[#allocation7_spill] sm:$0xff] }
 0x2ee   :  { %2201 = vmatmul.f32.gmra.mxu1 %v8322_v6 }
 0x2ef   :  { %v8317_v21 = vadd.f32 %v2142_v36, %v1934_v0  ;;  %1983 = vmatmul.f32.gmra.mxu0 %v568_v18 }
 0x2f0   :  { %v1518_v30 = vpop.f32.mrf.mxu2 }
 0x2f1   :  { %v1519_v3 = vadd.f32 %v1518_v30, %v1310_v5  ;;  %1789 = vmatmul.f32.gmra.mxu3 %v509_v46  ;;  %v13047_v30 = vld [vmem:[#allocation8_spill] sm:$0xff] }
 0x2f2   :  { %v511_v46 = vld [vmem:[#allocation2 + $0x2e8] sm:$0xff] }
 0x2f3   :  { %v1728_v35 = vadd.f32 %v8273_v49, %v1519_v3 }
 0x2f4   :  { %v1939_v36 = vpop.f32.mrf.mxu0 }
 0x2f5   :  { %v1937_v59 = vadd.f32 %v1936_v1, %v1728_v35  ;;  %1568 = vmatmul.f32.gmra.mxu2 %v8269_v50  ;;  %v8336_v0 = vpop.f32.mrf.mxu3  ;;  %v2151_v1 = vpop.f32.mrf.mxu1 }
 0x2f6   :  { %2204 = vmatmul.f32.gmra.mxu1 %v8331_v22 }
 0x2f7   :  { %v8329_v39 = vadd.f32 %v2145_v43, %v1937_v59  ;;  %1986 = vmatmul.f32.gmra.mxu0 %v569_v20  ;;  %v510_v43 = vld [vmem:[#allocation2 + $0x2d8] sm:$0xff] }
 0x2f8   :  { %v1521_v62 = vpop.f32.mrf.mxu2 }
 0x2f9   :  { %v1522_v18 = vadd.f32 %v1521_v62, %v13046_v54  ;;  %1792 = vmatmul.f32.gmra.mxu3 %v510_v43 }
 0x2fb   :  { %v1731_v49 = vadd.f32 %v8284_v45, %v1522_v18  ;;  %v8357_v18 = vld [vmem:[#allocation2 + $0x2da] sm:$0xff] }
 0x2fc   :  { %v1942_v8 = vpop.f32.mrf.mxu0 }
 0x2fd   :  { %v1940_v50 = vadd.f32 %v1939_v36, %v1731_v49  ;;  %1571 = vmatmul.f32.gmra.mxu2 %v8280_v51  ;;  %v8346_v35 = vpop.f32.mrf.mxu3  ;;  %v571_v36 = vld [vmem:[#allocation2 + $0x2b9] sm:$0xff]  ;;  %v937_v51 = vld [vmem:[%s12817_s1 + $0x308] sm:$0xff]  ;;  %v13048_v49 = vld [vmem:[#allocation9_spill] sm:$0xff] }
 0x2fe   :  { %2207 = vmatmul.f32.gmra.mxu1 %v8341_v27  ;;  %2252 = vmatpush.msra.mxu2 %v937_v51 }
 0x2ff   :  { %v8339_v26 = vadd.f32 %v2148_v25, %v1940_v50  ;;  %1989 = vmatmul.f32.gmra.mxu0 %v570_v32  ;;  %v2154_v25 = vpop.f32.mrf.mxu1  ;;  %v572_v50 = vld [vmem:[#allocation2 + $0x2c1] sm:$0xff] }
 0x300   :  { %v1524_v5 = vpop.f32.mrf.mxu2 }
 0x301   :  { %v1525_v3 = vadd.f32 %v1524_v5, %v13047_v30  ;;  %1795 = vmatmul.f32.gmra.mxu3 %v511_v46  ;;  %v512_v5 = vld [vmem:[#allocation2 + $0x2f0] sm:$0xff] }
 0x302   :  { %v573_v46 = vld [vmem:[#allocation2 + $0x2d1] sm:$0xff] }
 0x303   :  { %v1734_v45 = vadd.f32 %v8295_v24, %v1525_v3  ;;  %v953_v24 = vld [vmem:[%s12817_s1 + $0x388] sm:$0xff] }
 0x304   :  { %v1945_v20 = vpop.f32.mrf.mxu0  ;;  %2461 = vmatpush.msra.mxu3 %v953_v24  ;;  %v969_v3 = vld [vmem:[%s12817_s1 + $0x408] sm:$0xff] }
 0x305   :  { %v1943_v59 = vadd.f32 %v1942_v8, %v1734_v45  ;;  %1574 = vmatmul.f32.gmra.mxu2 %v8291_v52  ;;  %v8362_v32 = vpop.f32.mrf.mxu3  ;;  %2670 = vmatpush.msra.mxu0 %v969_v3 }
 0x306   :  { %2210 = vmatmul.f32.gmra.mxu1 %v8357_v18 }
 0x307   :  { %v8352_v62 = vadd.f32 %v2151_v1, %v1943_v59  ;;  %1992 = vmatmul.f32.gmra.mxu0 %v571_v36  ;;  %v2157_v36 = vpop.f32.mrf.mxu1  ;;  %v13049_v59 = vld [vmem:[#allocation10_spill] sm:$0xff] }
 0x308   :  { %v1527_v54 = vpop.f32.mrf.mxu2 }
 0x309   :  { %v1528_v52 = vadd.f32 %v1527_v54, %v13048_v49  ;;  %1798 = vmatmul.f32.gmra.mxu3 %v512_v5  ;;  %v513_v54 = vld [vmem:[#allocation2 + $0x300] sm:$0xff] }
 0x30b   :  { %v1737_v8 = vadd.f32 %v8312_v42, %v1528_v52  ;;  %v8370_v42 = vld [vmem:[#allocation2 + $0x2ea] sm:$0xff] }
 0x30c   :  { %v1948_v1 = vpop.f32.mrf.mxu0 }
 0x30d   :  { %v1946_v43 = vadd.f32 %v1945_v20, %v1737_v8  ;;  %1577 = vmatmul.f32.gmra.mxu2 %v8308_v29  ;;  %v8375_v20 = vpop.f32.mrf.mxu3  ;;  %v8380_v8 = vld [vmem:[#allocation2 + $0x2f2] sm:$0xff] }
 0x30e   :  { %2213 = vmatmul.f32.gmra.mxu1 %v8370_v42 }
 0x30f   :  { %v8365_v30 = vadd.f32 %v2154_v25, %v1946_v43  ;;  %1995 = vmatmul.f32.gmra.mxu0 %v572_v50  ;;  %v13051_v50 = vld [vmem:[#allocation11_spill] sm:$0xff]  ;;  %v2160_v5 = vpop.f32.mrf.mxu1 }
 0x310   :  { %v1530_v45 = vpop.f32.mrf.mxu2 }
 0x311   :  { %v1531_v51 = vadd.f32 %v1530_v45, %v13049_v59  ;;  %1801 = vmatmul.f32.gmra.mxu3 %v513_v54  ;;  %v574_v45 = vld [vmem:[#allocation2 + $0x2d9] sm:$0xff] }
 0x313   :  { %v1740_v29 = vadd.f32 %v8326_v33, %v1531_v51 }
 0x314   :  { %v1951_v25 = vpop.f32.mrf.mxu0 }
 0x315   :  { %v1949_v24 = vadd.f32 %v1948_v1, %v1740_v29  ;;  %1580 = vmatmul.f32.gmra.mxu2 %v8322_v6  ;;  %v8385_v3 = vpop.f32.mrf.mxu3  ;;  %v8390_v29 = vld [vmem:[#allocation2 + $0x302] sm:$0xff] }
 0x316   :  { %2216 = vmatmul.f32.gmra.mxu1 %v8380_v8 }
 0x317   :  { %v8378_v49 = vadd.f32 %v2157_v36, %v1949_v24  ;;  %1998 = vmatmul.f32.gmra.mxu0 %v573_v46  ;;  %v514_v36 = vld [vmem:[#allocation2 + $0x308] sm:$0xff] }
 0x318   :  { %v1533_v52 = vpop.f32.mrf.mxu2  ;;  %v13053_v46 = vld [vmem:[#allocation12_spill] sm:$0xff] }
 0x319   :  { %13050 = vst [vmem:[#allocation27_spill] sm:$0xff] %v8378_v49  ;;  %v1534_v43 = vadd.f32 %v1533_v52, %v13051_v50  ;;  %1804 = vmatmul.f32.gmra.mxu3 %v514_v36  ;;  %v2163_v52 = vpop.f32.mrf.mxu1  ;;  %v575_v50 = vld [vmem:[#allocation2 + $0x2e9] sm:$0xff] }
 0x31b   :  { %v1743_v33 = vadd.f32 %v8336_v0, %v1534_v43  ;;  %v936_v43 = vld [vmem:[%s12817_s1 + $0x300] sm:$0xff] }
 0x31c   :  { %v1954_v1 = vpop.f32.mrf.mxu0  ;;  %2253 = vmatpush.msra.mxu2 %v936_v43  ;;  %v13057_v43 = vld [vmem:[#allocation14_spill] sm:$0xff] }
 0x31d   :  { %v1952_v6 = vadd.f32 %v1951_v25, %v1743_v33  ;;  %1583 = vmatmul.f32.gmra.mxu2 %v8331_v22  ;;  %v8395_v54 = vpop.f32.mrf.mxu3 }
 0x31e   :  { %2219 = vmatmul.f32.gmra.mxu1 %v8390_v29 }
 0x31f   :  { %v8388_v59 = vadd.f32 %v2160_v5, %v1952_v6  ;;  %2001 = vmatmul.f32.gmra.mxu0 %v574_v45  ;;  %v515_v5 = vld [vmem:[#allocation2 + $0x318] sm:$0xff]  ;;  %v8406_v6 = vld [vmem:[#allocation2 + $0x30a] sm:$0xff] }
 0x320   :  { %v1536_v51 = vpop.f32.mrf.mxu2 }
 0x321   :  { %13052 = vst [vmem:[#allocation20_spill] sm:$0xff] %v8388_v59  ;;  %v1537_v24 = vadd.f32 %v1536_v51, %v13053_v46  ;;  %1807 = vmatmul.f32.gmra.mxu3 %v515_v5 }
 0x323   :  { %v1746_v0 = vadd.f32 %v8346_v35, %v1537_v24  ;;  %v952_v35 = vld [vmem:[%s12817_s1 + $0x380] sm:$0xff]  ;;  %v576_v24 = vld [vmem:[#allocation2 + $0x2f1] sm:$0xff] }
 0x324   :  { %v1957_v25 = vpop.f32.mrf.mxu0  ;;  %2462 = vmatpush.msra.mxu3 %v952_v35 }
 0x325   :  { %v1955_v22 = vadd.f32 %v1954_v1, %v1746_v0  ;;  %1586 = vmatmul.f32.gmra.mxu2 %v8341_v27  ;;  %v13055_v1 = vld [vmem:[#allocation13_spill] sm:$0xff]  ;;  %v1760_v51 = vpop.f32.mrf.mxu3 }
 0x326   :  { %2222 = vmatmul.f32.gmra.mxu1 %v8406_v6 }
 0x327   :  { %v8401_v33 = vadd.f32 %v2163_v52, %v1955_v22  ;;  %2004 = vmatmul.f32.gmra.mxu0 %v575_v50  ;;  %v516_v52 = vld [vmem:[#allocation2 + $0x320] sm:$0xff]  ;;  %v8417_v50 = vld [vmem:[%s12818_s0 + $0x1f0] sm:$0xff] }
 0x328   :  { %v1539_v45 = vpop.f32.mrf.mxu2  ;;  %v968_v22 = vld [vmem:[%s12817_s1 + $0x400] sm:$0xff]  ;;  %261 = vst [vmem:[#allocation2 + $0x331] sm:$0xff] %v8417_v50 }
 0x329   :  { %13054 = vst [vmem:[#allocation30_spill] sm:$0xff] %v8401_v33  ;;  %v1540_v36 = vadd.f32 %v1539_v45, %v13055_v1  ;;  %1810 = vmatmul.f32.gmra.mxu3 %v516_v52  ;;  %2671 = vmatpush.msra.mxu0 %v968_v22  ;;  %v577_v1 = vld [vmem:[#allocation2 + $0x301] sm:$0xff] }
 0x32a   :  { %v644_v22 = vld [vmem:[#allocation2 + $0x322] sm:$0xff] }
 0x32b   :  { %v1749_v27 = vadd.f32 %v8362_v32, %v1540_v36  ;;  %v13061_v33 = vld [vmem:[#allocation16_spill] sm:$0xff] }
 0x32c   :  { %v1960_v46 = vpop.f32.mrf.mxu0 }
 0x32d   :  { %v8411_v0 = vadd.f32 %v1957_v25, %v1749_v27  ;;  %1589 = vmatmul.f32.gmra.mxu2 %v8357_v18  ;;  %v643_v25 = vld [vmem:[#allocation2 + $0x31a] sm:$0xff]  ;;  %v1763_v35 = vpop.f32.mrf.mxu3 }
 0x32e   :  { %2225 = vmatmul.f32.gmra.mxu1 %v643_v25 }
 0x32f   :  { %13056 = vst [vmem:[#allocation22_spill] sm:$0xff] %v8411_v0  ;;  %2007 = vmatmul.f32.gmra.mxu0 %v576_v24  ;;  %v517_v27 = vld [vmem:[#allocation2 + $0x330] sm:$0xff]  ;;  %v197_v24 = vld [vmem:[%s12818_s0 + $0x1f8] sm:$0xff] }
 0x330   :  { %v1542_v32 = vpop.f32.mrf.mxu2  ;;  %262 = vst [vmem:[#allocation2 + $0x339] sm:$0xff] %v197_v24 }
 0x331   :  { %v1543_v5 = vadd.f32 %v1542_v32, %v13057_v43  ;;  %1813 = vmatmul.f32.gmra.mxu3 %v517_v27  ;;  %v13059_v32 = vld [vmem:[#allocation15_spill] sm:$0xff] }
 0x333   :  { %v1752_v18 = vadd.f32 %v8375_v20, %v1543_v5 }
 0x334   :  { %v1963_v45 = vpop.f32.mrf.mxu0 }
 0x335   :  { %v8425_v36 = vadd.f32 %v1960_v46, %v1752_v18  ;;  %1592 = vmatmul.f32.gmra.mxu2 %v8370_v42  ;;  %v1766_v5 = vpop.f32.mrf.mxu3  ;;  %v578_v18 = vld [vmem:[#allocation2 + $0x309] sm:$0xff] }
 0x336   :  { %2228 = vmatmul.f32.gmra.mxu1 %v644_v22 }
 0x337   :  { %13058 = vst [vmem:[#allocation33_spill] sm:$0xff] %v8425_v36  ;;  %2010 = vmatmul.f32.gmra.mxu0 %v577_v1  ;;  %v518_v42 = vld [vmem:[#allocation2 + $0x338] sm:$0xff] }
 0x338   :  { %v1545_v52 = vpop.f32.mrf.mxu2  ;;  %v645_v1 = vld [vmem:[#allocation2 + $0x332] sm:$0xff] }
 0x339   :  { %v1546_v43 = vadd.f32 %v1545_v52, %v13059_v32  ;;  %1816 = vmatmul.f32.gmra.mxu3 %v518_v42 }
 0x33b   :  { %v1755_v20 = vadd.f32 %v8385_v3, %v1546_v43  ;;  %v579_v3 = vld [vmem:[#allocation2 + $0x319] sm:$0xff] }
 0x33c   :  { %v1966_v46 = vpop.f32.mrf.mxu0 }
 0x33d   :  { %v8433_v36 = vadd.f32 %v1963_v45, %v1755_v20  ;;  %1595 = vmatmul.f32.gmra.mxu2 %v8380_v8  ;;  %v1769_v32 = vpop.f32.mrf.mxu3  ;;  %v712_v45 = vld [vmem:[#allocation2 + $0x31] sm:$0xff]  ;;  %v646_v20 = vld [vmem:[#allocation2 + $0x33a] sm:$0xff] }
 0x33e   :  { %2231 = vmatmul.f32.gmra.mxu1 %v645_v1  ;;  %v580_v1 = vld [vmem:[#allocation2 + $0x321] sm:$0xff] }
 0x33f   :  { %13060 = vst [vmem:[#allocation24_spill] sm:$0xff] %v8433_v36  ;;  %2013 = vmatmul.f32.gmra.mxu0 %v578_v18  ;;  %v13063_v18 = vld [vmem:[#allocation17_spill] sm:$0xff] }
 0x340   :  { %v1548_v0 = vpop.f32.mrf.mxu2 }
 0x341   :  { %v1549_v27 = vadd.f32 %v1548_v0, %v13061_v33  ;;  %2463 = vmatmul.f32.vlgmr.msra.gmra.mxu3 %v712_v45 }
 0x343   :  { %v1758_v52 = vadd.f32 %v8395_v54, %v1549_v27 }
 0x344   :  { %v1969_v59 = vpop.f32.mrf.mxu0 }
 0x345   :  { %v8438_v43 = vadd.f32 %v1966_v46, %v1758_v52  ;;  %1598 = vmatmul.f32.gmra.mxu2 %v8390_v29  ;;  %v1772_v33 = vpop.f32.mrf.mxu3  ;;  %v713_v46 = vld [vmem:[#allocation2 + $0x39] sm:$0xff] }
 0x346   :  { %2234 = vmatmul.f32.gmra.mxu1 %v646_v20  ;;  %v13064_v29 = vld [vmem:[#allocation18_spill] sm:$0xff] }
 0x347   :  { %13062 = vst [vmem:[#allocation36_spill] sm:$0xff] %v8438_v43  ;;  %2016 = vmatmul.f32.gmra.mxu0 %v579_v3 }
 0x348   :  { %v1551_v8 = vpop.f32.mrf.mxu2 }
 0x349   :  { %v1552_v42 = vadd.f32 %v1551_v8, %v13063_v18  ;;  %2466 = vmatmul.f32.gmra.mxu3 %v713_v46 }
 0x34b   :  { %v1761_v36 = vadd.f32 %v1760_v51, %v1552_v42  ;;  %v714_v51 = vld [vmem:[#allocation2 + $0x49] sm:$0xff] }
 0x34c   :  { %v1972_v0 = vpop.f32.mrf.mxu0 }
 0x34d   :  { %v8442_v54 = vadd.f32 %v1969_v59, %v1761_v36  ;;  %1601 = vmatmul.f32.gmra.mxu2 %v8406_v6  ;;  %v1775_v45 = vpop.f32.mrf.mxu3  ;;  %v13066_v59 = vld [vmem:[#allocation19_spill] sm:$0xff] }
 0x34f   :  { %2019 = vmatmul.f32.gmra.mxu0 %v580_v1  ;;  %v715_v1 = vld [vmem:[#allocation2 + $0x51] sm:$0xff] }
 0x350   :  { %v1554_v27 = vpop.f32.mrf.mxu2 }
 0x351   :  { %v1555_v52 = vadd.f32 %v1554_v27, %v13064_v29  ;;  %2469 = vmatmul.f32.gmra.mxu3 %v714_v51 }
 0x353   :  { %v1764_v3 = vadd.f32 %v1763_v35, %v1555_v52  ;;  %v776_v52 = vld [vmem:[#allocation2 + $0x32] sm:$0xff] }
 0x354   :  { %v1975_v43 = vpop.f32.mrf.mxu0 }
 0x355   :  { %v8446_v49 = vadd.f32 %v1972_v0, %v1764_v3  ;;  %1604 = vmatmul.f32.gmra.mxu2 %v643_v25  ;;  %v1778_v20 = vpop.f32.mrf.mxu3  ;;  %v13068_v0 = vld [vmem:[#allocation21_spill] sm:$0xff] }
 0x356   :  { %v648_v25 = vld [vmem:[#allocation2 + $0x30] sm:$0xff] }
 0x357   :  { %13065 = vst [vmem:[#allocation26_spill] sm:$0xff] %v8446_v49  ;;  %2022 = vmatmul.f32.gmra.mxu0 %v8417_v50  ;;  %v832_v49 = vld [vmem:[#allocation2 + $0x302] sm:$0xff] }
 0x358   :  { %v1557_v8 = vpop.f32.mrf.mxu2 }
 0x359   :  { %v1558_v36 = vadd.f32 %v1557_v8, %v13066_v59  ;;  %2472 = vmatmul.f32.gmra.mxu3 %v715_v1  ;;  %v649_v8 = vld [vmem:[#allocation2 + $0x38] sm:$0xff] }
 0x35b   :  { %v1767_v6 = vadd.f32 %v1766_v5, %v1558_v36  ;;  %v716_v5 = vld [vmem:[#allocation2 + $0x61] sm:$0xff] }
 0x35c   :  { %v1978_v18 = vpop.f32.mrf.mxu0 }
 0x35d   :  { %v8450_v42 = vadd.f32 %v1975_v43, %v1767_v6  ;;  %1607 = vmatmul.f32.gmra.mxu2 %v644_v22  ;;  %v1781_v29 = vpop.f32.mrf.mxu3  ;;  %v13070_v43 = vld [vmem:[#allocation23_spill] sm:$0xff] }
 0x35e   :  { %v777_v6 = vld [vmem:[#allocation2 + $0x3a] sm:$0xff] }
 0x35f   :  { %13067 = vst [vmem:[#allocation39_spill] sm:$0xff] %v8450_v42  ;;  %2025 = vmatmul.f32.gmra.mxu0 %v197_v24 }
 0x360   :  { %v1560_v35 = vpop.f32.mrf.mxu2 }
 0x361   :  { %v1561_v46 = vadd.f32 %v1560_v35, %v13068_v0  ;;  %2475 = vmatmul.f32.gmra.mxu3 %v716_v5  ;;  %v778_v5 = vld [vmem:[#allocation2 + $0x4a] sm:$0xff] }
 0x363   :  { %v1770_v27 = vadd.f32 %v1769_v32, %v1561_v46  ;;  %v717_v32 = vld [vmem:[#allocation2 + $0x69] sm:$0xff] }
 0x364   :  { %v1981_v50 = vpop.f32.mrf.mxu0  ;;  %v650_v46 = vld [vmem:[#allocation2 + $0x48] sm:$0xff] }
 0x365   :  { %v8453_v3 = vadd.f32 %v1978_v18, %v1770_v27  ;;  %2254 = vmatmul.f32.vlgmr.msra.gmra.mxu2 %v648_v25  ;;  %v1784_v59 = vpop.f32.mrf.mxu3  ;;  %v13072_v18 = vld [vmem:[#allocation25_spill] sm:$0xff] }
 0x367   :  { %13069 = vst [vmem:[#allocation29_spill] sm:$0xff] %v8453_v3  ;;  %2672 = vmatmul.f32.vlgmr.msra.gmra.mxu0 %v776_v52 }
 0x368   :  { %v1563_v51 = vpop.f32.mrf.mxu2 }
 0x369   :  { %v1564_v22 = vadd.f32 %v1563_v51, %v13070_v43  ;;  %2478 = vmatmul.f32.gmra.mxu3 %v717_v32 }
 0x36b   :  { %v1773_v24 = vadd.f32 %v1772_v33, %v1564_v22  ;;  %v718_v33 = vld [vmem:[#allocation2 + $0x79] sm:$0xff] }
 0x36c   :  { %v1984_v36 = vpop.f32.mrf.mxu0 }
 0x36d   :  { %v8456_v1 = vadd.f32 %v1981_v50, %v1773_v24  ;;  %2257 = vmatmul.f32.gmra.mxu2 %v649_v8  ;;  %v1787_v27 = vpop.f32.mrf.mxu3  ;;  %v13074_v50 = vld [vmem:[#allocation28_spill] sm:$0xff]  ;;  %v651_v8 = vld [vmem:[#allocation2 + $0x50] sm:$0xff] }
 0x36f   :  { %13071 = vst [vmem:[#allocation42_spill] sm:$0xff] %v8456_v1  ;;  %2675 = vmatmul.f32.gmra.mxu0 %v777_v6  ;;  %v779_v1 = vld [vmem:[#allocation2 + $0x52] sm:$0xff] }
 0x370   :  { %v1566_v35 = vpop.f32.mrf.mxu2 }
 0x371   :  { %v1567_v0 = vadd.f32 %v1566_v35, %v13072_v18  ;;  %2481 = vmatmul.f32.gmra.mxu3 %v718_v33 }
 0x373   :  { %v1776_v25 = vadd.f32 %v1775_v45, %v1567_v0  ;;  %v719_v45 = vld [vmem:[#allocation2 + $0x81] sm:$0xff] }
 0x374   :  { %v1987_v52 = vpop.f32.mrf.mxu0 }
 0x375   :  { %v8459_v51 = vadd.f32 %v1984_v36, %v1776_v25  ;;  %2260 = vmatmul.f32.gmra.mxu2 %v650_v46  ;;  %v1790_v6 = vpop.f32.mrf.mxu3  ;;  %v13076_v36 = vld [vmem:[#allocation31_spill] sm:$0xff] }
 0x376   :  { %v652_v46 = vld [vmem:[#allocation2 + $0x60] sm:$0xff] }
 0x377   :  { %13073 = vst [vmem:[#allocation32_spill] sm:$0xff] %v8459_v51  ;;  %2678 = vmatmul.f32.gmra.mxu0 %v778_v5  ;;  %v780_v51 = vld [vmem:[#allocation2 + $0x62] sm:$0xff] }
 0x378   :  { %v1569_v43 = vpop.f32.mrf.mxu2 }
 0x379   :  { %v1570_v22 = vadd.f32 %v1569_v43, %v13074_v50  ;;  %2484 = vmatmul.f32.gmra.mxu3 %v719_v45 }
 0x37b   :  { %v1779_v24 = vadd.f32 %v1778_v20, %v1570_v22  ;;  %v720_v20 = vld [vmem:[#allocation2 + $0x91] sm:$0xff] }
 0x37c   :  { %v1990_v32 = vpop.f32.mrf.mxu0 }
 0x37d   :  { %v8462_v35 = vadd.f32 %v1987_v52, %v1779_v24  ;;  %2263 = vmatmul.f32.gmra.mxu2 %v651_v8  ;;  %v1793_v5 = vpop.f32.mrf.mxu3  ;;  %v13078_v52 = vld [vmem:[#allocation34_spill] sm:$0xff]  ;;  %v653_v8 = vld [vmem:[#allocation2 + $0x68] sm:$0xff] }
 0x37f   :  { %13075 = vst [vmem:[#allocation45_spill] sm:$0xff] %v8462_v35  ;;  %2681 = vmatmul.f32.gmra.mxu0 %v779_v1  ;;  %v781_v35 = vld [vmem:[#allocation2 + $0x6a] sm:$0xff] }
 0x380   :  { %v1572_v18 = vpop.f32.mrf.mxu2 }
 0x381   :  { %v1573_v0 = vadd.f32 %v1572_v18, %v13076_v36  ;;  %2487 = vmatmul.f32.gmra.mxu3 %v720_v20 }
 0x383   :  { %v1782_v25 = vadd.f32 %v1781_v29, %v1573_v0  ;;  %v721_v29 = vld [vmem:[#allocation2 + $0x99] sm:$0xff] }
 0x384   :  { %v1993_v33 = vpop.f32.mrf.mxu0 }
 0x385   :  { %v8465_v43 = vadd.f32 %v1990_v32, %v1782_v25  ;;  %2266 = vmatmul.f32.gmra.mxu2 %v652_v46  ;;  %v1796_v24 = vpop.f32.mrf.mxu3  ;;  %v13080_v32 = vld [vmem:[#allocation37_spill] sm:$0xff]  ;;  %v654_v46 = vld [vmem:[#allocation2 + $0x78] sm:$0xff] }
 0x387   :  { %13077 = vst [vmem:[#allocation35_spill] sm:$0xff] %v8465_v43  ;;  %2684 = vmatmul.f32.gmra.mxu0 %v780_v51  ;;  %v782_v43 = vld [vmem:[#allocation2 + $0x7a] sm:$0xff] }
 0x388   :  { %v1575_v50 = vpop.f32.mrf.mxu2 }
 0x389   :  { %v1576_v22 = vadd.f32 %v1575_v50, %v13078_v52  ;;  %2490 = vmatmul.f32.gmra.mxu3 %v721_v29 }
 0x38b   :  { %v1785_v1 = vadd.f32 %v1784_v59, %v1576_v22  ;;  %v722_v59 = vld [vmem:[#allocation2 + $0xa9] sm:$0xff] }
 0x38c   :  { %v1996_v45 = vpop.f32.mrf.mxu0 }
 0x38d   :  { %v8468_v18 = vadd.f32 %v1993_v33, %v1785_v1  ;;  %2269 = vmatmul.f32.gmra.mxu2 %v653_v8  ;;  %v1799_v25 = vpop.f32.mrf.mxu3  ;;  %v13082_v33 = vld [vmem:[#allocation40_spill] sm:$0xff]  ;;  %v655_v8 = vld [vmem:[#allocation2 + $0x80] sm:$0xff] }
 0x38f   :  { %13079 = vst [vmem:[#allocation48_spill] sm:$0xff] %v8468_v18  ;;  %2687 = vmatmul.f32.gmra.mxu0 %v781_v35  ;;  %v783_v18 = vld [vmem:[#allocation2 + $0x82] sm:$0xff] }
 0x390   :  { %v1578_v36 = vpop.f32.mrf.mxu2 }
 0x391   :  { %v1579_v0 = vadd.f32 %v1578_v36, %v13080_v32  ;;  %2493 = vmatmul.f32.gmra.mxu3 %v722_v59 }
 0x393   :  { %v1788_v51 = vadd.f32 %v1787_v27, %v1579_v0  ;;  %v723_v27 = vld [vmem:[#allocation2 + $0xb1] sm:$0xff] }
 0x394   :  { %v1999_v20 = vpop.f32.mrf.mxu0 }
 0x395   :  { %v8471_v50 = vadd.f32 %v1996_v45, %v1788_v51  ;;  %2272 = vmatmul.f32.gmra.mxu2 %v654_v46  ;;  %v1802_v1 = vpop.f32.mrf.mxu3  ;;  %v13084_v45 = vld [vmem:[#allocation43_spill] sm:$0xff]  ;;  %v656_v46 = vld [vmem:[#allocation2 + $0x90] sm:$0xff] }
 0x397   :  { %13081 = vst [vmem:[#allocation38_spill] sm:$0xff] %v8471_v50  ;;  %2690 = vmatmul.f32.gmra.mxu0 %v782_v43  ;;  %v784_v50 = vld [vmem:[#allocation2 + $0x92] sm:$0xff] }
 0x398   :  { %v1581_v52 = vpop.f32.mrf.mxu2 }
 0x399   :  { %v1582_v22 = vadd.f32 %v1581_v52, %v13082_v33  ;;  %2496 = vmatmul.f32.gmra.mxu3 %v723_v27 }
 0x39b   :  { %v1791_v35 = vadd.f32 %v1790_v6, %v1582_v22  ;;  %v724_v6 = vld [vmem:[#allocation2 + $0xc1] sm:$0xff] }
 0x39c   :  { %v2002_v29 = vpop.f32.mrf.mxu0 }
 0x39d   :  { %v8474_v36 = vadd.f32 %v1999_v20, %v1791_v35  ;;  %2275 = vmatmul.f32.gmra.mxu2 %v655_v8  ;;  %v1805_v51 = vpop.f32.mrf.mxu3  ;;  %v13086_v20 = vld [vmem:[#allocation46_spill] sm:$0xff] }
 0x39e   :  { %v657_v8 = vld [vmem:[#allocation2 + $0x98] sm:$0xff] }
 0x39f   :  { %13083 = vst [vmem:[#allocation50_spill] sm:$0xff] %v8474_v36  ;;  %2693 = vmatmul.f32.gmra.mxu0 %v783_v18  ;;  %v785_v36 = vld [vmem:[#allocation2 + $0x9a] sm:$0xff] }
 0x3a0   :  { %v1584_v32 = vpop.f32.mrf.mxu2 }
 0x3a1   :  { %v1585_v0 = vadd.f32 %v1584_v32, %v13084_v45  ;;  %2499 = vmatmul.f32.gmra.mxu3 %v724_v6 }
 0x3a3   :  { %v1794_v43 = vadd.f32 %v1793_v5, %v1585_v0  ;;  %v725_v5 = vld [vmem:[#allocation2 + $0xc9] sm:$0xff] }
 0x3a4   :  { %v2005_v59 = vpop.f32.mrf.mxu0 }
 0x3a5   :  { %v8477_v52 = vadd.f32 %v2002_v29, %v1794_v43  ;;  %2278 = vmatmul.f32.gmra.mxu2 %v656_v46  ;;  %v1808_v35 = vpop.f32.mrf.mxu3  ;;  %v13088_v29 = vld [vmem:[#allocation49_spill] sm:$0xff]  ;;  %v658_v46 = vld [vmem:[#allocation2 + $0xa8] sm:$0xff] }
 0x3a7   :  { %13085 = vst [vmem:[#allocation41_spill] sm:$0xff] %v8477_v52  ;;  %2696 = vmatmul.f32.gmra.mxu0 %v784_v50  ;;  %v786_v52 = vld [vmem:[#allocation2 + $0xaa] sm:$0xff] }
 0x3a8   :  { %v1587_v33 = vpop.f32.mrf.mxu2 }
 0x3a9   :  { %v1588_v22 = vadd.f32 %v1587_v33, %v13086_v20  ;;  %2502 = vmatmul.f32.gmra.mxu3 %v725_v5 }
 0x3ab   :  { %v1797_v18 = vadd.f32 %v1796_v24, %v1588_v22  ;;  %v726_v24 = vld [vmem:[#allocation2 + $0xd9] sm:$0xff] }
 0x3ac   :  { %v2008_v27 = vpop.f32.mrf.mxu0 }
 0x3ad   :  { %v8480_v32 = vadd.f32 %v2005_v59, %v1797_v18  ;;  %2281 = vmatmul.f32.gmra.mxu2 %v657_v8  ;;  %v1811_v43 = vpop.f32.mrf.mxu3  ;;  %v13090_v59 = vld [vmem:[#allocation52_spill] sm:$0xff]  ;;  %v659_v8 = vld [vmem:[#allocation2 + $0xb0] sm:$0xff] }
 0x3af   :  { %13087 = vst [vmem:[#allocation53_spill] sm:$0xff] %v8480_v32  ;;  %2699 = vmatmul.f32.gmra.mxu0 %v785_v36  ;;  %v787_v32 = vld [vmem:[#allocation2 + $0xb2] sm:$0xff] }
 0x3b0   :  { %v1590_v45 = vpop.f32.mrf.mxu2 }
 0x3b1   :  { %v1591_v0 = vadd.f32 %v1590_v45, %v13088_v29  ;;  %2505 = vmatmul.f32.gmra.mxu3 %v726_v24 }
 0x3b3   :  { %v1800_v50 = vadd.f32 %v1799_v25, %v1591_v0  ;;  %v727_v25 = vld [vmem:[#allocation2 + $0xe1] sm:$0xff] }
 0x3b4   :  { %v2011_v6 = vpop.f32.mrf.mxu0 }
 0x3b5   :  { %v8483_v33 = vadd.f32 %v2008_v27, %v1800_v50  ;;  %2284 = vmatmul.f32.gmra.mxu2 %v658_v46  ;;  %v1814_v18 = vpop.f32.mrf.mxu3  ;;  %v13092_v27 = vld [vmem:[#allocation55_spill] sm:$0xff] }
 0x3b6   :  { %v660_v46 = vld [vmem:[#allocation2 + $0xc0] sm:$0xff] }
 0x3b7   :  { %13089 = vst [vmem:[#allocation44_spill] sm:$0xff] %v8483_v33  ;;  %2702 = vmatmul.f32.gmra.mxu0 %v786_v52  ;;  %v788_v33 = vld [vmem:[#allocation2 + $0xc2] sm:$0xff] }
 0x3b8   :  { %v1593_v20 = vpop.f32.mrf.mxu2 }
 0x3b9   :  { %v1594_v22 = vadd.f32 %v1593_v20, %v13090_v59  ;;  %2508 = vmatmul.f32.gmra.mxu3 %v727_v25 }
 0x3bb   :  { %v1803_v36 = vadd.f32 %v1802_v1, %v1594_v22  ;;  %v728_v1 = vld [vmem:[#allocation2 + $0xf1] sm:$0xff] }
 0x3bc   :  { %v2014_v5 = vpop.f32.mrf.mxu0 }
 0x3bd   :  { %v8486_v45 = vadd.f32 %v2011_v6, %v1803_v36  ;;  %2287 = vmatmul.f32.gmra.mxu2 %v659_v8  ;;  %v1817_v50 = vpop.f32.mrf.mxu3  ;;  %v13094_v6 = vld [vmem:[#allocation58_spill] sm:$0xff]  ;;  %v661_v8 = vld [vmem:[#allocation2 + $0xc8] sm:$0xff] }
 0x3bf   :  { %13091 = vst [vmem:[#allocation56_spill] sm:$0xff] %v8486_v45  ;;  %2705 = vmatmul.f32.gmra.mxu0 %v787_v32  ;;  %v789_v45 = vld [vmem:[#allocation2 + $0xca] sm:$0xff] }
 0x3c0   :  { %v1596_v29 = vpop.f32.mrf.mxu2 }
 0x3c1   :  { %v1597_v0 = vadd.f32 %v1596_v29, %v13092_v27  ;;  %2511 = vmatmul.f32.gmra.mxu3 %v728_v1 }
 0x3c3   :  { %v1806_v52 = vadd.f32 %v1805_v51, %v1597_v0  ;;  %v729_v51 = vld [vmem:[#allocation2 + $0xf9] sm:$0xff] }
 0x3c4   :  { %v2017_v24 = vpop.f32.mrf.mxu0 }
 0x3c5   :  { %v8489_v20 = vadd.f32 %v2014_v5, %v1806_v52  ;;  %2290 = vmatmul.f32.gmra.mxu2 %v660_v46  ;;  %v2464_v36 = vpop.f32.mrf.mxu3  ;;  %v13096_v5 = vld [vmem:[#allocation60_spill] sm:$0xff]  ;;  %v662_v46 = vld [vmem:[#allocation2 + $0xd8] sm:$0xff] }
 0x3c7   :  { %13093 = vst [vmem:[#allocation47_spill] sm:$0xff] %v8489_v20  ;;  %2708 = vmatmul.f32.gmra.mxu0 %v788_v33  ;;  %v790_v20 = vld [vmem:[#allocation2 + $0xda] sm:$0xff] }
 0x3c8   :  { %v1599_v59 = vpop.f32.mrf.mxu2 }
 0x3c9   :  { %v1600_v22 = vadd.f32 %v1599_v59, %v13094_v6  ;;  %2514 = vmatmul.f32.gmra.mxu3 %v729_v51 }
 0x3cb   :  { %v1809_v32 = vadd.f32 %v1808_v35, %v1600_v22  ;;  %v730_v35 = vld [vmem:[#allocation2 + $0x109] sm:$0xff] }
 0x3cc   :  { %v2020_v25 = vpop.f32.mrf.mxu0 }
 0x3cd   :  { %v8492_v29 = vadd.f32 %v2017_v24, %v1809_v32  ;;  %2293 = vmatmul.f32.gmra.mxu2 %v661_v8  ;;  %v2467_v52 = vpop.f32.mrf.mxu3  ;;  %v13098_v24 = vld [vmem:[#allocation62_spill] sm:$0xff]  ;;  %v663_v8 = vld [vmem:[#allocation2 + $0xe0] sm:$0xff] }
 0x3cf   :  { %13095 = vst [vmem:[#allocation59_spill] sm:$0xff] %v8492_v29  ;;  %2711 = vmatmul.f32.gmra.mxu0 %v789_v45  ;;  %v791_v29 = vld [vmem:[#allocation2 + $0xe2] sm:$0xff] }
 0x3d0   :  { %v1602_v27 = vpop.f32.mrf.mxu2 }
 0x3d1   :  { %v1603_v0 = vadd.f32 %v1602_v27, %v13096_v5  ;;  %2517 = vmatmul.f32.gmra.mxu3 %v730_v35 }
 0x3d3   :  { %v1812_v33 = vadd.f32 %v1811_v43, %v1603_v0  ;;  %v731_v43 = vld [vmem:[#allocation2 + $0x111] sm:$0xff] }
 0x3d4   :  { %v2023_v1 = vpop.f32.mrf.mxu0 }
 0x3d5   :  { %v8495_v59 = vadd.f32 %v2020_v25, %v1812_v33  ;;  %2296 = vmatmul.f32.gmra.mxu2 %v662_v46  ;;  %v2470_v32 = vpop.f32.mrf.mxu3  ;;  %v13100_v25 = vld [vmem:[#allocation64_spill] sm:$0xff]  ;;  %v664_v46 = vld [vmem:[#allocation2 + $0xf0] sm:$0xff] }
 0x3d7   :  { %13097 = vst [vmem:[#allocation51_spill] sm:$0xff] %v8495_v59  ;;  %2714 = vmatmul.f32.gmra.mxu0 %v790_v20  ;;  %v792_v59 = vld [vmem:[#allocation2 + $0xf2] sm:$0xff] }
 0x3d8   :  { %v1605_v6 = vpop.f32.mrf.mxu2 }
 0x3d9   :  { %v1606_v22 = vadd.f32 %v1605_v6, %v13098_v24  ;;  %2520 = vmatmul.f32.gmra.mxu3 %v731_v43  ;;  %v793_v43 = vld [vmem:[#allocation2 + $0xfa] sm:$0xff] }
 0x3db   :  { %v1815_v45 = vadd.f32 %v1814_v18, %v1606_v22  ;;  %v732_v18 = vld [vmem:[#allocation2 + $0x121] sm:$0xff]  ;;  %v665_v22 = vld [vmem:[#allocation2 + $0xf8] sm:$0xff] }
 0x3dc   :  { %v2026_v51 = vpop.f32.mrf.mxu0 }
 0x3dd   :  { %v8498_v27 = vadd.f32 %v2023_v1, %v1815_v45  ;;  %2299 = vmatmul.f32.gmra.mxu2 %v663_v8  ;;  %v2473_v33 = vpop.f32.mrf.mxu3 }
 0x3df   :  { %13099 = vst [vmem:[#allocation61_spill] sm:$0xff] %v8498_v27  ;;  %2717 = vmatmul.f32.gmra.mxu0 %v791_v29 }
 0x3e0   :  { %v1608_v5 = vpop.f32.mrf.mxu2 }
 0x3e1   :  { %v1609_v0 = vadd.f32 %v1608_v5, %v13100_v25  ;;  %2523 = vmatmul.f32.gmra.mxu3 %v732_v18  ;;  %v794_v18 = vld [vmem:[#allocation2 + $0x10a] sm:$0xff] }
 0x3e3   :  { %v1818_v20 = vadd.f32 %v1817_v50, %v1609_v0  ;;  %v733_v50 = vld [vmem:[#allocation2 + $0x129] sm:$0xff] }
 0x3e4   :  { %v2673_v35 = vpop.f32.mrf.mxu0  ;;  %v666_v0 = vld [vmem:[#allocation2 + $0x108] sm:$0xff] }
 0x3e5   :  { %v8501_v6 = vadd.f32 %v2026_v51, %v1818_v20  ;;  %2302 = vmatmul.f32.gmra.mxu2 %v664_v46  ;;  %v2476_v8 = vpop.f32.mrf.mxu3 }
 0x3e7   :  { %13101 = vst [vmem:[#allocation54_spill] sm:$0xff] %v8501_v6  ;;  %2720 = vmatmul.f32.gmra.mxu0 %v792_v59  ;;  %v809_v6 = vld [vmem:[#allocation2 + $0x1ea] sm:$0xff] }
 0x3e8   :  { %v2255_v24 = vpop.f32.mrf.mxu2 }
 0x3e9   :  { %v2256_v1 = vadd.f32 %v2255_v24, %v7814_v40  ;;  %2526 = vmatmul.f32.gmra.mxu3 %v733_v50  ;;  %v795_v50 = vld [vmem:[#allocation2 + $0x112] sm:$0xff] }
 0x3eb   :  { %v2465_v29 = vadd.f32 %v2464_v36, %v2256_v1  ;;  %v734_v36 = vld [vmem:[#allocation2 + $0x139] sm:$0xff]  ;;  %v667_v1 = vld [vmem:[#allocation2 + $0x110] sm:$0xff] }
 0x3ec   :  { %v2676_v45 = vpop.f32.mrf.mxu0 }
 0x3ed   :  { %v8504_v5 = vadd.f32 %v2673_v35, %v2465_v29  ;;  %2305 = vmatmul.f32.gmra.mxu2 %v665_v22  ;;  %v2479_v46 = vpop.f32.mrf.mxu3 }
 0x3ef   :  { %13102 = vst [vmem:[#allocation63_spill] sm:$0xff] %v8504_v5  ;;  %2723 = vmatmul.f32.gmra.mxu0 %v793_v43 }
 0x3f0   :  { %v2258_v25 = vpop.f32.mrf.mxu2 }
 0x3f1   :  { %v2259_v51 = vadd.f32 %v2258_v25, %v7829_v53  ;;  %2529 = vmatmul.f32.gmra.mxu3 %v734_v36  ;;  %v796_v36 = vld [vmem:[#allocation2 + $0x122] sm:$0xff] }
 0x3f3   :  { %v2468_v59 = vadd.f32 %v2467_v52, %v2259_v51  ;;  %v735_v52 = vld [vmem:[#allocation2 + $0x141] sm:$0xff] }
 0x3f4   :  { %v2679_v20 = vpop.f32.mrf.mxu0  ;;  %v668_v51 = vld [vmem:[#allocation2 + $0x120] sm:$0xff] }
 0x3f5   :  { %v8507_v40 = vadd.f32 %v2676_v45, %v2468_v59  ;;  %2308 = vmatmul.f32.gmra.mxu2 %v666_v0  ;;  %v2482_v29 = vpop.f32.mrf.mxu3 }
 0x3f7   :  { %13103 = vst [vmem:[#allocation57_spill] sm:$0xff] %v8507_v40  ;;  %2726 = vmatmul.f32.gmra.mxu0 %v794_v18 }
 0x3f8   :  { %v2261_v24 = vpop.f32.mrf.mxu2 }
 0x3f9   :  { %v2262_v35 = vadd.f32 %v2261_v24, %v7843_v9  ;;  %2532 = vmatmul.f32.gmra.mxu3 %v735_v52  ;;  %v797_v52 = vld [vmem:[#allocation2 + $0x12a] sm:$0xff] }
 0x3fb   :  { %v2471_v22 = vadd.f32 %v2470_v32, %v2262_v35  ;;  %v736_v32 = vld [vmem:[#allocation2 + $0x151] sm:$0xff]  ;;  %v669_v35 = vld [vmem:[#allocation2 + $0x128] sm:$0xff] }
 0x3fc   :  { %v2682_v43 = vpop.f32.mrf.mxu0 }
 0x3fd   :  { %v8510_v53 = vadd.f32 %v2679_v20, %v2471_v22  ;;  %2311 = vmatmul.f32.gmra.mxu2 %v667_v1  ;;  %v2485_v59 = vpop.f32.mrf.mxu3 }
 0x3ff   :  { %13104 = vst [vmem:[#allocation5_spill] sm:$0xff] %v8510_v53  ;;  %2729 = vmatmul.f32.gmra.mxu0 %v795_v50 }
 0x400   :  { %v2264_v25 = vpop.f32.mrf.mxu2 }
 0x401   :  { %v2265_v45 = vadd.f32 %v2264_v25, %v7860_v57  ;;  %2535 = vmatmul.f32.gmra.mxu3 %v736_v32  ;;  %v798_v32 = vld [vmem:[#allocation2 + $0x13a] sm:$0xff] }
 0x403   :  { %v2474_v0 = vadd.f32 %v2473_v33, %v2265_v45  ;;  %v737_v33 = vld [vmem:[#allocation2 + $0x159] sm:$0xff] }
 0x404   :  { %v2685_v18 = vpop.f32.mrf.mxu0  ;;  %v670_v45 = vld [vmem:[#allocation2 + $0x138] sm:$0xff] }
 0x405   :  { %v8513_v9 = vadd.f32 %v2682_v43, %v2474_v0  ;;  %2314 = vmatmul.f32.gmra.mxu2 %v668_v51  ;;  %v2488_v22 = vpop.f32.mrf.mxu3 }
 0x407   :  { %13105 = vst [vmem:[#allocation3_spill] sm:$0xff] %v8513_v9  ;;  %2732 = vmatmul.f32.gmra.mxu0 %v796_v36 }
 0x408   :  { %v2267_v24 = vpop.f32.mrf.mxu2 }
 0x409   :  { %v2268_v20 = vadd.f32 %v2267_v24, %v7877_v44  ;;  %2538 = vmatmul.f32.gmra.mxu3 %v737_v33  ;;  %v799_v33 = vld [vmem:[#allocation2 + $0x142] sm:$0xff] }
 0x40b   :  { %v2477_v1 = vadd.f32 %v2476_v8, %v2268_v20  ;;  %v738_v8 = vld [vmem:[#allocation2 + $0x169] sm:$0xff]  ;;  %v671_v20 = vld [vmem:[#allocation2 + $0x140] sm:$0xff] }
 0x40c   :  { %v2688_v50 = vpop.f32.mrf.mxu0 }
 0x40d   :  { %v8516_v57 = vadd.f32 %v2685_v18, %v2477_v1  ;;  %2317 = vmatmul.f32.gmra.mxu2 %v669_v35  ;;  %v2491_v0 = vpop.f32.mrf.mxu3 }
 0x40f   :  { %13106 = vst [vmem:[#allocation6_spill] sm:$0xff] %v8516_v57  ;;  %2735 = vmatmul.f32.gmra.mxu0 %v797_v52 }
 0x410   :  { %v2270_v25 = vpop.f32.mrf.mxu2 }
 0x411   :  { %v2271_v43 = vadd.f32 %v2270_v25, %v7894_v38  ;;  %2541 = vmatmul.f32.gmra.mxu3 %v738_v8  ;;  %v800_v8 = vld [vmem:[#allocation2 + $0x152] sm:$0xff] }
 0x413   :  { %v2480_v51 = vadd.f32 %v2479_v46, %v2271_v43  ;;  %v739_v46 = vld [vmem:[#allocation2 + $0x171] sm:$0xff] }
 0x414   :  { %v2691_v36 = vpop.f32.mrf.mxu0  ;;  %v672_v43 = vld [vmem:[#allocation2 + $0x150] sm:$0xff] }
 0x415   :  { %v8519_v44 = vadd.f32 %v2688_v50, %v2480_v51  ;;  %2320 = vmatmul.f32.gmra.mxu2 %v670_v45  ;;  %v2494_v1 = vpop.f32.mrf.mxu3 }
 0x417   :  { %13107 = vst [vmem:[#allocation4_spill] sm:$0xff] %v8519_v44  ;;  %2738 = vmatmul.f32.gmra.mxu0 %v798_v32 }
 0x418   :  { %v2273_v24 = vpop.f32.mrf.mxu2 }
 0x419   :  { %v2274_v18 = vadd.f32 %v2273_v24, %v7908_v10  ;;  %2544 = vmatmul.f32.gmra.mxu3 %v739_v46  ;;  %v801_v46 = vld [vmem:[#allocation2 + $0x15a] sm:$0xff] }
 0x41b   :  { %v2483_v35 = vadd.f32 %v2482_v29, %v2274_v18  ;;  %v740_v29 = vld [vmem:[#allocation2 + $0x181] sm:$0xff]  ;;  %v673_v18 = vld [vmem:[#allocation2 + $0x158] sm:$0xff] }
 0x41c   :  { %v2694_v52 = vpop.f32.mrf.mxu0 }
 0x41d   :  { %v8522_v38 = vadd.f32 %v2691_v36, %v2483_v35  ;;  %2323 = vmatmul.f32.gmra.mxu2 %v671_v20  ;;  %v2497_v51 = vpop.f32.mrf.mxu3 }
 0x41f   :  { %13108 = vst [vmem:[#allocation7_spill] sm:$0xff] %v8522_v38  ;;  %2741 = vmatmul.f32.gmra.mxu0 %v799_v33 }
 0x420   :  { %v2276_v25 = vpop.f32.mrf.mxu2 }
 0x421   :  { %v2277_v50 = vadd.f32 %v2276_v25, %v7926_v31  ;;  %2547 = vmatmul.f32.gmra.mxu3 %v740_v29  ;;  %v802_v29 = vld [vmem:[#allocation2 + $0x16a] sm:$0xff] }
 0x423   :  { %v2486_v45 = vadd.f32 %v2485_v59, %v2277_v50  ;;  %v741_v59 = vld [vmem:[#allocation2 + $0x189] sm:$0xff] }
 0x424   :  { %v2697_v32 = vpop.f32.mrf.mxu0  ;;  %v674_v50 = vld [vmem:[#allocation2 + $0x168] sm:$0xff] }
 0x425   :  { %v8525_v10 = vadd.f32 %v2694_v52, %v2486_v45  ;;  %2326 = vmatmul.f32.gmra.mxu2 %v672_v43  ;;  %v2500_v35 = vpop.f32.mrf.mxu3 }
 0x427   :  { %13109 = vst [vmem:[#allocation8_spill] sm:$0xff] %v8525_v10  ;;  %2744 = vmatmul.f32.gmra.mxu0 %v800_v8 }
 0x428   :  { %v2279_v24 = vpop.f32.mrf.mxu2 }
 0x429   :  { %v2280_v36 = vadd.f32 %v2279_v24, %v7949_v23  ;;  %2550 = vmatmul.f32.gmra.mxu3 %v741_v59  ;;  %v803_v59 = vld [vmem:[#allocation2 + $0x172] sm:$0xff] }
 0x42b   :  { %v2489_v20 = vadd.f32 %v2488_v22, %v2280_v36  ;;  %v742_v22 = vld [vmem:[#allocation2 + $0x199] sm:$0xff]  ;;  %v675_v36 = vld [vmem:[#allocation2 + $0x170] sm:$0xff] }
 0x42c   :  { %v2700_v33 = vpop.f32.mrf.mxu0 }
 0x42d   :  { %v8528_v31 = vadd.f32 %v2697_v32, %v2489_v20  ;;  %2329 = vmatmul.f32.gmra.mxu2 %v673_v18  ;;  %v2503_v45 = vpop.f32.mrf.mxu3 }
 0x42f   :  { %13110 = vst [vmem:[#allocation9_spill] sm:$0xff] %v8528_v31  ;;  %2747 = vmatmul.f32.gmra.mxu0 %v801_v46 }
 0x430   :  { %v2282_v25 = vpop.f32.mrf.mxu2 }
 0x431   :  { %v2283_v52 = vadd.f32 %v2282_v25, %v7973_v56  ;;  %2553 = vmatmul.f32.gmra.mxu3 %v742_v22  ;;  %v804_v22 = vld [vmem:[#allocation2 + $0x182] sm:$0xff] }
 0x433   :  { %v2492_v43 = vadd.f32 %v2491_v0, %v2283_v52  ;;  %v743_v0 = vld [vmem:[#allocation2 + $0x1a1] sm:$0xff] }
 0x434   :  { %v2703_v8 = vpop.f32.mrf.mxu0  ;;  %v676_v52 = vld [vmem:[#allocation2 + $0x180] sm:$0xff] }
 0x435   :  { %v8531_v23 = vadd.f32 %v2700_v33, %v2492_v43  ;;  %2332 = vmatmul.f32.gmra.mxu2 %v674_v50  ;;  %v2506_v20 = vpop.f32.mrf.mxu3 }
 0x437   :  { %2750 = vmatmul.f32.gmra.mxu0 %v802_v29 }
 0x438   :  { %v2285_v24 = vpop.f32.mrf.mxu2 }
 0x439   :  { %v2286_v32 = vadd.f32 %v2285_v24, %v7988_v13  ;;  %2556 = vmatmul.f32.gmra.mxu3 %v743_v0  ;;  %v805_v0 = vld [vmem:[#allocation2 + $0x18a] sm:$0xff] }
 0x43b   :  { %v2495_v18 = vadd.f32 %v2494_v1, %v2286_v32  ;;  %v744_v1 = vld [vmem:[#allocation2 + $0x1e1] sm:$0xff] }
 0x43c   :  { %v2706_v46 = vpop.f32.mrf.mxu0  ;;  %v677_v32 = vld [vmem:[#allocation2 + $0x188] sm:$0xff] }
 0x43d   :  { %v8534_v56 = vadd.f32 %v2703_v8, %v2495_v18  ;;  %2335 = vmatmul.f32.gmra.mxu2 %v675_v36  ;;  %v2509_v43 = vpop.f32.mrf.mxu3 }
 0x43f   :  { %13111 = vst [vmem:[#allocation10_spill] sm:$0xff] %v8534_v56  ;;  %2753 = vmatmul.f32.gmra.mxu0 %v803_v59 }
 0x440   :  { %v2288_v25 = vpop.f32.mrf.mxu2 }
 0x441   :  { %v2289_v33 = vadd.f32 %v2288_v25, %v8002_v15  ;;  %2559 = vmatmul.f32.gmra.mxu3 %v744_v1 }
 0x443   :  { %v2498_v50 = vadd.f32 %v2497_v51, %v2289_v33  ;;  %v745_v51 = vld [vmem:[#allocation2 + $0x1e9] sm:$0xff] }
 0x444   :  { %v2709_v29 = vpop.f32.mrf.mxu0 }
 0x445   :  { %v8537_v13 = vadd.f32 %v2706_v46, %v2498_v50  ;;  %2338 = vmatmul.f32.gmra.mxu2 %v676_v52  ;;  %v2512_v18 = vpop.f32.mrf.mxu3 }
 0x447   :  { %13112 = vst [vmem:[#allocation11_spill] sm:$0xff] %v8537_v13  ;;  %2756 = vmatmul.f32.gmra.mxu0 %v804_v22  ;;  %v806_v22 = vld [vmem:[#allocation2 + $0x19a] sm:$0xff] }
 0x448   :  { %v2291_v24 = vpop.f32.mrf.mxu2 }
 0x449   :  { %v2292_v8 = vadd.f32 %v2291_v24, %v8016_v60  ;;  %2562 = vmatmul.f32.gmra.mxu3 %v745_v51  ;;  %v8545_v60 = vld [vmem:[#allocation2 + $0x1b0] sm:$0xff] }
 0x44b   :  { %v2501_v36 = vadd.f32 %v2500_v35, %v2292_v8  ;;  %v746_v35 = vld [vmem:[#allocation2 + $0x1f9] sm:$0xff] }
 0x44c   :  { %v2712_v59 = vpop.f32.mrf.mxu0 }
 0x44d   :  { %v8540_v15 = vadd.f32 %v2709_v29, %v2501_v36  ;;  %2341 = vmatmul.f32.gmra.mxu2 %v677_v32  ;;  %v2515_v52 = vpop.f32.mrf.mxu3 }
 0x44f   :  { %13113 = vst [vmem:[#allocation12_spill] sm:$0xff] %v8540_v15  ;;  %2759 = vmatmul.f32.gmra.mxu0 %v805_v0 }
 0x450   :  { %v2294_v25 = vpop.f32.mrf.mxu2 }
 0x451   :  { %v2295_v46 = vadd.f32 %v2294_v25, %v8033_v12  ;;  %2565 = vmatmul.f32.gmra.mxu3 %v746_v35  ;;  %v807_v12 = vld [vmem:[#allocation2 + $0x1a2] sm:$0xff] }
 0x452   :  { %v680_v25 = vld [vmem:[#allocation2 + $0x1e0] sm:$0xff] }
 0x453   :  { %v2504_v33 = vadd.f32 %v2503_v45, %v2295_v46  ;;  %v808_v35 = vld [vmem:[#allocation2 + $0x1e2] sm:$0xff] }
 0x454   :  { %v2715_v50 = vpop.f32.mrf.mxu0 }
 0x455   :  { %v8543_v1 = vadd.f32 %v2712_v59, %v2504_v33  ;;  %2344 = vmatmul.f32.gmra.mxu2 %v8545_v60  ;;  %v2518_v32 = vpop.f32.mrf.mxu3  ;;  %v747_v59 = vld [vmem:[#allocation2 + $0x201] sm:$0xff] }
 0x457   :  { %13114 = vst [vmem:[#allocation13_spill] sm:$0xff] %v8543_v1  ;;  %2762 = vmatmul.f32.gmra.mxu0 %v806_v22 }
 0x458   :  { %v2297_v29 = vpop.f32.mrf.mxu2 }
 0x459   :  { %v2298_v24 = vadd.f32 %v2297_v29, %v8048_v4  ;;  %2568 = vmatmul.f32.gmra.mxu3 %v747_v59 }
 0x45b   :  { %v2507_v8 = vadd.f32 %v2506_v20, %v2298_v24  ;;  %v748_v20 = vld [vmem:[#allocation2 + $0x211] sm:$0xff]  ;;  %v681_v24 = vld [vmem:[#allocation2 + $0x1e8] sm:$0xff] }
 0x45c   :  { %v2718_v36 = vpop.f32.mrf.mxu0 }
 0x45d   :  { %v8549_v45 = vadd.f32 %v2715_v50, %v2507_v8  ;;  %2347 = vmatmul.f32.gmra.mxu2 %v8545_v60  ;;  %v2521_v33 = vpop.f32.mrf.mxu3 }
 0x45f   :  { %13115 = vst [vmem:[#allocation14_spill] sm:$0xff] %v8549_v45  ;;  %2765 = vmatmul.f32.gmra.mxu0 %v807_v12 }
 0x460   :  { %v2300_v0 = vpop.f32.mrf.mxu2 }
 0x461   :  { %v2301_v51 = vadd.f32 %v2300_v0, %v8065_v17  ;;  %2571 = vmatmul.f32.gmra.mxu3 %v748_v20  ;;  %v810_v20 = vld [vmem:[#allocation2 + $0x1fa] sm:$0xff] }
 0x463   :  { %v2510_v46 = vadd.f32 %v2509_v43, %v2301_v51  ;;  %v749_v43 = vld [vmem:[#allocation2 + $0x219] sm:$0xff] }
 0x464   :  { %v2721_v22 = vpop.f32.mrf.mxu0  ;;  %v682_v51 = vld [vmem:[#allocation2 + $0x1f8] sm:$0xff] }
 0x465   :  { %v8553_v4 = vadd.f32 %v2718_v36, %v2510_v46  ;;  %2350 = vmatmul.f32.gmra.mxu2 %v680_v25  ;;  %v2524_v12 = vpop.f32.mrf.mxu3 }
 0x467   :  { %13116 = vst [vmem:[#allocation15_spill] sm:$0xff] %v8553_v4  ;;  %2768 = vmatmul.f32.gmra.mxu0 %v808_v35 }
 0x468   :  { %v2303_v50 = vpop.f32.mrf.mxu2 }
 0x469   :  { %v2304_v29 = vadd.f32 %v2303_v50, %v8081_v37  ;;  %2574 = vmatmul.f32.gmra.mxu3 %v749_v43 }
 0x46b   :  { %v2513_v8 = vadd.f32 %v2512_v18, %v2304_v29  ;;  %v750_v18 = vld [vmem:[#allocation2 + $0x229] sm:$0xff]  ;;  %v683_v29 = vld [vmem:[#allocation2 + $0x200] sm:$0xff] }
 0x46c   :  { %v2724_v59 = vpop.f32.mrf.mxu0 }
 0x46d   :  { %v8556_v17 = vadd.f32 %v2721_v22, %v2513_v8  ;;  %2353 = vmatmul.f32.gmra.mxu2 %v681_v24  ;;  %v2527_v46 = vpop.f32.mrf.mxu3  ;;  %v811_v8 = vld [vmem:[#allocation2 + $0x202] sm:$0xff] }
 0x46f   :  { %13117 = vst [vmem:[#allocation16_spill] sm:$0xff] %v8556_v17  ;;  %2771 = vmatmul.f32.gmra.mxu0 %v809_v6 }
 0x470   :  { %v2306_v0 = vpop.f32.mrf.mxu2 }
 0x471   :  { %v2307_v36 = vadd.f32 %v2306_v0, %v8098_v28  ;;  %2577 = vmatmul.f32.gmra.mxu3 %v750_v18  ;;  %v4063_v28 = vld [vmem:[%s12821_s4 + $0x78] sm:$0xff] }
 0x472   :  { %4192 = vmatpush.msra.mxu1 %v4063_v28 }
 0x473   :  { %v2516_v25 = vadd.f32 %v2515_v52, %v2307_v36 }
 0x474   :  { %v2727_v35 = vpop.f32.mrf.mxu0 }
 0x475   :  { %v8559_v37 = vadd.f32 %v2724_v59, %v2516_v25  ;;  %2356 = vmatmul.f32.gmra.mxu2 %v682_v51  ;;  %v2530_v24 = vpop.f32.mrf.mxu3  ;;  %v751_v59 = vld [vmem:[#allocation2 + $0x231] sm:$0xff] }
 0x477   :  { %13118 = vst [vmem:[#allocation17_spill] sm:$0xff] %v8559_v37  ;;  %2774 = vmatmul.f32.gmra.mxu0 %v810_v20  ;;  %v812_v20 = vld [vmem:[#allocation2 + $0x212] sm:$0xff] }
 0x478   :  { %v2309_v50 = vpop.f32.mrf.mxu2 }
 0x479   :  { %v2310_v22 = vadd.f32 %v2309_v50, %v8112_v58  ;;  %2580 = vmatmul.f32.gmra.mxu3 %v751_v59  ;;  %v684_v58 = vld [vmem:[#allocation2 + $0x210] sm:$0xff]  ;;  %v752_v50 = vld [vmem:[#allocation2 + $0x241] sm:$0xff] }
 0x47a   :  { %v813_v59 = vld [vmem:[#allocation2 + $0x21a] sm:$0xff] }
 0x47b   :  { %v2519_v6 = vadd.f32 %v2518_v32, %v2310_v22 }
 0x47c   :  { %v2730_v52 = vpop.f32.mrf.mxu0 }
 0x47d   :  { %v8565_v43 = vadd.f32 %v2727_v35, %v2519_v6  ;;  %2359 = vmatmul.f32.gmra.mxu2 %v683_v29  ;;  %v2533_v32 = vpop.f32.mrf.mxu3  ;;  %v685_v29 = vld [vmem:[#allocation2 + $0x218] sm:$0xff] }
 0x47f   :  { %13119 = vst [vmem:[#allocation18_spill] sm:$0xff] %v8565_v43  ;;  %2777 = vmatmul.f32.gmra.mxu0 %v811_v8 }
 0x480   :  { %v2312_v0 = vpop.f32.mrf.mxu2 }
 0x481   :  { %v2313_v36 = vadd.f32 %v2312_v0, %v8129_v55  ;;  %2583 = vmatmul.f32.gmra.mxu3 %v752_v50  ;;  %v814_v50 = vld [vmem:[#allocation2 + $0x22a] sm:$0xff] }
 0x483   :  { %v2522_v51 = vadd.f32 %v2521_v33, %v2313_v36  ;;  %v753_v33 = vld [vmem:[#allocation2 + $0x249] sm:$0xff] }
 0x484   :  { %v2733_v25 = vpop.f32.mrf.mxu0  ;;  %v686_v36 = vld [vmem:[#allocation2 + $0x228] sm:$0xff] }
 0x485   :  { %v8568_v18 = vadd.f32 %v2730_v52, %v2522_v51  ;;  %2362 = vmatmul.f32.gmra.mxu2 %v684_v58  ;;  %v2536_v28 = vpop.f32.mrf.mxu3 }
 0x487   :  { %2780 = vmatmul.f32.gmra.mxu0 %v812_v20 }
 0x488   :  { %v2315_v22 = vpop.f32.mrf.mxu2 }
 0x489   :  { %v2316_v35 = vadd.f32 %v2315_v22, %v8146_v63  ;;  %2586 = vmatmul.f32.gmra.mxu3 %v753_v33 }
 0x48b   :  { %v2525_v6 = vadd.f32 %v2524_v12, %v2316_v35  ;;  %v754_v12 = vld [vmem:[#allocation2 + $0x259] sm:$0xff]  ;;  %v687_v35 = vld [vmem:[#allocation2 + $0x230] sm:$0xff] }
 0x48c   :  { %v2736_v8 = vpop.f32.mrf.mxu0 }
 0x48d   :  { %v8571_v55 = vadd.f32 %v2733_v25, %v2525_v6  ;;  %2365 = vmatmul.f32.gmra.mxu2 %v685_v29  ;;  %v2539_v51 = vpop.f32.mrf.mxu3 }
 0x48f   :  { %13120 = vst [vmem:[#allocation19_spill] sm:$0xff] %v8571_v55  ;;  %2783 = vmatmul.f32.gmra.mxu0 %v813_v59  ;;  %v815_v59 = vld [vmem:[#allocation2 + $0x232] sm:$0xff] }
 0x490   :  { %v2318_v0 = vpop.f32.mrf.mxu2 }
 0x491   :  { %v2319_v52 = vadd.f32 %v2318_v0, %v8163_v48  ;;  %2589 = vmatmul.f32.gmra.mxu3 %v754_v12  ;;  %v4062_v48 = vld [vmem:[%s12821_s4 + $0x70] sm:$0xff] }
 0x492   :  { %4193 = vmatpush.msra.mxu1 %v4062_v48 }
 0x493   :  { %v2528_v58 = vadd.f32 %v2527_v46, %v2319_v52 }
 0x494   :  { %v2739_v20 = vpop.f32.mrf.mxu0 }
 0x495   :  { %v8574_v63 = vadd.f32 %v2736_v8, %v2528_v58  ;;  %2368 = vmatmul.f32.gmra.mxu2 %v686_v36  ;;  %v2542_v6 = vpop.f32.mrf.mxu3  ;;  %v755_v8 = vld [vmem:[#allocation2 + $0x261] sm:$0xff] }
 0x497   :  { %13121 = vst [vmem:[#allocation21_spill] sm:$0xff] %v8574_v63  ;;  %2786 = vmatmul.f32.gmra.mxu0 %v814_v50  ;;  %v816_v50 = vld [vmem:[#allocation2 + $0x242] sm:$0xff] }
 0x498   :  { %v2321_v22 = vpop.f32.mrf.mxu2 }
 0x499   :  { %v2322_v25 = vadd.f32 %v2321_v22, %v8177_v41  ;;  %2592 = vmatmul.f32.gmra.mxu3 %v755_v8  ;;  %v688_v41 = vld [vmem:[#allocation2 + $0x240] sm:$0xff]  ;;  %v756_v22 = vld [vmem:[#allocation2 + $0x271] sm:$0xff] }
 0x49a   :  { %v817_v8 = vld [vmem:[#allocation2 + $0x24a] sm:$0xff] }
 0x49b   :  { %v2531_v29 = vadd.f32 %v2530_v24, %v2322_v25 }
 0x49c   :  { %v2742_v46 = vpop.f32.mrf.mxu0 }
 0x49d   :  { %v8580_v33 = vadd.f32 %v2739_v20, %v2531_v29  ;;  %2371 = vmatmul.f32.gmra.mxu2 %v687_v35  ;;  %v2545_v24 = vpop.f32.mrf.mxu3  ;;  %v689_v35 = vld [vmem:[#allocation2 + $0x248] sm:$0xff] }
 0x49f   :  { %13122 = vst [vmem:[#allocation23_spill] sm:$0xff] %v8580_v33  ;;  %2789 = vmatmul.f32.gmra.mxu0 %v815_v59 }
 0x4a0   :  { %v2324_v0 = vpop.f32.mrf.mxu2 }
 0x4a1   :  { %v2325_v52 = vadd.f32 %v2324_v0, %v8194_v7  ;;  %2595 = vmatmul.f32.gmra.mxu3 %v756_v22  ;;  %v818_v22 = vld [vmem:[#allocation2 + $0x25a] sm:$0xff] }
 0x4a3   :  { %v2534_v36 = vadd.f32 %v2533_v32, %v2325_v52  ;;  %v757_v32 = vld [vmem:[#allocation2 + $0x279] sm:$0xff] }
 0x4a4   :  { %v2745_v58 = vpop.f32.mrf.mxu0  ;;  %v690_v52 = vld [vmem:[#allocation2 + $0x258] sm:$0xff] }
 0x4a5   :  { %v8583_v12 = vadd.f32 %v2742_v46, %v2534_v36  ;;  %2374 = vmatmul.f32.gmra.mxu2 %v688_v41  ;;  %v2548_v48 = vpop.f32.mrf.mxu3 }
 0x4a7   :  { %13123 = vst [vmem:[#allocation25_spill] sm:$0xff] %v8583_v12  ;;  %2792 = vmatmul.f32.gmra.mxu0 %v816_v50 }
 0x4a8   :  { %v2327_v25 = vpop.f32.mrf.mxu2 }
 0x4a9   :  { %v2328_v20 = vadd.f32 %v2327_v25, %v8209_v14  ;;  %2598 = vmatmul.f32.gmra.mxu3 %v757_v32 }
 0x4ab   :  { %v2537_v29 = vadd.f32 %v2536_v28, %v2328_v20  ;;  %v758_v28 = vld [vmem:[#allocation2 + $0x289] sm:$0xff]  ;;  %v691_v20 = vld [vmem:[#allocation2 + $0x260] sm:$0xff] }
 0x4ac   :  { %v2748_v59 = vpop.f32.mrf.mxu0 }
 0x4ad   :  { %v8586_v7 = vadd.f32 %v2745_v58, %v2537_v29  ;;  %2377 = vmatmul.f32.gmra.mxu2 %v689_v35  ;;  %v2551_v36 = vpop.f32.mrf.mxu3 }
 0x4af   :  { %13124 = vst [vmem:[#allocation28_spill] sm:$0xff] %v8586_v7  ;;  %2795 = vmatmul.f32.gmra.mxu0 %v817_v8  ;;  %v819_v8 = vld [vmem:[#allocation2 + $0x262] sm:$0xff] }
 0x4b0   :  { %v2330_v0 = vpop.f32.mrf.mxu2 }
 0x4b1   :  { %v2331_v46 = vadd.f32 %v2330_v0, %v8224_v2  ;;  %2601 = vmatmul.f32.gmra.mxu3 %v758_v28  ;;  %v4061_v2 = vld [vmem:[%s12821_s4 + $0x68] sm:$0xff] }
 0x4b2   :  { %4194 = vmatpush.msra.mxu1 %v4061_v2 }
 0x4b3   :  { %v2540_v41 = vadd.f32 %v2539_v51, %v2331_v46 }
 0x4b4   :  { %v2751_v50 = vpop.f32.mrf.mxu0 }
 0x4b5   :  { %v8589_v14 = vadd.f32 %v2748_v59, %v2540_v41  ;;  %2380 = vmatmul.f32.gmra.mxu2 %v690_v52  ;;  %v2554_v29 = vpop.f32.mrf.mxu3  ;;  %v759_v59 = vld [vmem:[#allocation2 + $0x291] sm:$0xff] }
 0x4b7   :  { %13125 = vst [vmem:[#allocation31_spill] sm:$0xff] %v8589_v14  ;;  %2798 = vmatmul.f32.gmra.mxu0 %v818_v22  ;;  %v820_v22 = vld [vmem:[#allocation2 + $0x272] sm:$0xff] }
 0x4b8   :  { %v2333_v25 = vpop.f32.mrf.mxu2 }
 0x4b9   :  { %v2334_v58 = vadd.f32 %v2333_v25, %v8236_v47  ;;  %2604 = vmatmul.f32.gmra.mxu3 %v759_v59  ;;  %v692_v47 = vld [vmem:[#allocation2 + $0x270] sm:$0xff]  ;;  %v760_v25 = vld [vmem:[#allocation2 + $0x2a1] sm:$0xff] }
 0x4ba   :  { %v821_v59 = vld [vmem:[#allocation2 + $0x27a] sm:$0xff] }
 0x4bb   :  { %v2543_v35 = vadd.f32 %v2542_v6, %v2334_v58 }
 0x4bc   :  { %v2754_v51 = vpop.f32.mrf.mxu0 }
 0x4bd   :  { %v8595_v32 = vadd.f32 %v2751_v50, %v2543_v35  ;;  %2383 = vmatmul.f32.gmra.mxu2 %v691_v20  ;;  %v2557_v6 = vpop.f32.mrf.mxu3  ;;  %v693_v20 = vld [vmem:[#allocation2 + $0x278] sm:$0xff] }
 0x4bf   :  { %13126 = vst [vmem:[#allocation34_spill] sm:$0xff] %v8595_v32  ;;  %2801 = vmatmul.f32.gmra.mxu0 %v819_v8 }
 0x4c0   :  { %v2336_v0 = vpop.f32.mrf.mxu2 }
 0x4c1   :  { %v2337_v46 = vadd.f32 %v2336_v0, %v8250_v16  ;;  %2607 = vmatmul.f32.gmra.mxu3 %v760_v25  ;;  %v822_v25 = vld [vmem:[#allocation2 + $0x28a] sm:$0xff] }
 0x4c3   :  { %v2546_v52 = vadd.f32 %v2545_v24, %v2337_v46  ;;  %v761_v24 = vld [vmem:[#allocation2 + $0x2a9] sm:$0xff] }
 0x4c4   :  { %v2757_v41 = vpop.f32.mrf.mxu0  ;;  %v694_v46 = vld [vmem:[#allocation2 + $0x288] sm:$0xff] }
 0x4c5   :  { %v8598_v28 = vadd.f32 %v2754_v51, %v2546_v52  ;;  %2386 = vmatmul.f32.gmra.mxu2 %v692_v47  ;;  %v2560_v2 = vpop.f32.mrf.mxu3 }
 0x4c7   :  { %13127 = vst [vmem:[#allocation37_spill] sm:$0xff] %v8598_v28  ;;  %2804 = vmatmul.f32.gmra.mxu0 %v820_v22 }
 0x4c8   :  { %v2339_v58 = vpop.f32.mrf.mxu2 }
 0x4c9   :  { %v2340_v50 = vadd.f32 %v2339_v58, %v8264_v19  ;;  %2610 = vmatmul.f32.gmra.mxu3 %v761_v24 }
 0x4cb   :  { %v2549_v35 = vadd.f32 %v2548_v48, %v2340_v50  ;;  %v762_v48 = vld [vmem:[#allocation2 + $0x2b9] sm:$0xff]  ;;  %v695_v50 = vld [vmem:[#allocation2 + $0x290] sm:$0xff] }
 0x4cc   :  { %v2760_v8 = vpop.f32.mrf.mxu0 }
 0x4cd   :  { %v8601_v16 = vadd.f32 %v2757_v41, %v2549_v35  ;;  %2389 = vmatmul.f32.gmra.mxu2 %v693_v20  ;;  %v2563_v52 = vpop.f32.mrf.mxu3 }
 0x4cf   :  { %13128 = vst [vmem:[#allocation40_spill] sm:$0xff] %v8601_v16  ;;  %2807 = vmatmul.f32.gmra.mxu0 %v821_v59  ;;  %v823_v59 = vld [vmem:[#allocation2 + $0x292] sm:$0xff] }
 0x4d0   :  { %v2342_v0 = vpop.f32.mrf.mxu2 }
 0x4d1   :  { %v2343_v51 = vadd.f32 %v2342_v0, %v8278_v11  ;;  %2613 = vmatmul.f32.gmra.mxu3 %v762_v48  ;;  %v4060_v11 = vld [vmem:[%s12821_s4 + $0x60] sm:$0xff] }
 0x4d2   :  { %4195 = vmatpush.msra.mxu1 %v4060_v11 }
 0x4d3   :  { %v2552_v47 = vadd.f32 %v2551_v36, %v2343_v51 }
 0x4d4   :  { %v2763_v22 = vpop.f32.mrf.mxu0 }
 0x4d5   :  { %v8604_v19 = vadd.f32 %v2760_v8, %v2552_v47  ;;  %2392 = vmatmul.f32.gmra.mxu2 %v694_v46  ;;  %v2566_v35 = vpop.f32.mrf.mxu3  ;;  %v763_v8 = vld [vmem:[#allocation2 + $0x2c1] sm:$0xff] }
 0x4d7   :  { %2810 = vmatmul.f32.gmra.mxu0 %v822_v25  ;;  %v824_v25 = vld [vmem:[#allocation2 + $0x2a2] sm:$0xff] }
 0x4d8   :  { %v2345_v58 = vpop.f32.mrf.mxu2 }
 0x4d9   :  { %v2346_v41 = vadd.f32 %v2345_v58, %v8289_v34  ;;  %2616 = vmatmul.f32.gmra.mxu3 %v763_v8  ;;  %v696_v34 = vld [vmem:[#allocation2 + $0x2a0] sm:$0xff]  ;;  %v764_v58 = vld [vmem:[#allocation2 + $0x2d1] sm:$0xff] }
 0x4da   :  { %v825_v8 = vld [vmem:[#allocation2 + $0x2aa] sm:$0xff] }
 0x4db   :  { %v2555_v20 = vadd.f32 %v2554_v29, %v2346_v41 }
 0x4dc   :  { %v2766_v36 = vpop.f32.mrf.mxu0 }
 0x4dd   :  { %v8610_v24 = vadd.f32 %v2763_v22, %v2555_v20  ;;  %2395 = vmatmul.f32.gmra.mxu2 %v695_v50  ;;  %v2569_v29 = vpop.f32.mrf.mxu3  ;;  %v697_v50 = vld [vmem:[#allocation2 + $0x2a8] sm:$0xff] }
 0x4df   :  { %13129 = vst [vmem:[#allocation43_spill] sm:$0xff] %v8610_v24  ;;  %2813 = vmatmul.f32.gmra.mxu0 %v823_v59 }
 0x4e0   :  { %v2348_v0 = vpop.f32.mrf.mxu2 }
 0x4e1   :  { %v2349_v51 = vadd.f32 %v2348_v0, %v8303_v61  ;;  %2619 = vmatmul.f32.gmra.mxu3 %v764_v58  ;;  %v826_v58 = vld [vmem:[#allocation2 + $0x2ba] sm:$0xff] }
 0x4e3   :  { %v2558_v46 = vadd.f32 %v2557_v6, %v2349_v51  ;;  %v765_v6 = vld [vmem:[#allocation2 + $0x2d9] sm:$0xff] }
 0x4e4   :  { %v2769_v47 = vpop.f32.mrf.mxu0  ;;  %v698_v51 = vld [vmem:[#allocation2 + $0x2b8] sm:$0xff] }
 0x4e5   :  { %v8613_v48 = vadd.f32 %v2766_v36, %v2558_v46  ;;  %2398 = vmatmul.f32.gmra.mxu2 %v696_v34  ;;  %v2572_v11 = vpop.f32.mrf.mxu3 }
 0x4e7   :  { %13130 = vst [vmem:[#allocation46_spill] sm:$0xff] %v8613_v48  ;;  %2816 = vmatmul.f32.gmra.mxu0 %v824_v25 }
 0x4e8   :  { %v2351_v41 = vpop.f32.mrf.mxu2 }
 0x4e9   :  { %v2352_v22 = vadd.f32 %v2351_v41, %v8317_v21  ;;  %2622 = vmatmul.f32.gmra.mxu3 %v765_v6  ;;  %v766_v41 = vld [vmem:[#allocation2 + $0x2e9] sm:$0xff] }
 0x4ea   :  { %v827_v6 = vld [vmem:[#allocation2 + $0x2c2] sm:$0xff] }
 0x4eb   :  { %v2561_v20 = vadd.f32 %v2560_v2, %v2352_v22  ;;  %v8621_v2 = vpop.f32.mrf.mxu1 }
 0x4ec   :  { %v2772_v59 = vpop.f32.mrf.mxu0 }
 0x4ed   :  { %v8616_v61 = vadd.f32 %v2769_v47, %v2561_v20  ;;  %2401 = vmatmul.f32.gmra.mxu2 %v697_v50  ;;  %v2575_v46 = vpop.f32.mrf.mxu3  ;;  %v699_v50 = vld [vmem:[#allocation2 + $0x2c0] sm:$0xff] }
 0x4ef   :  { %13131 = vst [vmem:[#allocation49_spill] sm:$0xff] %v8616_v61  ;;  %2819 = vmatmul.f32.gmra.mxu0 %v825_v8 }
 0x4f0   :  { %v2354_v0 = vpop.f32.mrf.mxu2 }
 0x4f1   :  { %v2355_v36 = vadd.f32 %v2354_v0, %v8329_v39  ;;  %2625 = vmatmul.f32.gmra.mxu3 %v766_v41  ;;  %v4059_v39 = vld [vmem:[%s12821_s4 + $0x58] sm:$0xff] }
 0x4f2   :  { %4196 = vmatpush.msra.mxu1 %v4059_v39  ;;  %v767_v0 = vld [vmem:[#allocation2 + $0x2f1] sm:$0xff]  ;;  %v768_v39 = vld [vmem:[#allocation2 + $0x301] sm:$0xff] }
 0x4f3   :  { %v2564_v34 = vadd.f32 %v2563_v52, %v2355_v36  ;;  %v8629_v36 = vpop.f32.mrf.mxu1 }
 0x4f4   :  { %v2775_v25 = vpop.f32.mrf.mxu0 }
 0x4f5   :  { %v8619_v21 = vadd.f32 %v2772_v59, %v2564_v34  ;;  %2404 = vmatmul.f32.gmra.mxu2 %v698_v51  ;;  %v2578_v8 = vpop.f32.mrf.mxu3 }
 0x4f7   :  { %13132 = vst [vmem:[#allocation52_spill] sm:$0xff] %v8619_v21  ;;  %2822 = vmatmul.f32.gmra.mxu0 %v826_v58 }
 0x4f8   :  { %v2357_v47 = vpop.f32.mrf.mxu2 }
 0x4f9   :  { %v2358_v22 = vadd.f32 %v2357_v47, %v8339_v26  ;;  %2628 = vmatmul.f32.gmra.mxu3 %v767_v0  ;;  %v828_v47 = vld [vmem:[#allocation2 + $0x2d2] sm:$0xff] }
 0x4fb   :  { %v2567_v20 = vadd.f32 %v2566_v35, %v2358_v22  ;;  %v700_v35 = vld [vmem:[#allocation2 + $0x2d0] sm:$0xff] }
 0x4fc   :  { %v2778_v52 = vpop.f32.mrf.mxu0 }
 0x4fd   :  { %v8627_v59 = vadd.f32 %v2775_v25, %v2567_v20  ;;  %2407 = vmatmul.f32.gmra.mxu2 %v699_v50  ;;  %v2581_v58 = vpop.f32.mrf.mxu3  ;;  %v8635_v20 = vpop.f32.mrf.mxu1 }
 0x4ff   :  { %13133 = vst [vmem:[#allocation55_spill] sm:$0xff] %v8627_v59  ;;  %2825 = vmatmul.f32.gmra.mxu0 %v827_v6  ;;  %v701_v6 = vld [vmem:[#allocation2 + $0x2d8] sm:$0xff] }
 0x500   :  { %v2360_v51 = vpop.f32.mrf.mxu2 }
 0x501   :  { %v2361_v26 = vadd.f32 %v2360_v51, %v8352_v62  ;;  %2631 = vmatmul.f32.gmra.mxu3 %v768_v39 }
 0x503   :  { %v2570_v34 = vadd.f32 %v2569_v29, %v2361_v26  ;;  %v829_v29 = vld [vmem:[#allocation2 + $0x2da] sm:$0xff] }
 0x504   :  { %v2781_v41 = vpop.f32.mrf.mxu0 }
 0x505   :  { %v8632_v22 = vadd.f32 %v2778_v52, %v2570_v34  ;;  %2410 = vmatmul.f32.gmra.mxu2 %v700_v35  ;;  %v8637_v27 = vpop.f32.mrf.mxu3  ;;  %v769_v52 = vld [vmem:[#allocation2 + $0x309] sm:$0xff]  ;;  %v13135_v35 = vld [vmem:[#allocation27_spill] sm:$0xff] }
 0x507   :  { %2828 = vmatmul.f32.gmra.mxu0 %v828_v47  ;;  %v702_v47 = vld [vmem:[#allocation2 + $0x2e8] sm:$0xff] }
 0x508   :  { %v2363_v25 = vpop.f32.mrf.mxu2 }
 0x509   :  { %v2364_v50 = vadd.f32 %v2363_v25, %v8365_v30  ;;  %2634 = vmatmul.f32.gmra.mxu3 %v769_v52  ;;  %v8644_v25 = vpop.f32.mrf.mxu1  ;;  %v703_v52 = vld [vmem:[#allocation2 + $0x2f0] sm:$0xff] }
 0x50b   :  { %v2573_v0 = vadd.f32 %v2572_v11, %v2364_v50  ;;  %v830_v50 = vld [vmem:[#allocation2 + $0x2ea] sm:$0xff] }
 0x50c   :  { %v2784_v62 = vpop.f32.mrf.mxu0 }
 0x50d   :  { %v8639_v51 = vadd.f32 %v2781_v41, %v2573_v0  ;;  %2413 = vmatmul.f32.gmra.mxu2 %v701_v6  ;;  %v8642_v30 = vpop.f32.mrf.mxu3  ;;  %v770_v41 = vld [vmem:[#allocation2 + $0x319] sm:$0xff]  ;;  %v13138_v0 = vld [vmem:[#allocation20_spill] sm:$0xff] }
 0x50e   :  { %13136 = vst [vmem:[#allocation60_spill] sm:$0xff] %v8642_v30 }
 0x50f   :  { %13134 = vst [vmem:[#allocation58_spill] sm:$0xff] %v8639_v51  ;;  %2831 = vmatmul.f32.gmra.mxu0 %v829_v29 }
 0x510   :  { %v2366_v26 = vpop.f32.mrf.mxu2 }
 0x511   :  { %v2367_v34 = vadd.f32 %v2366_v26, %v13135_v35  ;;  %2637 = vmatmul.f32.gmra.mxu3 %v770_v41  ;;  %v13141_v41 = vld [vmem:[#allocation30_spill] sm:$0xff] }
 0x513   :  { %v2576_v39 = vadd.f32 %v2575_v46, %v2367_v34  ;;  %v4058_v46 = vld [vmem:[%s12821_s4 + $0x50] sm:$0xff] }
 0x514   :  { %v2787_v11 = vpop.f32.mrf.mxu0  ;;  %v831_v34 = vld [vmem:[#allocation2 + $0x2f2] sm:$0xff]  ;;  %4197 = vmatpush.msra.mxu1 %v4058_v46  ;;  %v705_v46 = vld [vmem:[#allocation2 + $0x308] sm:$0xff] }
 0x515   :  { %v8646_v3 = vadd.f32 %v2784_v62, %v2576_v39  ;;  %2416 = vmatmul.f32.gmra.mxu2 %v702_v47  ;;  %v8649_v26 = vpop.f32.mrf.mxu3  ;;  %v8656_v47 = vpop.f32.mrf.mxu1  ;;  %v771_v39 = vld [vmem:[#allocation2 + $0x321] sm:$0xff] }
 0x516   :  { %13139 = vst [vmem:[#allocation64_spill] sm:$0xff] %v8649_v26 }
 0x517   :  { %13137 = vst [vmem:[#allocation62_spill] sm:$0xff] %v8646_v3  ;;  %2834 = vmatmul.f32.gmra.mxu0 %v830_v50 }
 0x518   :  { %v2369_v6 = vpop.f32.mrf.mxu2 }
 0x519   :  { %v2370_v29 = vadd.f32 %v2369_v6, %v13138_v0  ;;  %2640 = vmatmul.f32.gmra.mxu3 %v771_v39  ;;  %v704_v6 = vld [vmem:[#allocation2 + $0x300] sm:$0xff] }
 0x51b   :  { %v2579_v42 = vadd.f32 %v2578_v8, %v2370_v29 }
 0x51c   :  { %v2790_v35 = vpop.f32.mrf.mxu0 }
 0x51d   :  { %v8654_v62 = vadd.f32 %v2787_v11, %v2579_v42  ;;  %2419 = vmatmul.f32.gmra.mxu2 %v703_v52  ;;  %v8659_v29 = vpop.f32.mrf.mxu3  ;;  %v772_v42 = vld [vmem:[#allocation2 + $0x331] sm:$0xff]  ;;  %v8665_v11 = vpop.f32.mrf.mxu1 }
 0x51e   :  { %13142 = vst [vmem:[#allocation20_spill] sm:$0xff] %v8659_v29 }
 0x51f   :  { %13140 = vst [vmem:[#allocation27_spill] sm:$0xff] %v8654_v62  ;;  %2837 = vmatmul.f32.gmra.mxu0 %v831_v34 }
 0x520   :  { %v2372_v50 = vpop.f32.mrf.mxu2 }
 0x521   :  { %v2373_v8 = vadd.f32 %v2372_v50, %v13141_v41  ;;  %2643 = vmatmul.f32.gmra.mxu3 %v772_v42  ;;  %v773_v50 = vld [vmem:[#allocation2 + $0x339] sm:$0xff]  ;;  %v774_v42 = vld [vmem:[#allocation2 + $0x349] sm:$0xff] }
 0x523   :  { %v2582_v0 = vadd.f32 %v2581_v58, %v2373_v8  ;;  %v833_v58 = vld [vmem:[#allocation2 + $0x30a] sm:$0xff] }
 0x524   :  { %v8661_v26 = vpop.f32.mrf.mxu0 }
 0x525   :  { %13143 = vst [vmem:[#allocation30_spill] sm:$0xff] %v8661_v26  ;;  %v8663_v30 = vadd.f32 %v2790_v35, %v2582_v0  ;;  %2422 = vmatmul.f32.gmra.mxu2 %v704_v6  ;;  %v8669_v34 = vpop.f32.mrf.mxu3  ;;  %v8675_v35 = vpop.f32.mrf.mxu1  ;;  %v834_v0 = vld [vmem:[#allocation2 + $0x31a] sm:$0xff] }
 0x526   :  { %13145 = vst [vmem:[#allocation66_spill] sm:$0xff] %v8669_v34 }
 0x527   :  { %13144 = vst [vmem:[#allocation65_spill] sm:$0xff] %v8663_v30  ;;  %2840 = vmatmul.f32.gmra.mxu0 %v832_v49  ;;  %v706_v49 = vld [vmem:[#allocation2 + $0x318] sm:$0xff] }
 0x528   :  { %v8667_v52 = vpop.f32.mrf.mxu2  ;;  %13147 = vst [vmem:[#allocation68_spill] sm:$0xff] %v8675_v35  ;;  %v836_v30 = vld [vmem:[#allocation2 + $0x332] sm:$0xff] }
 0x529   :  { %2646 = vmatmul.f32.gmra.mxu3 %v773_v50 }
 0x52c   :  { %v8671_v39 = vpop.f32.mrf.mxu0 }
 0x52d   :  { %13146 = vst [vmem:[#allocation67_spill] sm:$0xff] %v8671_v39  ;;  %2425 = vmatmul.f32.gmra.mxu2 %v705_v46  ;;  %v8677_v8 = vpop.f32.mrf.mxu3  ;;  %v707_v46 = vld [vmem:[#allocation2 + $0x320] sm:$0xff]  ;;  %v8688_v50 = vpop.f32.mrf.mxu1 }
 0x52e   :  { %13148 = vst [vmem:[#allocation69_spill] sm:$0xff] %v8677_v8  ;;  %v835_v8 = vld [vmem:[#allocation2 + $0x322] sm:$0xff] }
 0x52f   :  { %2843 = vmatmul.f32.gmra.mxu0 %v833_v58  ;;  %v4057_v58 = vld [vmem:[%s12821_s4 + $0x48] sm:$0xff]  ;;  %13151 = vst [vmem:[#allocation72_spill] sm:$0xff] %v8688_v50 }
 0x530   :  { %v8673_v41 = vpop.f32.mrf.mxu2  ;;  %4198 = vmatpush.msra.mxu1 %v4057_v58 }
 0x531   :  { %2649 = vmatmul.f32.gmra.mxu3 %v774_v42  ;;  %v708_v42 = vld [vmem:[#allocation2 + $0x330] sm:$0xff] }
 0x534   :  { %v8679_v6 = vpop.f32.mrf.mxu0 }
 0x535   :  { %13149 = vst [vmem:[#allocation70_spill] sm:$0xff] %v8679_v6  ;;  %2428 = vmatmul.f32.gmra.mxu2 %v706_v49  ;;  %v8683_v29 = vpop.f32.mrf.mxu3  ;;  %v775_v49 = vld [vmem:[#allocation2 + $0x351] sm:$0xff]  ;;  %v8698_v35 = vpop.f32.mrf.mxu1 }
 0x536   :  { %13150 = vst [vmem:[#allocation71_spill] sm:$0xff] %v8683_v29 }
 0x537   :  { %2846 = vmatmul.f32.gmra.mxu0 %v834_v0 }
 0x538   :  { %v8681_v34 = vpop.f32.mrf.mxu2 }
 0x539   :  { %2652 = vmatmul.f32.gmra.mxu3 %v775_v49 }
 0x53c   :  { %v8690_v39 = vpop.f32.mrf.mxu0 }
 0x53d   :  { %13152 = vst [vmem:[#allocation73_spill] sm:$0xff] %v8690_v39  ;;  %2431 = vmatmul.f32.gmra.mxu2 %v707_v46  ;;  %v8694_v6 = vpop.f32.mrf.mxu3  ;;  %v709_v39 = vld [vmem:[#allocation2 + $0x338] sm:$0xff]  ;;  %v8706_v49 = vpop.f32.mrf.mxu1 }
 0x53e   :  { %13153 = vst [vmem:[#allocation74_spill] sm:$0xff] %v8694_v6 }
 0x53f   :  { %2849 = vmatmul.f32.gmra.mxu0 %v835_v8  ;;  %v837_v8 = vld [vmem:[#allocation2 + $0x33a] sm:$0xff]  ;;  %13157 = vst [vmem:[#allocation78_spill] sm:$0xff] %v8706_v49  ;;  %v839_v49 = vld [vmem:[#allocation2 + $0x352] sm:$0xff] }
 0x540   :  { %v8692_v0 = vpop.f32.mrf.mxu2 }
 0x544   :  { %v8696_v29 = vpop.f32.mrf.mxu0 }
 0x545   :  { %13154 = vst [vmem:[#allocation75_spill] sm:$0xff] %v8696_v29  ;;  %2434 = vmatmul.f32.gmra.mxu2 %v708_v42  ;;  %v8702_v58 = vpop.f32.mrf.mxu3  ;;  %v838_v42 = vld [vmem:[#allocation2 + $0x34a] sm:$0xff] }
 0x546   :  { %13155 = vst [vmem:[#allocation76_spill] sm:$0xff] %v8702_v58  ;;  %v2865_v58 = vadd.f32 %v8507_v40, %v8504_v5 }
 0x547   :  { %2852 = vmatmul.f32.gmra.mxu0 %v836_v30 }
 0x548   :  { %v8700_v50 = vpop.f32.mrf.mxu2 }
 0x54c   :  { %v8704_v46 = vpop.f32.mrf.mxu0 }
 0x54d   :  { %13156 = vst [vmem:[#allocation77_spill] sm:$0xff] %v8704_v46  ;;  %2437 = vmatmul.f32.gmra.mxu2 %v709_v39  ;;  %v8712_v26 = vpop.f32.mrf.mxu3  ;;  %v8719_v46 = vpop.f32.mrf.mxu1  ;;  %v2866_v39 = vadd.f32 %v2865_v58, %v8510_v53 }
 0x54e   :  { %13159 = vst [vmem:[#allocation80_spill] sm:$0xff] %v8712_v26 }
 0x54f   :  { %2855 = vmatmul.f32.gmra.mxu0 %v837_v8  ;;  %13160 = vst [vmem:[#allocation81_spill] sm:$0xff] %v8719_v46  ;;  %v4056_v8 = vld [vmem:[%s12821_s4 + $0x40] sm:$0xff]  ;;  %v2867_v26 = vadd.f32 %v2866_v39, %v8513_v9 }
 0x550   :  { %v8708_v6 = vpop.f32.mrf.mxu2  ;;  %4199 = vmatpush.msra.mxu1 %v4056_v8 }
 0x551   :  { %v2868_v40 = vadd.f32 %v2867_v26, %v8516_v57 }
 0x553   :  { %v2869_v58 = vadd.f32 %v2868_v40, %v8519_v44 }
 0x554   :  { %v8710_v29 = vpop.f32.mrf.mxu0 }
 0x555   :  { %13158 = vst [vmem:[#allocation79_spill] sm:$0xff] %v8710_v29  ;;  %2440 = vmatmul.f32.gmra.mxu2 %v8545_v60  ;;  %v2870_v53 = vadd.f32 %v2869_v58, %v8522_v38  ;;  %v8736_v46 = vpop.f32.mrf.mxu1 }
 0x557   :  { %2858 = vmatmul.f32.gmra.mxu0 %v838_v42  ;;  %v8729_v42 = vpop.f32.mrf.mxu3  ;;  %v2871_v8 = vadd.f32 %v2870_v53, %v8525_v10 }
 0x558   :  { %v8715_v30 = vpop.f32.mrf.mxu2 }
 0x559   :  { %v2872_v39 = vadd.f32 %v2871_v8, %v8528_v31 }
 0x55b   :  { %v2873_v26 = vadd.f32 %v2872_v39, %v8531_v23 }
 0x55c   :  { %v8725_v29 = vpop.f32.mrf.mxu0 }
 0x55d   :  { %13161 = vst [vmem:[#allocation82_spill] sm:$0xff] %v8725_v29  ;;  %2443 = vmatmul.f32.gmra.mxu2 %v8545_v60  ;;  %v8751_v58 = vpop.f32.mrf.mxu1 }
 0x55f   :  { %2861 = vmatmul.f32.gmra.mxu0 %v839_v49  ;;  %v8744_v9 = vpop.f32.mrf.mxu3  ;;  %v2874_v49 = vadd.f32 %v2873_v26, %v8534_v56 }
 0x560   :  { %v8732_v5 = vpop.f32.mrf.mxu2 }
 0x561   :  { %v2875_v40 = vadd.f32 %v2874_v49, %v8537_v13 }
 0x563   :  { %v2876_v38 = vadd.f32 %v2875_v40, %v8540_v15 }
 0x564   :  { %v8738_v29 = vpop.f32.mrf.mxu0 }
 0x565   :  { %v2877_v53 = vadd.f32 %v2876_v38, %v8543_v1  ;;  %v8764_v56 = vpop.f32.mrf.mxu1  ;;  %v4055_v38 = vld [vmem:[%s12821_s4 + $0x38] sm:$0xff] }
 0x566   :  { %4200 = vmatpush.msra.mxu1 %v4055_v38 }
 0x567   :  { %v8757_v8 = vpop.f32.mrf.mxu3  ;;  %v2878_v31 = vadd.f32 %v2877_v53, %v8549_v45 }
 0x568   :  { %v8742_v60 = vpop.f32.mrf.mxu2 }
 0x569   :  { %v2879_v39 = vadd.f32 %v2878_v31, %v8553_v4 }
 0x56b   :  { %v2880_v26 = vadd.f32 %v2879_v39, %v8556_v17 }
 0x56c   :  { %v8748_v57 = vpop.f32.mrf.mxu0 }
 0x56d   :  { %v2881_v40 = vadd.f32 %v2880_v26, %v8559_v37  ;;  %v8782_v26 = vpop.f32.mrf.mxu1 }
 0x56f   :  { %v2882_v15 = vadd.f32 %v2881_v40, %v8565_v43  ;;  %v8775_v53 = vpop.f32.mrf.mxu3 }
 0x570   :  { %v8754_v44 = vpop.f32.mrf.mxu2 }
 0x571   :  { %v2883_v31 = vadd.f32 %v2882_v15, %v8568_v18 }
 0x573   :  { %v2884_v39 = vadd.f32 %v2883_v31, %v8571_v55 }
 0x574   :  { %v8760_v10 = vpop.f32.mrf.mxu0 }
 0x575   :  { %v2885_v4 = vadd.f32 %v2884_v39, %v8574_v63  ;;  %v8795_v55 = vpop.f32.mrf.mxu1 }
 0x577   :  { %v2886_v40 = vadd.f32 %v2885_v4, %v8580_v33  ;;  %v8788_v45 = vpop.f32.mrf.mxu3 }
 0x578   :  { %v8766_v49 = vpop.f32.mrf.mxu2 }
 0x579   :  { %v2887_v37 = vadd.f32 %v2886_v40, %v8583_v12 }
 0x57b   :  { %v2888_v38 = vadd.f32 %v2887_v37, %v8586_v7 }
 0x57c   :  { %v8773_v1 = vpop.f32.mrf.mxu0 }
 0x57d   :  { %v2889_v15 = vadd.f32 %v2888_v38, %v8589_v14 }
 0x57f   :  { %v2890_v31 = vadd.f32 %v2889_v15, %v8595_v32  ;;  %v8803_v40 = vpop.f32.mrf.mxu3  ;;  %v8810_v15 = vpop.f32.mrf.mxu1 }
 0x580   :  { %v8779_v17 = vpop.f32.mrf.mxu2 }
 0x581   :  { %v2891_v4 = vadd.f32 %v2890_v31, %v8598_v28  ;;  %v13162_v31 = vld [vmem:[#allocation22_spill] sm:$0xff] }
 0x583   :  { %v2892_v33 = vadd.f32 %v2891_v4, %v8601_v16  ;;  %v2167_v4 = vadd.f32 %v8621_v2, %v13162_v31 }
 0x584   :  { %v8785_v43 = vpop.f32.mrf.mxu0 }
 0x585   :  { %v2893_v37 = vadd.f32 %v2892_v33, %v8604_v19  ;;  %v13163_v33 = vld [vmem:[#allocation33_spill] sm:$0xff] }
 0x587   :  { %v2894_v7 = vadd.f32 %v2893_v37, %v8610_v24  ;;  %v8818_v28 = vpop.f32.mrf.mxu3  ;;  %v2170_v37 = vadd.f32 %v8629_v36, %v13163_v33  ;;  %v8838_v33 = vpop.f32.mrf.mxu1 }
 0x588   :  { %v8791_v13 = vpop.f32.mrf.mxu2 }
 0x589   :  { %v2895_v38 = vadd.f32 %v2894_v7, %v8613_v48  ;;  %v2376_v7 = vadd.f32 %v8667_v52, %v2167_v4  ;;  %v13164_v48 = vld [vmem:[#allocation24_spill] sm:$0xff]  ;;  %v2379_v31 = vadd.f32 %v8673_v41, %v2170_v37 }
 0x58a   :  { %v2173_v2 = vadd.f32 %v8635_v20, %v13164_v48  ;;  %v2179_v48 = vadd.f32 %v8656_v47, %v8442_v54  ;;  %v13166_v20 = vld [vmem:[#allocation60_spill] sm:$0xff] }
 0x58b   :  { %v2896_v32 = vadd.f32 %v2895_v38, %v8616_v61  ;;  %v4054_v38 = vld [vmem:[%s12821_s4 + $0x30] sm:$0xff]  ;;  %v2585_v52 = vadd.f32 %v8637_v27, %v2376_v7  ;;  %v2588_v41 = vadd.f32 %v13166_v20, %v2379_v31  ;;  %v13168_v7 = vld [vmem:[#allocation30_spill] sm:$0xff]  ;;  %v13172_v54 = vld [vmem:[#allocation68_spill] sm:$0xff] }
 0x58c   :  { %v8797_v39 = vpop.f32.mrf.mxu0  ;;  %4201 = vmatpush.msra.mxu1 %v4054_v38  ;;  %v2382_v4 = vadd.f32 %v8681_v34, %v2173_v2  ;;  %v13170_v38 = vld [vmem:[#allocation64_spill] sm:$0xff]  ;;  %v13174_v20 = vld [vmem:[#allocation67_spill] sm:$0xff] }
 0x58d   :  { %v2897_v16 = vadd.f32 %v2896_v32, %v8619_v21  ;;  %v13165_v21 = vld [vmem:[#allocation36_spill] sm:$0xff]  ;;  %v8851_v34 = vadd.f32 %v13168_v7, %v2585_v52  ;;  %v13177_v7 = vld [vmem:[#allocation29_spill] sm:$0xff] }
 0x58e   :  { %v2176_v36 = vadd.f32 %v8644_v25, %v13165_v21  ;;  %v13167_v21 = vld [vmem:[#allocation26_spill] sm:$0xff]  ;;  %v2591_v2 = vadd.f32 %v13170_v38, %v2382_v4  ;;  %v13178_v4 = vld [vmem:[#allocation72_spill] sm:$0xff] }
 0x58f   :  { %v2898_v24 = vadd.f32 %v2897_v16, %v8627_v59  ;;  %v2182_v25 = vadd.f32 %v8665_v11, %v13167_v21  ;;  %13169 = vst [vmem:[#allocation22_spill] sm:$0xff] %v8851_v34  ;;  %v8859_v31 = vpop.f32.mrf.mxu3  ;;  %v8863_v11 = vadd.f32 %v13174_v20, %v2588_v41  ;;  %v2188_v38 = vadd.f32 %v13178_v4, %v13177_v7  ;;  %v13184_v4 = vld [vmem:[#allocation32_spill] sm:$0xff] }
 0x590   :  { %v8801_v63 = vpop.f32.mrf.mxu2  ;;  %v2385_v37 = vadd.f32 %v8692_v0, %v2176_v36  ;;  %v13173_v0 = vld [vmem:[#allocation65_spill] sm:$0xff] }
 0x591   :  { %v2899_v32 = vadd.f32 %v2898_v24, %v8632_v22  ;;  %13175 = vst [vmem:[#allocation33_spill] sm:$0xff] %v8863_v11  ;;  %v2391_v52 = vadd.f32 %v8708_v6, %v2182_v25  ;;  %v13183_v25 = vld [vmem:[#allocation69_spill] sm:$0xff] }
 0x593   :  { %v2900_v16 = vadd.f32 %v2899_v32, %v8639_v51  ;;  %v2388_v32 = vadd.f32 %v8700_v50, %v2179_v48  ;;  %v13171_v51 = vld [vmem:[#allocation39_spill] sm:$0xff]  ;;  %v13179_v48 = vld [vmem:[#allocation70_spill] sm:$0xff]  ;;  %v2600_v7 = vadd.f32 %v13183_v25, %v2391_v52  ;;  %v13190_v52 = vld [vmem:[#allocation77_spill] sm:$0xff] }
 0x594   :  { %v8807_v12 = vpop.f32.mrf.mxu0  ;;  %v2185_v47 = vadd.f32 %v13172_v54, %v13171_v51  ;;  %v8871_v51 = vadd.f32 %v13179_v48, %v2591_v2  ;;  %v13180_v54 = vld [vmem:[#allocation66_spill] sm:$0xff] }
 0x595   :  { %v2901_v24 = vadd.f32 %v2900_v16, %v8646_v3  ;;  %v13185_v2 = vld [vmem:[#allocation78_spill] sm:$0xff] }
 0x596   :  { %v2394_v3 = vadd.f32 %v8715_v30, %v2185_v47  ;;  %v2194_v48 = vadd.f32 %v13185_v2, %v13184_v4  ;;  %v13186_v30 = vld [vmem:[#allocation75_spill] sm:$0xff]  ;;  %v13191_v25 = vld [vmem:[#allocation74_spill] sm:$0xff] }
 0x597   :  { %v2902_v27 = vadd.f32 %v2901_v24, %v8654_v62  ;;  %v13176_v24 = vld [vmem:[#allocation20_spill] sm:$0xff]  ;;  %v2597_v62 = vadd.f32 %v13180_v54, %v2388_v32 }
 0x598   :  { %v8813_v14 = vpop.f32.mrf.mxu2  ;;  %v2594_v21 = vadd.f32 %v13176_v24, %v2385_v37  ;;  %v13182_v24 = vld [vmem:[#allocation73_spill] sm:$0xff] }
 0x599   :  { %v2903_v36 = vadd.f32 %v2902_v27, %v13173_v0  ;;  %v13181_v27 = vld [vmem:[#allocation42_spill] sm:$0xff]  ;;  %v8887_v47 = vadd.f32 %v13186_v30, %v2597_v62  ;;  %v13192_v62 = vld [vmem:[#allocation35_spill] sm:$0xff] }
 0x59a   :  { %v2191_v41 = vadd.f32 %v8698_v35, %v13181_v27  ;;  %v8879_v6 = vadd.f32 %v13182_v24, %v2594_v21  ;;  %v13187_v35 = vld [vmem:[#allocation71_spill] sm:$0xff]  ;;  %v13188_v27 = vld [vmem:[#allocation45_spill] sm:$0xff]  ;;  %v2200_v2 = vadd.f32 %v8736_v46, %v13192_v62  ;;  %v13197_v46 = vld [vmem:[#allocation80_spill] sm:$0xff] }
 0x59b   :  { %v2904_v50 = vadd.f32 %v2903_v36, %v8851_v34  ;;  %v2397_v36 = vadd.f32 %v8732_v5, %v2188_v38  ;;  %v2220_v34 = vpop.f32.mrf.mxu1  ;;  %v2603_v54 = vadd.f32 %v13187_v35, %v2394_v3  ;;  %v13189_v21 = vld [vmem:[#allocation81_spill] sm:$0xff]  ;;  %v8897_v38 = vadd.f32 %v13190_v52, %v2600_v7  ;;  %v2638_v3 = vpop.f32.mrf.mxu3  ;;  %v13194_v35 = vld [vmem:[#allocation76_spill] sm:$0xff]  ;;  %v13198_v62 = vld [vmem:[#allocation38_spill] sm:$0xff] }
 0x59c   :  { %v8827_v61 = vpop.f32.mrf.mxu0  ;;  %v2197_v24 = vadd.f32 %v13189_v21, %v13188_v27  ;;  %v13195_v21 = vld [vmem:[#allocation48_spill] sm:$0xff] }
 0x59d   :  { %v2905_v37 = vadd.f32 %v2904_v50, %v8863_v11  ;;  %v2400_v50 = vadd.f32 %v8742_v60, %v2191_v41  ;;  %v2606_v4 = vadd.f32 %v13191_v25, %v2397_v36  ;;  %v13193_v41 = vld [vmem:[#allocation79_spill] sm:$0xff]  ;;  %v2203_v7 = vadd.f32 %v8751_v58, %v13195_v21  ;;  %v13201_v21 = vld [vmem:[#allocation53_spill] sm:$0xff] }
 0x59e   :  { %v8905_v30 = vadd.f32 %v13193_v41, %v2603_v54  ;;  %v2206_v54 = vadd.f32 %v8764_v56, %v13198_v62 }
 0x59f   :  { %v2906_v32 = vadd.f32 %v2905_v37, %v8871_v51  ;;  %v2403_v37 = vadd.f32 %v8754_v44, %v2194_v48  ;;  %v2609_v27 = vadd.f32 %v13194_v35, %v2400_v50  ;;  %v13196_v44 = vld [vmem:[#allocation82_spill] sm:$0xff] }
 0x5a0   :  { %v8840_v59 = vpop.f32.mrf.mxu2  ;;  %v8913_v48 = vadd.f32 %v13196_v44, %v2606_v4 }
 0x5a1   :  { %v2907_v5 = vadd.f32 %v2906_v32, %v8879_v6  ;;  %v2406_v32 = vadd.f32 %v8766_v49, %v2197_v24  ;;  %v2612_v25 = vadd.f32 %v13197_v46, %v2403_v37  ;;  %v8921_v49 = vadd.f32 %v8738_v29, %v2609_v27  ;;  %v13200_v29 = vld [vmem:[#allocation41_spill] sm:$0xff] }
 0x5a2   :  { %v2412_v24 = vadd.f32 %v8791_v13, %v2203_v7  ;;  %v2212_v27 = vadd.f32 %v8795_v55, %v13200_v29 }
 0x5a3   :  { %v2908_v60 = vadd.f32 %v2907_v5, %v8887_v47  ;;  %v2409_v5 = vadd.f32 %v8779_v17, %v2200_v2  ;;  %v2615_v58 = vadd.f32 %v8729_v42, %v2406_v32  ;;  %v2223_v41 = vpop.f32.mrf.mxu1  ;;  %v8929_v17 = vadd.f32 %v8748_v57, %v2612_v25 }
 0x5a4   :  { %v8857_v16 = vpop.f32.mrf.mxu0  ;;  %v2415_v2 = vadd.f32 %v8801_v63, %v2206_v54  ;;  %v2215_v57 = vadd.f32 %v8810_v15, %v13201_v21  ;;  %v2421_v44 = vadd.f32 %v8840_v59, %v2212_v27 }
 0x5a5   :  { %v2909_v36 = vadd.f32 %v2908_v60, %v8897_v38  ;;  %v13199_v60 = vld [vmem:[#allocation50_spill] sm:$0xff]  ;;  %v2618_v56 = vadd.f32 %v8744_v9, %v2409_v5  ;;  %v8937_v13 = vadd.f32 %v8760_v10, %v2615_v58  ;;  %v13202_v10 = vld [vmem:[#allocation44_spill] sm:$0xff] }
 0x5a6   :  { %v2209_v4 = vadd.f32 %v8782_v26, %v13199_v60  ;;  %v2621_v26 = vadd.f32 %v8757_v8, %v2412_v24  ;;  %v2624_v55 = vadd.f32 %v8775_v53, %v2415_v2  ;;  %v2218_v46 = vadd.f32 %v8838_v33, %v13202_v10  ;;  %v13203_v5 = vld [vmem:[#allocation56_spill] sm:$0xff] }
 0x5a7   :  { %v2910_v50 = vadd.f32 %v2909_v36, %v8905_v30  ;;  %v2641_v36 = vpop.f32.mrf.mxu3  ;;  %v8945_v63 = vadd.f32 %v8773_v1, %v2618_v56  ;;  %v4053_v1 = vld [vmem:[%s12821_s4 + $0x28] sm:$0xff]  ;;  %v2221_v62 = vadd.f32 %v2220_v34, %v13203_v5  ;;  %v2630_v54 = vadd.f32 %v8803_v40, %v2421_v44 }
 0x5a8   :  { %v2423_v20 = vpop.f32.mrf.mxu2  ;;  %v2418_v32 = vadd.f32 %v8813_v14, %v2209_v4  ;;  %v8953_v14 = vadd.f32 %v8785_v43, %v2621_v26  ;;  %4202 = vmatpush.msra.mxu1 %v4053_v1  ;;  %v8962_v33 = vadd.f32 %v8797_v39, %v2624_v55  ;;  %v13205_v26 = vld [vmem:[#allocation59_spill] sm:$0xff] }
 0x5a9   :  { %v2911_v37 = vadd.f32 %v2910_v50, %v8913_v48  ;;  %v2424_v25 = vadd.f32 %v2423_v20, %v2215_v57  ;;  %v13204_v50 = vld [vmem:[#allocation47_spill] sm:$0xff]  ;;  %v8973_v39 = vadd.f32 %v8827_v61, %v2630_v54  ;;  %v13207_v54 = vld [vmem:[#allocation61_spill] sm:$0xff] }
 0x5aa   :  { %v2627_v15 = vadd.f32 %v8788_v45, %v2418_v32  ;;  %v2224_v58 = vadd.f32 %v2223_v41, %v13204_v50 }
 0x5ab   :  { %v2912_v42 = vadd.f32 %v2911_v37, %v8921_v49  ;;  %v2226_v45 = vpop.f32.mrf.mxu1  ;;  %v2633_v34 = vadd.f32 %v8818_v28, %v2424_v25 }
 0x5ac   :  { %v8893_v11 = vpop.f32.mrf.mxu0  ;;  %v8968_v24 = vadd.f32 %v8807_v12, %v2627_v15  ;;  %v2227_v61 = vadd.f32 %v2226_v45, %v13205_v26 }
 0x5ad   :  { %v2913_v9 = vadd.f32 %v2912_v42, %v8929_v17  ;;  %v8978_v2 = vadd.f32 %v8857_v16, %v2633_v34 }
 0x5af   :  { %v2914_v8 = vadd.f32 %v2913_v9, %v8937_v13  ;;  %v2644_v56 = vpop.f32.mrf.mxu3 }
 0x5b0   :  { %v2426_v52 = vpop.f32.mrf.mxu2 }
 0x5b1   :  { %v2915_v59 = vadd.f32 %v2914_v8, %v8945_v63  ;;  %v2427_v43 = vadd.f32 %v2426_v52, %v2218_v46 }
 0x5b3   :  { %v2916_v20 = vadd.f32 %v2915_v59, %v8953_v14  ;;  %v2636_v40 = vadd.f32 %v8859_v31, %v2427_v43  ;;  %v2229_v21 = vpop.f32.mrf.mxu1 }
 0x5b4   :  { %v2847_v35 = vpop.f32.mrf.mxu0 }
 0x5b5   :  { %v2917_v37 = vadd.f32 %v2916_v20, %v8962_v33  ;;  %v8982_v27 = vadd.f32 %v8893_v11, %v2636_v40 }
 0x5b7   :  { %v2918_v41 = vadd.f32 %v2917_v37, %v8968_v24  ;;  %v2647_v44 = vpop.f32.mrf.mxu3 }
 0x5b8   :  { %v2429_v7 = vpop.f32.mrf.mxu2 }
 0x5b9   :  { %v2430_v60 = vadd.f32 %v2429_v7, %v2221_v62  ;;  %v2919_v28 = vadd.f32 %v2918_v41, %v8973_v39 }
 0x5bb   :  { %v2639_v12 = vadd.f32 %v2638_v3, %v2430_v60  ;;  %v2920_v32 = vadd.f32 %v2919_v28, %v8978_v2 }
 0x5bc   :  { %v2850_v53 = vpop.f32.mrf.mxu0 }
 0x5bd   :  { %v8986_v31 = vadd.f32 %v2847_v35, %v2639_v12  ;;  %v2921_v7 = vadd.f32 %v2920_v32, %v8982_v27  ;;  %v2232_v35 = vpop.f32.mrf.mxu1 }
 0x5be   :  { %v2233_v43 = vadd.f32 %v2232_v35, %v13207_v54 }
 0x5bf   :  { %v2922_v3 = vadd.f32 %v2921_v7, %v8986_v31  ;;  %v2650_v59 = vpop.f32.mrf.mxu3 }
 0x5c0   :  { %v2432_v4 = vpop.f32.mrf.mxu2 }
 0x5c1   :  { %v2433_v52 = vadd.f32 %v2432_v4, %v2224_v58  ;;  %v13208_v4 = vld [vmem:[#allocation54_spill] sm:$0xff] }
 0x5c3   :  { %v2642_v42 = vadd.f32 %v2641_v36, %v2433_v52  ;;  %v13206_v36 = vld [vmem:[#allocation51_spill] sm:$0xff] }
 0x5c4   :  { %v2853_v29 = vpop.f32.mrf.mxu0  ;;  %v2230_v8 = vadd.f32 %v2229_v21, %v13206_v36  ;;  %v13213_v36 = vld [vmem:[#allocation63_spill] sm:$0xff] }
 0x5c5   :  { %v2851_v16 = vadd.f32 %v2850_v53, %v2642_v42  ;;  %v2235_v34 = vpop.f32.mrf.mxu1 }
 0x5c6   :  { %v2236_v37 = vadd.f32 %v2235_v34, %v13208_v4  ;;  %v13219_v34 = vld [vmem:[#allocation7_spill] sm:$0xff] }
 0x5c7   :  { %v2923_v10 = vadd.f32 %v2922_v3, %v2851_v16 }
 0x5c8   :  { %v2435_v57 = vpop.f32.mrf.mxu2 }
 0x5c9   :  { %v2436_v9 = vadd.f32 %v2435_v57, %v2227_v61 }
 0x5cb   :  { %v2645_v55 = vadd.f32 %v2644_v56, %v2436_v9  ;;  %v2653_v56 = vpop.f32.mrf.mxu3 }
 0x5cc   :  { %v2856_v46 = vpop.f32.mrf.mxu0 }
 0x5cd   :  { %v2854_v11 = vadd.f32 %v2853_v29, %v2645_v55 }
 0x5cf   :  { %v2924_v15 = vadd.f32 %v2923_v10, %v2854_v11 }
 0x5d0   :  { %v2438_v25 = vpop.f32.mrf.mxu2 }
 0x5d1   :  { %v2439_v1 = vadd.f32 %v2438_v25, %v2230_v8 }
 0x5d3   :  { %v2648_v5 = vadd.f32 %v2647_v44, %v2439_v1 }
 0x5d4   :  { %v2859_v58 = vpop.f32.mrf.mxu0 }
 0x5d5   :  { %v2857_v62 = vadd.f32 %v2856_v46, %v2648_v5  ;;  %v13216_v5 = vld [vmem:[#allocation3_spill] sm:$0xff] }
 0x5d7   :  { %v2925_v53 = vadd.f32 %v2924_v15, %v2857_v62  ;;  %v13214_v15 = vld [vmem:[#allocation57_spill] sm:$0xff] }
 0x5d8   :  { %v2441_v50 = vpop.f32.mrf.mxu2 }
 0x5d9   :  { %v2442_v45 = vadd.f32 %v2441_v50, %v2233_v43  ;;  %v13218_v50 = vld [vmem:[#allocation4_spill] sm:$0xff] }
 0x5db   :  { %v2651_v20 = vadd.f32 %v2650_v59, %v2442_v45  ;;  %v13217_v59 = vld [vmem:[#allocation6_spill] sm:$0xff] }
 0x5dc   :  { %v2862_v12 = vpop.f32.mrf.mxu0 }
 0x5dd   :  { %v2860_v60 = vadd.f32 %v2859_v58, %v2651_v20 }
 0x5df   :  { %v2926_v40 = vadd.f32 %v2925_v53, %v2860_v60 }
 0x5e0   :  { %v2444_v52 = vpop.f32.mrf.mxu2 }
 0x5e1   :  { %v2445_v41 = vadd.f32 %v2444_v52, %v2236_v37 }
 0x5e3   :  { %v2654_v29 = vadd.f32 %v2653_v56, %v2445_v41 }
 0x5e5   :  { %v2863_v28 = vadd.f32 %v2862_v12, %v2654_v29  ;;  %v13221_v12 = vld [vmem:[#allocation9_spill] sm:$0xff] }
 0x5e7   :  { %v2927_v42 = vadd.f32 %v2926_v40, %v2863_v28  ;;  %v13220_v40 = vld [vmem:[#allocation8_spill] sm:$0xff] }
 0x5e9   :  { %v2928_v26 = vrot.slane %v2927_v42, 4 }
 0x5eb   :  { %v2929_v61 = vadd.f32 %v2928_v26, %v2927_v42 }
 0x5ed   :  { %v2930_v32 = vrot.slane %v2929_v61, 2 }
 0x5ef   :  { %v2931_v21 = vadd.f32 %v2930_v32, %v2929_v61 }
 0x5f1   :  { %v2932_v57 = vrot.slane %v2931_v21, 1 }
 0x5f3   :  { %v2933_v7 = vadd.f32 %v2932_v57, %v2931_v21  ;;  %v13222_v21 = vld [vmem:[#allocation10_spill] sm:$0xff] }
 0x5f5   :  { %v8993_v9 = vmul.f32 0.001953125, %v2933_v7 }
 0x5f7   :  { %v8996_v3 = vsub.f32 %v2851_v16, %v8993_v9  ;;  %v8999_v55 = vsub.f32 %v2854_v11, %v8993_v9  ;;  %v9002_v44 = vsub.f32 %v2857_v62, %v8993_v9  ;;  %v9005_v10 = vsub.f32 %v2860_v60, %v8993_v9  ;;  %v13215_v11 = vld [vmem:[#allocation5_spill] sm:$0xff] }
 0x5f8   :  { %v9008_v46 = vsub.f32 %v2863_v28, %v8993_v9  ;;  %v9012_v8 = vsub.f32 %v13213_v36, %v8993_v9  ;;  %v9016_v16 = vsub.f32 %v13214_v15, %v8993_v9  ;;  %v9020_v25 = vsub.f32 %v13215_v11, %v8993_v9  ;;  %v13223_v15 = vld [vmem:[#allocation11_spill] sm:$0xff] }
 0x5f9   :  { %13209 = vst [vmem:[#allocation24_spill] sm:$0xff] %v8996_v3  ;;  %v9028_v62 = vsub.f32 %v13216_v5, %v8993_v9  ;;  %v9032_v54 = vsub.f32 %v13217_v59, %v8993_v9  ;;  %v9038_v58 = vsub.f32 %v13218_v50, %v8993_v9  ;;  %v9044_v60 = vsub.f32 %v13219_v34, %v8993_v9  ;;  %v13229_v34 = vld [vmem:[#allocation14_spill] sm:$0xff] }
 0x5fa   :  { %13210 = vst [vmem:[#allocation36_spill] sm:$0xff] %v8999_v55  ;;  %v2999_v1 = vmul.f32 %v9012_v8, %v9012_v8  ;;  %v3000_v35 = vmul.f32 %v9016_v16, %v9016_v16  ;;  %v3001_v43 = vmul.f32 %v9020_v25, %v9020_v25  ;;  %v9050_v52 = vsub.f32 %v13220_v40, %v8993_v9 }
 0x5fb   :  { %13211 = vst [vmem:[#allocation60_spill] sm:$0xff] %v9002_v44  ;;  %v3002_v45 = vmul.f32 %v9028_v62, %v9028_v62  ;;  %v3003_v4 = vmul.f32 %v9032_v54, %v9032_v54  ;;  %v3004_v56 = vmul.f32 %v9038_v58, %v9038_v58  ;;  %v9056_v29 = vsub.f32 %v13221_v12, %v8993_v9 }
 0x5fc   :  { %13212 = vst [vmem:[#allocation26_spill] sm:$0xff] %v9005_v10  ;;  %v3063_v53 = vadd.f32 %v3000_v35, %v2999_v1  ;;  %v3005_v28 = vmul.f32 %v9044_v60, %v9044_v60  ;;  %v9062_v26 = vsub.f32 %v8531_v23, %v8993_v9  ;;  %v3006_v61 = vmul.f32 %v9050_v52, %v9050_v52  ;;  %v13225_v35 = vld [vmem:[#allocation12_spill] sm:$0xff] }
 0x5fd   :  { %v9068_v57 = vsub.f32 %v13222_v21, %v8993_v9  ;;  %v3007_v7 = vmul.f32 %v9056_v29, %v9056_v29  ;;  %v9074_v11 = vsub.f32 %v13223_v15, %v8993_v9  ;;  %v9080_v5 = vsub.f32 %v13225_v35, %v8993_v9 }
 0x5fe   :  { %v3064_v20 = vadd.f32 %v3063_v53, %v3001_v43  ;;  %v3008_v23 = vmul.f32 %v9062_v26, %v9062_v26  ;;  %v13227_v53 = vld [vmem:[#allocation13_spill] sm:$0xff] }
 0x5ff   :  { %13224 = vst [vmem:[#allocation30_spill] sm:$0xff] %v9074_v11  ;;  %v3009_v59 = vmul.f32 %v9068_v57, %v9068_v57  ;;  %v9086_v50 = vsub.f32 %v13227_v53, %v8993_v9  ;;  %v9122_v53 = vsub.f32 %v8568_v18, %v8993_v9 }
 0x600   :  { %v3065_v37 = vadd.f32 %v3064_v20, %v3002_v45  ;;  %13226 = vst [vmem:[#allocation64_spill] sm:$0xff] %v9080_v5  ;;  %v3010_v45 = vmul.f32 %v9074_v11, %v9074_v11 }
 0x601   :  { %13228 = vst [vmem:[#allocation39_spill] sm:$0xff] %v9086_v50  ;;  %v3012_v12 = vmul.f32 %v9086_v50, %v9086_v50  ;;  %v3018_v18 = vmul.f32 %v9122_v53, %v9122_v53 }
 0x602   :  { %v3066_v41 = vadd.f32 %v3065_v37, %v3003_v4  ;;  %v9092_v4 = vsub.f32 %v13229_v34, %v8993_v9  ;;  %v3011_v37 = vmul.f32 %v9080_v5, %v9080_v5  ;;  %13239 = vst [vmem:[#allocation72_spill] sm:$0xff] %v9122_v53  ;;  %v13240_v34 = vld [vmem:[#allocation19_spill] sm:$0xff] }
 0x604   :  { %v3067_v42 = vadd.f32 %v3066_v41, %v3004_v56  ;;  %13230 = vst [vmem:[#allocation68_spill] sm:$0xff] %v9092_v4  ;;  %v13231_v56 = vld [vmem:[#allocation15_spill] sm:$0xff] }
 0x605   :  { %v9098_v41 = vsub.f32 %v13231_v56, %v8993_v9 }
 0x606   :  { %v3068_v32 = vadd.f32 %v3067_v42, %v3005_v28  ;;  %v13233_v42 = vld [vmem:[#allocation16_spill] sm:$0xff] }
 0x607   :  { %13232 = vst [vmem:[#allocation65_spill] sm:$0xff] %v9098_v41  ;;  %v3014_v15 = vmul.f32 %v9098_v41, %v9098_v41 }
 0x608   :  { %v3069_v36 = vadd.f32 %v3068_v32, %v3006_v61  ;;  %v9104_v61 = vsub.f32 %v13233_v42, %v8993_v9  ;;  %v3013_v32 = vmul.f32 %v9092_v4, %v9092_v4 }
 0x60a   :  { %v3070_v1 = vadd.f32 %v3069_v36, %v3007_v7  ;;  %13234 = vst [vmem:[#allocation67_spill] sm:$0xff] %v9104_v61  ;;  %v13235_v7 = vld [vmem:[#allocation17_spill] sm:$0xff] }
 0x60b   :  { %v9110_v36 = vsub.f32 %v13235_v7, %v8993_v9 }
 0x60c   :  { %v3071_v43 = vadd.f32 %v3070_v1, %v3008_v23  ;;  %v13237_v1 = vld [vmem:[#allocation18_spill] sm:$0xff] }
 0x60d   :  { %13236 = vst [vmem:[#allocation20_spill] sm:$0xff] %v9110_v36  ;;  %v9116_v35 = vsub.f32 %v13237_v1, %v8993_v9 }
 0x60e   :  { %v3072_v20 = vadd.f32 %v3071_v43, %v3009_v59  ;;  %v3015_v59 = vmul.f32 %v9104_v61, %v9104_v61 }
 0x60f   :  { %13238 = vst [vmem:[#allocation29_spill] sm:$0xff] %v9116_v35 }
 0x610   :  { %v3073_v40 = vadd.f32 %v3072_v20, %v3010_v45  ;;  %v3016_v45 = vmul.f32 %v9110_v36, %v9110_v36 }
 0x612   :  { %v3074_v28 = vadd.f32 %v3073_v40, %v3011_v37  ;;  %v9128_v37 = vsub.f32 %v13240_v34, %v8993_v9  ;;  %v3017_v40 = vmul.f32 %v9116_v35, %v9116_v35 }
 0x614   :  { %v3075_v21 = vadd.f32 %v3074_v28, %v3012_v12  ;;  %13241 = vst [vmem:[#allocation70_spill] sm:$0xff] %v9128_v37  ;;  %v13242_v12 = vld [vmem:[#allocation21_spill] sm:$0xff]  ;;  %v3019_v7 = vmul.f32 %v9128_v37, %v9128_v37 }
 0x615   :  { %v9134_v28 = vsub.f32 %v13242_v12, %v8993_v9 }
 0x616   :  { %v3076_v23 = vadd.f32 %v3075_v21, %v3013_v32  ;;  %v13243_v32 = vld [vmem:[#allocation23_spill] sm:$0xff] }
 0x617   :  { %v9140_v21 = vsub.f32 %v13243_v32, %v8993_v9  ;;  %v13247_v32 = vld [vmem:[#allocation34_spill] sm:$0xff] }
 0x618   :  { %v3077_v43 = vadd.f32 %v3076_v23, %v3014_v15  ;;  %v13244_v23 = vld [vmem:[#allocation25_spill] sm:$0xff] }
 0x619   :  { %v9146_v1 = vsub.f32 %v13244_v23, %v8993_v9  ;;  %v3021_v34 = vmul.f32 %v9140_v21, %v9140_v21  ;;  %v9164_v23 = vsub.f32 %v13247_v32, %v8993_v9  ;;  %v9182_v32 = vsub.f32 %v8604_v19, %v8993_v9 }
 0x61a   :  { %v3078_v20 = vadd.f32 %v3077_v43, %v3015_v59  ;;  %v3020_v59 = vmul.f32 %v9134_v28, %v9134_v28 }
 0x61b   :  { %v3028_v19 = vmul.f32 %v9182_v32, %v9182_v32 }
 0x61c   :  { %v3079_v56 = vadd.f32 %v3078_v20, %v3016_v45  ;;  %v13245_v45 = vld [vmem:[#allocation28_spill] sm:$0xff] }
 0x61d   :  { %v9152_v20 = vsub.f32 %v13245_v45, %v8993_v9  ;;  %v13248_v45 = vld [vmem:[#allocation37_spill] sm:$0xff] }
 0x61e   :  { %v3080_v42 = vadd.f32 %v3079_v56, %v3017_v40  ;;  %v13246_v56 = vld [vmem:[#allocation31_spill] sm:$0xff]  ;;  %v9170_v37 = vsub.f32 %v13248_v45, %v8993_v9 }
 0x61f   :  { %v9158_v12 = vsub.f32 %v13246_v56, %v8993_v9  ;;  %v13249_v56 = vld [vmem:[#allocation40_spill] sm:$0xff]  ;;  %v13250_v45 = vld [vmem:[#allocation43_spill] sm:$0xff] }
 0x620   :  { %v3081_v15 = vadd.f32 %v3080_v42, %v3018_v18  ;;  %v3022_v18 = vmul.f32 %v9146_v1, %v9146_v1  ;;  %v9176_v53 = vsub.f32 %v13249_v56, %v8993_v9  ;;  %v9188_v35 = vsub.f32 %v13250_v45, %v8993_v9  ;;  %v13251_v56 = vld [vmem:[#allocation46_spill] sm:$0xff]  ;;  %v13253_v45 = vld [vmem:[#allocation52_spill] sm:$0xff] }
 0x621   :  { %v9194_v36 = vsub.f32 %v13251_v56, %v8993_v9  ;;  %v9206_v41 = vsub.f32 %v13253_v45, %v8993_v9  ;;  %v13254_v56 = vld [vmem:[#allocation55_spill] sm:$0xff]  ;;  %v13256_v45 = vld [vmem:[#allocation58_spill] sm:$0xff] }
 0x622   :  { %v3082_v43 = vadd.f32 %v3081_v15, %v3019_v7  ;;  %v3023_v7 = vmul.f32 %v9152_v20, %v9152_v20  ;;  %v9212_v4 = vsub.f32 %v13254_v56, %v8993_v9  ;;  %v9224_v50 = vsub.f32 %v13256_v45, %v8993_v9  ;;  %v13258_v56 = vld [vmem:[#allocation62_spill] sm:$0xff] }
 0x623   :  { %v9230_v5 = vsub.f32 %v13258_v56, %v8993_v9  ;;  %v9242_v45 = vsub.f32 %v13173_v0, %v8993_v9  ;;  %v13260_v56 = vld [vmem:[#allocation22_spill] sm:$0xff] }
 0x624   :  { %v3083_v40 = vadd.f32 %v3082_v43, %v3020_v59  ;;  %v3024_v59 = vmul.f32 %v9158_v12, %v9158_v12  ;;  %13257 = vst [vmem:[#allocation42_spill] sm:$0xff] %v9224_v50 }
 0x625   :  { %v3038_v0 = vmul.f32 %v9242_v45, %v9242_v45 }
 0x626   :  { %v3084_v42 = vadd.f32 %v3083_v40, %v3021_v34  ;;  %v3025_v34 = vmul.f32 %v9164_v23, %v9164_v23 }
 0x628   :  { %v3085_v15 = vadd.f32 %v3084_v42, %v3022_v18  ;;  %v3026_v18 = vmul.f32 %v9170_v37, %v9170_v37 }
 0x62a   :  { %v3086_v43 = vadd.f32 %v3085_v15, %v3023_v7  ;;  %v3027_v7 = vmul.f32 %v9176_v53, %v9176_v53 }
 0x62c   :  { %v3087_v40 = vadd.f32 %v3086_v43, %v3024_v59  ;;  %v13252_v43 = vld [vmem:[#allocation49_spill] sm:$0xff] }
 0x62d   :  { %v9200_v61 = vsub.f32 %v13252_v43, %v8993_v9  ;;  %v9218_v43 = vsub.f32 %v8632_v22, %v8993_v9 }
 0x62e   :  { %v3088_v42 = vadd.f32 %v3087_v40, %v3025_v34  ;;  %v3029_v34 = vmul.f32 %v9188_v35, %v9188_v35 }
 0x62f   :  { %13255 = vst [vmem:[#allocation66_spill] sm:$0xff] %v9218_v43  ;;  %v3034_v22 = vmul.f32 %v9218_v43, %v9218_v43  ;;  %v9248_v43 = vsub.f32 %v13260_v56, %v8993_v9  ;;  %v9266_v56 = vsub.f32 %v8879_v6, %v8993_v9 }
 0x630   :  { %v3089_v15 = vadd.f32 %v3088_v42, %v3026_v18  ;;  %v3030_v18 = vmul.f32 %v9194_v36, %v9194_v36 }
 0x631   :  { %v3042_v6 = vmul.f32 %v9266_v56, %v9266_v56 }
 0x632   :  { %v3090_v59 = vadd.f32 %v3089_v15, %v3027_v7  ;;  %v3031_v7 = vmul.f32 %v9200_v61, %v9200_v61 }
 0x634   :  { %v3091_v40 = vadd.f32 %v3090_v59, %v3028_v19  ;;  %v3032_v19 = vmul.f32 %v9206_v41, %v9206_v41 }
 0x636   :  { %v3092_v42 = vadd.f32 %v3091_v40, %v3029_v34  ;;  %v3033_v34 = vmul.f32 %v9212_v4, %v9212_v4 }
 0x638   :  { %v3093_v15 = vadd.f32 %v3092_v42, %v3030_v18  ;;  %v13259_v42 = vld [vmem:[#allocation27_spill] sm:$0xff] }
 0x639   :  { %v9236_v11 = vsub.f32 %v13259_v42, %v8993_v9  ;;  %v13261_v42 = vld [vmem:[#allocation33_spill] sm:$0xff] }
 0x63a   :  { %v3094_v59 = vadd.f32 %v3093_v15, %v3031_v7  ;;  %v3035_v7 = vmul.f32 %v9224_v50, %v9224_v50  ;;  %v9254_v50 = vsub.f32 %v13261_v42, %v8993_v9  ;;  %v9272_v42 = vsub.f32 %v8887_v47, %v8993_v9 }
 0x63c   :  { %v3095_v40 = vadd.f32 %v3094_v59, %v3032_v19  ;;  %v3036_v19 = vmul.f32 %v9230_v5, %v9230_v5  ;;  %v3043_v47 = vmul.f32 %v9272_v42, %v9272_v42 }
 0x63e   :  { %v3096_v18 = vadd.f32 %v3095_v40, %v3033_v34  ;;  %v3037_v34 = vmul.f32 %v9236_v11, %v9236_v11 }
 0x640   :  { %v3097_v15 = vadd.f32 %v3096_v18, %v3034_v22  ;;  %v9260_v18 = vsub.f32 %v8871_v51, %v8993_v9 }
 0x642   :  { %v3098_v59 = vadd.f32 %v3097_v15, %v3035_v7  ;;  %v3039_v7 = vmul.f32 %v9248_v43, %v9248_v43  ;;  %v3041_v51 = vmul.f32 %v9260_v18, %v9260_v18 }
 0x644   :  { %v3099_v40 = vadd.f32 %v3098_v59, %v3036_v19  ;;  %v3040_v19 = vmul.f32 %v9254_v50, %v9254_v50 }
 0x646   :  { %v3100_v22 = vadd.f32 %v3099_v40, %v3037_v34  ;;  %v9278_v40 = vsub.f32 %v8897_v38, %v8993_v9 }
 0x648   :  { %v3101_v15 = vadd.f32 %v3100_v22, %v3038_v0  ;;  %v9284_v22 = vsub.f32 %v8905_v30, %v8993_v9  ;;  %v3044_v38 = vmul.f32 %v9278_v40, %v9278_v40 }
 0x64a   :  { %v3102_v59 = vadd.f32 %v3101_v15, %v3039_v7  ;;  %v9290_v15 = vsub.f32 %v8913_v48, %v8993_v9  ;;  %v3045_v30 = vmul.f32 %v9284_v22, %v9284_v22 }
 0x64c   :  { %v3103_v34 = vadd.f32 %v3102_v59, %v3040_v19  ;;  %v9296_v59 = vsub.f32 %v8921_v49, %v8993_v9  ;;  %v3046_v48 = vmul.f32 %v9290_v15, %v9290_v15 }
 0x64e   :  { %v3104_v0 = vadd.f32 %v3103_v34, %v3041_v51  ;;  %v9302_v34 = vsub.f32 %v8929_v17, %v8993_v9  ;;  %v3047_v49 = vmul.f32 %v9296_v59, %v9296_v59 }
 0x650   :  { %v3105_v7 = vadd.f32 %v3104_v0, %v3042_v6  ;;  %v9308_v0 = vsub.f32 %v8937_v13, %v8993_v9  ;;  %v3048_v17 = vmul.f32 %v9302_v34, %v9302_v34 }
 0x652   :  { %v3106_v19 = vadd.f32 %v3105_v7, %v3043_v47  ;;  %v9314_v7 = vsub.f32 %v8945_v63, %v8993_v9  ;;  %v3049_v13 = vmul.f32 %v9308_v0, %v9308_v0 }
 0x654   :  { %v3107_v51 = vadd.f32 %v3106_v19, %v3044_v38  ;;  %v9320_v19 = vsub.f32 %v8953_v14, %v8993_v9  ;;  %v3050_v63 = vmul.f32 %v9314_v7, %v9314_v7 }
 0x656   :  { %v3108_v6 = vadd.f32 %v3107_v51, %v3045_v30  ;;  %v9326_v51 = vsub.f32 %v8962_v33, %v8993_v9  ;;  %v3051_v14 = vmul.f32 %v9320_v19, %v9320_v19 }
 0x658   :  { %v3109_v47 = vadd.f32 %v3108_v6, %v3046_v48  ;;  %v9332_v6 = vsub.f32 %v8968_v24, %v8993_v9  ;;  %v3052_v33 = vmul.f32 %v9326_v51, %v9326_v51 }
 0x65a   :  { %v3110_v38 = vadd.f32 %v3109_v47, %v3047_v49  ;;  %v9338_v47 = vsub.f32 %v8973_v39, %v8993_v9  ;;  %v3053_v24 = vmul.f32 %v9332_v6, %v9332_v6 }
 0x65c   :  { %v3111_v30 = vadd.f32 %v3110_v38, %v3048_v17  ;;  %13262 = vst [vmem:[#allocation73_spill] sm:$0xff] %v9338_v47  ;;  %v9344_v38 = vsub.f32 %v8978_v2, %v8993_v9  ;;  %v3054_v39 = vmul.f32 %v9338_v47, %v9338_v47  ;;  %v3058_v47 = vmul.f32 %v8996_v3, %v8996_v3 }
 0x65e   :  { %v3112_v48 = vadd.f32 %v3111_v30, %v3049_v13  ;;  %13263 = vst [vmem:[#allocation69_spill] sm:$0xff] %v9344_v38  ;;  %v9350_v30 = vsub.f32 %v8982_v27, %v8993_v9  ;;  %v3055_v2 = vmul.f32 %v9344_v38, %v9344_v38 }
 0x660   :  { %v3113_v49 = vadd.f32 %v3112_v48, %v3050_v63  ;;  %13264 = vst [vmem:[#allocation32_spill] sm:$0xff] %v9350_v30  ;;  %v9356_v48 = vsub.f32 %v8986_v31, %v8993_v9  ;;  %v3059_v31 = vmul.f32 %v8999_v55, %v8999_v55 }
 0x662   :  { %v3114_v17 = vadd.f32 %v3113_v49, %v3051_v14  ;;  %13265 = vst [vmem:[#allocation78_spill] sm:$0xff] %v9356_v48  ;;  %v3056_v49 = vmul.f32 %v9350_v30, %v9350_v30  ;;  %v3057_v27 = vmul.f32 %v9356_v48, %v9356_v48 }
 0x664   :  { %v3115_v13 = vadd.f32 %v3114_v17, %v3052_v33 }
 0x666   :  { %v3116_v63 = vadd.f32 %v3115_v13, %v3053_v24  ;;  %v3060_v13 = vmul.f32 %v9002_v44, %v9002_v44 }
 0x668   :  { %v3117_v14 = vadd.f32 %v3116_v63, %v3054_v39  ;;  %v3061_v63 = vmul.f32 %v9005_v10, %v9005_v10 }
 0x66a   :  { %v3118_v33 = vadd.f32 %v3117_v14, %v3055_v2  ;;  %v3062_v14 = vmul.f32 %v9008_v46, %v9008_v46 }
 0x66c   :  { %v3119_v17 = vadd.f32 %v3118_v33, %v3056_v49 }
 0x66e   :  { %v3120_v24 = vadd.f32 %v3119_v17, %v3057_v27 }
 0x670   :  { %v3121_v9 = vadd.f32 %v3120_v24, %v3058_v47 }
 0x672   :  { %v3122_v39 = vadd.f32 %v3121_v9, %v3059_v31 }
 0x674   :  { %v3123_v2 = vadd.f32 %v3122_v39, %v3060_v13  ;;  %v9377_v39 = vld [vmem:[%s12819_s2] ss:$0 sm:$0xff] }
 0x676   :  { %v3124_v49 = vadd.f32 %v3123_v2, %v3061_v63 }
 0x678   :  { %v3125_v33 = vadd.f32 %v3124_v49, %v3062_v14 }
 0x67a   :  { %v3126_v48 = vrot.slane %v3125_v33, 4 }
 0x67c   :  { %v3127_v3 = vadd.f32 %v3126_v48, %v3125_v33 }
 0x67e   :  { %v3128_v27 = vrot.slane %v3127_v3, 2 }
 0x680   :  { %v3129_v17 = vadd.f32 %v3128_v27, %v3127_v3  ;;  %v13266_v27 = vld [vmem:[#allocation66_spill] sm:$0xff] }
 0x682   :  { %v3130_v30 = vrot.slane %v3129_v17, 1 }
 0x684   :  { %v3131_v55 = vadd.f32 %v3130_v30, %v3129_v17  ;;  %v13267_v17 = vld [vmem:[#allocation42_spill] sm:$0xff] }
 0x686   :  { %v3132_v47 = vmul.f32 0.001953125, %v3131_v55  ;;  %v9384_v55 = vld [vmem:[%s12820_s3] ss:$0 sm:$0xff] }
 0x688   :  { %v3133_v24 = vadd.f32 1e-05, %v3132_v47 }
 0x68a   :  { %6849 = vrsqrt.f32 %v3133_v24  ;;  %vm3140_vm1 = vweird.f32 %v3133_v24 }
 0x690   :  { %v6850_v44 = vpop.eup %6849 }
 0x691   :  { %v3135_v31 = vmul.f32 %v6850_v44, %v3133_v24  ;;  %vm3141_vm0 = vweird.f32 %v6850_v44 }
 0x692   :  { %vm3142_vm2 = vmor %vm3140_vm1, %vm3141_vm0 }
 0x693   :  { %v3136_v9 = vmul.f32 %v6850_v44, %v3135_v31 }
 0x695   :  { %v3137_v38 = vmul.f32 0.5, %v3136_v9  ;;  %v13268_v9 = vld [vmem:[#allocation73_spill] sm:$0xff] }
 0x697   :  { %v3138_v10 = vsub.f32 1.5, %v3137_v38 }
 0x699   :  { %v3139_v13 = vmul.f32 %v6850_v44, %v3138_v10 }
 0x69b   :  { %v9379_v3 = vsel %vm3142_vm2, %v6850_v44, %v3139_v13  ;;  %v13269_v13 = vld [vmem:[#allocation69_spill] sm:$0xff] }
 0x69c   :  { %v3207_v30 = vmul.f32 %v9379_v3, %v9008_v46  ;;  %v3144_v63 = vmul.f32 %v9379_v3, %v9012_v8  ;;  %v3145_v44 = vmul.f32 %v9379_v3, %v9016_v16  ;;  %v9396_v2 = vmul.f32 %v9379_v3, %v9020_v25 }
 0x69d   :  { %v9400_v14 = vmul.f32 %v9379_v3, %v9028_v62  ;;  %v9404_v46 = vmul.f32 %v9379_v3, %v9032_v54  ;;  %v9408_v49 = vmul.f32 %v9379_v3, %v9038_v58  ;;  %v9412_v8 = vmul.f32 %v9379_v3, %v9044_v60 }
 0x69e   :  { %v3275_v38 = vmul.f32 %v9377_v39, %v3207_v30  ;;  %v9416_v16 = vmul.f32 %v9379_v3, %v9050_v52  ;;  %v9420_v25 = vmul.f32 %v9379_v3, %v9056_v29  ;;  %v9424_v62 = vmul.f32 %v9379_v3, %v9062_v26  ;;  %v13270_v30 = vld [vmem:[#allocation32_spill] sm:$0xff] }
 0x69f   :  { %v9428_v54 = vmul.f32 %v9379_v3, %v9068_v57  ;;  %v3165_v58 = vmul.f32 %v9379_v3, %v9134_v28  ;;  %v3166_v60 = vmul.f32 %v9379_v3, %v9140_v21  ;;  %v3167_v52 = vmul.f32 %v9379_v3, %v9146_v1 }
 0x6a0   :  { %v3343_v10 = vadd.f32 %v9384_v55, %v3275_v38  ;;  %v3168_v29 = vmul.f32 %v9379_v3, %v9152_v20  ;;  %v3169_v26 = vmul.f32 %v9379_v3, %v9158_v12  ;;  %v3170_v33 = vmul.f32 %v9379_v3, %v9164_v23  ;;  %v13271_v38 = vld [vmem:[#allocation78_spill] sm:$0xff] }
 0x6a1   :  { %v3171_v57 = vmul.f32 %v9379_v3, %v9170_v37  ;;  %v3172_v28 = vmul.f32 %v9379_v3, %v9176_v53  ;;  %v3173_v21 = vmul.f32 %v9379_v3, %v9182_v32  ;;  %v3174_v1 = vmul.f32 %v9379_v3, %v9188_v35 }
 0x6a2   :  { %v3407_v48 = vmax.f32 %v3343_v10, 0.0  ;;  %v3175_v20 = vmul.f32 %v9379_v3, %v9194_v36  ;;  %v3176_v12 = vmul.f32 %v9379_v3, %v9200_v61  ;;  %v3177_v23 = vmul.f32 %v9379_v3, %v9206_v41  ;;  %v13272_v10 = vld [vmem:[#allocation24_spill] sm:$0xff] }
 0x6a3   :  { %v3178_v37 = vmul.f32 %v9379_v3, %v9212_v4  ;;  %v3179_v53 = vmul.f32 %v9379_v3, %v13266_v27  ;;  %v3180_v32 = vmul.f32 %v9379_v3, %v13267_v17  ;;  %v3181_v35 = vmul.f32 %v9379_v3, %v9230_v5  ;;  %v4052_v4 = vld [vmem:[%s12821_s4 + $0x20] sm:$0xff]  ;;  %v13274_v27 = vld [vmem:[#allocation60_spill] sm:$0xff]  ;;  %v13275_v17 = vld [vmem:[#allocation26_spill] sm:$0xff] }
 0x6a4   :  { %3471 = vst [vmem:[#allocation2 + $0x339] sm:$0xff] %v3407_v48  ;;  %v3182_v36 = vmul.f32 %v9379_v3, %v9236_v11  ;;  %v3183_v61 = vmul.f32 %v9379_v3, %v9242_v45  ;;  %v3184_v41 = vmul.f32 %v9379_v3, %v9248_v43  ;;  %v3185_v47 = vmul.f32 %v9379_v3, %v9254_v50  ;;  %v13273_v48 = vld [vmem:[#allocation36_spill] sm:$0xff] }
 0x6a5   :  { %v3186_v24 = vmul.f32 %v9379_v3, %v9260_v18  ;;  %v3187_v5 = vmul.f32 %v9379_v3, %v9266_v56  ;;  %v3188_v11 = vmul.f32 %v9379_v3, %v9272_v42  ;;  %4203 = vmatpush.msra.mxu1 %v4052_v4  ;;  %v3189_v43 = vmul.f32 %v9379_v3, %v9278_v40 }
 0x6a6   :  { %v3190_v45 = vmul.f32 %v9379_v3, %v9284_v22  ;;  %v3191_v31 = vmul.f32 %v9379_v3, %v9290_v15  ;;  %v3192_v50 = vmul.f32 %v9379_v3, %v9296_v59  ;;  %v3193_v18 = vmul.f32 %v9379_v3, %v9302_v34 }
 0x6a7   :  { %v3194_v56 = vmul.f32 %v9379_v3, %v9308_v0  ;;  %v3195_v42 = vmul.f32 %v9379_v3, %v9314_v7  ;;  %v3196_v40 = vmul.f32 %v9379_v3, %v9320_v19  ;;  %v3197_v22 = vmul.f32 %v9379_v3, %v9326_v51 }
 0x6a8   :  { %v3198_v15 = vmul.f32 %v9379_v3, %v9332_v6  ;;  %v3199_v59 = vmul.f32 %v9379_v3, %v13268_v9  ;;  %v3200_v34 = vmul.f32 %v9379_v3, %v13269_v13  ;;  %v3201_v0 = vmul.f32 %v9379_v3, %v13270_v30 }
 0x6a9   :  { %v3202_v7 = vmul.f32 %v9379_v3, %v13271_v38  ;;  %v3203_v19 = vmul.f32 %v9379_v3, %v13272_v10  ;;  %v3204_v51 = vmul.f32 %v9379_v3, %v13273_v48  ;;  %v3205_v6 = vmul.f32 %v9379_v3, %v13274_v27 }
 0x6aa   :  { %v3206_v4 = vmul.f32 %v9379_v3, %v13275_v17  ;;  %v3212_v9 = vmul.f32 %v9377_v39, %v3144_v63  ;;  %v3213_v13 = vmul.f32 %v9377_v39, %v3145_v44  ;;  %v9520_v30 = vmul.f32 %v9377_v39, %v3165_v58 }
 0x6ab   :  { %v9523_v38 = vmul.f32 %v9377_v39, %v3166_v60  ;;  %v9526_v10 = vmul.f32 %v9377_v39, %v3167_v52  ;;  %v9529_v48 = vmul.f32 %v9377_v39, %v3168_v29  ;;  %v9532_v27 = vmul.f32 %v9377_v39, %v3169_v26 }
 0x6ac   :  { %v9535_v17 = vmul.f32 %v9377_v39, %v3170_v33  ;;  %v9538_v63 = vmul.f32 %v9377_v39, %v3171_v57  ;;  %v9541_v44 = vmul.f32 %v9377_v39, %v3172_v28  ;;  %v9544_v58 = vmul.f32 %v9377_v39, %v3173_v21 }
 0x6ad   :  { %v9547_v60 = vmul.f32 %v9377_v39, %v3174_v1  ;;  %v9550_v52 = vmul.f32 %v9377_v39, %v3175_v20  ;;  %v9553_v29 = vmul.f32 %v9377_v39, %v3176_v12  ;;  %v9556_v26 = vmul.f32 %v9377_v39, %v3177_v23 }
 0x6ae   :  { %v9559_v33 = vmul.f32 %v9377_v39, %v3178_v37  ;;  %v9562_v57 = vmul.f32 %v9377_v39, %v3179_v53  ;;  %v9565_v28 = vmul.f32 %v9377_v39, %v3180_v32  ;;  %v9568_v21 = vmul.f32 %v9377_v39, %v3181_v35 }
 0x6af   :  { %v9571_v1 = vmul.f32 %v9377_v39, %v3182_v36  ;;  %v9574_v20 = vmul.f32 %v9377_v39, %v3183_v61  ;;  %v9577_v12 = vmul.f32 %v9377_v39, %v3184_v41  ;;  %v9580_v23 = vmul.f32 %v9377_v39, %v3185_v47 }
 0x6b0   :  { %v9583_v37 = vmul.f32 %v9377_v39, %v3186_v24  ;;  %v9586_v53 = vmul.f32 %v9377_v39, %v3187_v5  ;;  %v9589_v32 = vmul.f32 %v9377_v39, %v3188_v11  ;;  %v9592_v35 = vmul.f32 %v9377_v39, %v3189_v43 }
 0x6b1   :  { %v9595_v36 = vmul.f32 %v9377_v39, %v3190_v45  ;;  %v9598_v61 = vmul.f32 %v9377_v39, %v3191_v31  ;;  %v9601_v41 = vmul.f32 %v9377_v39, %v3192_v50  ;;  %v9604_v47 = vmul.f32 %v9377_v39, %v3193_v18 }
 0x6b2   :  { %v9607_v24 = vmul.f32 %v9377_v39, %v3194_v56  ;;  %v9610_v5 = vmul.f32 %v9377_v39, %v3195_v42  ;;  %v9613_v11 = vmul.f32 %v9377_v39, %v3196_v40  ;;  %v9616_v43 = vmul.f32 %v9377_v39, %v3197_v22 }
 0x6b3   :  { %v9619_v45 = vmul.f32 %v9377_v39, %v3198_v15  ;;  %v9622_v31 = vmul.f32 %v9377_v39, %v3199_v59  ;;  %v9625_v50 = vmul.f32 %v9377_v39, %v3200_v34  ;;  %v9628_v18 = vmul.f32 %v9377_v39, %v3201_v0  ;;  %v4079_v0 = vld [vmem:[%s12821_s4 + $0xf8] sm:$0xff] }
 0x6b4   :  { %v9631_v56 = vmul.f32 %v9377_v39, %v3202_v7  ;;  %v9634_v42 = vmul.f32 %v9377_v39, %v3203_v19  ;;  %v9637_v40 = vmul.f32 %v9377_v39, %v3204_v51  ;;  %v3214_v22 = vmul.f32 %v9377_v39, %v9396_v2  ;;  %4401 = vmatpush.msrb.mxu2 %v4079_v0 }
 0x6b5   :  { %v3215_v15 = vmul.f32 %v9377_v39, %v9400_v14  ;;  %v9644_v59 = vmul.f32 %v9377_v39, %v3205_v6  ;;  %v9647_v34 = vmul.f32 %v9377_v39, %v3206_v4  ;;  %v3216_v7 = vmul.f32 %v9377_v39, %v9404_v46  ;;  %v13279_v14 = vld [vmem:[#allocation30_spill] sm:$0xff]  ;;  %v13280_v6 = vld [vmem:[#allocation64_spill] sm:$0xff] }
 0x6b6   :  { %13276 = vst [vmem:[#allocation75_spill] sm:$0xff] %v9637_v40  ;;  %v3217_v19 = vmul.f32 %v9377_v39, %v9408_v49  ;;  %v3218_v2 = vmul.f32 %v9377_v39, %v9412_v8  ;;  %v9660_v51 = vmul.f32 %v9379_v3, %v13279_v14  ;;  %v9664_v4 = vmul.f32 %v9379_v3, %v13280_v6  ;;  %v13282_v46 = vld [vmem:[#allocation68_spill] sm:$0xff]  ;;  %v4078_v49 = vld [vmem:[%s12821_s4 + $0xf0] sm:$0xff] }
 0x6b7   :  { %13277 = vst [vmem:[#allocation71_spill] sm:$0xff] %v9644_v59  ;;  %v9672_v40 = vmul.f32 %v9379_v3, %v13282_v46  ;;  %v9679_v8 = vmul.f32 %v9377_v39, %v9416_v16  ;;  %v9683_v0 = vmul.f32 %v9377_v39, %v9420_v25  ;;  %v9691_v14 = vmul.f32 %v9377_v39, %v9428_v54  ;;  %v4077_v54 = vld [vmem:[%s12821_s4 + $0xe8] sm:$0xff] }
 0x6b8   :  { %13278 = vst [vmem:[#allocation45_spill] sm:$0xff] %v9647_v34  ;;  %v13281_v34 = vld [vmem:[#allocation39_spill] sm:$0xff]  ;;  %4402 = vmatpush.msrb.mxu2 %v4078_v49  ;;  %v9694_v6 = vadd.f32 %v9384_v55, %v3212_v9  ;;  %v9697_v46 = vadd.f32 %v9384_v55, %v3213_v13  ;;  %v9700_v16 = vadd.f32 %v9384_v55, %v3214_v22 }
 0x6b9   :  { %v9668_v59 = vmul.f32 %v9379_v3, %v13281_v34  ;;  %v9687_v34 = vmul.f32 %v9377_v39, %v9424_v62  ;;  %13283 = vst [vmem:[#allocation81_spill] sm:$0xff] %v9691_v14  ;;  %v9703_v25 = vadd.f32 %v9384_v55, %v3215_v15  ;;  %v4095_v62 = vld [vmem:[%s12821_s4 + $0x178] sm:$0xff]  ;;  %v9712_v9 = vadd.f32 %v9384_v55, %v3216_v7 }
 0x6ba   :  { %13284 = vst [vmem:[#allocation77_spill] sm:$0xff] %v9700_v16  ;;  %v9715_v13 = vadd.f32 %v9384_v55, %v3217_v19  ;;  %v9718_v22 = vadd.f32 %v9384_v55, %v3218_v2  ;;  %v9722_v15 = vadd.f32 %v9384_v55, %v9520_v30  ;;  %4610 = vmatpush.msrb.mxu3 %v4095_v62  ;;  %v4094_v30 = vld [vmem:[%s12821_s4 + $0x170] sm:$0xff] }
 0x6bb   :  { %13285 = vst [vmem:[#allocation74_spill] sm:$0xff] %v9703_v25  ;;  %v9726_v49 = vadd.f32 %v9384_v55, %v9523_v38  ;;  %v9730_v14 = vadd.f32 %v9384_v55, %v9526_v10  ;;  %v9734_v7 = vadd.f32 %v9384_v55, %v9529_v48  ;;  %v9738_v19 = vadd.f32 %v9384_v55, %v9532_v27  ;;  %v4076_v38 = vld [vmem:[%s12821_s4 + $0xe0] sm:$0xff] }
 0x6bc   :  { %4403 = vmatpush.msrb.mxu2 %v4077_v54  ;;  %v9748_v10 = vadd.f32 %v9384_v55, %v9535_v17  ;;  %v9752_v48 = vadd.f32 %v9384_v55, %v9538_v63  ;;  %v9756_v27 = vadd.f32 %v9384_v55, %v9541_v44  ;;  %v9760_v2 = vadd.f32 %v9384_v55, %v9544_v58  ;;  %v4093_v58 = vld [vmem:[%s12821_s4 + $0x168] sm:$0xff] }
 0x6bd   :  { %4611 = vmatpush.msrb.mxu3 %v4094_v30  ;;  %v9764_v62 = vadd.f32 %v9384_v55, %v9547_v60  ;;  %v9768_v17 = vadd.f32 %v9384_v55, %v9550_v52  ;;  %v9772_v63 = vadd.f32 %v9384_v55, %v9553_v29  ;;  %v9776_v44 = vadd.f32 %v9384_v55, %v9556_v26  ;;  %v4075_v60 = vld [vmem:[%s12821_s4 + $0xd8] sm:$0xff] }
 0x6be   :  { %4404 = vmatpush.msrb.mxu2 %v4076_v38  ;;  %v9786_v52 = vadd.f32 %v9384_v55, %v9559_v33  ;;  %v9790_v29 = vadd.f32 %v9384_v55, %v9562_v57  ;;  %v9794_v26 = vadd.f32 %v9384_v55, %v9565_v28  ;;  %v9798_v54 = vadd.f32 %v9384_v55, %v9568_v21  ;;  %v4092_v21 = vld [vmem:[%s12821_s4 + $0x160] sm:$0xff] }
 0x6bf   :  { %4612 = vmatpush.msrb.mxu3 %v4093_v58  ;;  %v9802_v30 = vadd.f32 %v9384_v55, %v9571_v1  ;;  %v9806_v33 = vadd.f32 %v9384_v55, %v9574_v20  ;;  %v9810_v57 = vadd.f32 %v9384_v55, %v9577_v12  ;;  %v9814_v28 = vadd.f32 %v9384_v55, %v9580_v23  ;;  %v4074_v1 = vld [vmem:[%s12821_s4 + $0xd0] sm:$0xff] }
 0x6c0   :  { %4405 = vmatpush.msrb.mxu2 %v4075_v60  ;;  %v9824_v20 = vadd.f32 %v9384_v55, %v9583_v37  ;;  %v9828_v12 = vadd.f32 %v9384_v55, %v9586_v53  ;;  %v9832_v23 = vadd.f32 %v9384_v55, %v9589_v32  ;;  %v9836_v38 = vadd.f32 %v9384_v55, %v9592_v35  ;;  %v4091_v35 = vld [vmem:[%s12821_s4 + $0x158] sm:$0xff] }
 0x6c1   :  { %4613 = vmatpush.msrb.mxu3 %v4092_v21  ;;  %v9840_v58 = vadd.f32 %v9384_v55, %v9595_v36  ;;  %v9844_v37 = vadd.f32 %v9384_v55, %v9598_v61  ;;  %v9848_v53 = vadd.f32 %v9384_v55, %v9601_v41  ;;  %v9852_v32 = vadd.f32 %v9384_v55, %v9604_v47  ;;  %v4073_v36 = vld [vmem:[%s12821_s4 + $0xc8] sm:$0xff] }
 0x6c2   :  { %4406 = vmatpush.msrb.mxu2 %v4074_v1  ;;  %v9862_v61 = vadd.f32 %v9384_v55, %v9607_v24  ;;  %v9866_v41 = vadd.f32 %v9384_v55, %v9610_v5  ;;  %v9870_v47 = vadd.f32 %v9384_v55, %v9613_v11  ;;  %v9874_v60 = vadd.f32 %v9384_v55, %v9616_v43  ;;  %v4090_v43 = vld [vmem:[%s12821_s4 + $0x150] sm:$0xff]  ;;  %v13292_v1 = vld [vmem:[#allocation75_spill] sm:$0xff] }
 0x6c3   :  { %4614 = vmatpush.msrb.mxu3 %v4091_v35  ;;  %v9878_v21 = vadd.f32 %v9384_v55, %v9619_v45  ;;  %v9882_v24 = vadd.f32 %v9384_v55, %v9622_v31  ;;  %v9886_v5 = vadd.f32 %v9384_v55, %v9625_v50  ;;  %v9890_v11 = vadd.f32 %v9384_v55, %v9628_v18  ;;  %v4072_v45 = vld [vmem:[%s12821_s4 + $0xc0] sm:$0xff] }
 0x6c4   :  { %4407 = vmatpush.msrb.mxu2 %v4073_v36  ;;  %v9900_v31 = vadd.f32 %v9384_v55, %v9631_v56  ;;  %v9904_v50 = vadd.f32 %v9384_v55, %v9634_v42  ;;  %v9908_v18 = vadd.f32 %v9384_v55, %v13292_v1  ;;  %v13294_v35 = vld [vmem:[#allocation71_spill] sm:$0xff]  ;;  %v4089_v1 = vld [vmem:[%s12821_s4 + $0x148] sm:$0xff] }
 0x6c5   :  { %13286 = vst [vmem:[#allocation35_spill] sm:$0xff] %v9878_v21  ;;  %v9912_v36 = vadd.f32 %v9384_v55, %v13294_v35  ;;  %4615 = vmatpush.msrb.mxu3 %v4090_v43  ;;  %v4071_v35 = vld [vmem:[%s12821_s4 + $0xb8] sm:$0xff]  ;;  %v13298_v43 = vld [vmem:[#allocation65_spill] sm:$0xff]  ;;  %v13299_v42 = vld [vmem:[#allocation67_spill] sm:$0xff] }
 0x6c6   :  { %13287 = vst [vmem:[#allocation79_spill] sm:$0xff] %v9882_v24  ;;  %4408 = vmatpush.msrb.mxu2 %v4072_v45  ;;  %v3160_v56 = vmul.f32 %v9379_v3, %v13299_v42  ;;  %v13302_v45 = vmax.f32 %v9697_v46, 0.0  ;;  %v13305_v24 = vmax.f32 %v9700_v16, 0.0 }
 0x6c7   :  { %13288 = vst [vmem:[#allocation76_spill] sm:$0xff] %v9886_v5  ;;  %4616 = vmatpush.msrb.mxu3 %v4089_v1  ;;  %v13301_v1 = vld [vmem:[#allocation20_spill] sm:$0xff] }
 0x6c8   :  { %13289 = vst [vmem:[#allocation48_spill] sm:$0xff] %v9890_v11  ;;  %v13296_v11 = vld [vmem:[#allocation45_spill] sm:$0xff]  ;;  %4409 = vmatpush.msrb.mxu2 %v4071_v35  ;;  %v3161_v42 = vmul.f32 %v9379_v3, %v13301_v1 }
 0x6c9   :  { %13290 = vst [vmem:[#allocation82_spill] sm:$0xff] %v9900_v31  ;;  %v9916_v5 = vadd.f32 %v9384_v55, %v13296_v11  ;;  %v3223_v11 = vmul.f32 %v9377_v39, %v9660_v51  ;;  %v9933_v31 = vadd.f32 %v9384_v55, %v9679_v8  ;;  %v13300_v51 = vmax.f32 %v9694_v6, 0.0  ;;  %v4088_v8 = vld [vmem:[%s12821_s4 + $0x140] sm:$0xff]  ;;  %v4070_v35 = vld [vmem:[%s12821_s4 + $0xb0] sm:$0xff] }
 0x6ca   :  { %13291 = vst [vmem:[#allocation80_spill] sm:$0xff] %v9904_v50  ;;  %4617 = vmatpush.msrb.mxu3 %v4088_v8  ;;  %v13304_v50 = vld [vmem:[#allocation81_spill] sm:$0xff]  ;;  %4410 = vmatpush.msrb.mxu2 %v4070_v35  ;;  %v13306_v8 = vld [vmem:[#allocation72_spill] sm:$0xff]  ;;  %v13308_v35 = vld [vmem:[#allocation70_spill] sm:$0xff] }
 0x6cb   :  { %13293 = vst [vmem:[#allocation38_spill] sm:$0xff] %v9908_v18  ;;  %v9942_v18 = vadd.f32 %v9384_v55, %v9683_v0  ;;  %v9956_v0 = vadd.f32 %v9384_v55, %v9687_v34  ;;  %v9970_v34 = vadd.f32 %v9384_v55, %v13304_v50  ;;  %v3164_v16 = vmul.f32 %v9379_v3, %v13308_v35  ;;  %v4085_v35 = vld [vmem:[%s12821_s4 + $0x128] sm:$0xff] }
 0x6cc   :  { %13295 = vst [vmem:[#allocation50_spill] sm:$0xff] %v9912_v36  ;;  %v3159_v36 = vmul.f32 %v9379_v3, %v13298_v43  ;;  %v13307_v43 = vmax.f32 %v9703_v25, 0.0  ;;  %v13309_v50 = vmax.f32 %v9712_v9, 0.0 }
 0x6cd   :  { %13297 = vst [vmem:[#allocation41_spill] sm:$0xff] %v9916_v5  ;;  %v3224_v5 = vmul.f32 %v9377_v39, %v9664_v4  ;;  %v3225_v4 = vmul.f32 %v9377_v39, %v9668_v59  ;;  %v3226_v59 = vmul.f32 %v9377_v39, %v9672_v40  ;;  %v9982_v40 = vadd.f32 %v9384_v55, %v3223_v11 }
 0x6ce   :  { %3408 = vst [vmem:[#allocation2 + $0x19] sm:$0xff] %v13300_v51  ;;  %v13303_v51 = vld [vmem:[#allocation29_spill] sm:$0xff]  ;;  %v3227_v21 = vmul.f32 %v9377_v39, %v3159_v36  ;;  %v12890_v11 = vmax.f32 %v9942_v18, 0.0 }
 0x6cf   :  { %3409 = vst [vmem:[#allocation2 + $0x21] sm:$0xff] %v13302_v45  ;;  %v3162_v1 = vmul.f32 %v9379_v3, %v13303_v51  ;;  %v4087_v45 = vld [vmem:[%s12821_s4 + $0x138] sm:$0xff]  ;;  %v3163_v51 = vmul.f32 %v9379_v3, %v13306_v8  ;;  %v3228_v8 = vmul.f32 %v9377_v39, %v3160_v56  ;;  %v9994_v36 = vadd.f32 %v9384_v55, %v3224_v5  ;;  %v4068_v56 = vld [vmem:[%s12821_s4 + $0xa0] sm:$0xff] }
 0x6d0   :  { %3410 = vst [vmem:[#allocation2 + $0x31] sm:$0xff] %v13305_v24  ;;  %4618 = vmatpush.msrb.mxu3 %v4087_v45  ;;  %v4069_v24 = vld [vmem:[%s12821_s4 + $0xa8] sm:$0xff]  ;;  %v3229_v45 = vmul.f32 %v9377_v39, %v3161_v42  ;;  %v10004_v25 = vadd.f32 %v9384_v55, %v3225_v4  ;;  %v12885_v3 = vmax.f32 %v9956_v0, 0.0  ;;  %v13310_v5 = vmax.f32 %v9715_v13, 0.0 }
 0x6d1   :  { %3411 = vst [vmem:[#allocation2 + $0x39] sm:$0xff] %v13307_v43  ;;  %4411 = vmatpush.msrb.mxu2 %v4069_v24  ;;  %v4086_v43 = vld [vmem:[%s12821_s4 + $0x130] sm:$0xff]  ;;  %v10014_v24 = vadd.f32 %v9384_v55, %v3226_v59  ;;  %v13311_v4 = vmax.f32 %v9718_v22, 0.0  ;;  %v13312_v59 = vmax.f32 %v9933_v31, 0.0  ;;  %v10034_v42 = vadd.f32 %v9384_v55, %v3228_v8 }
 0x6d2   :  { %3412 = vst [vmem:[#allocation2 + $0x49] sm:$0xff] %v13309_v50  ;;  %4619 = vmatpush.msrb.mxu3 %v4086_v43  ;;  %v3230_v50 = vmul.f32 %v9377_v39, %v3162_v1  ;;  %v3231_v43 = vmul.f32 %v9377_v39, %v3163_v51  ;;  %v12886_v1 = vmax.f32 %v9982_v40, 0.0  ;;  %v12889_v51 = vmax.f32 %v9994_v36, 0.0 }
 0x6d3   :  { %3413 = vst [vmem:[#allocation2 + $0x51] sm:$0xff] %v13310_v5  ;;  %4412 = vmatpush.msrb.mxu2 %v4068_v56  ;;  %v10024_v5 = vadd.f32 %v9384_v55, %v3227_v21  ;;  %v3232_v56 = vmul.f32 %v9377_v39, %v3164_v16  ;;  %v4067_v21 = vld [vmem:[%s12821_s4 + $0x98] sm:$0xff]  ;;  %v4084_v39 = vld [vmem:[%s12821_s4 + $0x120] sm:$0xff]  ;;  %v12888_v8 = vmax.f32 %v10014_v24, 0.0 }
 0x6d4   :  { %3414 = vst [vmem:[#allocation2 + $0x61] sm:$0xff] %v13311_v4  ;;  %4620 = vmatpush.msrb.mxu3 %v4085_v35  ;;  %v4111_v4 = vld [vmem:[%s12821_s4 + $0x1f8] sm:$0xff]  ;;  %v10043_v35 = vadd.f32 %v9384_v55, %v3229_v45  ;;  %v10052_v16 = vadd.f32 %v9384_v55, %v3230_v50  ;;  %v4110_v45 = vld [vmem:[%s12821_s4 + $0x1f0] sm:$0xff] }
 0x6d5   :  { %3415 = vst [vmem:[#allocation2 + $0x69] sm:$0xff] %v13312_v59  ;;  %4819 = vmatpush.msrb.mxu0 %v4111_v4  ;;  %v12887_v59 = vmax.f32 %v10004_v25, 0.0  ;;  %4413 = vmatpush.msrb.mxu2 %v4067_v21  ;;  %v13313_v4 = vmax.f32 %v9970_v34, 0.0  ;;  %v12891_v21 = vmax.f32 %v10024_v5, 0.0  ;;  %v4066_v50 = vld [vmem:[%s12821_s4 + $0x90] sm:$0xff] }
 0x6d6   :  { %3416 = vst [vmem:[#allocation2 + $0x79] sm:$0xff] %v12890_v11  ;;  %4621 = vmatpush.msrb.mxu3 %v4084_v39  ;;  %v12892_v39 = vmax.f32 %v10034_v42, 0.0 }
 0x6d7   :  { %3417 = vst [vmem:[#allocation2 + $0x81] sm:$0xff] %v12885_v3  ;;  %v10061_v3 = vadd.f32 %v9384_v55, %v3231_v43  ;;  %4820 = vmatpush.msrb.mxu0 %v4110_v45  ;;  %4414 = vmatpush.msrb.mxu2 %v4066_v50  ;;  %v4083_v43 = vld [vmem:[%s12821_s4 + $0x118] sm:$0xff]  ;;  %v4065_v50 = vld [vmem:[%s12821_s4 + $0x88] sm:$0xff] }
 0x6d8   :  { %3418 = vst [vmem:[#allocation2 + $0x91] sm:$0xff] %v13313_v4  ;;  %v10070_v4 = vadd.f32 %v9384_v55, %v3232_v56  ;;  %4622 = vmatpush.msrb.mxu3 %v4083_v43  ;;  %v4109_v55 = vld [vmem:[%s12821_s4 + $0x1e8] sm:$0xff]  ;;  %v12894_v56 = vmax.f32 %v10052_v16, 0.0  ;;  %v4051_v45 = vld [vmem:[%s12821_s4 + $0x18] sm:$0xff]  ;;  %v4082_v43 = vld [vmem:[%s12821_s4 + $0x110] sm:$0xff] }
 0x6d9   :  { %3419 = vst [vmem:[#allocation2 + $0x99] sm:$0xff] %v12886_v1  ;;  %v12893_v1 = vmax.f32 %v10043_v35, 0.0  ;;  %4821 = vmatpush.msrb.mxu0 %v4109_v55  ;;  %4204 = vmatpush.msra.mxu1 %v4051_v45  ;;  %v4064_v55 = vld [vmem:[%s12821_s4 + $0x80] sm:$0xff]  ;;  %v4050_v45 = vld [vmem:[%s12821_s4 + $0x10] sm:$0xff] }
 0x6da   :  { %3420 = vst [vmem:[#allocation2 + $0xa9] sm:$0xff] %v12889_v51  ;;  %4415 = vmatpush.msrb.mxu2 %v4065_v50  ;;  %v4081_v51 = vld [vmem:[%s12821_s4 + $0x108] sm:$0xff]  ;;  %v12895_v11 = vmax.f32 %v10070_v4, 0.0  ;;  %4623 = vmatpush.msrb.mxu3 %v4082_v43  ;;  %v4107_v50 = vld [vmem:[%s12821_s4 + $0x1d8] sm:$0xff] }
 0x6db   :  { %3421 = vst [vmem:[#allocation2 + $0xb1] sm:$0xff] %v12887_v59  ;;  %4205 = vmatpush.msra.mxu1 %v4050_v45  ;;  %v4049_v59 = vld [vmem:[%s12821_s4 + $0x8] sm:$0xff]  ;;  %v12896_v45 = vmax.f32 %v9730_v14, 0.0 }
 0x6dc   :  { %3422 = vst [vmem:[#allocation2 + $0xc1] sm:$0xff] %v12888_v8  ;;  %v4108_v8 = vld [vmem:[%s12821_s4 + $0x1e0] sm:$0xff]  ;;  %4416 = vmatpush.msrb.mxu2 %v4064_v55  ;;  %4624 = vmatpush.msrb.mxu3 %v4081_v51  ;;  %v4105_v43 = vld [vmem:[%s12821_s4 + $0x1c8] sm:$0xff] }
 0x6dd   :  { %3423 = vst [vmem:[#allocation2 + $0xc9] sm:$0xff] %v12891_v21  ;;  %4822 = vmatpush.msrb.mxu0 %v4108_v8  ;;  %v3536_v21 = vld [vmem:[#allocation2 + $0x1] sm:$0xff]  ;;  %v4106_v8 = vld [vmem:[%s12821_s4 + $0x1d0] sm:$0xff]  ;;  %4206 = vmatpush.msra.mxu1 %v4049_v59 }
 0x6de   :  { %3424 = vst [vmem:[#allocation2 + $0xd9] sm:$0xff] %v12892_v39  ;;  %v4080_v39 = vld [vmem:[%s12821_s4 + $0x100] sm:$0xff]  ;;  %4417 = vmatmul.f32.vlgmr.msrb.gmra.mxu2 %v3536_v21  ;;  %v3370_v21 = vmax.f32 %v9748_v10, 0.0 }
 0x6df   :  { %3425 = vst [vmem:[#allocation2 + $0xe1] sm:$0xff] %v12893_v1  ;;  %4823 = vmatpush.msrb.mxu0 %v4107_v50  ;;  %v3600_v55 = vld [vmem:[#allocation2 + $0x2] sm:$0xff]  ;;  %v13314_v1 = vmax.f32 %v10061_v3, 0.0  ;;  %4625 = vmatpush.msrb.mxu3 %v4080_v39  ;;  %v12897_v50 = vmax.f32 %v9738_v19, 0.0  ;;  %v3371_v39 = vmax.f32 %v9752_v48, 0.0 }
 0x6e0   :  { %3426 = vst [vmem:[#allocation2 + $0xf1] sm:$0xff] %v12894_v56  ;;  %v4048_v51 = vld [vmem:[%s12821_s4] sm:$0xff]  ;;  %4626 = vmatmul.f32.vlgmr.msrb.gmra.mxu3 %v3600_v55  ;;  %v10153_v56 = vld [vmem:[#allocation2 + $0x1b0] sm:$0xff] }
 0x6e1   :  { %3427 = vst [vmem:[#allocation2 + $0xf9] sm:$0xff] %v13314_v1  ;;  %4824 = vmatpush.msrb.mxu0 %v4106_v8  ;;  %v13315_v1 = vmax.f32 %v9722_v15, 0.0  ;;  %4207 = vmatpush.msra.mxu1 %v4048_v51  ;;  %v4104_v59 = vld [vmem:[%s12821_s4 + $0x1c0] sm:$0xff]  ;;  %v4103_v8 = vld [vmem:[%s12821_s4 + $0x1b8] sm:$0xff]  ;;  %v13317_v51 = vmax.f32 %v9734_v7, 0.0  ;;  %v3601_v55 = vld [vmem:[#allocation2 + $0xa] sm:$0xff] }
 0x6e2   :  { %3428 = vst [vmem:[#allocation2 + $0x109] sm:$0xff] %v12895_v11  ;;  %v13316_v11 = vmax.f32 %v9726_v49, 0.0  ;;  %4208 = vmatmul.f32.vlgmr.msra.gmra.mxu1 %v10153_v56 }
 0x6e3   :  { %3429 = vst [vmem:[#allocation2 + $0x111] sm:$0xff] %v13315_v1  ;;  %4825 = vmatpush.msrb.mxu0 %v4105_v43  ;;  %v4102_v1 = vld [vmem:[%s12821_s4 + $0x1b0] sm:$0xff]  ;;  %v13318_v43 = vmax.f32 %v9756_v27, 0.0 }
 0x6e4   :  { %3430 = vst [vmem:[#allocation2 + $0x121] sm:$0xff] %v13316_v11  ;;  %v3537_v11 = vld [vmem:[#allocation2 + $0x9] sm:$0xff] }
 0x6e5   :  { %3431 = vst [vmem:[#allocation2 + $0x129] sm:$0xff] %v12896_v45  ;;  %4826 = vmatpush.msrb.mxu0 %v4104_v59  ;;  %v3374_v45 = vmax.f32 %v9764_v62, 0.0  ;;  %v4101_v59 = vld [vmem:[%s12821_s4 + $0x1a8] sm:$0xff]  ;;  %v3377_v62 = vmax.f32 %v9776_v44, 0.0  ;;  %v3379_v44 = vmax.f32 %v9790_v29, 0.0  ;;  %v4126_v29 = vld [vmem:[%s12821_s4 + $0x270] sm:$0xff] }
 0x6e6   :  { %3432 = vst [vmem:[#allocation2 + $0x139] sm:$0xff] %v13317_v51  ;;  %v3375_v51 = vmax.f32 %v9768_v17, 0.0  ;;  %4420 = vmatmul.f32.gmra.mxu2 %v3537_v11  ;;  %v4100_v17 = vld [vmem:[%s12821_s4 + $0x1a0] sm:$0xff]  ;;  %v3378_v11 = vmax.f32 %v9786_v52, 0.0  ;;  %v3381_v52 = vmax.f32 %v9798_v54, 0.0  ;;  %v4097_v54 = vld [vmem:[%s12821_s4 + $0x188] sm:$0xff] }
 0x6e7   :  { %3433 = vst [vmem:[#allocation2 + $0x141] sm:$0xff] %v12897_v50  ;;  %4827 = vmatpush.msrb.mxu0 %v4103_v8  ;;  %v3376_v50 = vmax.f32 %v9772_v63, 0.0  ;;  %v13319_v8 = vmax.f32 %v9760_v2, 0.0  ;;  %v4127_v63 = vld [vmem:[%s12821_s4 + $0x278] sm:$0xff] }
 0x6e8   :  { %3434 = vst [vmem:[#allocation2 + $0x151] sm:$0xff] %v3370_v21  ;;  %4629 = vmatmul.f32.gmra.mxu3 %v3601_v55  ;;  %5028 = vmatpush.msrb.mxu1 %v4127_v63  ;;  %v4099_v55 = vld [vmem:[%s12821_s4 + $0x198] sm:$0xff]  ;;  %v3603_v63 = vld [vmem:[#allocation2 + $0x22] sm:$0xff] }
 0x6e9   :  { %3435 = vst [vmem:[#allocation2 + $0x159] sm:$0xff] %v3371_v39  ;;  %4828 = vmatpush.msrb.mxu0 %v4102_v1  ;;  %v3382_v1 = vmax.f32 %v9802_v30, 0.0  ;;  %v3385_v30 = vmax.f32 %v9814_v28, 0.0  ;;  %v3389_v28 = vmax.f32 %v9836_v38, 0.0  ;;  %v3394_v38 = vmax.f32 %v9862_v61, 0.0 }
 0x6ea   :  { %3436 = vst [vmem:[#allocation2 + $0x169] sm:$0xff] %v13318_v43  ;;  %4211 = vmatmul.f32.gmra.mxu1 %v10153_v56  ;;  %v3380_v43 = vmax.f32 %v9794_v26, 0.0  ;;  %v3383_v26 = vmax.f32 %v9806_v33, 0.0  ;;  %v4096_v33 = vld [vmem:[%s12821_s4 + $0x180] sm:$0xff] }
 0x6eb   :  { %3437 = vst [vmem:[#allocation2 + $0x171] sm:$0xff] %v13319_v8  ;;  %4829 = vmatpush.msrb.mxu0 %v4101_v59  ;;  %5029 = vmatpush.msrb.mxu1 %v4126_v29  ;;  %v13320_v59 = vmax.f32 %v9694_v6, 0.0  ;;  %v3386_v8 = vmax.f32 %v9824_v20, 0.0  ;;  %v3387_v6 = vmax.f32 %v9828_v12, 0.0  ;;  %v13321_v20 = vmax.f32 %v9697_v46, 0.0 }
 0x6ec   :  { %3438 = vst [vmem:[#allocation2 + $0x181] sm:$0xff] %v3374_v45  ;;  %v4098_v45 = vld [vmem:[%s12821_s4 + $0x190] sm:$0xff]  ;;  %v3392_v12 = vmax.f32 %v9848_v53, 0.0  ;;  %v3397_v46 = vmax.f32 %v9874_v60, 0.0  ;;  %v13322_v53 = vld [vmem:[#allocation35_spill] sm:$0xff]  ;;  %v13328_v60 = vld [vmem:[#allocation82_spill] sm:$0xff] }
 0x6ed   :  { %3439 = vst [vmem:[#allocation2 + $0x189] sm:$0xff] %v3375_v51  ;;  %4830 = vmatpush.msrb.mxu0 %v4100_v17  ;;  %v3602_v51 = vld [vmem:[#allocation2 + $0x1a] sm:$0xff]  ;;  %v3390_v17 = vmax.f32 %v9840_v58, 0.0  ;;  %v3395_v58 = vmax.f32 %v9866_v41, 0.0  ;;  %v3604_v41 = vld [vmem:[#allocation2 + $0x32] sm:$0xff] }
 0x6ee   :  { %3440 = vst [vmem:[#allocation2 + $0x1c9] sm:$0xff] %v3376_v50  ;;  %v3474_v50 = vld [vmem:[#allocation2 + $0x18] sm:$0xff]  ;;  %4423 = vmatmul.f32.gmra.mxu2 %v13320_v59 }
 0x6ef   :  { %3441 = vst [vmem:[#allocation2 + $0x1d1] sm:$0xff] %v3377_v62  ;;  %4831 = vmatpush.msrb.mxu0 %v4099_v55  ;;  %v3384_v62 = vmax.f32 %v9810_v57, 0.0  ;;  %v3388_v57 = vmax.f32 %v9832_v23, 0.0  ;;  %v3393_v23 = vmax.f32 %v9852_v32, 0.0  ;;  %v3398_v55 = vmax.f32 %v13322_v53, 0.0  ;;  %v13323_v32 = vld [vmem:[#allocation79_spill] sm:$0xff] }
 0x6f0   :  { %3442 = vst [vmem:[#allocation2 + $0x1e1] sm:$0xff] %v3378_v11  ;;  %4632 = vmatmul.f32.gmra.mxu3 %v3602_v51  ;;  %v3391_v11 = vmax.f32 %v9844_v37, 0.0  ;;  %v3396_v37 = vmax.f32 %v9870_v47, 0.0  ;;  %v3476_v51 = vld [vmem:[#allocation2 + $0x30] sm:$0xff]  ;;  %v13330_v59 = vld [vmem:[#allocation38_spill] sm:$0xff]  ;;  %v3480_v53 = vld [vmem:[#allocation2 + $0x60] sm:$0xff] }
 0x6f1   :  { %3443 = vst [vmem:[#allocation2 + $0x1e9] sm:$0xff] %v3379_v44  ;;  %4832 = vmatpush.msrb.mxu0 %v4098_v45  ;;  %v3475_v44 = vld [vmem:[#allocation2 + $0x20] sm:$0xff]  ;;  %v13326_v45 = vld [vmem:[#allocation76_spill] sm:$0xff] }
 0x6f2   :  { %3444 = vst [vmem:[#allocation2 + $0x1f9] sm:$0xff] %v3380_v43  ;;  %4214 = vmatmul.f32.gmra.mxu1 %v3474_v50  ;;  %v3399_v43 = vmax.f32 %v13323_v32, 0.0  ;;  %v3400_v29 = vmax.f32 %v13326_v45, 0.0  ;;  %v3481_v32 = vld [vmem:[#allocation2 + $0x68] sm:$0xff]  ;;  %v3629_v10 = vld [vmem:[#allocation2 + $0x15a] sm:$0xff] }
 0x6f3   :  { %3445 = vst [vmem:[#allocation2 + $0x201] sm:$0xff] %v3381_v52  ;;  %4833 = vmatpush.msrb.mxu0 %v4097_v54  ;;  %v13324_v52 = vld [vmem:[#allocation77_spill] sm:$0xff]  ;;  %v13329_v54 = vld [vmem:[#allocation80_spill] sm:$0xff] }
 0x6f4   :  { %3446 = vst [vmem:[#allocation2 + $0x211] sm:$0xff] %v3382_v1  ;;  %v13325_v61 = vmax.f32 %v13324_v52, 0.0  ;;  %v13327_v1 = vld [vmem:[#allocation48_spill] sm:$0xff]  ;;  %v3482_v52 = vld [vmem:[#allocation2 + $0x78] sm:$0xff] }
 0x6f5   :  { %3447 = vst [vmem:[#allocation2 + $0x219] sm:$0xff] %v3383_v26  ;;  %4834 = vmatpush.msrb.mxu0 %v4096_v33  ;;  %v3401_v47 = vmax.f32 %v13327_v1, 0.0  ;;  %v3402_v26 = vmax.f32 %v13328_v60, 0.0  ;;  %v3611_v45 = vld [vmem:[#allocation2 + $0x82] sm:$0xff]  ;;  %v3484_v1 = vld [vmem:[#allocation2 + $0x90] sm:$0xff] }
 0x6f6   :  { %3448 = vst [vmem:[#allocation2 + $0x229] sm:$0xff] %v3384_v62  ;;  %4835 = vmatmul.f32.vlgmr.msrb.gmra.mxu0 %v3474_v50  ;;  %4426 = vmatmul.f32.gmra.mxu2 %v13321_v20  ;;  %v3403_v50 = vmax.f32 %v13329_v54, 0.0  ;;  %v3404_v62 = vmax.f32 %v13330_v59, 0.0  ;;  %v3477_v20 = vld [vmem:[#allocation2 + $0x38] sm:$0xff]  ;;  %v3614_v60 = vld [vmem:[#allocation2 + $0xaa] sm:$0xff]  ;;  %v13344_v54 = vmax.f32 %v10004_v25, 0.0 }
 0x6f7   :  { %3449 = vst [vmem:[#allocation2 + $0x231] sm:$0xff] %v3385_v30  ;;  %v13331_v30 = vld [vmem:[#allocation50_spill] sm:$0xff]  ;;  %v3487_v59 = vld [vmem:[#allocation2 + $0xb0] sm:$0xff] }
 0x6f8   :  { %3450 = vst [vmem:[#allocation2 + $0x241] sm:$0xff] %v3386_v8  ;;  %4635 = vmatmul.f32.gmra.mxu3 %v3603_v63  ;;  %v3405_v33 = vmax.f32 %v13331_v30, 0.0  ;;  %v4125_v8 = vld [vmem:[%s12821_s4 + $0x268] sm:$0xff]  ;;  %v4122_v25 = vld [vmem:[%s12821_s4 + $0x250] sm:$0xff] }
 0x6f9   :  { %3451 = vst [vmem:[#allocation2 + $0x249] sm:$0xff] %v3387_v6  ;;  %v13332_v6 = vld [vmem:[#allocation41_spill] sm:$0xff]  ;;  %5030 = vmatpush.msrb.mxu1 %v4125_v8  ;;  %v3616_v30 = vld [vmem:[#allocation2 + $0xc2] sm:$0xff] }
 0x6fa   :  { %3452 = vst [vmem:[#allocation2 + $0x259] sm:$0xff] %v3388_v57  ;;  %4217 = vmatmul.f32.gmra.mxu1 %v3475_v44  ;;  %v3406_v57 = vmax.f32 %v13332_v6, 0.0  ;;  %v3606_v63 = vld [vmem:[#allocation2 + $0x4a] sm:$0xff] }
 0x6fb   :  { %3453 = vst [vmem:[#allocation2 + $0x261] sm:$0xff] %v3389_v28  ;;  %v13333_v28 = vld [vmem:[#allocation74_spill] sm:$0xff] }
 0x6fc   :  { %3454 = vst [vmem:[#allocation2 + $0x271] sm:$0xff] %v3390_v17  ;;  %v13334_v17 = vmax.f32 %v13333_v28, 0.0 }
 0x6fd   :  { %3455 = vst [vmem:[#allocation2 + $0x279] sm:$0xff] %v3391_v11  ;;  %v3605_v11 = vld [vmem:[#allocation2 + $0x3a] sm:$0xff] }
 0x6fe   :  { %3456 = vst [vmem:[#allocation2 + $0x289] sm:$0xff] %v3392_v12  ;;  %4838 = vmatmul.f32.gmra.mxu0 %v3475_v44  ;;  %4429 = vmatmul.f32.gmra.mxu2 %v13325_v61  ;;  %v13335_v12 = vmax.f32 %v9712_v9, 0.0  ;;  %v13336_v44 = vmax.f32 %v9715_v13, 0.0  ;;  %v4124_v9 = vld [vmem:[%s12821_s4 + $0x260] sm:$0xff]  ;;  %v13338_v13 = vmax.f32 %v9933_v31, 0.0  ;;  %v13340_v61 = vmax.f32 %v9956_v0, 0.0 }
 0x6ff   :  { %3457 = vst [vmem:[#allocation2 + $0x291] sm:$0xff] %v3393_v23  ;;  %v3478_v23 = vld [vmem:[#allocation2 + $0x48] sm:$0xff]  ;;  %5031 = vmatpush.msrb.mxu1 %v4124_v9  ;;  %v13341_v31 = vmax.f32 %v9970_v34, 0.0  ;;  %v13342_v0 = vmax.f32 %v9982_v40, 0.0  ;;  %v13343_v34 = vmax.f32 %v9994_v36, 0.0  ;;  %v3488_v36 = vld [vmem:[#allocation2 + $0xc0] sm:$0xff] }
 0x700   :  { %3458 = vst [vmem:[#allocation2 + $0x2a1] sm:$0xff] %v3394_v38  ;;  %4638 = vmatmul.f32.gmra.mxu3 %v3604_v41  ;;  %v3607_v38 = vld [vmem:[#allocation2 + $0x52] sm:$0xff] }
 0x701   :  { %3459 = vst [vmem:[#allocation2 + $0x2a9] sm:$0xff] %v3395_v58  ;;  %v3479_v58 = vld [vmem:[#allocation2 + $0x50] sm:$0xff] }
 0x702   :  { %3460 = vst [vmem:[#allocation2 + $0x2b9] sm:$0xff] %v3396_v37  ;;  %4220 = vmatmul.f32.gmra.mxu1 %v3476_v51  ;;  %v13337_v37 = vmax.f32 %v9718_v22, 0.0  ;;  %v13339_v22 = vmax.f32 %v9942_v18, 0.0  ;;  %v3612_v41 = vld [vmem:[#allocation2 + $0x92] sm:$0xff] }
 0x703   :  { %3461 = vst [vmem:[#allocation2 + $0x2c1] sm:$0xff] %v3397_v46  ;;  %v3608_v46 = vld [vmem:[#allocation2 + $0x62] sm:$0xff]  ;;  %v4123_v18 = vld [vmem:[%s12821_s4 + $0x258] sm:$0xff] }
 0x704   :  { %3462 = vst [vmem:[#allocation2 + $0x2d1] sm:$0xff] %v3398_v55  ;;  %v3609_v55 = vld [vmem:[#allocation2 + $0x6a] sm:$0xff]  ;;  %5032 = vmatpush.msrb.mxu1 %v4123_v18 }
 0x705   :  { %3463 = vst [vmem:[#allocation2 + $0x2d9] sm:$0xff] %v3399_v43  ;;  %v3610_v43 = vld [vmem:[#allocation2 + $0x7a] sm:$0xff]  ;;  %v3492_v18 = vld [vmem:[#allocation2 + $0xf0] sm:$0xff] }
 0x706   :  { %3464 = vst [vmem:[#allocation2 + $0x2e9] sm:$0xff] %v3400_v29  ;;  %4841 = vmatmul.f32.gmra.mxu0 %v3476_v51  ;;  %4432 = vmatmul.f32.gmra.mxu2 %v13334_v17  ;;  %v3483_v29 = vld [vmem:[#allocation2 + $0x80] sm:$0xff]  ;;  %v3485_v51 = vld [vmem:[#allocation2 + $0x98] sm:$0xff]  ;;  %v13346_v17 = vmax.f32 %v10024_v5, 0.0 }
 0x707   :  { %3465 = vst [vmem:[#allocation2 + $0x2f1] sm:$0xff] %v3401_v47  ;;  %v3613_v47 = vld [vmem:[#allocation2 + $0x9a] sm:$0xff]  ;;  %5033 = vmatpush.msrb.mxu1 %v4122_v25  ;;  %v3494_v25 = vld [vmem:[#allocation2 + $0x108] sm:$0xff] }
 0x708   :  { %3466 = vst [vmem:[#allocation2 + $0x301] sm:$0xff] %v3402_v26  ;;  %4641 = vmatmul.f32.gmra.mxu3 %v3605_v11  ;;  %v3486_v26 = vld [vmem:[#allocation2 + $0xa8] sm:$0xff] }
 0x709   :  { %3467 = vst [vmem:[#allocation2 + $0x309] sm:$0xff] %v3403_v50  ;;  %v3615_v50 = vld [vmem:[#allocation2 + $0xb2] sm:$0xff]  ;;  %v3489_v11 = vld [vmem:[#allocation2 + $0xc8] sm:$0xff] }
 0x70a   :  { %3468 = vst [vmem:[#allocation2 + $0x319] sm:$0xff] %v3404_v62  ;;  %4223 = vmatmul.f32.gmra.mxu1 %v3477_v20  ;;  %v13345_v62 = vmax.f32 %v10014_v24, 0.0  ;;  %v3617_v24 = vld [vmem:[#allocation2 + $0xca] sm:$0xff] }
 0x70b   :  { %3469 = vst [vmem:[#allocation2 + $0x321] sm:$0xff] %v3405_v33 }
 0x70c   :  { %3470 = vst [vmem:[#allocation2 + $0x331] sm:$0xff] %v3406_v57 }
 0x70e   :  { %4844 = vmatmul.f32.gmra.mxu0 %v3477_v20  ;;  %4435 = vmatmul.f32.gmra.mxu2 %v13335_v12 }
 0x710   :  { %4644 = vmatmul.f32.gmra.mxu3 %v3606_v63 }
 0x712   :  { %4226 = vmatmul.f32.gmra.mxu1 %v3478_v23 }
 0x716   :  { %4847 = vmatmul.f32.gmra.mxu0 %v3478_v23  ;;  %4438 = vmatmul.f32.gmra.mxu2 %v13336_v44 }
 0x718   :  { %4647 = vmatmul.f32.gmra.mxu3 %v3607_v38  ;;  %v13347_v38 = vmax.f32 %v10034_v42, 0.0 }
 0x71a   :  { %4229 = vmatmul.f32.gmra.mxu1 %v3479_v58 }
 0x71e   :  { %4850 = vmatmul.f32.gmra.mxu0 %v3479_v58  ;;  %4441 = vmatmul.f32.gmra.mxu2 %v13337_v37  ;;  %v3618_v58 = vld [vmem:[#allocation2 + $0xda] sm:$0xff] }
 0x71f   :  { %v3490_v37 = vld [vmem:[#allocation2 + $0xd8] sm:$0xff] }
 0x720   :  { %4650 = vmatmul.f32.gmra.mxu3 %v3608_v46 }
 0x722   :  { %4232 = vmatmul.f32.gmra.mxu1 %v3480_v53 }
 0x726   :  { %4853 = vmatmul.f32.gmra.mxu0 %v3480_v53  ;;  %4444 = vmatmul.f32.gmra.mxu2 %v13338_v13 }
 0x728   :  { %4653 = vmatmul.f32.gmra.mxu3 %v3609_v55 }
 0x72a   :  { %4235 = vmatmul.f32.gmra.mxu1 %v3481_v32 }
 0x72e   :  { %4856 = vmatmul.f32.gmra.mxu0 %v3481_v32  ;;  %4447 = vmatmul.f32.gmra.mxu2 %v13339_v22  ;;  %v13348_v32 = vmax.f32 %v10043_v35, 0.0  ;;  %v3619_v22 = vld [vmem:[#allocation2 + $0xe2] sm:$0xff] }
 0x730   :  { %4656 = vmatmul.f32.gmra.mxu3 %v3610_v43  ;;  %v3491_v43 = vld [vmem:[#allocation2 + $0xe0] sm:$0xff] }
 0x732   :  { %4238 = vmatmul.f32.gmra.mxu1 %v3482_v52 }
 0x736   :  { %4859 = vmatmul.f32.gmra.mxu0 %v3482_v52  ;;  %4450 = vmatmul.f32.gmra.mxu2 %v13340_v61 }
 0x738   :  { %4659 = vmatmul.f32.gmra.mxu3 %v3611_v45 }
 0x73a   :  { %4241 = vmatmul.f32.gmra.mxu1 %v3483_v29 }
 0x73e   :  { %4862 = vmatmul.f32.gmra.mxu0 %v3483_v29  ;;  %4453 = vmatmul.f32.gmra.mxu2 %v13341_v31 }
 0x740   :  { %4662 = vmatmul.f32.gmra.mxu3 %v3612_v41  ;;  %v13349_v41 = vmax.f32 %v10052_v16, 0.0  ;;  %v13350_v16 = vmax.f32 %v10061_v3, 0.0 }
 0x742   :  { %4244 = vmatmul.f32.gmra.mxu1 %v3484_v1 }
 0x746   :  { %4865 = vmatmul.f32.gmra.mxu0 %v3484_v1  ;;  %4456 = vmatmul.f32.gmra.mxu2 %v13342_v0  ;;  %v3620_v1 = vld [vmem:[#allocation2 + $0xf2] sm:$0xff] }
 0x748   :  { %4665 = vmatmul.f32.gmra.mxu3 %v3613_v47 }
 0x74a   :  { %4247 = vmatmul.f32.gmra.mxu1 %v3485_v51 }
 0x74e   :  { %4868 = vmatmul.f32.gmra.mxu0 %v3485_v51  ;;  %4459 = vmatmul.f32.gmra.mxu2 %v13343_v34 }
 0x750   :  { %4668 = vmatmul.f32.gmra.mxu3 %v3614_v60  ;;  %v4121_v60 = vld [vmem:[%s12821_s4 + $0x248] sm:$0xff] }
 0x751   :  { %5034 = vmatpush.msrb.mxu1 %v4121_v60 }
 0x752   :  { %4250 = vmatmul.f32.gmra.mxu1 %v3486_v26 }
 0x756   :  { %4871 = vmatmul.f32.gmra.mxu0 %v3486_v26  ;;  %4462 = vmatmul.f32.gmra.mxu2 %v13344_v54  ;;  %v3621_v54 = vld [vmem:[#allocation2 + $0xfa] sm:$0xff] }
 0x758   :  { %4671 = vmatmul.f32.gmra.mxu3 %v3615_v50  ;;  %v3493_v50 = vld [vmem:[#allocation2 + $0xf8] sm:$0xff] }
 0x75a   :  { %4253 = vmatmul.f32.gmra.mxu1 %v3487_v59 }
 0x75e   :  { %4874 = vmatmul.f32.gmra.mxu0 %v3487_v59  ;;  %4465 = vmatmul.f32.gmra.mxu2 %v13345_v62 }
 0x75f   :  { %v4209_v40 = vpop.f32.mrf.mxu1 }
 0x760   :  { %4674 = vmatmul.f32.gmra.mxu3 %v3616_v30 }
 0x761   :  { %v4418_v33 = vpop.f32.mrf.mxu2 }
 0x762   :  { %4256 = vmatmul.f32.gmra.mxu1 %v3488_v36  ;;  %v4419_v8 = vadd.f32 %v4418_v33, %v4209_v40 }
 0x763   :  { %v4627_v6 = vpop.f32.mrf.mxu3 }
 0x764   :  { %v10276_v57 = vadd.f32 %v4627_v6, %v4419_v8  ;;  %v13351_v8 = vmax.f32 %v10070_v4, 0.0  ;;  %v3622_v6 = vld [vmem:[#allocation2 + $0x10a] sm:$0xff] }
 0x766   :  { %4877 = vmatmul.f32.gmra.mxu0 %v3488_v36  ;;  %4468 = vmatmul.f32.gmra.mxu2 %v13346_v17 }
 0x767   :  { %v4212_v28 = vpop.f32.mrf.mxu1 }
 0x768   :  { %4677 = vmatmul.f32.gmra.mxu3 %v3617_v24 }
 0x769   :  { %v4421_v20 = vpop.f32.mrf.mxu2 }
 0x76a   :  { %4259 = vmatmul.f32.gmra.mxu1 %v3489_v11  ;;  %v4422_v12 = vadd.f32 %v4421_v20, %v4212_v28 }
 0x76b   :  { %v4630_v63 = vpop.f32.mrf.mxu3 }
 0x76c   :  { %v10283_v23 = vadd.f32 %v4630_v63, %v4422_v12  ;;  %v13352_v12 = vmax.f32 %v9722_v15, 0.0  ;;  %v3623_v63 = vld [vmem:[#allocation2 + $0x112] sm:$0xff] }
 0x76e   :  { %4880 = vmatmul.f32.gmra.mxu0 %v3489_v11  ;;  %4471 = vmatmul.f32.gmra.mxu2 %v13347_v38 }
 0x76f   :  { %v4215_v44 = vpop.f32.mrf.mxu1 }
 0x770   :  { %4680 = vmatmul.f32.gmra.mxu3 %v3618_v58 }
 0x771   :  { %v4424_v5 = vpop.f32.mrf.mxu2 }
 0x772   :  { %4262 = vmatmul.f32.gmra.mxu1 %v3490_v37  ;;  %v4425_v53 = vadd.f32 %v4424_v5, %v4215_v44  ;;  %v3495_v44 = vld [vmem:[#allocation2 + $0x110] sm:$0xff] }
 0x773   :  { %v10287_v46 = vpop.f32.mrf.mxu0  ;;  %v4633_v9 = vpop.f32.mrf.mxu3 }
 0x774   :  { %v10289_v13 = vadd.f32 %v4633_v9, %v4425_v53  ;;  %v13353_v9 = vmax.f32 %v9726_v49, 0.0  ;;  %v13354_v49 = vmax.f32 %v9730_v14, 0.0 }
 0x776   :  { %4883 = vmatmul.f32.gmra.mxu0 %v3490_v37  ;;  %4474 = vmatmul.f32.gmra.mxu2 %v13348_v32  ;;  %v3496_v32 = vld [vmem:[#allocation2 + $0x120] sm:$0xff] }
 0x777   :  { %v4218_v55 = vpop.f32.mrf.mxu1 }
 0x778   :  { %4683 = vmatmul.f32.gmra.mxu3 %v3619_v22 }
 0x779   :  { %v4427_v52 = vpop.f32.mrf.mxu2 }
 0x77a   :  { %4265 = vmatmul.f32.gmra.mxu1 %v3491_v43  ;;  %v4428_v61 = vadd.f32 %v4427_v52, %v4218_v55  ;;  %v3624_v55 = vld [vmem:[#allocation2 + $0x122] sm:$0xff] }
 0x77b   :  { %v10293_v42 = vpop.f32.mrf.mxu0  ;;  %v4636_v45 = vpop.f32.mrf.mxu3 }
 0x77c   :  { %v10295_v29 = vadd.f32 %v4636_v45, %v4428_v61  ;;  %v4120_v45 = vld [vmem:[%s12821_s4 + $0x240] sm:$0xff] }
 0x77d   :  { %5035 = vmatpush.msrb.mxu1 %v4120_v45 }
 0x77e   :  { %4886 = vmatmul.f32.gmra.mxu0 %v3491_v43  ;;  %4477 = vmatmul.f32.gmra.mxu2 %v13349_v41  ;;  %v3625_v41 = vld [vmem:[#allocation2 + $0x12a] sm:$0xff] }
 0x77f   :  { %v4221_v31 = vpop.f32.mrf.mxu1 }
 0x780   :  { %4686 = vmatmul.f32.gmra.mxu3 %v3620_v1  ;;  %v3497_v1 = vld [vmem:[#allocation2 + $0x128] sm:$0xff] }
 0x781   :  { %v4430_v0 = vpop.f32.mrf.mxu2 }
 0x782   :  { %4268 = vmatmul.f32.gmra.mxu1 %v3492_v18  ;;  %v4431_v47 = vadd.f32 %v4430_v0, %v4221_v31 }
 0x783   :  { %v10299_v35 = vpop.f32.mrf.mxu0  ;;  %v4639_v51 = vpop.f32.mrf.mxu3 }
 0x784   :  { %v10301_v34 = vadd.f32 %v4639_v51, %v4431_v47 }
 0x786   :  { %4889 = vmatmul.f32.gmra.mxu0 %v3492_v18  ;;  %4480 = vmatmul.f32.gmra.mxu2 %v13350_v16  ;;  %v13355_v16 = vmax.f32 %v9734_v7, 0.0 }
 0x787   :  { %v4224_v26 = vpop.f32.mrf.mxu1 }
 0x788   :  { %4689 = vmatmul.f32.gmra.mxu3 %v3621_v54  ;;  %v3626_v54 = vld [vmem:[#allocation2 + $0x13a] sm:$0xff] }
 0x789   :  { %v4433_v40 = vpop.f32.mrf.mxu2 }
 0x78a   :  { %4271 = vmatmul.f32.gmra.mxu1 %v3493_v50  ;;  %v4434_v62 = vadd.f32 %v4433_v40, %v4224_v26 }
 0x78b   :  { %v10308_v59 = vpop.f32.mrf.mxu0  ;;  %v4642_v30 = vpop.f32.mrf.mxu3 }
 0x78c   :  { %v10310_v36 = vadd.f32 %v4642_v30, %v4434_v62 }
 0x78e   :  { %4892 = vmatmul.f32.gmra.mxu0 %v3493_v50  ;;  %4483 = vmatmul.f32.gmra.mxu2 %v13351_v8  ;;  %v3498_v50 = vld [vmem:[#allocation2 + $0x138] sm:$0xff] }
 0x78f   :  { %v4227_v33 = vpop.f32.mrf.mxu1 }
 0x790   :  { %4692 = vmatmul.f32.gmra.mxu3 %v3622_v6  ;;  %v13356_v6 = vmax.f32 %v9738_v19, 0.0 }
 0x791   :  { %v4436_v28 = vpop.f32.mrf.mxu2 }
 0x792   :  { %4274 = vmatmul.f32.gmra.mxu1 %v3494_v25  ;;  %v4437_v17 = vadd.f32 %v4436_v28, %v4227_v33  ;;  %v3499_v28 = vld [vmem:[#allocation2 + $0x140] sm:$0xff] }
 0x793   :  { %v10314_v3 = vpop.f32.mrf.mxu0  ;;  %v4645_v24 = vpop.f32.mrf.mxu3 }
 0x794   :  { %v10316_v11 = vadd.f32 %v4645_v24, %v4437_v17 }
 0x796   :  { %4895 = vmatmul.f32.gmra.mxu0 %v3494_v25  ;;  %4486 = vmatmul.f32.gmra.mxu2 %v13352_v12  ;;  %v3627_v25 = vld [vmem:[#allocation2 + $0x142] sm:$0xff] }
 0x797   :  { %v4230_v20 = vpop.f32.mrf.mxu1 }
 0x798   :  { %4695 = vmatmul.f32.gmra.mxu3 %v3623_v63 }
 0x799   :  { %v4439_v38 = vpop.f32.mrf.mxu2 }
 0x79a   :  { %4277 = vmatmul.f32.gmra.mxu1 %v3495_v44  ;;  %v4440_v58 = vadd.f32 %v4439_v38, %v4230_v20  ;;  %v3500_v38 = vld [vmem:[#allocation2 + $0x150] sm:$0xff] }
 0x79b   :  { %v10320_v4 = vpop.f32.mrf.mxu0  ;;  %v4648_v37 = vpop.f32.mrf.mxu3 }
 0x79c   :  { %v10322_v5 = vadd.f32 %v4648_v37, %v4440_v58 }
 0x79e   :  { %4898 = vmatmul.f32.gmra.mxu0 %v3495_v44  ;;  %4489 = vmatmul.f32.gmra.mxu2 %v13353_v9  ;;  %v3628_v44 = vld [vmem:[#allocation2 + $0x152] sm:$0xff] }
 0x79f   :  { %v4233_v53 = vpop.f32.mrf.mxu1 }
 0x7a0   :  { %4698 = vmatmul.f32.gmra.mxu3 %v3624_v55  ;;  %v4119_v55 = vld [vmem:[%s12821_s4 + $0x238] sm:$0xff] }
 0x7a1   :  { %v4442_v22 = vpop.f32.mrf.mxu2  ;;  %5036 = vmatpush.msrb.mxu1 %v4119_v55 }
 0x7a2   :  { %4280 = vmatmul.f32.gmra.mxu1 %v3496_v32  ;;  %v4443_v43 = vadd.f32 %v4442_v22, %v4233_v53 }
 0x7a3   :  { %v10326_v15 = vpop.f32.mrf.mxu0  ;;  %v4651_v52 = vpop.f32.mrf.mxu3 }
 0x7a4   :  { %v10328_v61 = vadd.f32 %v4651_v52, %v4443_v43 }
 0x7a6   :  { %4901 = vmatmul.f32.gmra.mxu0 %v3496_v32  ;;  %4492 = vmatmul.f32.gmra.mxu2 %v13354_v49 }
 0x7a7   :  { %v4236_v31 = vpop.f32.mrf.mxu1 }
 0x7a8   :  { %4701 = vmatmul.f32.gmra.mxu3 %v3625_v41  ;;  %v13357_v41 = vmax.f32 %v9756_v27, 0.0 }
 0x7a9   :  { %v4445_v0 = vpop.f32.mrf.mxu2 }
 0x7aa   :  { %4283 = vmatmul.f32.gmra.mxu1 %v3497_v1  ;;  %v4446_v47 = vadd.f32 %v4445_v0, %v4236_v31  ;;  %v3502_v0 = vld [vmem:[#allocation2 + $0x168] sm:$0xff] }
 0x7ab   :  { %v10335_v18 = vpop.f32.mrf.mxu0  ;;  %v4654_v51 = vpop.f32.mrf.mxu3 }
 0x7ac   :  { %v10337_v60 = vadd.f32 %v4654_v51, %v4446_v47 }
 0x7ae   :  { %4904 = vmatmul.f32.gmra.mxu0 %v3497_v1  ;;  %4495 = vmatmul.f32.gmra.mxu2 %v13355_v16  ;;  %v3630_v1 = vld [vmem:[#allocation2 + $0x16a] sm:$0xff] }
 0x7af   :  { %v4239_v26 = vpop.f32.mrf.mxu1 }
 0x7b0   :  { %4704 = vmatmul.f32.gmra.mxu3 %v3626_v54  ;;  %v13358_v54 = vmax.f32 %v9760_v2, 0.0 }
 0x7b1   :  { %v4448_v40 = vpop.f32.mrf.mxu2 }
 0x7b2   :  { %4286 = vmatmul.f32.gmra.mxu1 %v3498_v50  ;;  %v4449_v62 = vadd.f32 %v4448_v40, %v4239_v26  ;;  %v3503_v40 = vld [vmem:[#allocation2 + $0x170] sm:$0xff] }
 0x7b3   :  { %v10341_v14 = vpop.f32.mrf.mxu0  ;;  %v4657_v30 = vpop.f32.mrf.mxu3 }
 0x7b4   :  { %v10343_v33 = vadd.f32 %v4657_v30, %v4449_v62 }
 0x7b6   :  { %4907 = vmatmul.f32.gmra.mxu0 %v3498_v50  ;;  %4498 = vmatmul.f32.gmra.mxu2 %v13356_v6  ;;  %v3631_v50 = vld [vmem:[#allocation2 + $0x172] sm:$0xff] }
 0x7b7   :  { %v4242_v8 = vpop.f32.mrf.mxu1  ;;  %v3568_v6 = vld [vmem:[#allocation2 + $0x1b1] sm:$0xff] }
 0x7b8   :  { %4707 = vmatmul.f32.gmra.mxu3 %v3627_v25 }
 0x7b9   :  { %v4451_v17 = vpop.f32.mrf.mxu2 }
 0x7ba   :  { %4289 = vmatmul.f32.gmra.mxu1 %v3499_v28  ;;  %v4452_v24 = vadd.f32 %v4451_v17, %v4242_v8 }
 0x7bb   :  { %v10347_v7 = vpop.f32.mrf.mxu0  ;;  %v4660_v20 = vpop.f32.mrf.mxu3 }
 0x7bc   :  { %v10349_v12 = vadd.f32 %v4660_v20, %v4452_v24 }
 0x7be   :  { %4910 = vmatmul.f32.gmra.mxu0 %v3499_v28  ;;  %4501 = vmatmul.f32.gmra.mxu2 %v3370_v21  ;;  %v3501_v21 = vld [vmem:[#allocation2 + $0x158] sm:$0xff] }
 0x7bf   :  { %v4245_v63 = vpop.f32.mrf.mxu1  ;;  %v3632_v28 = vld [vmem:[#allocation2 + $0x1b2] sm:$0xff] }
 0x7c0   :  { %4710 = vmatmul.f32.gmra.mxu3 %v3628_v44 }
 0x7c1   :  { %v4454_v58 = vpop.f32.mrf.mxu2 }
 0x7c2   :  { %4292 = vmatmul.f32.gmra.mxu1 %v3500_v38  ;;  %v4455_v37 = vadd.f32 %v4454_v58, %v4245_v63  ;;  %v3694_v63 = vld [vmem:[#allocation2 + $0x180] sm:$0xff] }
 0x7c3   :  { %v10353_v19 = vpop.f32.mrf.mxu0  ;;  %v4663_v53 = vpop.f32.mrf.mxu3 }
 0x7c4   :  { %v10355_v9 = vadd.f32 %v4663_v53, %v4455_v37  ;;  %v4118_v37 = vld [vmem:[%s12821_s4 + $0x230] sm:$0xff]  ;;  %v3633_v53 = vld [vmem:[#allocation2 + $0x1ba] sm:$0xff] }
 0x7c5   :  { %5037 = vmatpush.msrb.mxu1 %v4118_v37 }
 0x7c6   :  { %4913 = vmatmul.f32.gmra.mxu0 %v3500_v38  ;;  %4504 = vmatmul.f32.gmra.mxu2 %v3371_v39  ;;  %v3569_v38 = vld [vmem:[#allocation2 + $0x1b9] sm:$0xff] }
 0x7c7   :  { %v4248_v32 = vpop.f32.mrf.mxu1 }
 0x7c8   :  { %4713 = vmatmul.f32.gmra.mxu3 %v3629_v10 }
 0x7c9   :  { %v4457_v43 = vpop.f32.mrf.mxu2 }
 0x7ca   :  { %4295 = vmatmul.f32.gmra.mxu1 %v3501_v21  ;;  %v4458_v52 = vadd.f32 %v4457_v43, %v4248_v32  ;;  %v3695_v43 = vld [vmem:[#allocation2 + $0x188] sm:$0xff] }
 0x7cb   :  { %v10362_v22 = vpop.f32.mrf.mxu0  ;;  %v4666_v45 = vpop.f32.mrf.mxu3 }
 0x7cc   :  { %v10364_v31 = vadd.f32 %v4666_v45, %v4458_v52 }
 0x7ce   :  { %4916 = vmatmul.f32.gmra.mxu0 %v3501_v21  ;;  %4507 = vmatmul.f32.gmra.mxu2 %v13357_v41 }
 0x7cf   :  { %v4251_v49 = vpop.f32.mrf.mxu1 }
 0x7d0   :  { %4716 = vmatmul.f32.gmra.mxu3 %v3630_v1  ;;  %v3634_v1 = vld [vmem:[#allocation2 + $0x1ca] sm:$0xff] }
 0x7d1   :  { %v4460_v39 = vpop.f32.mrf.mxu2 }
 0x7d2   :  { %4298 = vmatmul.f32.gmra.mxu1 %v3502_v0  ;;  %v4461_v47 = vadd.f32 %v4460_v39, %v4251_v49  ;;  %v3570_v49 = vld [vmem:[#allocation2 + $0x1c9] sm:$0xff] }
 0x7d3   :  { %v10368_v48 = vpop.f32.mrf.mxu0  ;;  %v4669_v51 = vpop.f32.mrf.mxu3 }
 0x7d4   :  { %v10370_v26 = vadd.f32 %v4669_v51, %v4461_v47 }
 0x7d6   :  { %4919 = vmatmul.f32.gmra.mxu0 %v3502_v0  ;;  %4510 = vmatmul.f32.gmra.mxu2 %v13358_v54  ;;  %v3506_v0 = vld [vmem:[#allocation2 + $0x1c8] sm:$0xff]  ;;  %v3571_v54 = vld [vmem:[#allocation2 + $0x1d1] sm:$0xff] }
 0x7d7   :  { %v4254_v16 = vpop.f32.mrf.mxu1 }
 0x7d8   :  { %4719 = vmatmul.f32.gmra.mxu3 %v3631_v50 }
 0x7d9   :  { %v4463_v62 = vpop.f32.mrf.mxu2 }
 0x7da   :  { %4301 = vmatmul.f32.gmra.mxu1 %v3503_v40  ;;  %v4464_v30 = vadd.f32 %v4463_v62, %v4254_v16  ;;  %v3507_v62 = vld [vmem:[#allocation2 + $0x1d0] sm:$0xff] }
 0x7db   :  { %v10374_v27 = vpop.f32.mrf.mxu0  ;;  %v4672_v8 = vpop.f32.mrf.mxu3 }
 0x7dc   :  { %v10376_v25 = vadd.f32 %v4672_v8, %v4464_v30 }
 0x7de   :  { %4922 = vmatmul.f32.gmra.mxu0 %v3503_v40  ;;  %4513 = vmatmul.f32.gmra.mxu2 %v3568_v6  ;;  %v3635_v40 = vld [vmem:[#allocation2 + $0x1d2] sm:$0xff] }
 0x7df   :  { %v4257_v17 = vpop.f32.mrf.mxu1 }
 0x7e0   :  { %4722 = vmatmul.f32.gmra.mxu3 %v3632_v28 }
 0x7e1   :  { %v4466_v2 = vpop.f32.mrf.mxu2 }
 0x7e2   :  { %4304 = vmatmul.f32.gmra.mxu1 %v10153_v56  ;;  %v4467_v20 = vadd.f32 %v4466_v2, %v4257_v17  ;;  %v3572_v2 = vld [vmem:[#allocation2 + $0x1e1] sm:$0xff] }
 0x7e3   :  { %v10378_v24 = vpop.f32.mrf.mxu0  ;;  %v4675_v44 = vpop.f32.mrf.mxu3 }
 0x7e4   :  { %v10381_v58 = vadd.f32 %v4675_v44, %v4467_v20  ;;  %v3508_v44 = vld [vmem:[#allocation2 + $0x1e0] sm:$0xff] }
 0x7e6   :  { %4925 = vmatmul.f32.gmra.mxu0 %v3694_v63  ;;  %4516 = vmatmul.f32.gmra.mxu2 %v3569_v38  ;;  %v3636_v63 = vld [vmem:[#allocation2 + $0x1e2] sm:$0xff] }
 0x7e7   :  { %v4260_v55 = vpop.f32.mrf.mxu1 }
 0x7e8   :  { %4725 = vmatmul.f32.gmra.mxu3 %v3633_v53 }
 0x7e9   :  { %v4469_v10 = vpop.f32.mrf.mxu2 }
 0x7ea   :  { %4307 = vmatmul.f32.gmra.mxu1 %v10153_v56  ;;  %v4470_v21 = vadd.f32 %v4469_v10, %v4260_v55 }
 0x7eb   :  { %v10386_v32 = vpop.f32.mrf.mxu0  ;;  %v4678_v52 = vpop.f32.mrf.mxu3 }
 0x7ec   :  { %v10389_v45 = vadd.f32 %v4678_v52, %v4470_v21  ;;  %v4117_v21 = vld [vmem:[%s12821_s4 + $0x228] sm:$0xff] }
 0x7ed   :  { %5038 = vmatpush.msrb.mxu1 %v4117_v21 }
 0x7ee   :  { %4928 = vmatmul.f32.gmra.mxu0 %v3695_v43  ;;  %4519 = vmatmul.f32.gmra.mxu2 %v3570_v49  ;;  %v3573_v43 = vld [vmem:[#allocation2 + $0x1e9] sm:$0xff] }
 0x7ef   :  { %v4263_v41 = vpop.f32.mrf.mxu1  ;;  %v3637_v49 = vld [vmem:[#allocation2 + $0x1ea] sm:$0xff] }
 0x7f0   :  { %4728 = vmatmul.f32.gmra.mxu3 %v3634_v1 }
 0x7f1   :  { %v4472_v47 = vpop.f32.mrf.mxu2 }
 0x7f2   :  { %4310 = vmatmul.f32.gmra.mxu1 %v3506_v0  ;;  %v4473_v51 = vadd.f32 %v4472_v47, %v4263_v41  ;;  %v3509_v41 = vld [vmem:[#allocation2 + $0x1e8] sm:$0xff] }
 0x7f3   :  { %v10391_v39 = vpop.f32.mrf.mxu0  ;;  %v4681_v16 = vpop.f32.mrf.mxu3 }
 0x7f4   :  { %v10393_v56 = vadd.f32 %v4681_v16, %v4473_v51 }
 0x7f6   :  { %4931 = vmatmul.f32.gmra.mxu0 %v3506_v0  ;;  %4522 = vmatmul.f32.gmra.mxu2 %v3571_v54  ;;  %v3574_v54 = vld [vmem:[#allocation2 + $0x1f9] sm:$0xff] }
 0x7f7   :  { %v4266_v50 = vpop.f32.mrf.mxu1 }
 0x7f8   :  { %4731 = vmatmul.f32.gmra.mxu3 %v3635_v40  ;;  %v3638_v40 = vld [vmem:[#allocation2 + $0x1fa] sm:$0xff] }
 0x7f9   :  { %v4475_v8 = vpop.f32.mrf.mxu2 }
 0x7fa   :  { %4313 = vmatmul.f32.gmra.mxu1 %v3507_v62  ;;  %v4476_v6 = vadd.f32 %v4475_v8, %v4266_v50 }
 0x7fb   :  { %v10395_v30 = vpop.f32.mrf.mxu0  ;;  %v4684_v28 = vpop.f32.mrf.mxu3 }
 0x7fc   :  { %v10397_v17 = vadd.f32 %v4684_v28, %v4476_v6 }
 0x7fe   :  { %4934 = vmatmul.f32.gmra.mxu0 %v3507_v62  ;;  %4525 = vmatmul.f32.gmra.mxu2 %v3572_v2  ;;  %v3510_v62 = vld [vmem:[#allocation2 + $0x1f8] sm:$0xff] }
 0x7ff   :  { %v4269_v20 = vpop.f32.mrf.mxu1 }
 0x800   :  { %4734 = vmatmul.f32.gmra.mxu3 %v3636_v63  ;;  %v3575_v63 = vld [vmem:[#allocation2 + $0x201] sm:$0xff] }
 0x801   :  { %v4478_v37 = vpop.f32.mrf.mxu2 }
 0x802   :  { %4316 = vmatmul.f32.gmra.mxu1 %v3508_v44  ;;  %v4479_v53 = vadd.f32 %v4478_v37, %v4269_v20  ;;  %v3639_v37 = vld [vmem:[#allocation2 + $0x202] sm:$0xff] }
 0x803   :  { %v10399_v38 = vpop.f32.mrf.mxu0  ;;  %v4687_v55 = vpop.f32.mrf.mxu3 }
 0x804   :  { %v10401_v10 = vadd.f32 %v4687_v55, %v4479_v53  ;;  %v3511_v53 = vld [vmem:[#allocation2 + $0x200] sm:$0xff] }
 0x806   :  { %4937 = vmatmul.f32.gmra.mxu0 %v3508_v44  ;;  %4528 = vmatmul.f32.gmra.mxu2 %v3573_v43 }
 0x807   :  { %v4272_v52 = vpop.f32.mrf.mxu1 }
 0x808   :  { %4737 = vmatmul.f32.gmra.mxu3 %v3637_v49 }
 0x809   :  { %v4481_v0 = vpop.f32.mrf.mxu2 }
 0x80a   :  { %4319 = vmatmul.f32.gmra.mxu1 %v3509_v41  ;;  %v4482_v47 = vadd.f32 %v4481_v0, %v4272_v52 }
 0x80b   :  { %v10406_v1 = vpop.f32.mrf.mxu0  ;;  %v4690_v51 = vpop.f32.mrf.mxu3 }
 0x80c   :  { %v10408_v16 = vadd.f32 %v4690_v51, %v4482_v47  ;;  %v3640_v47 = vld [vmem:[#allocation2 + $0x212] sm:$0xff] }
 0x80d   :  { %v3512_v51 = vld [vmem:[#allocation2 + $0x210] sm:$0xff] }
 0x80e   :  { %4940 = vmatmul.f32.gmra.mxu0 %v3509_v41  ;;  %4531 = vmatmul.f32.gmra.mxu2 %v3574_v54  ;;  %v3576_v41 = vld [vmem:[#allocation2 + $0x211] sm:$0xff] }
 0x80f   :  { %v4275_v50 = vpop.f32.mrf.mxu1 }
 0x810   :  { %4740 = vmatmul.f32.gmra.mxu3 %v3638_v40 }
 0x811   :  { %v4484_v6 = vpop.f32.mrf.mxu2 }
 0x812   :  { %4322 = vmatmul.f32.gmra.mxu1 %v3510_v62  ;;  %v4485_v28 = vadd.f32 %v4484_v6, %v4275_v50 }
 0x813   :  { %v10410_v8 = vpop.f32.mrf.mxu0  ;;  %v4693_v2 = vpop.f32.mrf.mxu3 }
 0x814   :  { %v10412_v20 = vadd.f32 %v4693_v2, %v4485_v28  ;;  %v4116_v28 = vld [vmem:[%s12821_s4 + $0x220] sm:$0xff] }
 0x815   :  { %v3577_v2 = vld [vmem:[#allocation2 + $0x219] sm:$0xff]  ;;  %5039 = vmatpush.msrb.mxu1 %v4116_v28 }
 0x816   :  { %4943 = vmatmul.f32.gmra.mxu0 %v3510_v62  ;;  %4534 = vmatmul.f32.gmra.mxu2 %v3575_v63 }
 0x817   :  { %v4278_v44 = vpop.f32.mrf.mxu1 }
 0x818   :  { %4743 = vmatmul.f32.gmra.mxu3 %v3639_v37  ;;  %v3513_v37 = vld [vmem:[#allocation2 + $0x218] sm:$0xff] }
 0x819   :  { %v4487_v21 = vpop.f32.mrf.mxu2 }
 0x81a   :  { %4325 = vmatmul.f32.gmra.mxu1 %v3511_v53  ;;  %v4488_v43 = vadd.f32 %v4487_v21, %v4278_v44  ;;  %v3641_v44 = vld [vmem:[#allocation2 + $0x21a] sm:$0xff] }
 0x81b   :  { %v10414_v55 = vpop.f32.mrf.mxu0  ;;  %v4696_v52 = vpop.f32.mrf.mxu3 }
 0x81c   :  { %v10416_v49 = vadd.f32 %v4696_v52, %v4488_v43 }
 0x81e   :  { %4946 = vmatmul.f32.gmra.mxu0 %v3511_v53  ;;  %4537 = vmatmul.f32.gmra.mxu2 %v3576_v41 }
 0x81f   :  { %v4281_v0 = vpop.f32.mrf.mxu1 }
 0x820   :  { %4746 = vmatmul.f32.gmra.mxu3 %v3640_v47 }
 0x821   :  { %v4490_v50 = vpop.f32.mrf.mxu2 }
 0x822   :  { %4328 = vmatmul.f32.gmra.mxu1 %v3512_v51  ;;  %v4491_v40 = vadd.f32 %v4490_v50, %v4281_v0  ;;  %v3578_v0 = vld [vmem:[#allocation2 + $0x229] sm:$0xff] }
 0x823   :  { %v10418_v54 = vpop.f32.mrf.mxu0  ;;  %v4699_v62 = vpop.f32.mrf.mxu3  ;;  %v3514_v50 = vld [vmem:[#allocation2 + $0x228] sm:$0xff] }
 0x824   :  { %v10420_v6 = vadd.f32 %v4699_v62, %v4491_v40 }
 0x826   :  { %4949 = vmatmul.f32.gmra.mxu0 %v3512_v51  ;;  %13359 = vst [vmem:[#allocation53_spill] sm:$0xff] %v10420_v6  ;;  %4540 = vmatmul.f32.gmra.mxu2 %v3577_v2  ;;  %v3642_v51 = vld [vmem:[#allocation2 + $0x22a] sm:$0xff] }
 0x827   :  { %v4284_v63 = vpop.f32.mrf.mxu1 }
 0x828   :  { %4749 = vmatmul.f32.gmra.mxu3 %v3641_v44 }
 0x829   :  { %v4493_v21 = vpop.f32.mrf.mxu2 }
 0x82a   :  { %4331 = vmatmul.f32.gmra.mxu1 %v3513_v37  ;;  %v4494_v43 = vadd.f32 %v4493_v21, %v4284_v63  ;;  %v3579_v63 = vld [vmem:[#allocation2 + $0x231] sm:$0xff] }
 0x82b   :  { %v10425_v53 = vpop.f32.mrf.mxu0  ;;  %v4702_v52 = vpop.f32.mrf.mxu3 }
 0x82c   :  { %v10427_v41 = vadd.f32 %v4702_v52, %v4494_v43  ;;  %v3515_v43 = vld [vmem:[#allocation2 + $0x230] sm:$0xff] }
 0x82e   :  { %4952 = vmatmul.f32.gmra.mxu0 %v3513_v37  ;;  %13360 = vst [vmem:[#allocation44_spill] sm:$0xff] %v10427_v41  ;;  %4543 = vmatmul.f32.gmra.mxu2 %v3578_v0  ;;  %v3643_v37 = vld [vmem:[#allocation2 + $0x232] sm:$0xff] }
 0x82f   :  { %v4287_v47 = vpop.f32.mrf.mxu1 }
 0x830   :  { %4752 = vmatmul.f32.gmra.mxu3 %v3642_v51 }
 0x831   :  { %v4496_v62 = vpop.f32.mrf.mxu2 }
 0x832   :  { %4334 = vmatmul.f32.gmra.mxu1 %v3514_v50  ;;  %v4497_v28 = vadd.f32 %v4496_v62, %v4287_v47  ;;  %v3580_v47 = vld [vmem:[#allocation2 + $0x241] sm:$0xff] }
 0x833   :  { %v10429_v40 = vpop.f32.mrf.mxu0  ;;  %v4705_v2 = vpop.f32.mrf.mxu3 }
 0x834   :  { %13361 = vst [vmem:[#allocation56_spill] sm:$0xff] %v10429_v40  ;;  %v10431_v44 = vadd.f32 %v4705_v2, %v4497_v28  ;;  %v3516_v28 = vld [vmem:[#allocation2 + $0x240] sm:$0xff] }
 0x836   :  { %4955 = vmatmul.f32.gmra.mxu0 %v3514_v50  ;;  %13362 = vst [vmem:[#allocation47_spill] sm:$0xff] %v10431_v44  ;;  %4546 = vmatmul.f32.gmra.mxu2 %v3579_v63  ;;  %v3644_v50 = vld [vmem:[#allocation2 + $0x242] sm:$0xff] }
 0x837   :  { %v4290_v21 = vpop.f32.mrf.mxu1 }
 0x838   :  { %4755 = vmatmul.f32.gmra.mxu3 %v3643_v37 }
 0x839   :  { %v4499_v0 = vpop.f32.mrf.mxu2 }
 0x83a   :  { %4337 = vmatmul.f32.gmra.mxu1 %v3515_v43  ;;  %v4500_v51 = vadd.f32 %v4499_v0, %v4290_v21  ;;  %v3581_v21 = vld [vmem:[#allocation2 + $0x249] sm:$0xff] }
 0x83b   :  { %v10433_v52 = vpop.f32.mrf.mxu0  ;;  %v4708_v41 = vpop.f32.mrf.mxu3  ;;  %v3645_v0 = vld [vmem:[#allocation2 + $0x24a] sm:$0xff] }
 0x83c   :  { %13363 = vst [vmem:[#allocation59_spill] sm:$0xff] %v10433_v52  ;;  %v10435_v40 = vadd.f32 %v4708_v41, %v4500_v51  ;;  %v4115_v41 = vld [vmem:[%s12821_s4 + $0x218] sm:$0xff]  ;;  %v3517_v51 = vld [vmem:[#allocation2 + $0x248] sm:$0xff] }
 0x83d   :  { %5040 = vmatpush.msrb.mxu1 %v4115_v41 }
 0x83e   :  { %4958 = vmatmul.f32.gmra.mxu0 %v3515_v43  ;;  %13364 = vst [vmem:[#allocation51_spill] sm:$0xff] %v10435_v40  ;;  %4549 = vmatmul.f32.gmra.mxu2 %v3580_v47  ;;  %v3518_v40 = vld [vmem:[#allocation2 + $0x258] sm:$0xff] }
 0x83f   :  { %v4293_v62 = vpop.f32.mrf.mxu1 }
 0x840   :  { %4758 = vmatmul.f32.gmra.mxu3 %v3644_v50 }
 0x841   :  { %v4502_v63 = vpop.f32.mrf.mxu2 }
 0x842   :  { %4340 = vmatmul.f32.gmra.mxu1 %v3516_v28  ;;  %v4503_v37 = vadd.f32 %v4502_v63, %v4293_v62 }
 0x843   :  { %v10437_v2 = vpop.f32.mrf.mxu0  ;;  %v4711_v44 = vpop.f32.mrf.mxu3 }
 0x844   :  { %13365 = vst [vmem:[#allocation61_spill] sm:$0xff] %v10437_v2  ;;  %v10439_v52 = vadd.f32 %v4711_v44, %v4503_v37 }
 0x846   :  { %4961 = vmatmul.f32.gmra.mxu0 %v3516_v28  ;;  %13366 = vst [vmem:[#allocation54_spill] sm:$0xff] %v10439_v52  ;;  %4552 = vmatmul.f32.gmra.mxu2 %v3581_v21  ;;  %v3582_v28 = vld [vmem:[#allocation2 + $0x259] sm:$0xff] }
 0x847   :  { %v4296_v43 = vpop.f32.mrf.mxu1  ;;  %v3646_v52 = vld [vmem:[#allocation2 + $0x25a] sm:$0xff] }
 0x848   :  { %4761 = vmatmul.f32.gmra.mxu3 %v3645_v0 }
 0x849   :  { %v4505_v50 = vpop.f32.mrf.mxu2 }
 0x84a   :  { %4343 = vmatmul.f32.gmra.mxu1 %v3517_v51  ;;  %v4506_v62 = vadd.f32 %v4505_v50, %v4296_v43  ;;  %v3583_v43 = vld [vmem:[#allocation2 + $0x261] sm:$0xff] }
 0x84b   :  { %v10444_v47 = vpop.f32.mrf.mxu0  ;;  %v4714_v63 = vpop.f32.mrf.mxu3 }
 0x84c   :  { %13367 = vst [vmem:[#allocation63_spill] sm:$0xff] %v10444_v47  ;;  %v10446_v44 = vadd.f32 %v4714_v63, %v4506_v62  ;;  %v3519_v62 = vld [vmem:[#allocation2 + $0x260] sm:$0xff] }
 0x84e   :  { %4964 = vmatmul.f32.gmra.mxu0 %v3517_v51  ;;  %13368 = vst [vmem:[#allocation57_spill] sm:$0xff] %v10446_v44  ;;  %4555 = vmatmul.f32.gmra.mxu2 %v3582_v28  ;;  %v3647_v51 = vld [vmem:[#allocation2 + $0x262] sm:$0xff] }
 0x84f   :  { %v4299_v37 = vpop.f32.mrf.mxu1 }
 0x850   :  { %4764 = vmatmul.f32.gmra.mxu3 %v3646_v52 }
 0x851   :  { %v4508_v21 = vpop.f32.mrf.mxu2 }
 0x852   :  { %4346 = vmatmul.f32.gmra.mxu1 %v3518_v40  ;;  %v4509_v0 = vadd.f32 %v4508_v21, %v4299_v37  ;;  %v3584_v37 = vld [vmem:[#allocation2 + $0x271] sm:$0xff] }
 0x853   :  { %v10448_v41 = vpop.f32.mrf.mxu0  ;;  %v4717_v2 = vpop.f32.mrf.mxu3 }
 0x854   :  { %13369 = vst [vmem:[#allocation5_spill] sm:$0xff] %v10448_v41  ;;  %v10450_v47 = vadd.f32 %v4717_v2, %v4509_v0  ;;  %v3520_v2 = vld [vmem:[#allocation2 + $0x270] sm:$0xff] }
 0x856   :  { %4967 = vmatmul.f32.gmra.mxu0 %v3518_v40  ;;  %13370 = vst [vmem:[#allocation3_spill] sm:$0xff] %v10450_v47  ;;  %4558 = vmatmul.f32.gmra.mxu2 %v3583_v43  ;;  %v3648_v40 = vld [vmem:[#allocation2 + $0x272] sm:$0xff] }
 0x857   :  { %v4302_v50 = vpop.f32.mrf.mxu1 }
 0x858   :  { %4767 = vmatmul.f32.gmra.mxu3 %v3647_v51 }
 0x859   :  { %v4511_v28 = vpop.f32.mrf.mxu2 }
 0x85a   :  { %4349 = vmatmul.f32.gmra.mxu1 %v3519_v62  ;;  %v4512_v52 = vadd.f32 %v4511_v28, %v4302_v50  ;;  %v3585_v50 = vld [vmem:[#allocation2 + $0x279] sm:$0xff] }
 0x85b   :  { %v10452_v63 = vpop.f32.mrf.mxu0  ;;  %v4720_v44 = vpop.f32.mrf.mxu3  ;;  %v3649_v28 = vld [vmem:[#allocation2 + $0x27a] sm:$0xff] }
 0x85c   :  { %13371 = vst [vmem:[#allocation6_spill] sm:$0xff] %v10452_v63  ;;  %v10454_v41 = vadd.f32 %v4720_v44, %v4512_v52  ;;  %v4114_v44 = vld [vmem:[%s12821_s4 + $0x210] sm:$0xff]  ;;  %v3521_v52 = vld [vmem:[#allocation2 + $0x278] sm:$0xff] }
 0x85d   :  { %5041 = vmatpush.msrb.mxu1 %v4114_v44 }
 0x85e   :  { %4970 = vmatmul.f32.gmra.mxu0 %v3519_v62  ;;  %13372 = vst [vmem:[#allocation4_spill] sm:$0xff] %v10454_v41  ;;  %4561 = vmatmul.f32.gmra.mxu2 %v3584_v37  ;;  %v3522_v41 = vld [vmem:[#allocation2 + $0x288] sm:$0xff] }
 0x85f   :  { %v4305_v21 = vpop.f32.mrf.mxu1 }
 0x860   :  { %4770 = vmatmul.f32.gmra.mxu3 %v3648_v40 }
 0x861   :  { %v4514_v43 = vpop.f32.mrf.mxu2 }
 0x862   :  { %4352 = vmatmul.f32.gmra.mxu1 %v3520_v2  ;;  %v4515_v51 = vadd.f32 %v4514_v43, %v4305_v21 }
 0x863   :  { %v10456_v0 = vpop.f32.mrf.mxu0  ;;  %v4723_v47 = vpop.f32.mrf.mxu3 }
 0x864   :  { %13373 = vst [vmem:[#allocation7_spill] sm:$0xff] %v10456_v0  ;;  %v10458_v63 = vadd.f32 %v4723_v47, %v4515_v51 }
 0x866   :  { %4973 = vmatmul.f32.gmra.mxu0 %v3520_v2  ;;  %13374 = vst [vmem:[#allocation8_spill] sm:$0xff] %v10458_v63  ;;  %4564 = vmatmul.f32.gmra.mxu2 %v3585_v50  ;;  %v3586_v2 = vld [vmem:[#allocation2 + $0x289] sm:$0xff] }
 0x867   :  { %v4308_v62 = vpop.f32.mrf.mxu1  ;;  %v3650_v63 = vld [vmem:[#allocation2 + $0x28a] sm:$0xff] }
 0x868   :  { %4773 = vmatmul.f32.gmra.mxu3 %v3649_v28 }
 0x869   :  { %v4517_v40 = vpop.f32.mrf.mxu2 }
 0x86a   :  { %4355 = vmatmul.f32.gmra.mxu1 %v3521_v52  ;;  %v4518_v21 = vadd.f32 %v4517_v40, %v4308_v62  ;;  %v3587_v62 = vld [vmem:[#allocation2 + $0x291] sm:$0xff] }
 0x86b   :  { %v10463_v37 = vpop.f32.mrf.mxu0  ;;  %v4726_v43 = vpop.f32.mrf.mxu3 }
 0x86c   :  { %13375 = vst [vmem:[#allocation9_spill] sm:$0xff] %v10463_v37  ;;  %v10465_v47 = vadd.f32 %v4726_v43, %v4518_v21  ;;  %v3523_v21 = vld [vmem:[#allocation2 + $0x290] sm:$0xff] }
 0x86e   :  { %4976 = vmatmul.f32.gmra.mxu0 %v3521_v52  ;;  %13376 = vst [vmem:[#allocation10_spill] sm:$0xff] %v10465_v47  ;;  %4567 = vmatmul.f32.gmra.mxu2 %v3586_v2  ;;  %v3651_v52 = vld [vmem:[#allocation2 + $0x292] sm:$0xff] }
 0x86f   :  { %v4311_v51 = vpop.f32.mrf.mxu1 }
 0x870   :  { %4776 = vmatmul.f32.gmra.mxu3 %v3650_v63 }
 0x871   :  { %v4520_v50 = vpop.f32.mrf.mxu2 }
 0x872   :  { %4358 = vmatmul.f32.gmra.mxu1 %v3522_v41  ;;  %v4521_v28 = vadd.f32 %v4520_v50, %v4311_v51  ;;  %v3588_v51 = vld [vmem:[#allocation2 + $0x2a1] sm:$0xff] }
 0x873   :  { %v10467_v44 = vpop.f32.mrf.mxu0  ;;  %v4729_v0 = vpop.f32.mrf.mxu3 }
 0x874   :  { %13377 = vst [vmem:[#allocation11_spill] sm:$0xff] %v10467_v44  ;;  %v10469_v37 = vadd.f32 %v4729_v0, %v4521_v28  ;;  %v3524_v0 = vld [vmem:[#allocation2 + $0x2a0] sm:$0xff] }
 0x876   :  { %4979 = vmatmul.f32.gmra.mxu0 %v3522_v41  ;;  %13378 = vst [vmem:[#allocation12_spill] sm:$0xff] %v10469_v37  ;;  %4570 = vmatmul.f32.gmra.mxu2 %v3587_v62  ;;  %v3652_v41 = vld [vmem:[#allocation2 + $0x2a2] sm:$0xff] }
 0x877   :  { %v4314_v40 = vpop.f32.mrf.mxu1 }
 0x878   :  { %4779 = vmatmul.f32.gmra.mxu3 %v3651_v52 }
 0x879   :  { %v4523_v2 = vpop.f32.mrf.mxu2 }
 0x87a   :  { %4361 = vmatmul.f32.gmra.mxu1 %v3523_v21  ;;  %v4524_v63 = vadd.f32 %v4523_v2, %v4314_v40  ;;  %v3589_v40 = vld [vmem:[#allocation2 + $0x2a9] sm:$0xff] }
 0x87b   :  { %v10471_v43 = vpop.f32.mrf.mxu0  ;;  %v4732_v47 = vpop.f32.mrf.mxu3  ;;  %v3653_v2 = vld [vmem:[#allocation2 + $0x2aa] sm:$0xff] }
 0x87c   :  { %13379 = vst [vmem:[#allocation13_spill] sm:$0xff] %v10471_v43  ;;  %v10473_v44 = vadd.f32 %v4732_v47, %v4524_v63  ;;  %v4113_v47 = vld [vmem:[%s12821_s4 + $0x208] sm:$0xff] }
 0x87d   :  { %5042 = vmatpush.msrb.mxu1 %v4113_v47  ;;  %v3525_v63 = vld [vmem:[#allocation2 + $0x2a8] sm:$0xff] }
 0x87e   :  { %4982 = vmatmul.f32.gmra.mxu0 %v3523_v21  ;;  %13380 = vst [vmem:[#allocation14_spill] sm:$0xff] %v10473_v44  ;;  %4573 = vmatmul.f32.gmra.mxu2 %v3588_v51  ;;  %v3526_v44 = vld [vmem:[#allocation2 + $0x2b8] sm:$0xff] }
 0x87f   :  { %v4317_v50 = vpop.f32.mrf.mxu1 }
 0x880   :  { %4782 = vmatmul.f32.gmra.mxu3 %v3652_v41 }
 0x881   :  { %v4526_v62 = vpop.f32.mrf.mxu2 }
 0x882   :  { %4364 = vmatmul.f32.gmra.mxu1 %v3524_v0  ;;  %v4527_v52 = vadd.f32 %v4526_v62, %v4317_v50 }
 0x883   :  { %v10475_v28 = vpop.f32.mrf.mxu0  ;;  %v4735_v37 = vpop.f32.mrf.mxu3 }
 0x884   :  { %13381 = vst [vmem:[#allocation15_spill] sm:$0xff] %v10475_v28  ;;  %v10477_v43 = vadd.f32 %v4735_v37, %v4527_v52 }
 0x886   :  { %4985 = vmatmul.f32.gmra.mxu0 %v3524_v0  ;;  %13382 = vst [vmem:[#allocation16_spill] sm:$0xff] %v10477_v43  ;;  %4576 = vmatmul.f32.gmra.mxu2 %v3589_v40  ;;  %v3590_v0 = vld [vmem:[#allocation2 + $0x2b9] sm:$0xff] }
 0x887   :  { %v4320_v21 = vpop.f32.mrf.mxu1  ;;  %v3654_v43 = vld [vmem:[#allocation2 + $0x2ba] sm:$0xff] }
 0x888   :  { %4785 = vmatmul.f32.gmra.mxu3 %v3653_v2 }
 0x889   :  { %v4529_v41 = vpop.f32.mrf.mxu2 }
 0x88a   :  { %4367 = vmatmul.f32.gmra.mxu1 %v3525_v63  ;;  %v4530_v50 = vadd.f32 %v4529_v41, %v4320_v21  ;;  %v3591_v21 = vld [vmem:[#allocation2 + $0x2c1] sm:$0xff] }
 0x88b   :  { %v10482_v51 = vpop.f32.mrf.mxu0  ;;  %v4738_v62 = vpop.f32.mrf.mxu3 }
 0x88c   :  { %13383 = vst [vmem:[#allocation17_spill] sm:$0xff] %v10482_v51  ;;  %v10484_v37 = vadd.f32 %v4738_v62, %v4530_v50  ;;  %v3527_v50 = vld [vmem:[#allocation2 + $0x2c0] sm:$0xff] }
 0x88e   :  { %4988 = vmatmul.f32.gmra.mxu0 %v3525_v63  ;;  %13384 = vst [vmem:[#allocation18_spill] sm:$0xff] %v10484_v37  ;;  %4579 = vmatmul.f32.gmra.mxu2 %v3590_v0  ;;  %v3655_v63 = vld [vmem:[#allocation2 + $0x2c2] sm:$0xff] }
 0x88f   :  { %v4323_v52 = vpop.f32.mrf.mxu1 }
 0x890   :  { %4788 = vmatmul.f32.gmra.mxu3 %v3654_v43 }
 0x891   :  { %v4532_v40 = vpop.f32.mrf.mxu2 }
 0x892   :  { %4370 = vmatmul.f32.gmra.mxu1 %v3526_v44  ;;  %v4533_v2 = vadd.f32 %v4532_v40, %v4323_v52  ;;  %v3592_v52 = vld [vmem:[#allocation2 + $0x2d1] sm:$0xff] }
 0x893   :  { %v10486_v47 = vpop.f32.mrf.mxu0  ;;  %v4741_v28 = vpop.f32.mrf.mxu3 }
 0x894   :  { %13385 = vst [vmem:[#allocation19_spill] sm:$0xff] %v10486_v47  ;;  %v10488_v51 = vadd.f32 %v4741_v28, %v4533_v2  ;;  %v3528_v28 = vld [vmem:[#allocation2 + $0x2d0] sm:$0xff] }
 0x896   :  { %4991 = vmatmul.f32.gmra.mxu0 %v3526_v44  ;;  %13386 = vst [vmem:[#allocation21_spill] sm:$0xff] %v10488_v51  ;;  %4582 = vmatmul.f32.gmra.mxu2 %v3591_v21  ;;  %v3656_v44 = vld [vmem:[#allocation2 + $0x2d2] sm:$0xff] }
 0x897   :  { %v4326_v41 = vpop.f32.mrf.mxu1 }
 0x898   :  { %4791 = vmatmul.f32.gmra.mxu3 %v3655_v63 }
 0x899   :  { %v4535_v0 = vpop.f32.mrf.mxu2 }
 0x89a   :  { %4373 = vmatmul.f32.gmra.mxu1 %v3527_v50  ;;  %v4536_v43 = vadd.f32 %v4535_v0, %v4326_v41  ;;  %v4143_v41 = vld [vmem:[%s12821_s4 + $0x2f8] sm:$0xff] }
 0x89b   :  { %v10490_v62 = vpop.f32.mrf.mxu0  ;;  %v4744_v37 = vpop.f32.mrf.mxu3  ;;  %v3593_v0 = vld [vmem:[#allocation2 + $0x2d9] sm:$0xff]  ;;  %5237 = vmatpush.msra.mxu2 %v4143_v41  ;;  %v4157_v41 = vld [vmem:[%s12821_s4 + $0x368] sm:$0xff] }
 0x89c   :  { %13387 = vst [vmem:[#allocation23_spill] sm:$0xff] %v10490_v62  ;;  %v10492_v47 = vadd.f32 %v4744_v37, %v4536_v43  ;;  %v4112_v37 = vld [vmem:[%s12821_s4 + $0x200] sm:$0xff] }
 0x89d   :  { %5043 = vmatpush.msrb.mxu1 %v4112_v37  ;;  %v4141_v37 = vld [vmem:[%s12821_s4 + $0x2e8] sm:$0xff] }
 0x89e   :  { %4994 = vmatmul.f32.gmra.mxu0 %v3527_v50  ;;  %13388 = vst [vmem:[#allocation25_spill] sm:$0xff] %v10492_v47  ;;  %4585 = vmatmul.f32.gmra.mxu2 %v3592_v52  ;;  %v4159_v50 = vld [vmem:[%s12821_s4 + $0x378] sm:$0xff]  ;;  %v4158_v52 = vld [vmem:[%s12821_s4 + $0x370] sm:$0xff] }
 0x89f   :  { %v4329_v40 = vpop.f32.mrf.mxu1  ;;  %5446 = vmatpush.msra.mxu3 %v4159_v50  ;;  %v4140_v50 = vld [vmem:[%s12821_s4 + $0x2e0] sm:$0xff] }
 0x8a0   :  { %4794 = vmatmul.f32.gmra.mxu3 %v3656_v44  ;;  %v3529_v44 = vld [vmem:[#allocation2 + $0x2d8] sm:$0xff] }
 0x8a1   :  { %v4538_v21 = vpop.f32.mrf.mxu2  ;;  %5447 = vmatpush.msra.mxu3 %v4158_v52  ;;  %v4139_v52 = vld [vmem:[%s12821_s4 + $0x2d8] sm:$0xff] }
 0x8a2   :  { %4376 = vmatmul.f32.gmra.mxu1 %v3528_v28  ;;  %v4539_v63 = vadd.f32 %v4538_v21, %v4329_v40  ;;  %v3657_v40 = vld [vmem:[#allocation2 + $0x2da] sm:$0xff] }
 0x8a3   :  { %v10494_v2 = vpop.f32.mrf.mxu0  ;;  %v4747_v51 = vpop.f32.mrf.mxu3  ;;  %5448 = vmatpush.msra.mxu3 %v4157_v41  ;;  %v4138_v41 = vld [vmem:[%s12821_s4 + $0x2d0] sm:$0xff]  ;;  %v3728_v47 = vld [vmem:[#allocation2 + $0x19] sm:$0xff] }
 0x8a4   :  { %13389 = vst [vmem:[#allocation28_spill] sm:$0xff] %v10494_v2  ;;  %v10496_v62 = vadd.f32 %v4747_v51, %v4539_v63  ;;  %v4142_v51 = vld [vmem:[%s12821_s4 + $0x2f0] sm:$0xff] }
 0x8a5   :  { %5238 = vmatpush.msra.mxu2 %v4142_v51  ;;  %v4156_v51 = vld [vmem:[%s12821_s4 + $0x360] sm:$0xff] }
 0x8a6   :  { %4997 = vmatmul.f32.gmra.mxu0 %v3528_v28  ;;  %13390 = vst [vmem:[#allocation31_spill] sm:$0xff] %v10496_v62  ;;  %4588 = vmatmul.f32.gmra.mxu2 %v3593_v0 }
 0x8a7   :  { %v4332_v43 = vpop.f32.mrf.mxu1  ;;  %5239 = vmatpush.msra.mxu2 %v4141_v37  ;;  %5449 = vmatpush.msra.mxu3 %v4156_v51 }
 0x8a8   :  { %4797 = vmatmul.f32.gmra.mxu3 %v3657_v40  ;;  %v4155_v40 = vld [vmem:[%s12821_s4 + $0x358] sm:$0xff] }
 0x8a9   :  { %v4541_v21 = vpop.f32.mrf.mxu2  ;;  %5240 = vmatpush.msra.mxu2 %v4140_v50  ;;  %5450 = vmatpush.msra.mxu3 %v4155_v40  ;;  %v4136_v40 = vld [vmem:[%s12821_s4 + $0x2c0] sm:$0xff] }
 0x8aa   :  { %4379 = vmatmul.f32.gmra.mxu1 %v3529_v44  ;;  %v4542_v63 = vadd.f32 %v4541_v21, %v4332_v43  ;;  %v3594_v21 = vld [vmem:[#allocation2 + $0x2e9] sm:$0xff] }
 0x8ab   :  { %v10513_v28 = vpop.f32.mrf.mxu0  ;;  %v4750_v0 = vpop.f32.mrf.mxu3  ;;  %5241 = vmatpush.msra.mxu2 %v4139_v52  ;;  %v4153_v52 = vld [vmem:[%s12821_s4 + $0x348] sm:$0xff] }
 0x8ac   :  { %13391 = vst [vmem:[#allocation34_spill] sm:$0xff] %v10513_v28  ;;  %v10527_v43 = vadd.f32 %v4750_v0, %v4542_v63  ;;  %v4154_v63 = vld [vmem:[%s12821_s4 + $0x350] sm:$0xff]  ;;  %v3530_v0 = vld [vmem:[#allocation2 + $0x2e8] sm:$0xff] }
 0x8ad   :  { %5242 = vmatpush.msra.mxu2 %v4138_v41  ;;  %5451 = vmatpush.msra.mxu3 %v4154_v63  ;;  %v4152_v41 = vld [vmem:[%s12821_s4 + $0x340] sm:$0xff]  ;;  %v4135_v63 = vld [vmem:[%s12821_s4 + $0x2b8] sm:$0xff] }
 0x8ae   :  { %5000 = vmatmul.f32.gmra.mxu0 %v3529_v44  ;;  %13392 = vst [vmem:[#allocation37_spill] sm:$0xff] %v10527_v43  ;;  %4591 = vmatmul.f32.gmra.mxu2 %v3594_v21  ;;  %v3658_v44 = vld [vmem:[#allocation2 + $0x2ea] sm:$0xff] }
 0x8af   :  { %v4335_v37 = vpop.f32.mrf.mxu1  ;;  %v4137_v21 = vld [vmem:[%s12821_s4 + $0x2c8] sm:$0xff]  ;;  %5452 = vmatpush.msra.mxu3 %v4153_v52  ;;  %v4134_v52 = vld [vmem:[%s12821_s4 + $0x2b0] sm:$0xff] }
 0x8b0   :  { %4800 = vmatmul.f32.gmra.mxu3 %v3658_v44  ;;  %5243 = vmatpush.msra.mxu2 %v4137_v21  ;;  %v4174_v21 = vld [vmem:[%s12821_s4 + $0x3f0] sm:$0xff] }
 0x8b1   :  { %v4544_v50 = vpop.f32.mrf.mxu2  ;;  %5453 = vmatpush.msra.mxu3 %v4152_v41 }
 0x8b2   :  { %4382 = vmatmul.f32.gmra.mxu1 %v3530_v0  ;;  %v4545_v51 = vadd.f32 %v4544_v50, %v4335_v37  ;;  %v4175_v50 = vld [vmem:[%s12821_s4 + $0x3f8] sm:$0xff]  ;;  %5244 = vmatpush.msra.mxu2 %v4136_v40  ;;  %v3531_v40 = vld [vmem:[#allocation2 + $0x2f0] sm:$0xff] }
 0x8b3   :  { %v10541_v43 = vpop.f32.mrf.mxu0  ;;  %v4753_v44 = vpop.f32.mrf.mxu3  ;;  %5655 = vmatpush.msra.mxu0 %v4175_v50 }
 0x8b4   :  { %13393 = vst [vmem:[#allocation40_spill] sm:$0xff] %v10541_v43  ;;  %v10555_v37 = vadd.f32 %v4753_v44, %v4545_v51  ;;  %v3595_v43 = vld [vmem:[#allocation2 + $0x2f1] sm:$0xff]  ;;  %5245 = vmatpush.msra.mxu2 %v4135_v63  ;;  %v4133_v63 = vld [vmem:[%s12821_s4 + $0x2a8] sm:$0xff] }
 0x8b5   :  { %v3659_v51 = vld [vmem:[#allocation2 + $0x2f2] sm:$0xff]  ;;  %5656 = vmatpush.msra.mxu0 %v4174_v21  ;;  %v4149_v21 = vld [vmem:[%s12821_s4 + $0x328] sm:$0xff] }
 0x8b6   :  { %5003 = vmatmul.f32.gmra.mxu0 %v3530_v0  ;;  %13394 = vst [vmem:[#allocation43_spill] sm:$0xff] %v10555_v37  ;;  %4594 = vmatmul.f32.gmra.mxu2 %v3595_v43  ;;  %v4151_v0 = vld [vmem:[%s12821_s4 + $0x338] sm:$0xff]  ;;  %v4150_v44 = vld [vmem:[%s12821_s4 + $0x330] sm:$0xff] }
 0x8b7   :  { %v4338_v62 = vpop.f32.mrf.mxu1  ;;  %5454 = vmatpush.msra.mxu3 %v4151_v0  ;;  %5246 = vmatpush.msra.mxu2 %v4134_v52  ;;  %v4132_v52 = vld [vmem:[%s12821_s4 + $0x2a0] sm:$0xff] }
 0x8b8   :  { %4803 = vmatmul.f32.gmra.mxu3 %v3659_v51  ;;  %v4173_v51 = vld [vmem:[%s12821_s4 + $0x3e8] sm:$0xff] }
 0x8b9   :  { %v4547_v43 = vpop.f32.mrf.mxu2  ;;  %5455 = vmatpush.msra.mxu3 %v4150_v44  ;;  %5657 = vmatpush.msra.mxu0 %v4173_v51  ;;  %v4171_v44 = vld [vmem:[%s12821_s4 + $0x3d8] sm:$0xff] }
 0x8ba   :  { %4385 = vmatmul.f32.gmra.mxu1 %v3531_v40  ;;  %v4548_v41 = vadd.f32 %v4547_v43, %v4338_v62  ;;  %v4172_v62 = vld [vmem:[%s12821_s4 + $0x3e0] sm:$0xff]  ;;  %5247 = vmatpush.msra.mxu2 %v4133_v63  ;;  %v4170_v63 = vld [vmem:[%s12821_s4 + $0x3d0] sm:$0xff] }
 0x8bb   :  { %v10575_v50 = vpop.f32.mrf.mxu0  ;;  %v4756_v37 = vpop.f32.mrf.mxu3  ;;  %v4148_v43 = vld [vmem:[%s12821_s4 + $0x320] sm:$0xff]  ;;  %5456 = vmatpush.msra.mxu3 %v4149_v21  ;;  %5658 = vmatpush.msra.mxu0 %v4172_v62 }
 0x8bc   :  { %13395 = vst [vmem:[#allocation46_spill] sm:$0xff] %v10575_v50  ;;  %v10589_v0 = vadd.f32 %v4756_v37, %v4548_v41  ;;  %v3596_v50 = vld [vmem:[#allocation2 + $0x301] sm:$0xff]  ;;  %v4131_v37 = vld [vmem:[%s12821_s4 + $0x298] sm:$0xff]  ;;  %5248 = vmatpush.msra.mxu2 %v4132_v52 }
 0x8bd   :  { %5457 = vmatpush.msra.mxu3 %v4148_v43  ;;  %v4147_v41 = vld [vmem:[%s12821_s4 + $0x318] sm:$0xff]  ;;  %v3532_v21 = vld [vmem:[#allocation2 + $0x300] sm:$0xff]  ;;  %5659 = vmatpush.msra.mxu0 %v4171_v44  ;;  %v4146_v43 = vld [vmem:[%s12821_s4 + $0x310] sm:$0xff] }
 0x8be   :  { %5006 = vmatmul.f32.gmra.mxu0 %v3531_v40  ;;  %13396 = vst [vmem:[#allocation49_spill] sm:$0xff] %v10589_v0  ;;  %4597 = vmatmul.f32.gmra.mxu2 %v3596_v50  ;;  %v3660_v40 = vld [vmem:[#allocation2 + $0x302] sm:$0xff]  ;;  %v4130_v50 = vld [vmem:[%s12821_s4 + $0x290] sm:$0xff] }
 0x8bf   :  { %v4341_v51 = vpop.f32.mrf.mxu1  ;;  %5249 = vmatpush.msra.mxu2 %v4131_v37  ;;  %5458 = vmatpush.msra.mxu3 %v4147_v41  ;;  %v4129_v44 = vld [vmem:[%s12821_s4 + $0x288] sm:$0xff]  ;;  %v4168_v41 = vld [vmem:[%s12821_s4 + $0x3c0] sm:$0xff] }
 0x8c0   :  { %4806 = vmatmul.f32.gmra.mxu3 %v3660_v40  ;;  %5660 = vmatpush.msra.mxu0 %v4170_v63  ;;  %v4169_v40 = vld [vmem:[%s12821_s4 + $0x3c8] sm:$0xff] }
 0x8c1   :  { %v4550_v52 = vpop.f32.mrf.mxu2  ;;  %5250 = vmatpush.msra.mxu2 %v4130_v50  ;;  %v4145_v37 = vld [vmem:[%s12821_s4 + $0x308] sm:$0xff]  ;;  %5459 = vmatpush.msra.mxu3 %v4146_v43  ;;  %v4191_v50 = vld [vmem:[%s12821_s4 + $0x478] sm:$0xff] }
 0x8c2   :  { %4388 = vmatmul.f32.gmra.mxu1 %v3532_v21  ;;  %v4551_v0 = vadd.f32 %v4550_v52, %v4341_v51  ;;  %v4128_v51 = vld [vmem:[%s12821_s4 + $0x280] sm:$0xff]  ;;  %v3597_v63 = vld [vmem:[#allocation2 + $0x309] sm:$0xff]  ;;  %5661 = vmatpush.msra.mxu0 %v4169_v40 }
 0x8c3   :  { %v10612_v62 = vpop.f32.mrf.mxu0  ;;  %v4759_v28 = vpop.f32.mrf.mxu3  ;;  %5251 = vmatpush.msra.mxu2 %v4129_v44  ;;  %5460 = vmatpush.msra.mxu3 %v4145_v37  ;;  %v3533_v43 = vld [vmem:[#allocation2 + $0x308] sm:$0xff] }
 0x8c4   :  { %13397 = vst [vmem:[#allocation52_spill] sm:$0xff] %v10612_v62  ;;  %v10626_v62 = vadd.f32 %v4759_v28, %v4551_v0  ;;  %v4144_v28 = vld [vmem:[%s12821_s4 + $0x300] sm:$0xff]  ;;  %v3661_v0 = vld [vmem:[#allocation2 + $0x30a] sm:$0xff]  ;;  %5662 = vmatpush.msra.mxu0 %v4168_v41  ;;  %5864 = vmatpush.msra.mxu1 %v4191_v50 }
 0x8c5   :  { %5252 = vmatpush.msra.mxu2 %v4128_v51  ;;  %5461 = vmatpush.msra.mxu3 %v4144_v28  ;;  %v3598_v50 = vld [vmem:[#allocation2 + $0x319] sm:$0xff] }
 0x8c6   :  { %5009 = vmatmul.f32.gmra.mxu0 %v3532_v21  ;;  %13398 = vst [vmem:[#allocation55_spill] sm:$0xff] %v10626_v62  ;;  %4600 = vmatmul.f32.gmra.mxu2 %v3597_v63  ;;  %v4167_v21 = vld [vmem:[%s12821_s4 + $0x3b8] sm:$0xff]  ;;  %v4166_v63 = vld [vmem:[%s12821_s4 + $0x3b0] sm:$0xff] }
 0x8c7   :  { %v4344_v52 = vpop.f32.mrf.mxu1  ;;  %5663 = vmatpush.msra.mxu0 %v4167_v21  ;;  %v3662_v28 = vld [vmem:[#allocation2 + $0x31a] sm:$0xff] }
 0x8c8   :  { %4809 = vmatmul.f32.gmra.mxu3 %v3661_v0  ;;  %v4165_v0 = vld [vmem:[%s12821_s4 + $0x3a8] sm:$0xff]  ;;  %v3534_v21 = vld [vmem:[#allocation2 + $0x318] sm:$0xff] }
 0x8c9   :  { %v4553_v40 = vpop.f32.mrf.mxu2  ;;  %5664 = vmatpush.msra.mxu0 %v4166_v63 }
 0x8ca   :  { %4391 = vmatmul.f32.gmra.mxu1 %v3533_v43  ;;  %v4554_v37 = vadd.f32 %v4553_v40, %v4344_v52  ;;  %v4164_v52 = vld [vmem:[%s12821_s4 + $0x3a0] sm:$0xff] }
 0x8cb   :  { %v10643_v44 = vpop.f32.mrf.mxu0  ;;  %v4762_v51 = vpop.f32.mrf.mxu3  ;;  %5665 = vmatpush.msra.mxu0 %v4165_v0 }
 0x8cc   :  { %13399 = vst [vmem:[#allocation58_spill] sm:$0xff] %v10643_v44  ;;  %v10648_v41 = vadd.f32 %v4762_v51, %v4554_v37  ;;  %v4162_v51 = vld [vmem:[%s12821_s4 + $0x390] sm:$0xff] }
 0x8cd   :  { %5666 = vmatpush.msra.mxu0 %v4164_v52  ;;  %v3663_v52 = vld [vmem:[#allocation2 + $0x322] sm:$0xff]  ;;  %v3856_v44 = vld [vmem:[#allocation2 + $0x30] sm:$0xff] }
 0x8ce   :  { %5012 = vmatmul.f32.gmra.mxu0 %v3533_v43  ;;  %13400 = vst [vmem:[#allocation62_spill] sm:$0xff] %v10648_v41  ;;  %4603 = vmatmul.f32.gmra.mxu2 %v3598_v50  ;;  %v4163_v43 = vld [vmem:[%s12821_s4 + $0x398] sm:$0xff]  ;;  %v3599_v41 = vld [vmem:[#allocation2 + $0x321] sm:$0xff] }
 0x8cf   :  { %v4347_v62 = vpop.f32.mrf.mxu1  ;;  %5667 = vmatpush.msra.mxu0 %v4163_v43 }
 0x8d0   :  { %4812 = vmatmul.f32.gmra.mxu3 %v3662_v28  ;;  %v4161_v28 = vld [vmem:[%s12821_s4 + $0x388] sm:$0xff] }
 0x8d1   :  { %v4556_v37 = vpop.f32.mrf.mxu2  ;;  %5668 = vmatpush.msra.mxu0 %v4162_v51  ;;  %v3792_v51 = vld [vmem:[#allocation2 + $0x1a] sm:$0xff] }
 0x8d2   :  { %4394 = vmatmul.f32.gmra.mxu1 %v3534_v21  ;;  %v4557_v63 = vadd.f32 %v4556_v37, %v4347_v62  ;;  %v4160_v62 = vld [vmem:[%s12821_s4 + $0x380] sm:$0xff] }
 0x8d3   :  { %v10659_v40 = vpop.f32.mrf.mxu0  ;;  %v4765_v50 = vpop.f32.mrf.mxu3  ;;  %5669 = vmatpush.msra.mxu0 %v4161_v28  ;;  %v3535_v37 = vld [vmem:[#allocation2 + $0x320] sm:$0xff] }
 0x8d4   :  { %13401 = vst [vmem:[#allocation27_spill] sm:$0xff] %v10659_v40  ;;  %v10664_v0 = vadd.f32 %v4765_v50, %v4557_v63 }
 0x8d5   :  { %5670 = vmatpush.msra.mxu0 %v4160_v62 }
 0x8d6   :  { %5015 = vmatmul.f32.gmra.mxu0 %v3534_v21  ;;  %13402 = vst [vmem:[#allocation22_spill] sm:$0xff] %v10664_v0  ;;  %4606 = vmatmul.f32.gmra.mxu2 %v3599_v41 }
 0x8d7   :  { %v4350_v40 = vpop.f32.mrf.mxu1 }
 0x8d8   :  { %4815 = vmatmul.f32.gmra.mxu3 %v3663_v52 }
 0x8d9   :  { %v4559_v21 = vpop.f32.mrf.mxu2 }
 0x8da   :  { %4397 = vmatmul.f32.gmra.mxu1 %v3535_v37  ;;  %v4560_v63 = vadd.f32 %v4559_v21, %v4350_v40  ;;  %v4190_v40 = vld [vmem:[%s12821_s4 + $0x470] sm:$0xff] }
 0x8db   :  { %v10672_v43 = vpop.f32.mrf.mxu0  ;;  %v4768_v50 = vpop.f32.mrf.mxu3  ;;  %5865 = vmatpush.msra.mxu1 %v4190_v40  ;;  %v3730_v40 = vld [vmem:[#allocation2 + $0x31] sm:$0xff] }
 0x8dc   :  { %13403 = vst [vmem:[#allocation33_spill] sm:$0xff] %v10672_v43  ;;  %v10674_v0 = vadd.f32 %v4768_v50, %v4560_v63  ;;  %v3726_v43 = vld [vmem:[#allocation2 + $0x330] sm:$0xff]  ;;  %v3857_v63 = vld [vmem:[#allocation2 + $0x38] sm:$0xff] }
 0x8de   :  { %5018 = vmatmul.f32.gmra.mxu0 %v3535_v37  ;;  %13404 = vst [vmem:[#allocation66_spill] sm:$0xff] %v10674_v0  ;;  %5253 = vmatmul.f32.vlgmr.msra.gmra.mxu2 %v3792_v51  ;;  %v3793_v37 = vld [vmem:[#allocation2 + $0x22] sm:$0xff] }
 0x8df   :  { %v4353_v41 = vpop.f32.mrf.mxu1 }
 0x8e0   :  { %5462 = vmatmul.f32.vlgmr.msra.gmra.mxu3 %v3856_v44  ;;  %v3729_v44 = vld [vmem:[#allocation2 + $0x21] sm:$0xff] }
 0x8e1   :  { %v4562_v28 = vpop.f32.mrf.mxu2 }
 0x8e2   :  { %5044 = vmatmul.f32.vlgmr.msrb.gmra.mxu1 %v3728_v47  ;;  %v4563_v52 = vadd.f32 %v4562_v28, %v4353_v41  ;;  %v3727_v41 = vld [vmem:[#allocation2 + $0x338] sm:$0xff] }
 0x8e3   :  { %v10676_v2 = vpop.f32.mrf.mxu0  ;;  %v4771_v6 = vpop.f32.mrf.mxu3  ;;  %v3794_v28 = vld [vmem:[#allocation2 + $0x32] sm:$0xff] }
 0x8e4   :  { %v10678_v62 = vadd.f32 %v4771_v6, %v4563_v52 }
 0x8e6   :  { %5021 = vmatmul.f32.gmra.mxu0 %v3726_v43  ;;  %13405 = vst [vmem:[#allocation42_spill] sm:$0xff] %v10678_v62  ;;  %5256 = vmatmul.f32.gmra.mxu2 %v3793_v37  ;;  %v3858_v62 = vld [vmem:[#allocation2 + $0x48] sm:$0xff] }
 0x8e7   :  { %v4356_v21 = vpop.f32.mrf.mxu1 }
 0x8e8   :  { %5465 = vmatmul.f32.gmra.mxu3 %v3857_v63 }
 0x8e9   :  { %v4565_v47 = vpop.f32.mrf.mxu2 }
 0x8ea   :  { %5047 = vmatmul.f32.gmra.mxu1 %v3729_v44  ;;  %v4566_v51 = vadd.f32 %v4565_v47, %v4356_v21  ;;  %v3795_v21 = vld [vmem:[#allocation2 + $0x3a] sm:$0xff] }
 0x8eb   :  { %v10683_v50 = vpop.f32.mrf.mxu0  ;;  %v4774_v43 = vpop.f32.mrf.mxu3 }
 0x8ec   :  { %13406 = vst [vmem:[#allocation73_spill] sm:$0xff] %v10683_v50  ;;  %v10685_v6 = vadd.f32 %v4774_v43, %v4566_v51  ;;  %v3859_v51 = vld [vmem:[#allocation2 + $0x50] sm:$0xff] }
 0x8ee   :  { %5024 = vmatmul.f32.gmra.mxu0 %v3727_v41  ;;  %13407 = vst [vmem:[#allocation69_spill] sm:$0xff] %v10685_v6  ;;  %5259 = vmatmul.f32.gmra.mxu2 %v3794_v28  ;;  %v3731_v41 = vld [vmem:[#allocation2 + $0x39] sm:$0xff] }
 0x8ef   :  { %v4359_v52 = vpop.f32.mrf.mxu1 }
 0x8f0   :  { %5468 = vmatmul.f32.gmra.mxu3 %v3858_v62 }
 0x8f1   :  { %v4568_v63 = vpop.f32.mrf.mxu2 }
 0x8f2   :  { %5050 = vmatmul.f32.gmra.mxu1 %v3730_v40  ;;  %v4569_v0 = vadd.f32 %v4568_v63, %v4359_v52  ;;  %v3796_v52 = vld [vmem:[#allocation2 + $0x4a] sm:$0xff] }
 0x8f3   :  { %v10687_v37 = vpop.f32.mrf.mxu0  ;;  %v4777_v50 = vpop.f32.mrf.mxu3 }
 0x8f4   :  { %13408 = vst [vmem:[#allocation32_spill] sm:$0xff] %v10687_v37  ;;  %v10689_v44 = vadd.f32 %v4777_v50, %v4569_v0  ;;  %v3860_v0 = vld [vmem:[#allocation2 + $0x60] sm:$0xff]  ;;  %v3732_v50 = vld [vmem:[#allocation2 + $0x49] sm:$0xff] }
 0x8f6   :  { %5671 = vmatmul.f32.vlgmr.msra.gmra.mxu0 %v3730_v40  ;;  %13409 = vst [vmem:[#allocation78_spill] sm:$0xff] %v10689_v44  ;;  %5262 = vmatmul.f32.gmra.mxu2 %v3795_v21 }
 0x8f7   :  { %v4362_v47 = vpop.f32.mrf.mxu1 }
 0x8f8   :  { %5471 = vmatmul.f32.gmra.mxu3 %v3859_v51 }
 0x8f9   :  { %v4571_v28 = vpop.f32.mrf.mxu2 }
 0x8fa   :  { %5053 = vmatmul.f32.gmra.mxu1 %v3731_v41  ;;  %v4572_v62 = vadd.f32 %v4571_v28, %v4362_v47  ;;  %v3797_v47 = vld [vmem:[#allocation2 + $0x52] sm:$0xff]  ;;  %v3861_v28 = vld [vmem:[#allocation2 + $0x68] sm:$0xff] }
 0x8fb   :  { %v10691_v43 = vpop.f32.mrf.mxu0  ;;  %v4780_v6 = vpop.f32.mrf.mxu3 }
 0x8fc   :  { %13410 = vst [vmem:[#allocation24_spill] sm:$0xff] %v10691_v43  ;;  %v10693_v37 = vadd.f32 %v4780_v6, %v4572_v62  ;;  %v4189_v6 = vld [vmem:[%s12821_s4 + $0x468] sm:$0xff]  ;;  %v3733_v62 = vld [vmem:[#allocation2 + $0x51] sm:$0xff] }
 0x8fd   :  { %5866 = vmatpush.msra.mxu1 %v4189_v6 }
 0x8fe   :  { %5674 = vmatmul.f32.gmra.mxu0 %v3731_v41  ;;  %13411 = vst [vmem:[#allocation36_spill] sm:$0xff] %v10693_v37  ;;  %5265 = vmatmul.f32.gmra.mxu2 %v3796_v52  ;;  %v3734_v37 = vld [vmem:[#allocation2 + $0x61] sm:$0xff] }
 0x8ff   :  { %v4365_v63 = vpop.f32.mrf.mxu1 }
 0x900   :  { %5474 = vmatmul.f32.gmra.mxu3 %v3860_v0 }
 0x901   :  { %v4574_v21 = vpop.f32.mrf.mxu2 }
 0x902   :  { %5056 = vmatmul.f32.gmra.mxu1 %v3732_v50  ;;  %v4575_v51 = vadd.f32 %v4574_v21, %v4365_v63 }
 0x903   :  { %v10695_v40 = vpop.f32.mrf.mxu0  ;;  %v4783_v44 = vpop.f32.mrf.mxu3 }
 0x904   :  { %13412 = vst [vmem:[#allocation60_spill] sm:$0xff] %v10695_v40  ;;  %v10697_v43 = vadd.f32 %v4783_v44, %v4575_v51 }
 0x906   :  { %5677 = vmatmul.f32.gmra.mxu0 %v3732_v50  ;;  %13413 = vst [vmem:[#allocation26_spill] sm:$0xff] %v10697_v43  ;;  %5268 = vmatmul.f32.gmra.mxu2 %v3797_v47  ;;  %v3798_v50 = vld [vmem:[#allocation2 + $0x62] sm:$0xff]  ;;  %v3862_v43 = vld [vmem:[#allocation2 + $0x78] sm:$0xff] }
 0x907   :  { %v4368_v41 = vpop.f32.mrf.mxu1 }
 0x908   :  { %5477 = vmatmul.f32.gmra.mxu3 %v3861_v28 }
 0x909   :  { %v4577_v0 = vpop.f32.mrf.mxu2 }
 0x90a   :  { %5059 = vmatmul.f32.gmra.mxu1 %v3733_v62  ;;  %v4578_v63 = vadd.f32 %v4577_v0, %v4368_v41  ;;  %v3799_v41 = vld [vmem:[#allocation2 + $0x6a] sm:$0xff] }
 0x90b   :  { %v10702_v52 = vpop.f32.mrf.mxu0  ;;  %v4786_v21 = vpop.f32.mrf.mxu3 }
 0x90c   :  { %13414 = vst [vmem:[#allocation30_spill] sm:$0xff] %v10702_v52  ;;  %v10704_v44 = vadd.f32 %v4786_v21, %v4578_v63  ;;  %v3735_v63 = vld [vmem:[#allocation2 + $0x69] sm:$0xff] }
 0x90e   :  { %5680 = vmatmul.f32.gmra.mxu0 %v3733_v62  ;;  %13415 = vst [vmem:[#allocation64_spill] sm:$0xff] %v10704_v44  ;;  %5271 = vmatmul.f32.gmra.mxu2 %v3798_v50  ;;  %v3863_v62 = vld [vmem:[#allocation2 + $0x80] sm:$0xff] }
 0x90f   :  { %v4371_v51 = vpop.f32.mrf.mxu1 }
 0x910   :  { %5480 = vmatmul.f32.gmra.mxu3 %v3862_v43 }
 0x911   :  { %v4580_v47 = vpop.f32.mrf.mxu2 }
 0x912   :  { %5062 = vmatmul.f32.gmra.mxu1 %v3734_v37  ;;  %v4581_v28 = vadd.f32 %v4580_v47, %v4371_v51  ;;  %v3800_v51 = vld [vmem:[#allocation2 + $0x7a] sm:$0xff] }
 0x913   :  { %v10706_v6 = vpop.f32.mrf.mxu0  ;;  %v4789_v40 = vpop.f32.mrf.mxu3 }
 0x914   :  { %13416 = vst [vmem:[#allocation39_spill] sm:$0xff] %v10706_v6  ;;  %v10708_v52 = vadd.f32 %v4789_v40, %v4581_v28  ;;  %v3736_v40 = vld [vmem:[#allocation2 + $0x79] sm:$0xff] }
 0x916   :  { %5683 = vmatmul.f32.gmra.mxu0 %v3734_v37  ;;  %13417 = vst [vmem:[#allocation68_spill] sm:$0xff] %v10708_v52  ;;  %5274 = vmatmul.f32.gmra.mxu2 %v3799_v41  ;;  %v3864_v37 = vld [vmem:[#allocation2 + $0x90] sm:$0xff] }
 0x917   :  { %v4374_v0 = vpop.f32.mrf.mxu1 }
 0x918   :  { %5483 = vmatmul.f32.gmra.mxu3 %v3863_v62 }
 0x919   :  { %v4583_v50 = vpop.f32.mrf.mxu2 }
 0x91a   :  { %5065 = vmatmul.f32.gmra.mxu1 %v3735_v63  ;;  %v4584_v43 = vadd.f32 %v4583_v50, %v4374_v0  ;;  %v3801_v0 = vld [vmem:[#allocation2 + $0x82] sm:$0xff]  ;;  %v3865_v50 = vld [vmem:[#allocation2 + $0x98] sm:$0xff] }
 0x91b   :  { %v10710_v21 = vpop.f32.mrf.mxu0  ;;  %v4792_v44 = vpop.f32.mrf.mxu3 }
 0x91c   :  { %13418 = vst [vmem:[#allocation75_spill] sm:$0xff] %v10710_v21  ;;  %v10712_v6 = vadd.f32 %v4792_v44, %v4584_v43  ;;  %v4188_v44 = vld [vmem:[%s12821_s4 + $0x460] sm:$0xff] }
 0x91d   :  { %5867 = vmatpush.msra.mxu1 %v4188_v44  ;;  %v3737_v43 = vld [vmem:[#allocation2 + $0x81] sm:$0xff] }
 0x91e   :  { %5686 = vmatmul.f32.gmra.mxu0 %v3735_v63  ;;  %13419 = vst [vmem:[#allocation71_spill] sm:$0xff] %v10712_v6  ;;  %5277 = vmatmul.f32.gmra.mxu2 %v3800_v51  ;;  %v3738_v6 = vld [vmem:[#allocation2 + $0x91] sm:$0xff] }
 0x91f   :  { %v4377_v47 = vpop.f32.mrf.mxu1 }
 0x920   :  { %5486 = vmatmul.f32.gmra.mxu3 %v3864_v37 }
 0x921   :  { %v4586_v41 = vpop.f32.mrf.mxu2 }
 0x922   :  { %5068 = vmatmul.f32.gmra.mxu1 %v3736_v40  ;;  %v4587_v62 = vadd.f32 %v4586_v41, %v4377_v47 }
 0x923   :  { %v10714_v28 = vpop.f32.mrf.mxu0  ;;  %v4795_v52 = vpop.f32.mrf.mxu3 }
 0x924   :  { %13420 = vst [vmem:[#allocation45_spill] sm:$0xff] %v10714_v28  ;;  %v10716_v21 = vadd.f32 %v4795_v52, %v4587_v62 }
 0x926   :  { %5689 = vmatmul.f32.gmra.mxu0 %v3736_v40  ;;  %13421 = vst [vmem:[#allocation65_spill] sm:$0xff] %v10716_v21  ;;  %5280 = vmatmul.f32.gmra.mxu2 %v3801_v0  ;;  %v3802_v40 = vld [vmem:[#allocation2 + $0x92] sm:$0xff]  ;;  %v3866_v21 = vld [vmem:[#allocation2 + $0xa8] sm:$0xff] }
 0x927   :  { %v4380_v63 = vpop.f32.mrf.mxu1 }
 0x928   :  { %5489 = vmatmul.f32.gmra.mxu3 %v3865_v50 }
 0x929   :  { %v4589_v37 = vpop.f32.mrf.mxu2 }
 0x92a   :  { %5071 = vmatmul.f32.gmra.mxu1 %v3737_v43  ;;  %v4590_v47 = vadd.f32 %v4589_v37, %v4380_v63  ;;  %v3803_v63 = vld [vmem:[#allocation2 + $0x9a] sm:$0xff] }
 0x92b   :  { %v10721_v51 = vpop.f32.mrf.mxu0  ;;  %v4798_v41 = vpop.f32.mrf.mxu3 }
 0x92c   :  { %13422 = vst [vmem:[#allocation67_spill] sm:$0xff] %v10721_v51  ;;  %v10723_v52 = vadd.f32 %v4798_v41, %v4590_v47  ;;  %v3739_v47 = vld [vmem:[#allocation2 + $0x99] sm:$0xff] }
 0x92e   :  { %5692 = vmatmul.f32.gmra.mxu0 %v3737_v43  ;;  %13423 = vst [vmem:[#allocation20_spill] sm:$0xff] %v10723_v52  ;;  %5283 = vmatmul.f32.gmra.mxu2 %v3802_v40  ;;  %v3867_v43 = vld [vmem:[#allocation2 + $0xb0] sm:$0xff] }
 0x92f   :  { %v4383_v62 = vpop.f32.mrf.mxu1 }
 0x930   :  { %5492 = vmatmul.f32.gmra.mxu3 %v3866_v21 }
 0x931   :  { %v4592_v0 = vpop.f32.mrf.mxu2 }
 0x932   :  { %5074 = vmatmul.f32.gmra.mxu1 %v3738_v6  ;;  %v4593_v50 = vadd.f32 %v4592_v0, %v4383_v62  ;;  %v3804_v62 = vld [vmem:[#allocation2 + $0xaa] sm:$0xff] }
 0x933   :  { %v10725_v44 = vpop.f32.mrf.mxu0  ;;  %v4801_v28 = vpop.f32.mrf.mxu3 }
 0x934   :  { %13424 = vst [vmem:[#allocation29_spill] sm:$0xff] %v10725_v44  ;;  %v10727_v51 = vadd.f32 %v4801_v28, %v4593_v50  ;;  %v3740_v28 = vld [vmem:[#allocation2 + $0xa9] sm:$0xff] }
 0x936   :  { %5695 = vmatmul.f32.gmra.mxu0 %v3738_v6  ;;  %13425 = vst [vmem:[#allocation81_spill] sm:$0xff] %v10727_v51  ;;  %5286 = vmatmul.f32.gmra.mxu2 %v3803_v63  ;;  %v3868_v6 = vld [vmem:[#allocation2 + $0xc0] sm:$0xff] }
 0x937   :  { %v4386_v37 = vpop.f32.mrf.mxu1 }
 0x938   :  { %5495 = vmatmul.f32.gmra.mxu3 %v3867_v43 }
 0x939   :  { %v4595_v40 = vpop.f32.mrf.mxu2 }
 0x93a   :  { %5077 = vmatmul.f32.gmra.mxu1 %v3739_v47  ;;  %v4596_v21 = vadd.f32 %v4595_v40, %v4386_v37  ;;  %v3805_v37 = vld [vmem:[#allocation2 + $0xb2] sm:$0xff]  ;;  %v3869_v40 = vld [vmem:[#allocation2 + $0xc8] sm:$0xff] }
 0x93b   :  { %v10729_v41 = vpop.f32.mrf.mxu0  ;;  %v4804_v52 = vpop.f32.mrf.mxu3 }
 0x93c   :  { %13426 = vst [vmem:[#allocation72_spill] sm:$0xff] %v10729_v41  ;;  %v10731_v44 = vadd.f32 %v4804_v52, %v4596_v21  ;;  %v4187_v52 = vld [vmem:[%s12821_s4 + $0x458] sm:$0xff] }
 0x93d   :  { %5868 = vmatpush.msra.mxu1 %v4187_v52  ;;  %v3741_v21 = vld [vmem:[#allocation2 + $0xb1] sm:$0xff] }
 0x93e   :  { %5698 = vmatmul.f32.gmra.mxu0 %v3739_v47  ;;  %13427 = vst [vmem:[#allocation70_spill] sm:$0xff] %v10731_v44  ;;  %5289 = vmatmul.f32.gmra.mxu2 %v3804_v62  ;;  %v3742_v44 = vld [vmem:[#allocation2 + $0xc1] sm:$0xff] }
 0x93f   :  { %v4389_v0 = vpop.f32.mrf.mxu1 }
 0x940   :  { %5498 = vmatmul.f32.gmra.mxu3 %v3868_v6 }
 0x941   :  { %v4598_v63 = vpop.f32.mrf.mxu2 }
 0x942   :  { %5080 = vmatmul.f32.gmra.mxu1 %v3740_v28  ;;  %v4599_v43 = vadd.f32 %v4598_v63, %v4389_v0 }
 0x943   :  { %v10733_v50 = vpop.f32.mrf.mxu0  ;;  %v4807_v51 = vpop.f32.mrf.mxu3 }
 0x944   :  { %13428 = vst [vmem:[#allocation35_spill] sm:$0xff] %v10733_v50  ;;  %v10735_v41 = vadd.f32 %v4807_v51, %v4599_v43 }
 0x946   :  { %5701 = vmatmul.f32.gmra.mxu0 %v3740_v28  ;;  %13429 = vst [vmem:[#allocation79_spill] sm:$0xff] %v10735_v41  ;;  %5292 = vmatmul.f32.gmra.mxu2 %v3805_v37  ;;  %v3806_v28 = vld [vmem:[#allocation2 + $0xc2] sm:$0xff]  ;;  %v3870_v41 = vld [vmem:[#allocation2 + $0xd8] sm:$0xff] }
 0x947   :  { %v4392_v47 = vpop.f32.mrf.mxu1 }
 0x948   :  { %5501 = vmatmul.f32.gmra.mxu3 %v3869_v40 }
 0x949   :  { %v4601_v6 = vpop.f32.mrf.mxu2 }
 0x94a   :  { %5083 = vmatmul.f32.gmra.mxu1 %v3741_v21  ;;  %v4602_v0 = vadd.f32 %v4601_v6, %v4392_v47  ;;  %v3807_v47 = vld [vmem:[#allocation2 + $0xca] sm:$0xff] }
 0x94b   :  { %v10740_v62 = vpop.f32.mrf.mxu0  ;;  %v4810_v63 = vpop.f32.mrf.mxu3 }
 0x94c   :  { %13430 = vst [vmem:[#allocation77_spill] sm:$0xff] %v10740_v62  ;;  %v10742_v51 = vadd.f32 %v4810_v63, %v4602_v0  ;;  %v3743_v0 = vld [vmem:[#allocation2 + $0xc9] sm:$0xff] }
 0x94e   :  { %5704 = vmatmul.f32.gmra.mxu0 %v3741_v21  ;;  %13431 = vst [vmem:[#allocation76_spill] sm:$0xff] %v10742_v51  ;;  %5295 = vmatmul.f32.gmra.mxu2 %v3806_v28  ;;  %v3871_v21 = vld [vmem:[#allocation2 + $0xe0] sm:$0xff] }
 0x94f   :  { %v4395_v43 = vpop.f32.mrf.mxu1 }
 0x950   :  { %5504 = vmatmul.f32.gmra.mxu3 %v3870_v41 }
 0x951   :  { %v4604_v37 = vpop.f32.mrf.mxu2 }
 0x952   :  { %5086 = vmatmul.f32.gmra.mxu1 %v3742_v44  ;;  %v4605_v40 = vadd.f32 %v4604_v37, %v4395_v43 }
 0x953   :  { %v10744_v52 = vpop.f32.mrf.mxu0  ;;  %v4813_v50 = vpop.f32.mrf.mxu3 }
 0x954   :  { %13432 = vst [vmem:[#allocation48_spill] sm:$0xff] %v10744_v52  ;;  %v10746_v62 = vadd.f32 %v4813_v50, %v4605_v40  ;;  %v3808_v50 = vld [vmem:[#allocation2 + $0xda] sm:$0xff]  ;;  %v3872_v40 = vld [vmem:[#allocation2 + $0xf0] sm:$0xff] }
 0x956   :  { %5707 = vmatmul.f32.gmra.mxu0 %v3742_v44  ;;  %13433 = vst [vmem:[#allocation82_spill] sm:$0xff] %v10746_v62  ;;  %5298 = vmatmul.f32.gmra.mxu2 %v3807_v47  ;;  %v4837_v44 = vadd.f32 %v10287_v46, %v10276_v57  ;;  %v3744_v47 = vld [vmem:[#allocation2 + $0xd9] sm:$0xff]  ;;  %v4186_v57 = vld [vmem:[%s12821_s4 + $0x450] sm:$0xff]  ;;  %v4840_v46 = vadd.f32 %v10293_v42, %v10283_v23 }
 0x957   :  { %v4398_v6 = vpop.f32.mrf.mxu1  ;;  %5869 = vmatpush.msra.mxu1 %v4186_v57  ;;  %v4843_v23 = vadd.f32 %v10299_v35, %v10289_v13  ;;  %v3810_v42 = vld [vmem:[#allocation2 + $0xf2] sm:$0xff]  ;;  %v3874_v57 = vld [vmem:[#allocation2 + $0x108] sm:$0xff]  ;;  %v3811_v13 = vld [vmem:[#allocation2 + $0xfa] sm:$0xff] }
 0x958   :  { %5507 = vmatmul.f32.gmra.mxu3 %v3871_v21 }
 0x959   :  { %v4607_v28 = vpop.f32.mrf.mxu2 }
 0x95a   :  { %5089 = vmatmul.f32.gmra.mxu1 %v3743_v0  ;;  %v4608_v41 = vadd.f32 %v4607_v28, %v4398_v6 }
 0x95b   :  { %v10748_v63 = vpop.f32.mrf.mxu0  ;;  %v4816_v51 = vpop.f32.mrf.mxu3 }
 0x95c   :  { %13434 = vst [vmem:[#allocation80_spill] sm:$0xff] %v10748_v63  ;;  %v10750_v52 = vadd.f32 %v4816_v51, %v4608_v41  ;;  %v3809_v51 = vld [vmem:[#allocation2 + $0xe2] sm:$0xff] }
 0x95e   :  { %5710 = vmatmul.f32.gmra.mxu0 %v3743_v0  ;;  %13435 = vst [vmem:[#allocation38_spill] sm:$0xff] %v10750_v52  ;;  %5301 = vmatmul.f32.gmra.mxu2 %v3808_v50  ;;  %v3745_v50 = vld [vmem:[#allocation2 + $0xe1] sm:$0xff] }
 0x95f   :  { %v5045_v43 = vpop.f32.mrf.mxu1 }
 0x960   :  { %v5046_v37 = vadd.f32 %v5045_v43, %v4837_v44  ;;  %5510 = vmatmul.f32.gmra.mxu3 %v3872_v40  ;;  %v3873_v44 = vld [vmem:[#allocation2 + $0xf8] sm:$0xff] }
 0x961   :  { %v5254_v62 = vpop.f32.mrf.mxu2 }
 0x962   :  { %5092 = vmatmul.f32.gmra.mxu1 %v3744_v47  ;;  %v5255_v63 = vadd.f32 %v5254_v62, %v5046_v37 }
 0x963   :  { %v10754_v21 = vpop.f32.mrf.mxu0  ;;  %v5463_v6 = vpop.f32.mrf.mxu3 }
 0x964   :  { %13436 = vst [vmem:[#allocation50_spill] sm:$0xff] %v10754_v21  ;;  %v10756_v0 = vadd.f32 %v5463_v6, %v5255_v63 }
 0x966   :  { %5713 = vmatmul.f32.gmra.mxu0 %v3744_v47  ;;  %5304 = vmatmul.f32.gmra.mxu2 %v3809_v51 }
 0x967   :  { %v5048_v28 = vpop.f32.mrf.mxu1 }
 0x968   :  { %v5049_v41 = vadd.f32 %v5048_v28, %v4840_v46  ;;  %5513 = vmatmul.f32.gmra.mxu3 %v3873_v44  ;;  %v3746_v46 = vld [vmem:[#allocation2 + $0xf1] sm:$0xff] }
 0x969   :  { %v5257_v63 = vpop.f32.mrf.mxu2 }
 0x96a   :  { %5095 = vmatmul.f32.gmra.mxu1 %v3745_v50  ;;  %v5258_v43 = vadd.f32 %v5257_v63, %v5049_v41  ;;  %v4846_v63 = vadd.f32 %v10308_v59, %v10295_v29  ;;  %v3812_v29 = vld [vmem:[#allocation2 + $0x10a] sm:$0xff] }
 0x96b   :  { %v10763_v62 = vpop.f32.mrf.mxu0  ;;  %v5466_v37 = vpop.f32.mrf.mxu3 }
 0x96c   :  { %13437 = vst [vmem:[#allocation41_spill] sm:$0xff] %v10763_v62  ;;  %v10765_v40 = vadd.f32 %v5466_v37, %v5258_v43  ;;  %v3875_v37 = vld [vmem:[#allocation2 + $0x110] sm:$0xff] }
 0x96e   :  { %5716 = vmatmul.f32.gmra.mxu0 %v3745_v50  ;;  %5307 = vmatmul.f32.gmra.mxu2 %v3810_v42 }
 0x96f   :  { %v5051_v47 = vpop.f32.mrf.mxu1 }
 0x970   :  { %v5052_v6 = vadd.f32 %v5051_v47, %v4843_v23  ;;  %5516 = vmatmul.f32.gmra.mxu3 %v3874_v57  ;;  %v3747_v23 = vld [vmem:[#allocation2 + $0xf9] sm:$0xff] }
 0x971   :  { %v5260_v28 = vpop.f32.mrf.mxu2 }
 0x972   :  { %5098 = vmatmul.f32.gmra.mxu1 %v3746_v46  ;;  %v5261_v44 = vadd.f32 %v5260_v28, %v5052_v6  ;;  %v4849_v28 = vadd.f32 %v10314_v3, %v10301_v34  ;;  %v4185_v34 = vld [vmem:[%s12821_s4 + $0x448] sm:$0xff]  ;;  %v4852_v3 = vadd.f32 %v10320_v4, %v10310_v36  ;;  %v4855_v36 = vadd.f32 %v10326_v15, %v10316_v11 }
 0x973   :  { %v10769_v51 = vpop.f32.mrf.mxu0  ;;  %v5469_v41 = vpop.f32.mrf.mxu3  ;;  %5870 = vmatpush.msra.mxu1 %v4185_v34  ;;  %v3814_v4 = vld [vmem:[#allocation2 + $0x122] sm:$0xff]  ;;  %v3878_v34 = vld [vmem:[#allocation2 + $0x138] sm:$0xff]  ;;  %v3815_v11 = vld [vmem:[#allocation2 + $0x12a] sm:$0xff] }
 0x974   :  { %v10771_v50 = vadd.f32 %v5469_v41, %v5261_v44  ;;  %v3876_v41 = vld [vmem:[#allocation2 + $0x120] sm:$0xff] }
 0x976   :  { %5719 = vmatmul.f32.gmra.mxu0 %v3746_v46  ;;  %5310 = vmatmul.f32.gmra.mxu2 %v3811_v13 }
 0x977   :  { %v5054_v35 = vpop.f32.mrf.mxu1 }
 0x978   :  { %v5055_v43 = vadd.f32 %v5054_v35, %v4846_v63  ;;  %5519 = vmatmul.f32.gmra.mxu3 %v3875_v37  ;;  %v3748_v63 = vld [vmem:[#allocation2 + $0x109] sm:$0xff] }
 0x979   :  { %v5263_v47 = vpop.f32.mrf.mxu2 }
 0x97a   :  { %5101 = vmatmul.f32.gmra.mxu1 %v3747_v23  ;;  %v5264_v57 = vadd.f32 %v5263_v47, %v5055_v43  ;;  %v3813_v47 = vld [vmem:[#allocation2 + $0x112] sm:$0xff] }
 0x97b   :  { %v10775_v42 = vpop.f32.mrf.mxu0  ;;  %v5472_v6 = vpop.f32.mrf.mxu3 }
 0x97c   :  { %v10777_v46 = vadd.f32 %v5472_v6, %v5264_v57 }
 0x97e   :  { %5722 = vmatmul.f32.gmra.mxu0 %v3747_v23  ;;  %5313 = vmatmul.f32.gmra.mxu2 %v3812_v29  ;;  %v3749_v29 = vld [vmem:[#allocation2 + $0x111] sm:$0xff] }
 0x97f   :  { %v5057_v59 = vpop.f32.mrf.mxu1 }
 0x980   :  { %v5058_v44 = vadd.f32 %v5057_v59, %v4849_v28  ;;  %5522 = vmatmul.f32.gmra.mxu3 %v3876_v41  ;;  %v3877_v28 = vld [vmem:[#allocation2 + $0x128] sm:$0xff] }
 0x981   :  { %v5266_v35 = vpop.f32.mrf.mxu2 }
 0x982   :  { %5104 = vmatmul.f32.gmra.mxu1 %v3748_v63  ;;  %v5267_v37 = vadd.f32 %v5266_v35, %v5058_v44 }
 0x983   :  { %v10781_v13 = vpop.f32.mrf.mxu0  ;;  %v5475_v43 = vpop.f32.mrf.mxu3 }
 0x984   :  { %v10783_v23 = vadd.f32 %v5475_v43, %v5267_v37 }
 0x986   :  { %5725 = vmatmul.f32.gmra.mxu0 %v3748_v63  ;;  %5316 = vmatmul.f32.gmra.mxu2 %v3813_v47 }
 0x987   :  { %v5060_v57 = vpop.f32.mrf.mxu1 }
 0x988   :  { %v5061_v6 = vadd.f32 %v5060_v57, %v4852_v3  ;;  %5525 = vmatmul.f32.gmra.mxu3 %v3877_v28  ;;  %v3750_v3 = vld [vmem:[#allocation2 + $0x121] sm:$0xff] }
 0x989   :  { %v5269_v44 = vpop.f32.mrf.mxu2 }
 0x98a   :  { %5107 = vmatmul.f32.gmra.mxu1 %v3749_v29  ;;  %v5270_v41 = vadd.f32 %v5269_v44, %v5061_v6  ;;  %v4858_v44 = vadd.f32 %v10335_v18, %v10322_v5  ;;  %v3816_v5 = vld [vmem:[#allocation2 + $0x13a] sm:$0xff] }
 0x98b   :  { %v10790_v59 = vpop.f32.mrf.mxu0  ;;  %v5478_v63 = vpop.f32.mrf.mxu3 }
 0x98c   :  { %v10792_v35 = vadd.f32 %v5478_v63, %v5270_v41  ;;  %v3879_v63 = vld [vmem:[#allocation2 + $0x140] sm:$0xff] }
 0x98e   :  { %5728 = vmatmul.f32.gmra.mxu0 %v3749_v29  ;;  %5319 = vmatmul.f32.gmra.mxu2 %v3814_v4 }
 0x98f   :  { %v5063_v37 = vpop.f32.mrf.mxu1 }
 0x990   :  { %v5064_v43 = vadd.f32 %v5063_v37, %v4855_v36  ;;  %5528 = vmatmul.f32.gmra.mxu3 %v3878_v34  ;;  %v3751_v36 = vld [vmem:[#allocation2 + $0x129] sm:$0xff] }
 0x991   :  { %v5272_v57 = vpop.f32.mrf.mxu2 }
 0x992   :  { %5110 = vmatmul.f32.gmra.mxu1 %v3750_v3  ;;  %v5273_v28 = vadd.f32 %v5272_v57, %v5064_v43  ;;  %v4861_v57 = vadd.f32 %v10341_v14, %v10328_v61  ;;  %v4184_v61 = vld [vmem:[%s12821_s4 + $0x440] sm:$0xff]  ;;  %v4864_v14 = vadd.f32 %v10347_v7, %v10337_v60  ;;  %v4867_v60 = vadd.f32 %v10353_v19, %v10343_v33  ;;  %v3818_v7 = vld [vmem:[#allocation2 + $0x152] sm:$0xff] }
 0x993   :  { %v10796_v47 = vpop.f32.mrf.mxu0  ;;  %v5481_v6 = vpop.f32.mrf.mxu3  ;;  %5871 = vmatpush.msra.mxu1 %v4184_v61  ;;  %v3882_v61 = vld [vmem:[#allocation2 + $0x168] sm:$0xff]  ;;  %v3819_v33 = vld [vmem:[#allocation2 + $0x15a] sm:$0xff] }
 0x994   :  { %v10798_v29 = vadd.f32 %v5481_v6, %v5273_v28  ;;  %v3880_v6 = vld [vmem:[#allocation2 + $0x150] sm:$0xff] }
 0x996   :  { %5731 = vmatmul.f32.gmra.mxu0 %v3750_v3  ;;  %5322 = vmatmul.f32.gmra.mxu2 %v3815_v11 }
 0x997   :  { %v5066_v15 = vpop.f32.mrf.mxu1 }
 0x998   :  { %v5067_v41 = vadd.f32 %v5066_v15, %v4858_v44  ;;  %5531 = vmatmul.f32.gmra.mxu3 %v3879_v63  ;;  %v3752_v44 = vld [vmem:[#allocation2 + $0x139] sm:$0xff] }
 0x999   :  { %v5275_v37 = vpop.f32.mrf.mxu2 }
 0x99a   :  { %5113 = vmatmul.f32.gmra.mxu1 %v3751_v36  ;;  %v5276_v34 = vadd.f32 %v5275_v37, %v5067_v41  ;;  %v3817_v37 = vld [vmem:[#allocation2 + $0x142] sm:$0xff] }
 0x99b   :  { %v10802_v4 = vpop.f32.mrf.mxu0  ;;  %v5484_v43 = vpop.f32.mrf.mxu3 }
 0x99c   :  { %v10804_v3 = vadd.f32 %v5484_v43, %v5276_v34 }
 0x99e   :  { %5734 = vmatmul.f32.gmra.mxu0 %v3751_v36  ;;  %5325 = vmatmul.f32.gmra.mxu2 %v3816_v5  ;;  %v3753_v5 = vld [vmem:[#allocation2 + $0x141] sm:$0xff] }
 0x99f   :  { %v5069_v18 = vpop.f32.mrf.mxu1 }
 0x9a0   :  { %v5070_v28 = vadd.f32 %v5069_v18, %v4861_v57  ;;  %5534 = vmatmul.f32.gmra.mxu3 %v3880_v6  ;;  %v3881_v57 = vld [vmem:[#allocation2 + $0x158] sm:$0xff] }
 0x9a1   :  { %v5278_v15 = vpop.f32.mrf.mxu2 }
 0x9a2   :  { %5116 = vmatmul.f32.gmra.mxu1 %v3752_v44  ;;  %v5279_v63 = vadd.f32 %v5278_v15, %v5070_v28 }
 0x9a3   :  { %v10808_v11 = vpop.f32.mrf.mxu0  ;;  %v5487_v41 = vpop.f32.mrf.mxu3 }
 0x9a4   :  { %v10810_v36 = vadd.f32 %v5487_v41, %v5279_v63 }
 0x9a6   :  { %5737 = vmatmul.f32.gmra.mxu0 %v3752_v44  ;;  %5328 = vmatmul.f32.gmra.mxu2 %v3817_v37 }
 0x9a7   :  { %v5072_v34 = vpop.f32.mrf.mxu1 }
 0x9a8   :  { %v5073_v43 = vadd.f32 %v5072_v34, %v4864_v14  ;;  %5537 = vmatmul.f32.gmra.mxu3 %v3881_v57  ;;  %v3754_v14 = vld [vmem:[#allocation2 + $0x151] sm:$0xff] }
 0x9a9   :  { %v5281_v28 = vpop.f32.mrf.mxu2 }
 0x9aa   :  { %5119 = vmatmul.f32.gmra.mxu1 %v3753_v5  ;;  %v5282_v6 = vadd.f32 %v5281_v28, %v5073_v43  ;;  %v4870_v28 = vadd.f32 %v10362_v22, %v10349_v12  ;;  %v3820_v12 = vld [vmem:[#allocation2 + $0x16a] sm:$0xff] }
 0x9ab   :  { %v10817_v18 = vpop.f32.mrf.mxu0  ;;  %v5490_v44 = vpop.f32.mrf.mxu3 }
 0x9ac   :  { %v10819_v15 = vadd.f32 %v5490_v44, %v5282_v6  ;;  %v3883_v44 = vld [vmem:[#allocation2 + $0x170] sm:$0xff] }
 0x9ae   :  { %5740 = vmatmul.f32.gmra.mxu0 %v3753_v5  ;;  %5331 = vmatmul.f32.gmra.mxu2 %v3818_v7 }
 0x9af   :  { %v5075_v63 = vpop.f32.mrf.mxu1 }
 0x9b0   :  { %v5076_v41 = vadd.f32 %v5075_v63, %v4867_v60  ;;  %5540 = vmatmul.f32.gmra.mxu3 %v3882_v61  ;;  %v3755_v60 = vld [vmem:[#allocation2 + $0x159] sm:$0xff] }
 0x9b1   :  { %v5284_v34 = vpop.f32.mrf.mxu2 }
 0x9b2   :  { %5122 = vmatmul.f32.gmra.mxu1 %v3754_v14  ;;  %v5285_v57 = vadd.f32 %v5284_v34, %v5076_v41  ;;  %v4873_v34 = vadd.f32 %v10368_v48, %v10355_v9  ;;  %v4183_v9 = vld [vmem:[%s12821_s4 + $0x438] sm:$0xff]  ;;  %v4876_v48 = vadd.f32 %v10374_v27, %v10364_v31  ;;  %v4879_v31 = vadd.f32 %v10378_v24, %v10370_v26  ;;  %v3822_v27 = vld [vmem:[#allocation2 + $0x182] sm:$0xff]  ;;  %v3823_v24 = vld [vmem:[#allocation2 + $0x18a] sm:$0xff] }
 0x9b3   :  { %v10823_v37 = vpop.f32.mrf.mxu0  ;;  %v5493_v43 = vpop.f32.mrf.mxu3  ;;  %5872 = vmatpush.msra.mxu1 %v4183_v9  ;;  %v3758_v9 = vld [vmem:[#allocation2 + $0x181] sm:$0xff]  ;;  %v4882_v26 = vadd.f32 %v10386_v32, %v10376_v25  ;;  %v3824_v25 = vld [vmem:[#allocation2 + $0x1ca] sm:$0xff] }
 0x9b4   :  { %v10825_v5 = vadd.f32 %v5493_v43, %v5285_v57  ;;  %v3884_v43 = vld [vmem:[#allocation2 + $0x180] sm:$0xff] }
 0x9b6   :  { %5743 = vmatmul.f32.gmra.mxu0 %v3754_v14  ;;  %5334 = vmatmul.f32.gmra.mxu2 %v3819_v33 }
 0x9b7   :  { %v5078_v19 = vpop.f32.mrf.mxu1 }
 0x9b8   :  { %v5079_v6 = vadd.f32 %v5078_v19, %v4870_v28  ;;  %5543 = vmatmul.f32.gmra.mxu3 %v3883_v44  ;;  %v3756_v28 = vld [vmem:[#allocation2 + $0x169] sm:$0xff] }
 0x9b9   :  { %v5287_v63 = vpop.f32.mrf.mxu2 }
 0x9ba   :  { %5125 = vmatmul.f32.gmra.mxu1 %v3755_v60  ;;  %v5288_v61 = vadd.f32 %v5287_v63, %v5079_v6  ;;  %v3821_v63 = vld [vmem:[#allocation2 + $0x172] sm:$0xff] }
 0x9bb   :  { %v10829_v7 = vpop.f32.mrf.mxu0  ;;  %v5496_v41 = vpop.f32.mrf.mxu3 }
 0x9bc   :  { %v10831_v14 = vadd.f32 %v5496_v41, %v5288_v61 }
 0x9be   :  { %5746 = vmatmul.f32.gmra.mxu0 %v3755_v60  ;;  %5337 = vmatmul.f32.gmra.mxu2 %v3820_v12  ;;  %v3757_v12 = vld [vmem:[#allocation2 + $0x171] sm:$0xff] }
 0x9bf   :  { %v5081_v22 = vpop.f32.mrf.mxu1 }
 0x9c0   :  { %v5082_v57 = vadd.f32 %v5081_v22, %v4873_v34  ;;  %5546 = vmatmul.f32.gmra.mxu3 %v3884_v43  ;;  %v3885_v34 = vld [vmem:[#allocation2 + $0x188] sm:$0xff] }
 0x9c1   :  { %v5290_v19 = vpop.f32.mrf.mxu2 }
 0x9c2   :  { %5128 = vmatmul.f32.gmra.mxu1 %v3756_v28  ;;  %v5291_v44 = vadd.f32 %v5290_v19, %v5082_v57 }
 0x9c3   :  { %v10835_v33 = vpop.f32.mrf.mxu0  ;;  %v5499_v6 = vpop.f32.mrf.mxu3 }
 0x9c4   :  { %v10837_v60 = vadd.f32 %v5499_v6, %v5291_v44 }
 0x9c6   :  { %5749 = vmatmul.f32.gmra.mxu0 %v3756_v28  ;;  %13438 = vst [vmem:[#allocation74_spill] sm:$0xff] %v10837_v60  ;;  %5340 = vmatmul.f32.gmra.mxu2 %v3821_v63  ;;  %v13551_v60 = vld [vmem:[#allocation26_spill] sm:$0xff] }
 0x9c7   :  { %v5084_v61 = vpop.f32.mrf.mxu1 }
 0x9c8   :  { %v5085_v41 = vadd.f32 %v5084_v61, %v4876_v48  ;;  %5549 = vmatmul.f32.gmra.mxu3 %v3885_v34  ;;  %v10850_v48 = vld [vmem:[#allocation2 + $0x1b0] sm:$0xff] }
 0x9c9   :  { %v5293_v57 = vpop.f32.mrf.mxu2 }
 0x9ca   :  { %5131 = vmatmul.f32.gmra.mxu1 %v3757_v12  ;;  %v5294_v43 = vadd.f32 %v5293_v57, %v5085_v41 }
 0x9cb   :  { %v10844_v22 = vpop.f32.mrf.mxu0  ;;  %v5502_v28 = vpop.f32.mrf.mxu3 }
 0x9cc   :  { %v10846_v19 = vadd.f32 %v5502_v28, %v5294_v43  ;;  %v3759_v28 = vld [vmem:[#allocation2 + $0x189] sm:$0xff] }
 0x9ce   :  { %5752 = vmatmul.f32.gmra.mxu0 %v3757_v12  ;;  %13439 = vst [vmem:[#allocation83_spill] sm:$0xff] %v10846_v19  ;;  %5343 = vmatmul.f32.gmra.mxu2 %v3822_v27 }
 0x9cf   :  { %v5087_v44 = vpop.f32.mrf.mxu1 }
 0x9d0   :  { %v5088_v6 = vadd.f32 %v5087_v44, %v4879_v31  ;;  %5552 = vmatmul.f32.gmra.mxu3 %v10850_v48 }
 0x9d1   :  { %v5296_v61 = vpop.f32.mrf.mxu2 }
 0x9d2   :  { %5134 = vmatmul.f32.gmra.mxu1 %v3758_v9  ;;  %v5297_v41 = vadd.f32 %v5296_v61, %v5088_v6  ;;  %v4885_v61 = vadd.f32 %v10391_v39, %v10381_v58  ;;  %v4182_v58 = vld [vmem:[%s12821_s4 + $0x430] sm:$0xff]  ;;  %v4888_v39 = vadd.f32 %v10395_v30, %v10389_v45  ;;  %v4891_v45 = vadd.f32 %v10399_v38, %v10393_v56  ;;  %v3826_v30 = vld [vmem:[#allocation2 + $0x1e2] sm:$0xff] }
 0x9d3   :  { %v10853_v63 = vpop.f32.mrf.mxu0  ;;  %v5505_v34 = vpop.f32.mrf.mxu3  ;;  %5873 = vmatpush.msra.mxu1 %v4182_v58  ;;  %v3827_v56 = vld [vmem:[#allocation2 + $0x1ea] sm:$0xff] }
 0x9d4   :  { %13440 = vst [vmem:[#allocation84_spill] sm:$0xff] %v10853_v63  ;;  %v10855_v12 = vadd.f32 %v5505_v34, %v5297_v41  ;;  %v3888_v34 = vld [vmem:[#allocation2 + $0x1e0] sm:$0xff] }
 0x9d6   :  { %5755 = vmatmul.f32.gmra.mxu0 %v3758_v9  ;;  %13441 = vst [vmem:[#allocation85_spill] sm:$0xff] %v10855_v12  ;;  %5346 = vmatmul.f32.gmra.mxu2 %v3823_v24 }
 0x9d7   :  { %v5090_v57 = vpop.f32.mrf.mxu1 }
 0x9d8   :  { %v5091_v43 = vadd.f32 %v5090_v57, %v4882_v26  ;;  %5555 = vmatmul.f32.gmra.mxu3 %v10850_v48  ;;  %v3760_v26 = vld [vmem:[#allocation2 + $0x1c9] sm:$0xff]  ;;  %v3950_v57 = vld [vmem:[#allocation2 + $0x199] sm:$0xff] }
 0x9d9   :  { %v5299_v27 = vpop.f32.mrf.mxu2 }
 0x9da   :  { %5137 = vmatmul.f32.gmra.mxu1 %v3759_v28  ;;  %v5300_v44 = vadd.f32 %v5299_v27, %v5091_v43 }
 0x9db   :  { %v10860_v31 = vpop.f32.mrf.mxu0  ;;  %v5508_v6 = vpop.f32.mrf.mxu3 }
 0x9dc   :  { %13442 = vst [vmem:[#allocation86_spill] sm:$0xff] %v10860_v31  ;;  %v10862_v9 = vadd.f32 %v5508_v6, %v5300_v44  ;;  %v3825_v44 = vld [vmem:[#allocation2 + $0x1d2] sm:$0xff] }
 0x9de   :  { %5758 = vmatmul.f32.gmra.mxu0 %v3759_v28  ;;  %13443 = vst [vmem:[#allocation87_spill] sm:$0xff] %v10862_v9  ;;  %5349 = vmatmul.f32.gmra.mxu2 %v3824_v25  ;;  %v3889_v25 = vld [vmem:[#allocation2 + $0x1e8] sm:$0xff]  ;;  %v3984_v9 = vld [vmem:[#allocation2 + $0x32] sm:$0xff] }
 0x9df   :  { %v5093_v32 = vpop.f32.mrf.mxu1 }
 0x9e0   :  { %v5094_v41 = vadd.f32 %v5093_v32, %v4885_v61  ;;  %5558 = vmatmul.f32.gmra.mxu3 %v3888_v34  ;;  %v3761_v32 = vld [vmem:[#allocation2 + $0x1d1] sm:$0xff] }
 0x9e1   :  { %v5302_v62 = vpop.f32.mrf.mxu2 }
 0x9e2   :  { %5140 = vmatmul.f32.gmra.mxu1 %v3760_v26  ;;  %v5303_v43 = vadd.f32 %v5302_v62, %v5094_v41  ;;  %v3951_v41 = vld [vmem:[#allocation2 + $0x1a1] sm:$0xff] }
 0x9e3   :  { %v10866_v24 = vpop.f32.mrf.mxu0  ;;  %v5511_v27 = vpop.f32.mrf.mxu3 }
 0x9e4   :  { %13444 = vst [vmem:[#allocation88_spill] sm:$0xff] %v10866_v24  ;;  %v10868_v28 = vadd.f32 %v5511_v27, %v5303_v43 }
 0x9e6   :  { %5761 = vmatmul.f32.gmra.mxu0 %v3950_v57  ;;  %13445 = vst [vmem:[#allocation89_spill] sm:$0xff] %v10868_v28  ;;  %5352 = vmatmul.f32.gmra.mxu2 %v3825_v44  ;;  %v3762_v44 = vld [vmem:[#allocation2 + $0x1e1] sm:$0xff] }
 0x9e7   :  { %v5096_v6 = vpop.f32.mrf.mxu1 }
 0x9e8   :  { %v5097_v61 = vadd.f32 %v5096_v6, %v4888_v39  ;;  %5561 = vmatmul.f32.gmra.mxu3 %v3889_v25  ;;  %v3890_v39 = vld [vmem:[#allocation2 + $0x1f8] sm:$0xff] }
 0x9e9   :  { %v5305_v34 = vpop.f32.mrf.mxu2 }
 0x9ea   :  { %5143 = vmatmul.f32.gmra.mxu1 %v3761_v32  ;;  %v5306_v26 = vadd.f32 %v5305_v34, %v5097_v61  ;;  %v4894_v34 = vadd.f32 %v10406_v1, %v10397_v17  ;;  %v3828_v17 = vld [vmem:[#allocation2 + $0x1fa] sm:$0xff] }
 0x9eb   :  { %v10875_v62 = vpop.f32.mrf.mxu0  ;;  %v5514_v57 = vpop.f32.mrf.mxu3 }
 0x9ec   :  { %13446 = vst [vmem:[#allocation90_spill] sm:$0xff] %v10875_v62  ;;  %v10877_v43 = vadd.f32 %v5514_v57, %v5306_v26  ;;  %v3891_v57 = vld [vmem:[#allocation2 + $0x200] sm:$0xff] }
 0x9ee   :  { %5764 = vmatmul.f32.gmra.mxu0 %v3951_v41  ;;  %13447 = vst [vmem:[#allocation91_spill] sm:$0xff] %v10877_v43  ;;  %5355 = vmatmul.f32.gmra.mxu2 %v3826_v30 }
 0x9ef   :  { %v5099_v27 = vpop.f32.mrf.mxu1 }
 0x9f0   :  { %v5100_v58 = vadd.f32 %v5099_v27, %v4891_v45  ;;  %5564 = vmatmul.f32.gmra.mxu3 %v3890_v39  ;;  %v3763_v45 = vld [vmem:[#allocation2 + $0x1e9] sm:$0xff] }
 0x9f1   :  { %v5308_v25 = vpop.f32.mrf.mxu2 }
 0x9f2   :  { %5146 = vmatmul.f32.gmra.mxu1 %v3762_v44  ;;  %v5309_v32 = vadd.f32 %v5308_v25, %v5100_v58  ;;  %v4897_v25 = vadd.f32 %v10410_v8, %v10401_v10  ;;  %v4181_v10 = vld [vmem:[%s12821_s4 + $0x428] sm:$0xff]  ;;  %v4900_v8 = vadd.f32 %v10414_v55, %v10408_v16  ;;  %v4903_v16 = vadd.f32 %v10418_v54, %v10412_v20  ;;  %v3830_v55 = vld [vmem:[#allocation2 + $0x212] sm:$0xff]  ;;  %v3831_v20 = vld [vmem:[#allocation2 + $0x21a] sm:$0xff] }
 0x9f3   :  { %v10881_v6 = vpop.f32.mrf.mxu0  ;;  %v5517_v61 = vpop.f32.mrf.mxu3  ;;  %5874 = vmatpush.msra.mxu1 %v4181_v10  ;;  %v3894_v10 = vld [vmem:[#allocation2 + $0x228] sm:$0xff] }
 0x9f4   :  { %13448 = vst [vmem:[#allocation92_spill] sm:$0xff] %v10881_v6  ;;  %v10883_v41 = vadd.f32 %v5517_v61, %v5309_v32  ;;  %v3892_v61 = vld [vmem:[#allocation2 + $0x210] sm:$0xff] }
 0x9f6   :  { %5767 = vmatmul.f32.gmra.mxu0 %v3762_v44  ;;  %13449 = vst [vmem:[#allocation93_spill] sm:$0xff] %v10883_v41  ;;  %5358 = vmatmul.f32.gmra.mxu2 %v3827_v56 }
 0x9f7   :  { %v5102_v38 = vpop.f32.mrf.mxu1 }
 0x9f8   :  { %v5103_v26 = vadd.f32 %v5102_v38, %v4894_v34  ;;  %5567 = vmatmul.f32.gmra.mxu3 %v3891_v57  ;;  %v3764_v34 = vld [vmem:[#allocation2 + $0x1f9] sm:$0xff] }
 0x9f9   :  { %v5311_v27 = vpop.f32.mrf.mxu2 }
 0x9fa   :  { %5149 = vmatmul.f32.gmra.mxu1 %v3763_v45  ;;  %v5312_v39 = vadd.f32 %v5311_v27, %v5103_v26  ;;  %v3829_v27 = vld [vmem:[#allocation2 + $0x202] sm:$0xff] }
 0x9fb   :  { %v10887_v30 = vpop.f32.mrf.mxu0  ;;  %v5520_v58 = vpop.f32.mrf.mxu3 }
 0x9fc   :  { %13450 = vst [vmem:[#allocation94_spill] sm:$0xff] %v10887_v30  ;;  %v10889_v44 = vadd.f32 %v5520_v58, %v5312_v39 }
 0x9fe   :  { %5770 = vmatmul.f32.gmra.mxu0 %v3763_v45  ;;  %13451 = vst [vmem:[#allocation95_spill] sm:$0xff] %v10889_v44  ;;  %5361 = vmatmul.f32.gmra.mxu2 %v3828_v17  ;;  %v3765_v17 = vld [vmem:[#allocation2 + $0x201] sm:$0xff] }
 0x9ff   :  { %v5105_v1 = vpop.f32.mrf.mxu1 }
 0xa00   :  { %v5106_v32 = vadd.f32 %v5105_v1, %v4897_v25  ;;  %5570 = vmatmul.f32.gmra.mxu3 %v3892_v61  ;;  %v3893_v25 = vld [vmem:[#allocation2 + $0x218] sm:$0xff] }
 0xa01   :  { %v5314_v38 = vpop.f32.mrf.mxu2 }
 0xa02   :  { %5152 = vmatmul.f32.gmra.mxu1 %v3764_v34  ;;  %v5315_v57 = vadd.f32 %v5314_v38, %v5106_v32 }
 0xa03   :  { %v10893_v56 = vpop.f32.mrf.mxu0  ;;  %v5523_v26 = vpop.f32.mrf.mxu3 }
 0xa04   :  { %13452 = vst [vmem:[#allocation96_spill] sm:$0xff] %v10893_v56  ;;  %v10895_v45 = vadd.f32 %v5523_v26, %v5315_v57 }
 0xa06   :  { %5773 = vmatmul.f32.gmra.mxu0 %v3764_v34  ;;  %13453 = vst [vmem:[#allocation97_spill] sm:$0xff] %v10895_v45  ;;  %5364 = vmatmul.f32.gmra.mxu2 %v3829_v27 }
 0xa07   :  { %v5108_v39 = vpop.f32.mrf.mxu1 }
 0xa08   :  { %v5109_v58 = vadd.f32 %v5108_v39, %v4900_v8  ;;  %5573 = vmatmul.f32.gmra.mxu3 %v3893_v25  ;;  %v3766_v8 = vld [vmem:[#allocation2 + $0x211] sm:$0xff] }
 0xa09   :  { %v5317_v32 = vpop.f32.mrf.mxu2 }
 0xa0a   :  { %5155 = vmatmul.f32.gmra.mxu1 %v3765_v17  ;;  %v5318_v61 = vadd.f32 %v5317_v32, %v5109_v58  ;;  %v4906_v32 = vadd.f32 %v10425_v53, %v10416_v49  ;;  %v3832_v49 = vld [vmem:[#allocation2 + $0x22a] sm:$0xff] }
 0xa0b   :  { %v10902_v1 = vpop.f32.mrf.mxu0  ;;  %v5526_v34 = vpop.f32.mrf.mxu3 }
 0xa0c   :  { %13454 = vst [vmem:[#allocation98_spill] sm:$0xff] %v10902_v1  ;;  %v10904_v38 = vadd.f32 %v5526_v34, %v5318_v61  ;;  %v3895_v34 = vld [vmem:[#allocation2 + $0x230] sm:$0xff] }
 0xa0e   :  { %5776 = vmatmul.f32.gmra.mxu0 %v3765_v17  ;;  %13455 = vst [vmem:[#allocation99_spill] sm:$0xff] %v10904_v38  ;;  %5367 = vmatmul.f32.gmra.mxu2 %v3830_v55  ;;  %v11051_v38 = vld [vmem:[#allocation2 + $0x302] sm:$0xff] }
 0xa0f   :  { %v5111_v57 = vpop.f32.mrf.mxu1 }
 0xa10   :  { %v5112_v26 = vadd.f32 %v5111_v57, %v4903_v16  ;;  %5576 = vmatmul.f32.gmra.mxu3 %v3894_v10  ;;  %v3767_v16 = vld [vmem:[#allocation2 + $0x219] sm:$0xff] }
 0xa11   :  { %v5320_v39 = vpop.f32.mrf.mxu2 }
 0xa12   :  { %5158 = vmatmul.f32.gmra.mxu1 %v3766_v8  ;;  %v5321_v25 = vadd.f32 %v5320_v39, %v5112_v26  ;;  %v13460_v39 = vld [vmem:[#allocation53_spill] sm:$0xff] }
 0xa13   :  { %v10908_v27 = vpop.f32.mrf.mxu0  ;;  %v5529_v58 = vpop.f32.mrf.mxu3 }
 0xa14   :  { %13456 = vst [vmem:[#allocation100_spill] sm:$0xff] %v10908_v27  ;;  %v10910_v17 = vadd.f32 %v5529_v58, %v5321_v25  ;;  %v13461_v25 = vld [vmem:[#allocation56_spill] sm:$0xff] }
 0xa15   :  { %v4909_v58 = vadd.f32 %v13461_v25, %v13460_v39  ;;  %v3833_v25 = vld [vmem:[#allocation2 + $0x232] sm:$0xff]  ;;  %v3786_v27 = vld [vmem:[#allocation2 + $0x301] sm:$0xff] }
 0xa16   :  { %5779 = vmatmul.f32.gmra.mxu0 %v3766_v8  ;;  %13457 = vst [vmem:[#allocation101_spill] sm:$0xff] %v10910_v17  ;;  %5370 = vmatmul.f32.gmra.mxu2 %v3831_v20  ;;  %v11044_v17 = vld [vmem:[#allocation2 + $0x2f2] sm:$0xff] }
 0xa17   :  { %v5114_v54 = vpop.f32.mrf.mxu1 }
 0xa18   :  { %v5115_v61 = vadd.f32 %v5114_v54, %v4906_v32  ;;  %5579 = vmatmul.f32.gmra.mxu3 %v3895_v34  ;;  %v3896_v32 = vld [vmem:[#allocation2 + $0x240] sm:$0xff]  ;;  %v3768_v54 = vld [vmem:[#allocation2 + $0x229] sm:$0xff] }
 0xa19   :  { %v5323_v57 = vpop.f32.mrf.mxu2 }
 0xa1a   :  { %5161 = vmatmul.f32.gmra.mxu1 %v3767_v16  ;;  %v5324_v10 = vadd.f32 %v5323_v57, %v5115_v61  ;;  %v4180_v57 = vld [vmem:[%s12821_s4 + $0x420] sm:$0xff] }
 0xa1b   :  { %v10914_v55 = vpop.f32.mrf.mxu0  ;;  %v5532_v26 = vpop.f32.mrf.mxu3  ;;  %5875 = vmatpush.msra.mxu1 %v4180_v57 }
 0xa1c   :  { %13458 = vst [vmem:[#allocation102_spill] sm:$0xff] %v10914_v55  ;;  %v10916_v8 = vadd.f32 %v5532_v26, %v5324_v10  ;;  %v13464_v10 = vld [vmem:[#allocation44_spill] sm:$0xff]  ;;  %v13465_v26 = vld [vmem:[#allocation59_spill] sm:$0xff] }
 0xa1d   :  { %v4912_v39 = vadd.f32 %v13465_v26, %v13464_v10  ;;  %v3834_v26 = vld [vmem:[#allocation2 + $0x242] sm:$0xff] }
 0xa1e   :  { %5782 = vmatmul.f32.gmra.mxu0 %v3767_v16  ;;  %13459 = vst [vmem:[#allocation103_spill] sm:$0xff] %v10916_v8  ;;  %5373 = vmatmul.f32.gmra.mxu2 %v3832_v49  ;;  %v13469_v8 = vld [vmem:[#allocation61_spill] sm:$0xff]  ;;  %v13530_v55 = vld [vmem:[#allocation43_spill] sm:$0xff] }
 0xa1f   :  { %v5117_v53 = vpop.f32.mrf.mxu1 }
 0xa20   :  { %v5118_v20 = vadd.f32 %v5117_v53, %v4909_v58  ;;  %5582 = vmatmul.f32.gmra.mxu3 %v3896_v32  ;;  %v3897_v53 = vld [vmem:[#allocation2 + $0x248] sm:$0xff]  ;;  %v3769_v32 = vld [vmem:[#allocation2 + $0x231] sm:$0xff] }
 0xa21   :  { %v5326_v52 = vpop.f32.mrf.mxu2 }
 0xa22   :  { %5164 = vmatmul.f32.gmra.mxu1 %v3768_v54  ;;  %v5327_v21 = vadd.f32 %v5326_v52, %v5118_v20 }
 0xa23   :  { %v10920_v34 = vpop.f32.mrf.mxu0  ;;  %v5535_v61 = vpop.f32.mrf.mxu3 }
 0xa24   :  { %13462 = vst [vmem:[#allocation53_spill] sm:$0xff] %v10920_v34  ;;  %v10922_v16 = vadd.f32 %v5535_v61, %v5327_v21 }
 0xa26   :  { %5785 = vmatmul.f32.gmra.mxu0 %v3768_v54  ;;  %13463 = vst [vmem:[#allocation56_spill] sm:$0xff] %v10922_v16  ;;  %5376 = vmatmul.f32.gmra.mxu2 %v3833_v25  ;;  %v13468_v16 = vld [vmem:[#allocation47_spill] sm:$0xff] }
 0xa27   :  { %v5120_v58 = vpop.f32.mrf.mxu1  ;;  %v4915_v10 = vadd.f32 %v13469_v8, %v13468_v16  ;;  %v3835_v8 = vld [vmem:[#allocation2 + $0x24a] sm:$0xff] }
 0xa28   :  { %v5121_v49 = vadd.f32 %v5120_v58, %v4912_v39  ;;  %5585 = vmatmul.f32.gmra.mxu3 %v3897_v53  ;;  %v3898_v39 = vld [vmem:[#allocation2 + $0x258] sm:$0xff]  ;;  %v3770_v58 = vld [vmem:[#allocation2 + $0x241] sm:$0xff] }
 0xa29   :  { %v5329_v21 = vpop.f32.mrf.mxu2 }
 0xa2a   :  { %5167 = vmatmul.f32.gmra.mxu1 %v3769_v32  ;;  %v5330_v20 = vadd.f32 %v5329_v21, %v5121_v49  ;;  %v13472_v21 = vld [vmem:[#allocation51_spill] sm:$0xff] }
 0xa2b   :  { %v10929_v52 = vpop.f32.mrf.mxu0  ;;  %v5538_v54 = vpop.f32.mrf.mxu3 }
 0xa2c   :  { %13466 = vst [vmem:[#allocation44_spill] sm:$0xff] %v10929_v52  ;;  %v10931_v61 = vadd.f32 %v5538_v54, %v5330_v20  ;;  %v13473_v20 = vld [vmem:[#allocation63_spill] sm:$0xff] }
 0xa2d   :  { %v4918_v54 = vadd.f32 %v13473_v20, %v13472_v21  ;;  %v3836_v21 = vld [vmem:[#allocation2 + $0x25a] sm:$0xff] }
 0xa2e   :  { %5788 = vmatmul.f32.gmra.mxu0 %v3769_v32  ;;  %13467 = vst [vmem:[#allocation59_spill] sm:$0xff] %v10931_v61  ;;  %5379 = vmatmul.f32.gmra.mxu2 %v3834_v26 }
 0xa2f   :  { %v5123_v57 = vpop.f32.mrf.mxu1 }
 0xa30   :  { %v5124_v25 = vadd.f32 %v5123_v57, %v4915_v10  ;;  %5588 = vmatmul.f32.gmra.mxu3 %v3898_v39  ;;  %v3899_v10 = vld [vmem:[#allocation2 + $0x260] sm:$0xff]  ;;  %v3771_v57 = vld [vmem:[#allocation2 + $0x249] sm:$0xff] }
 0xa31   :  { %v5332_v52 = vpop.f32.mrf.mxu2 }
 0xa32   :  { %5170 = vmatmul.f32.gmra.mxu1 %v3770_v58  ;;  %v5333_v34 = vadd.f32 %v5332_v52, %v5124_v25 }
 0xa33   :  { %v10935_v53 = vpop.f32.mrf.mxu0  ;;  %v5541_v49 = vpop.f32.mrf.mxu3 }
 0xa34   :  { %13470 = vst [vmem:[#allocation47_spill] sm:$0xff] %v10935_v53  ;;  %v10937_v32 = vadd.f32 %v5541_v49, %v5333_v34  ;;  %v13476_v34 = vld [vmem:[#allocation54_spill] sm:$0xff] }
 0xa36   :  { %5791 = vmatmul.f32.gmra.mxu0 %v3770_v58  ;;  %13471 = vst [vmem:[#allocation61_spill] sm:$0xff] %v10937_v32  ;;  %5382 = vmatmul.f32.gmra.mxu2 %v3835_v8  ;;  %v13477_v58 = vld [vmem:[#allocation5_spill] sm:$0xff] }
 0xa37   :  { %v5126_v16 = vpop.f32.mrf.mxu1  ;;  %v4921_v49 = vadd.f32 %v13477_v58, %v13476_v34  ;;  %v3837_v58 = vld [vmem:[#allocation2 + $0x262] sm:$0xff] }
 0xa38   :  { %v5127_v26 = vadd.f32 %v5126_v16, %v4918_v54  ;;  %5591 = vmatmul.f32.gmra.mxu3 %v3899_v10  ;;  %v3900_v54 = vld [vmem:[#allocation2 + $0x270] sm:$0xff]  ;;  %v3772_v16 = vld [vmem:[#allocation2 + $0x259] sm:$0xff] }
 0xa39   :  { %v5335_v61 = vpop.f32.mrf.mxu2 }
 0xa3a   :  { %5173 = vmatmul.f32.gmra.mxu1 %v3771_v57  ;;  %v5336_v53 = vadd.f32 %v5335_v61, %v5127_v26 }
 0xa3b   :  { %v10941_v39 = vpop.f32.mrf.mxu0  ;;  %v5544_v52 = vpop.f32.mrf.mxu3 }
 0xa3c   :  { %13474 = vst [vmem:[#allocation51_spill] sm:$0xff] %v10941_v39  ;;  %v10943_v25 = vadd.f32 %v5544_v52, %v5336_v53  ;;  %v4179_v53 = vld [vmem:[%s12821_s4 + $0x418] sm:$0xff] }
 0xa3d   :  { %v13481_v52 = vld [vmem:[#allocation6_spill] sm:$0xff]  ;;  %5876 = vmatpush.msra.mxu1 %v4179_v53 }
 0xa3e   :  { %5794 = vmatmul.f32.gmra.mxu0 %v3771_v57  ;;  %13475 = vst [vmem:[#allocation63_spill] sm:$0xff] %v10943_v25  ;;  %5385 = vmatmul.f32.gmra.mxu2 %v3836_v21  ;;  %v13480_v57 = vld [vmem:[#allocation57_spill] sm:$0xff]  ;;  %v13485_v25 = vld [vmem:[#allocation7_spill] sm:$0xff] }
 0xa3f   :  { %v5129_v20 = vpop.f32.mrf.mxu1  ;;  %v4924_v34 = vadd.f32 %v13481_v52, %v13480_v57  ;;  %v3838_v52 = vld [vmem:[#allocation2 + $0x272] sm:$0xff] }
 0xa40   :  { %v5130_v8 = vadd.f32 %v5129_v20, %v4921_v49  ;;  %5594 = vmatmul.f32.gmra.mxu3 %v3900_v54  ;;  %v3901_v20 = vld [vmem:[#allocation2 + $0x278] sm:$0xff]  ;;  %v3773_v54 = vld [vmem:[#allocation2 + $0x261] sm:$0xff] }
 0xa41   :  { %v5338_v32 = vpop.f32.mrf.mxu2 }
 0xa42   :  { %5176 = vmatmul.f32.gmra.mxu1 %v3772_v16  ;;  %v5339_v39 = vadd.f32 %v5338_v32, %v5130_v8 }
 0xa43   :  { %v10947_v10 = vpop.f32.mrf.mxu0  ;;  %v5547_v61 = vpop.f32.mrf.mxu3 }
 0xa44   :  { %13478 = vst [vmem:[#allocation54_spill] sm:$0xff] %v10947_v10  ;;  %v10949_v26 = vadd.f32 %v5547_v61, %v5339_v39 }
 0xa46   :  { %5797 = vmatmul.f32.gmra.mxu0 %v3772_v16  ;;  %13479 = vst [vmem:[#allocation5_spill] sm:$0xff] %v10949_v26  ;;  %5388 = vmatmul.f32.gmra.mxu2 %v3837_v58  ;;  %v13484_v26 = vld [vmem:[#allocation3_spill] sm:$0xff] }
 0xa47   :  { %v5132_v49 = vpop.f32.mrf.mxu1  ;;  %v4927_v57 = vadd.f32 %v13485_v25, %v13484_v26  ;;  %v3839_v25 = vld [vmem:[#allocation2 + $0x27a] sm:$0xff] }
 0xa48   :  { %v5133_v21 = vadd.f32 %v5132_v49, %v4924_v34  ;;  %5597 = vmatmul.f32.gmra.mxu3 %v3901_v20  ;;  %v3902_v34 = vld [vmem:[#allocation2 + $0x288] sm:$0xff]  ;;  %v3774_v49 = vld [vmem:[#allocation2 + $0x271] sm:$0xff] }
 0xa49   :  { %v5341_v39 = vpop.f32.mrf.mxu2 }
 0xa4a   :  { %5179 = vmatmul.f32.gmra.mxu1 %v3773_v54  ;;  %v5342_v8 = vadd.f32 %v5341_v39, %v5133_v21  ;;  %v13488_v39 = vld [vmem:[#allocation4_spill] sm:$0xff] }
 0xa4b   :  { %v10956_v32 = vpop.f32.mrf.mxu0  ;;  %v5550_v16 = vpop.f32.mrf.mxu3 }
 0xa4c   :  { %13482 = vst [vmem:[#allocation57_spill] sm:$0xff] %v10956_v32  ;;  %v10958_v61 = vadd.f32 %v5550_v16, %v5342_v8  ;;  %v13489_v8 = vld [vmem:[#allocation9_spill] sm:$0xff] }
 0xa4d   :  { %v4930_v16 = vadd.f32 %v13489_v8, %v13488_v39  ;;  %v3840_v39 = vld [vmem:[#allocation2 + $0x28a] sm:$0xff] }
 0xa4e   :  { %5800 = vmatmul.f32.gmra.mxu0 %v3773_v54  ;;  %13483 = vst [vmem:[#allocation6_spill] sm:$0xff] %v10958_v61  ;;  %5391 = vmatmul.f32.gmra.mxu2 %v3838_v52 }
 0xa4f   :  { %v5135_v53 = vpop.f32.mrf.mxu1 }
 0xa50   :  { %v5136_v58 = vadd.f32 %v5135_v53, %v4927_v57  ;;  %5600 = vmatmul.f32.gmra.mxu3 %v3902_v34  ;;  %v3903_v57 = vld [vmem:[#allocation2 + $0x290] sm:$0xff]  ;;  %v3775_v53 = vld [vmem:[#allocation2 + $0x279] sm:$0xff] }
 0xa51   :  { %v5344_v32 = vpop.f32.mrf.mxu2 }
 0xa52   :  { %5182 = vmatmul.f32.gmra.mxu1 %v3774_v49  ;;  %v5345_v10 = vadd.f32 %v5344_v32, %v5136_v58 }
 0xa53   :  { %v10962_v20 = vpop.f32.mrf.mxu0  ;;  %v5553_v21 = vpop.f32.mrf.mxu3 }
 0xa54   :  { %13486 = vst [vmem:[#allocation3_spill] sm:$0xff] %v10962_v20  ;;  %v10964_v54 = vadd.f32 %v5553_v21, %v5345_v10  ;;  %v13492_v10 = vld [vmem:[#allocation8_spill] sm:$0xff] }
 0xa56   :  { %5803 = vmatmul.f32.gmra.mxu0 %v3774_v49  ;;  %13487 = vst [vmem:[#allocation7_spill] sm:$0xff] %v10964_v54  ;;  %5394 = vmatmul.f32.gmra.mxu2 %v3839_v25  ;;  %v13493_v49 = vld [vmem:[#allocation11_spill] sm:$0xff] }
 0xa57   :  { %v5138_v26 = vpop.f32.mrf.mxu1  ;;  %v4933_v21 = vadd.f32 %v13493_v49, %v13492_v10  ;;  %v3841_v49 = vld [vmem:[#allocation2 + $0x292] sm:$0xff] }
 0xa58   :  { %v5139_v52 = vadd.f32 %v5138_v26, %v4930_v16  ;;  %5603 = vmatmul.f32.gmra.mxu3 %v3903_v57  ;;  %v3904_v16 = vld [vmem:[#allocation2 + $0x2a0] sm:$0xff]  ;;  %v3776_v26 = vld [vmem:[#allocation2 + $0x289] sm:$0xff] }
 0xa59   :  { %v5347_v61 = vpop.f32.mrf.mxu2 }
 0xa5a   :  { %5185 = vmatmul.f32.gmra.mxu1 %v3775_v53  ;;  %v5348_v20 = vadd.f32 %v5347_v61, %v5139_v52 }
 0xa5b   :  { %v10968_v34 = vpop.f32.mrf.mxu0  ;;  %v5556_v32 = vpop.f32.mrf.mxu3 }
 0xa5c   :  { %13490 = vst [vmem:[#allocation4_spill] sm:$0xff] %v10968_v34  ;;  %v10970_v58 = vadd.f32 %v5556_v32, %v5348_v20  ;;  %v4178_v20 = vld [vmem:[%s12821_s4 + $0x410] sm:$0xff] }
 0xa5d   :  { %v13497_v32 = vld [vmem:[#allocation13_spill] sm:$0xff]  ;;  %5877 = vmatpush.msra.mxu1 %v4178_v20 }
 0xa5e   :  { %5806 = vmatmul.f32.gmra.mxu0 %v3775_v53  ;;  %13491 = vst [vmem:[#allocation9_spill] sm:$0xff] %v10970_v58  ;;  %5397 = vmatmul.f32.gmra.mxu2 %v3840_v39  ;;  %v13496_v53 = vld [vmem:[#allocation10_spill] sm:$0xff]  ;;  %v13501_v58 = vld [vmem:[#allocation15_spill] sm:$0xff] }
 0xa5f   :  { %v5141_v8 = vpop.f32.mrf.mxu1  ;;  %v4936_v10 = vadd.f32 %v13497_v32, %v13496_v53  ;;  %v3842_v32 = vld [vmem:[#allocation2 + $0x2a2] sm:$0xff] }
 0xa60   :  { %v5142_v25 = vadd.f32 %v5141_v8, %v4933_v21  ;;  %5606 = vmatmul.f32.gmra.mxu3 %v3904_v16  ;;  %v3905_v8 = vld [vmem:[#allocation2 + $0x2a8] sm:$0xff]  ;;  %v3777_v16 = vld [vmem:[#allocation2 + $0x291] sm:$0xff] }
 0xa61   :  { %v5350_v54 = vpop.f32.mrf.mxu2 }
 0xa62   :  { %5188 = vmatmul.f32.gmra.mxu1 %v3776_v26  ;;  %v5351_v34 = vadd.f32 %v5350_v54, %v5142_v25 }
 0xa63   :  { %v10974_v57 = vpop.f32.mrf.mxu0  ;;  %v5559_v61 = vpop.f32.mrf.mxu3 }
 0xa64   :  { %13494 = vst [vmem:[#allocation8_spill] sm:$0xff] %v10974_v57  ;;  %v10976_v52 = vadd.f32 %v5559_v61, %v5351_v34 }
 0xa66   :  { %5809 = vmatmul.f32.gmra.mxu0 %v3776_v26  ;;  %13495 = vst [vmem:[#allocation11_spill] sm:$0xff] %v10976_v52  ;;  %5400 = vmatmul.f32.gmra.mxu2 %v3841_v49  ;;  %v13500_v52 = vld [vmem:[#allocation12_spill] sm:$0xff] }
 0xa67   :  { %v5144_v21 = vpop.f32.mrf.mxu1  ;;  %v4939_v53 = vadd.f32 %v13501_v58, %v13500_v52  ;;  %v3843_v58 = vld [vmem:[#allocation2 + $0x2aa] sm:$0xff] }
 0xa68   :  { %v5145_v39 = vadd.f32 %v5144_v21, %v4936_v10  ;;  %5609 = vmatmul.f32.gmra.mxu3 %v3905_v8  ;;  %v3906_v10 = vld [vmem:[#allocation2 + $0x2b8] sm:$0xff]  ;;  %v3778_v21 = vld [vmem:[#allocation2 + $0x2a1] sm:$0xff] }
 0xa69   :  { %v5353_v34 = vpop.f32.mrf.mxu2 }
 0xa6a   :  { %5191 = vmatmul.f32.gmra.mxu1 %v3777_v16  ;;  %v5354_v25 = vadd.f32 %v5353_v34, %v5145_v39  ;;  %v13504_v34 = vld [vmem:[#allocation14_spill] sm:$0xff] }
 0xa6b   :  { %v10983_v54 = vpop.f32.mrf.mxu0  ;;  %v5562_v26 = vpop.f32.mrf.mxu3 }
 0xa6c   :  { %13498 = vst [vmem:[#allocation10_spill] sm:$0xff] %v10983_v54  ;;  %v10985_v61 = vadd.f32 %v5562_v26, %v5354_v25  ;;  %v13505_v25 = vld [vmem:[#allocation17_spill] sm:$0xff] }
 0xa6d   :  { %v4942_v26 = vadd.f32 %v13505_v25, %v13504_v34  ;;  %v3844_v34 = vld [vmem:[#allocation2 + $0x2ba] sm:$0xff] }
 0xa6e   :  { %5812 = vmatmul.f32.gmra.mxu0 %v3777_v16  ;;  %13499 = vst [vmem:[#allocation13_spill] sm:$0xff] %v10985_v61  ;;  %5403 = vmatmul.f32.gmra.mxu2 %v3842_v32 }
 0xa6f   :  { %v5147_v20 = vpop.f32.mrf.mxu1 }
 0xa70   :  { %v5148_v49 = vadd.f32 %v5147_v20, %v4939_v53  ;;  %5612 = vmatmul.f32.gmra.mxu3 %v3906_v10  ;;  %v3907_v53 = vld [vmem:[#allocation2 + $0x2c0] sm:$0xff]  ;;  %v3779_v20 = vld [vmem:[#allocation2 + $0x2a9] sm:$0xff] }
 0xa71   :  { %v5356_v54 = vpop.f32.mrf.mxu2 }
 0xa72   :  { %5194 = vmatmul.f32.gmra.mxu1 %v3778_v21  ;;  %v5357_v57 = vadd.f32 %v5356_v54, %v5148_v49 }
 0xa73   :  { %v10989_v8 = vpop.f32.mrf.mxu0  ;;  %v5565_v39 = vpop.f32.mrf.mxu3 }
 0xa74   :  { %13502 = vst [vmem:[#allocation12_spill] sm:$0xff] %v10989_v8  ;;  %v10991_v16 = vadd.f32 %v5565_v39, %v5357_v57  ;;  %v13508_v57 = vld [vmem:[#allocation16_spill] sm:$0xff] }
 0xa76   :  { %5815 = vmatmul.f32.gmra.mxu0 %v3778_v21  ;;  %13503 = vst [vmem:[#allocation15_spill] sm:$0xff] %v10991_v16  ;;  %5406 = vmatmul.f32.gmra.mxu2 %v3843_v58  ;;  %v13509_v21 = vld [vmem:[#allocation19_spill] sm:$0xff] }
 0xa77   :  { %v5150_v52 = vpop.f32.mrf.mxu1  ;;  %v4945_v39 = vadd.f32 %v13509_v21, %v13508_v57  ;;  %v3845_v21 = vld [vmem:[#allocation2 + $0x2c2] sm:$0xff] }
 0xa78   :  { %v5151_v32 = vadd.f32 %v5150_v52, %v4942_v26  ;;  %5615 = vmatmul.f32.gmra.mxu3 %v3907_v53  ;;  %v3908_v26 = vld [vmem:[#allocation2 + $0x2d0] sm:$0xff]  ;;  %v3780_v52 = vld [vmem:[#allocation2 + $0x2b9] sm:$0xff] }
 0xa79   :  { %v5359_v61 = vpop.f32.mrf.mxu2 }
 0xa7a   :  { %5197 = vmatmul.f32.gmra.mxu1 %v3779_v20  ;;  %v5360_v8 = vadd.f32 %v5359_v61, %v5151_v32 }
 0xa7b   :  { %v10995_v10 = vpop.f32.mrf.mxu0  ;;  %v5568_v54 = vpop.f32.mrf.mxu3 }
 0xa7c   :  { %13506 = vst [vmem:[#allocation14_spill] sm:$0xff] %v10995_v10  ;;  %v10997_v49 = vadd.f32 %v5568_v54, %v5360_v8  ;;  %v4177_v8 = vld [vmem:[%s12821_s4 + $0x408] sm:$0xff]  ;;  %v13513_v54 = vld [vmem:[#allocation23_spill] sm:$0xff] }
 0xa7d   :  { %5878 = vmatpush.msra.mxu1 %v4177_v8 }
 0xa7e   :  { %5818 = vmatmul.f32.gmra.mxu0 %v3779_v20  ;;  %13507 = vst [vmem:[#allocation17_spill] sm:$0xff] %v10997_v49  ;;  %5409 = vmatmul.f32.gmra.mxu2 %v3844_v34  ;;  %v13512_v20 = vld [vmem:[#allocation18_spill] sm:$0xff]  ;;  %v13517_v49 = vld [vmem:[#allocation28_spill] sm:$0xff] }
 0xa7f   :  { %v5153_v25 = vpop.f32.mrf.mxu1  ;;  %v4948_v57 = vadd.f32 %v13513_v54, %v13512_v20  ;;  %v11016_v54 = vld [vmem:[#allocation2 + $0x2d2] sm:$0xff] }
 0xa80   :  { %v5154_v58 = vadd.f32 %v5153_v25, %v4945_v39  ;;  %5618 = vmatmul.f32.gmra.mxu3 %v3908_v26  ;;  %v3909_v25 = vld [vmem:[#allocation2 + $0x2d8] sm:$0xff]  ;;  %v3781_v26 = vld [vmem:[#allocation2 + $0x2c1] sm:$0xff] }
 0xa81   :  { %v5362_v16 = vpop.f32.mrf.mxu2 }
 0xa82   :  { %5200 = vmatmul.f32.gmra.mxu1 %v3780_v52  ;;  %v5363_v10 = vadd.f32 %v5362_v16, %v5154_v58 }
 0xa83   :  { %v11001_v53 = vpop.f32.mrf.mxu0  ;;  %v5571_v61 = vpop.f32.mrf.mxu3 }
 0xa84   :  { %13510 = vst [vmem:[#allocation16_spill] sm:$0xff] %v11001_v53  ;;  %v11003_v32 = vadd.f32 %v5571_v61, %v5363_v10 }
 0xa86   :  { %5821 = vmatmul.f32.gmra.mxu0 %v3780_v52  ;;  %13511 = vst [vmem:[#allocation19_spill] sm:$0xff] %v11003_v32  ;;  %5412 = vmatmul.f32.gmra.mxu2 %v3845_v21  ;;  %v13516_v32 = vld [vmem:[#allocation21_spill] sm:$0xff]  ;;  %v3910_v21 = vld [vmem:[#allocation2 + $0x2e8] sm:$0xff] }
 0xa87   :  { %v5156_v39 = vpop.f32.mrf.mxu1  ;;  %v4951_v20 = vadd.f32 %v13517_v49, %v13516_v32  ;;  %v13521_v49 = vld [vmem:[#allocation34_spill] sm:$0xff] }
 0xa88   :  { %v5157_v34 = vadd.f32 %v5156_v39, %v4948_v57  ;;  %5621 = vmatmul.f32.gmra.mxu3 %v3909_v25  ;;  %v3782_v39 = vld [vmem:[#allocation2 + $0x2d1] sm:$0xff] }
 0xa89   :  { %v5365_v10 = vpop.f32.mrf.mxu2 }
 0xa8a   :  { %5203 = vmatmul.f32.gmra.mxu1 %v3781_v26  ;;  %v5366_v58 = vadd.f32 %v5365_v10, %v5157_v34 }
 0xa8b   :  { %v11010_v16 = vpop.f32.mrf.mxu0  ;;  %v5574_v52 = vpop.f32.mrf.mxu3 }
 0xa8c   :  { %13514 = vst [vmem:[#allocation18_spill] sm:$0xff] %v11010_v16  ;;  %v11012_v61 = vadd.f32 %v5574_v52, %v5366_v58  ;;  %v13520_v52 = vld [vmem:[#allocation25_spill] sm:$0xff] }
 0xa8d   :  { %v4954_v32 = vadd.f32 %v13521_v49, %v13520_v52  ;;  %v13525_v52 = vld [vmem:[#allocation40_spill] sm:$0xff] }
 0xa8e   :  { %5824 = vmatmul.f32.gmra.mxu0 %v3781_v26  ;;  %13515 = vst [vmem:[#allocation23_spill] sm:$0xff] %v11012_v61  ;;  %5415 = vmatmul.f32.gmra.mxu2 %v11016_v54  ;;  %v11025_v61 = vld [vmem:[#allocation2 + $0x2da] sm:$0xff] }
 0xa8f   :  { %v5159_v8 = vpop.f32.mrf.mxu1 }
 0xa90   :  { %v5160_v57 = vadd.f32 %v5159_v8, %v4951_v20  ;;  %5624 = vmatmul.f32.gmra.mxu3 %v3910_v21  ;;  %v3911_v8 = vld [vmem:[#allocation2 + $0x2f0] sm:$0xff]  ;;  %v3783_v21 = vld [vmem:[#allocation2 + $0x2d9] sm:$0xff] }
 0xa91   :  { %v5368_v34 = vpop.f32.mrf.mxu2 }
 0xa92   :  { %5206 = vmatmul.f32.gmra.mxu1 %v3782_v39  ;;  %v5369_v10 = vadd.f32 %v5368_v34, %v5160_v57 }
 0xa93   :  { %v11019_v25 = vpop.f32.mrf.mxu0  ;;  %v5577_v26 = vpop.f32.mrf.mxu3 }
 0xa94   :  { %13518 = vst [vmem:[#allocation21_spill] sm:$0xff] %v11019_v25  ;;  %v11021_v58 = vadd.f32 %v5577_v26, %v5369_v10  ;;  %v13524_v26 = vld [vmem:[#allocation31_spill] sm:$0xff] }
 0xa95   :  { %v4957_v49 = vadd.f32 %v13525_v52, %v13524_v26  ;;  %v13527_v26 = vld [vmem:[#allocation37_spill] sm:$0xff]  ;;  %v13528_v52 = vld [vmem:[#allocation46_spill] sm:$0xff] }
 0xa96   :  { %5827 = vmatmul.f32.gmra.mxu0 %v3782_v39  ;;  %13519 = vst [vmem:[#allocation28_spill] sm:$0xff] %v11021_v58  ;;  %5418 = vmatmul.f32.gmra.mxu2 %v11025_v61  ;;  %v11034_v58 = vld [vmem:[#allocation2 + $0x2ea] sm:$0xff] }
 0xa97   :  { %v5162_v16 = vpop.f32.mrf.mxu1 }
 0xa98   :  { %v5163_v20 = vadd.f32 %v5162_v16, %v4954_v32  ;;  %5627 = vmatmul.f32.gmra.mxu3 %v3911_v8  ;;  %v3912_v32 = vld [vmem:[#allocation2 + $0x300] sm:$0xff]  ;;  %v3784_v8 = vld [vmem:[#allocation2 + $0x2e9] sm:$0xff] }
 0xa99   :  { %v5371_v57 = vpop.f32.mrf.mxu2 }
 0xa9a   :  { %5209 = vmatmul.f32.gmra.mxu1 %v3783_v21  ;;  %v5372_v34 = vadd.f32 %v5371_v57, %v5163_v20 }
 0xa9b   :  { %v11028_v25 = vpop.f32.mrf.mxu0  ;;  %v5580_v39 = vpop.f32.mrf.mxu3 }
 0xa9c   :  { %13522 = vst [vmem:[#allocation25_spill] sm:$0xff] %v11028_v25  ;;  %v11030_v10 = vadd.f32 %v5580_v39, %v5372_v34  ;;  %v4176_v39 = vld [vmem:[%s12821_s4 + $0x400] sm:$0xff] }
 0xa9d   :  { %5879 = vmatpush.msra.mxu1 %v4176_v39 }
 0xa9e   :  { %5830 = vmatmul.f32.gmra.mxu0 %v3783_v21  ;;  %13523 = vst [vmem:[#allocation34_spill] sm:$0xff] %v11030_v10  ;;  %5421 = vmatmul.f32.gmra.mxu2 %v11034_v58  ;;  %v4960_v10 = vadd.f32 %v13528_v52, %v13527_v26  ;;  %v13531_v26 = vld [vmem:[#allocation52_spill] sm:$0xff] }
 0xa9f   :  { %v5165_v53 = vpop.f32.mrf.mxu1  ;;  %v4963_v52 = vadd.f32 %v13531_v26, %v13530_v55  ;;  %v13533_v55 = vld [vmem:[#allocation58_spill] sm:$0xff]  ;;  %v11058_v26 = vld [vmem:[#allocation2 + $0x30a] sm:$0xff] }
 0xaa0   :  { %v5166_v16 = vadd.f32 %v5165_v53, %v4957_v49  ;;  %5630 = vmatmul.f32.gmra.mxu3 %v3912_v32  ;;  %v3913_v32 = vld [vmem:[#allocation2 + $0x308] sm:$0xff] }
 0xaa1   :  { %v5374_v20 = vpop.f32.mrf.mxu2 }
 0xaa2   :  { %5212 = vmatmul.f32.gmra.mxu1 %v3784_v8  ;;  %v5375_v57 = vadd.f32 %v5374_v20, %v5166_v16 }
 0xaa3   :  { %v11037_v25 = vpop.f32.mrf.mxu0  ;;  %v5583_v21 = vpop.f32.mrf.mxu3 }
 0xaa4   :  { %13526 = vst [vmem:[#allocation31_spill] sm:$0xff] %v11037_v25  ;;  %v5584_v34 = vadd.f32 %v5583_v21, %v5375_v57  ;;  %v3785_v25 = vld [vmem:[#allocation2 + $0x2f1] sm:$0xff] }
 0xaa6   :  { %5833 = vmatmul.f32.gmra.mxu0 %v3784_v8  ;;  %5424 = vmatmul.f32.gmra.mxu2 %v11044_v17 }
 0xaa7   :  { %v5168_v53 = vpop.f32.mrf.mxu1 }
 0xaa8   :  { %v5169_v49 = vadd.f32 %v5168_v53, %v4960_v10  ;;  %5633 = vmatmul.f32.gmra.mxu3 %v3913_v32  ;;  %v3914_v53 = vld [vmem:[#allocation2 + $0x318] sm:$0xff] }
 0xaa9   :  { %v5377_v8 = vpop.f32.mrf.mxu2 }
 0xaaa   :  { %5215 = vmatmul.f32.gmra.mxu1 %v3785_v25  ;;  %v5378_v20 = vadd.f32 %v5377_v8, %v5169_v49 }
 0xaab   :  { %v11047_v16 = vpop.f32.mrf.mxu0  ;;  %v5586_v57 = vpop.f32.mrf.mxu3 }
 0xaac   :  { %13529 = vst [vmem:[#allocation40_spill] sm:$0xff] %v11047_v16  ;;  %v5587_v21 = vadd.f32 %v5586_v57, %v5378_v20  ;;  %v13532_v20 = vld [vmem:[#allocation49_spill] sm:$0xff] }
 0xaad   :  { %v4966_v57 = vadd.f32 %v13533_v55, %v13532_v20  ;;  %v11065_v55 = vld [vmem:[#allocation2 + $0x31a] sm:$0xff] }
 0xaae   :  { %5836 = vmatmul.f32.gmra.mxu0 %v3785_v25  ;;  %5427 = vmatmul.f32.gmra.mxu2 %v11051_v38 }
 0xaaf   :  { %v5171_v39 = vpop.f32.mrf.mxu1 }
 0xab0   :  { %v5172_v10 = vadd.f32 %v5171_v39, %v4963_v52  ;;  %5636 = vmatmul.f32.gmra.mxu3 %v3914_v53  ;;  %v3915_v39 = vld [vmem:[#allocation2 + $0x320] sm:$0xff]  ;;  %v3787_v53 = vld [vmem:[#allocation2 + $0x309] sm:$0xff] }
 0xab1   :  { %v5380_v16 = vpop.f32.mrf.mxu2 }
 0xab2   :  { %5218 = vmatmul.f32.gmra.mxu1 %v3786_v27  ;;  %v5381_v49 = vadd.f32 %v5380_v16, %v5172_v10 }
 0xab3   :  { %v5792_v32 = vpop.f32.mrf.mxu0  ;;  %v5589_v25 = vpop.f32.mrf.mxu3 }
 0xab4   :  { %v11054_v45 = vadd.f32 %v5792_v32, %v5584_v34  ;;  %v5590_v8 = vadd.f32 %v5589_v25, %v5381_v49  ;;  %v13534_v49 = vld [vmem:[#allocation55_spill] sm:$0xff] }
 0xab5   :  { %v13535_v25 = vld [vmem:[#allocation27_spill] sm:$0xff] }
 0xab6   :  { %5839 = vmatmul.f32.gmra.mxu0 %v3786_v27  ;;  %5430 = vmatmul.f32.gmra.mxu2 %v11058_v26  ;;  %v4969_v20 = vadd.f32 %v13535_v25, %v13534_v49  ;;  %v11072_v25 = vld [vmem:[#allocation2 + $0x322] sm:$0xff] }
 0xab7   :  { %v5174_v1 = vpop.f32.mrf.mxu1 }
 0xab8   :  { %v5175_v52 = vadd.f32 %v5174_v1, %v4966_v57  ;;  %5639 = vmatmul.f32.gmra.mxu3 %v3915_v39  ;;  %v3916_v57 = vld [vmem:[#allocation2 + $0x330] sm:$0xff]  ;;  %v3788_v39 = vld [vmem:[#allocation2 + $0x319] sm:$0xff] }
 0xab9   :  { %v5383_v34 = vpop.f32.mrf.mxu2 }
 0xaba   :  { %5221 = vmatmul.f32.gmra.mxu1 %v3787_v53  ;;  %v5384_v16 = vadd.f32 %v5383_v34, %v5175_v52 }
 0xabb   :  { %v5795_v44 = vpop.f32.mrf.mxu0  ;;  %v5592_v27 = vpop.f32.mrf.mxu3 }
 0xabc   :  { %v11061_v32 = vadd.f32 %v5795_v44, %v5587_v21  ;;  %v5593_v10 = vadd.f32 %v5592_v27, %v5384_v16  ;;  %v13536_v16 = vld [vmem:[#allocation62_spill] sm:$0xff]  ;;  %v13537_v27 = vld [vmem:[#allocation33_spill] sm:$0xff] }
 0xabd   :  { %v4972_v49 = vadd.f32 %v13537_v27, %v13536_v16  ;;  %v11079_v16 = vld [vmem:[#allocation2 + $0x332] sm:$0xff] }
 0xabe   :  { %5842 = vmatmul.f32.gmra.mxu0 %v3787_v53  ;;  %5433 = vmatmul.f32.gmra.mxu2 %v11065_v55 }
 0xabf   :  { %v5177_v56 = vpop.f32.mrf.mxu1 }
 0xac0   :  { %v5178_v1 = vadd.f32 %v5177_v56, %v4969_v20  ;;  %5642 = vmatmul.f32.gmra.mxu3 %v3916_v57  ;;  %v3917_v20 = vld [vmem:[#allocation2 + $0x338] sm:$0xff]  ;;  %v3789_v57 = vld [vmem:[#allocation2 + $0x321] sm:$0xff] }
 0xac1   :  { %v5386_v44 = vpop.f32.mrf.mxu2 }
 0xac2   :  { %5224 = vmatmul.f32.gmra.mxu1 %v3788_v39  ;;  %v5387_v52 = vadd.f32 %v5386_v44, %v5178_v1 }
 0xac3   :  { %v5798_v41 = vpop.f32.mrf.mxu0  ;;  %v5595_v53 = vpop.f32.mrf.mxu3 }
 0xac4   :  { %v11068_v21 = vadd.f32 %v5798_v41, %v5590_v8  ;;  %v5596_v34 = vadd.f32 %v5595_v53, %v5387_v52  ;;  %v13538_v52 = vld [vmem:[#allocation22_spill] sm:$0xff] }
 0xac5   :  { %v4975_v53 = vadd.f32 %v10676_v2, %v13538_v52  ;;  %v13540_v2 = vld [vmem:[#allocation73_spill] sm:$0xff]  ;;  %v11087_v52 = vld [vmem:[#allocation2 + $0x33a] sm:$0xff] }
 0xac6   :  { %5845 = vmatmul.f32.gmra.mxu0 %v3788_v39  ;;  %5436 = vmatmul.f32.gmra.mxu2 %v11072_v25 }
 0xac7   :  { %v5180_v30 = vpop.f32.mrf.mxu1 }
 0xac8   :  { %v5181_v56 = vadd.f32 %v5180_v30, %v4972_v49  ;;  %5645 = vmatmul.f32.gmra.mxu3 %v3917_v20  ;;  %v3790_v49 = vld [vmem:[#allocation2 + $0x331] sm:$0xff] }
 0xac9   :  { %v5389_v41 = vpop.f32.mrf.mxu2 }
 0xaca   :  { %5227 = vmatmul.f32.gmra.mxu1 %v3789_v57  ;;  %v5390_v1 = vadd.f32 %v5389_v41, %v5181_v56 }
 0xacb   :  { %v5801_v43 = vpop.f32.mrf.mxu0  ;;  %v5598_v39 = vpop.f32.mrf.mxu3 }
 0xacc   :  { %v11075_v8 = vadd.f32 %v5801_v43, %v5593_v10  ;;  %v5599_v44 = vadd.f32 %v5598_v39, %v5390_v1  ;;  %v13539_v1 = vld [vmem:[#allocation66_spill] sm:$0xff] }
 0xacd   :  { %v4978_v39 = vadd.f32 %v13540_v2, %v13539_v1 }
 0xace   :  { %5848 = vmatmul.f32.gmra.mxu0 %v3789_v57  ;;  %5439 = vmatmul.f32.gmra.mxu2 %v11079_v16 }
 0xacf   :  { %v5183_v27 = vpop.f32.mrf.mxu1 }
 0xad0   :  { %v5184_v30 = vadd.f32 %v5183_v27, %v4975_v53  ;;  %5648 = vmatmul.f32.gmra.mxu3 %v10850_v48  ;;  %v3791_v27 = vld [vmem:[#allocation2 + $0x339] sm:$0xff]  ;;  %v6857_v48 = vld [vmem:[#allocation2 + $0x1b0] sm:$0xff] }
 0xad1   :  { %v5392_v43 = vpop.f32.mrf.mxu2 }
 0xad2   :  { %5230 = vmatmul.f32.gmra.mxu1 %v3790_v49  ;;  %v5393_v56 = vadd.f32 %v5392_v43, %v5184_v30 }
 0xad3   :  { %v5804_v20 = vpop.f32.mrf.mxu0  ;;  %v5601_v57 = vpop.f32.mrf.mxu3 }
 0xad4   :  { %v11083_v10 = vadd.f32 %v5804_v20, %v5596_v34  ;;  %v5602_v41 = vadd.f32 %v5601_v57, %v5393_v56  ;;  %v13541_v56 = vld [vmem:[#allocation42_spill] sm:$0xff]  ;;  %v13542_v57 = vld [vmem:[#allocation32_spill] sm:$0xff] }
 0xad5   :  { %v4981_v1 = vadd.f32 %v13542_v57, %v13541_v56  ;;  %v3983_v57 = vld [vmem:[#allocation2 + $0x351] sm:$0xff] }
 0xad6   :  { %5851 = vmatmul.f32.gmra.mxu0 %v3790_v49  ;;  %5442 = vmatmul.f32.gmra.mxu2 %v11087_v52 }
 0xad7   :  { %v5186_v6 = vpop.f32.mrf.mxu1 }
 0xad8   :  { %v5187_v53 = vadd.f32 %v5186_v6, %v4978_v39  ;;  %5651 = vmatmul.f32.gmra.mxu3 %v6857_v48  ;;  %v3982_v6 = vld [vmem:[#allocation2 + $0x349] sm:$0xff] }
 0xad9   :  { %v5395_v34 = vpop.f32.mrf.mxu2 }
 0xada   :  { %5233 = vmatmul.f32.gmra.mxu1 %v3791_v27  ;;  %v5396_v30 = vadd.f32 %v5395_v34, %v5187_v53  ;;  %v13544_v53 = vld [vmem:[#allocation24_spill] sm:$0xff] }
 0xadb   :  { %v5807_v28 = vpop.f32.mrf.mxu0  ;;  %v5604_v49 = vpop.f32.mrf.mxu3 }
 0xadc   :  { %v11090_v20 = vadd.f32 %v5807_v28, %v5599_v44  ;;  %v5605_v43 = vadd.f32 %v5604_v49, %v5396_v30  ;;  %v13543_v44 = vld [vmem:[#allocation69_spill] sm:$0xff]  ;;  %v3985_v49 = vld [vmem:[#allocation2 + $0x3a] sm:$0xff] }
 0xade   :  { %5854 = vmatmul.f32.gmra.mxu0 %v3791_v27  ;;  %v4984_v27 = vadd.f32 %v13544_v53, %v13543_v44 }
 0xadf   :  { %v5189_v2 = vpop.f32.mrf.mxu1 }
 0xae0   :  { %v5190_v62 = vadd.f32 %v5189_v2, %v4981_v1 }
 0xae1   :  { %v5398_v39 = vpop.f32.mrf.mxu2 }
 0xae2   :  { %5880 = vmatmul.f32.vlgmr.msra.gmra.mxu1 %v3984_v9  ;;  %v5399_v12 = vadd.f32 %v5398_v39, %v5190_v62  ;;  %v13545_v62 = vld [vmem:[#allocation78_spill] sm:$0xff]  ;;  %v3986_v39 = vld [vmem:[#allocation2 + $0x4a] sm:$0xff] }
 0xae3   :  { %v5810_v24 = vpop.f32.mrf.mxu0  ;;  %v5607_v31 = vpop.f32.mrf.mxu3 }
 0xae4   :  { %v11094_v48 = vadd.f32 %v5810_v24, %v5602_v41  ;;  %v5608_v28 = vadd.f32 %v5607_v31, %v5399_v12  ;;  %v13546_v41 = vld [vmem:[#allocation60_spill] sm:$0xff] }
 0xae6   :  { %5857 = vmatmul.f32.gmra.mxu0 %v3982_v6  ;;  %v4987_v6 = vadd.f32 %v13546_v41, %v13545_v62 }
 0xae7   :  { %v5192_v34 = vpop.f32.mrf.mxu1 }
 0xae8   :  { %v5193_v30 = vadd.f32 %v5192_v34, %v4984_v27 }
 0xae9   :  { %v5401_v1 = vpop.f32.mrf.mxu2 }
 0xaea   :  { %5883 = vmatmul.f32.gmra.mxu1 %v3985_v49  ;;  %v5402_v9 = vadd.f32 %v5401_v1, %v5193_v30 }
 0xaeb   :  { %v5813_v56 = vpop.f32.mrf.mxu0  ;;  %v5610_v19 = vpop.f32.mrf.mxu3 }
 0xaec   :  { %v11098_v2 = vadd.f32 %v5813_v56, %v5605_v43  ;;  %v5611_v24 = vadd.f32 %v5610_v19, %v5402_v9  ;;  %v13548_v43 = vld [vmem:[#allocation36_spill] sm:$0xff]  ;;  %v13549_v56 = vld [vmem:[#allocation30_spill] sm:$0xff] }
 0xaed   :  { %v4990_v30 = vadd.f32 %v13549_v56, %v13548_v43  ;;  %v3987_v19 = vld [vmem:[#allocation2 + $0x52] sm:$0xff] }
 0xaee   :  { %5860 = vmatmul.f32.gmra.mxu0 %v3983_v57 }
 0xaef   :  { %v5195_v12 = vpop.f32.mrf.mxu1 }
 0xaf0   :  { %v5196_v31 = vadd.f32 %v5195_v12, %v4987_v6 }
 0xaf1   :  { %v5404_v53 = vpop.f32.mrf.mxu2 }
 0xaf2   :  { %5886 = vmatmul.f32.gmra.mxu1 %v3986_v39  ;;  %v5405_v34 = vadd.f32 %v5404_v53, %v5196_v31 }
 0xaf3   :  { %v5816_v44 = vpop.f32.mrf.mxu0  ;;  %v5613_v49 = vpop.f32.mrf.mxu3 }
 0xaf4   :  { %v11102_v27 = vadd.f32 %v5816_v44, %v5608_v28  ;;  %v5614_v63 = vadd.f32 %v5613_v49, %v5405_v34  ;;  %v13552_v28 = vld [vmem:[#allocation39_spill] sm:$0xff] }
 0xaf5   :  { %v4993_v44 = vadd.f32 %v13552_v28, %v13551_v60  ;;  %v3988_v34 = vld [vmem:[#allocation2 + $0x62] sm:$0xff]  ;;  %v3990_v60 = vld [vmem:[#allocation2 + $0x7a] sm:$0xff] }
 0xaf6   :  { %13547 = vst [vmem:[#allocation37_spill] sm:$0xff] %v11102_v27 }
 0xaf7   :  { %v5198_v1 = vpop.f32.mrf.mxu1 }
 0xaf8   :  { %v5199_v57 = vadd.f32 %v5198_v1, %v4990_v30 }
 0xaf9   :  { %v5407_v62 = vpop.f32.mrf.mxu2 }
 0xafa   :  { %5889 = vmatmul.f32.gmra.mxu1 %v3987_v19  ;;  %v5408_v6 = vadd.f32 %v5407_v62, %v5199_v57 }
 0xafb   :  { %v5819_v9 = vpop.f32.mrf.mxu0  ;;  %v5616_v12 = vpop.f32.mrf.mxu3 }
 0xafc   :  { %v11106_v41 = vadd.f32 %v5819_v9, %v5611_v24  ;;  %v5617_v39 = vadd.f32 %v5616_v12, %v5408_v6  ;;  %v3989_v24 = vld [vmem:[#allocation2 + $0x6a] sm:$0xff] }
 0xafe   :  { %13550 = vst [vmem:[#allocation46_spill] sm:$0xff] %v11106_v41  ;;  %v4015_v41 = vld [vmem:[#allocation2 + $0x1a2] sm:$0xff] }
 0xaff   :  { %v5201_v31 = vpop.f32.mrf.mxu1 }
 0xb00   :  { %v5202_v53 = vadd.f32 %v5201_v31, %v4993_v44  ;;  %v3992_v31 = vld [vmem:[#allocation2 + $0x92] sm:$0xff] }
 0xb01   :  { %v5410_v43 = vpop.f32.mrf.mxu2 }
 0xb02   :  { %5892 = vmatmul.f32.gmra.mxu1 %v3988_v34  ;;  %v5411_v30 = vadd.f32 %v5410_v43, %v5202_v53  ;;  %v3993_v34 = vld [vmem:[#allocation2 + $0x9a] sm:$0xff] }
 0xb03   :  { %v5822_v49 = vpop.f32.mrf.mxu0  ;;  %v5619_v1 = vpop.f32.mrf.mxu3 }
 0xb04   :  { %v11110_v56 = vadd.f32 %v5822_v49, %v5614_v63  ;;  %v5620_v19 = vadd.f32 %v5619_v1, %v5411_v30  ;;  %v3991_v63 = vld [vmem:[#allocation2 + $0x82] sm:$0xff]  ;;  %v3994_v49 = vld [vmem:[#allocation2 + $0xaa] sm:$0xff]  ;;  %v3995_v30 = vld [vmem:[#allocation2 + $0xb2] sm:$0xff] }
 0xb06   :  { %13553 = vst [vmem:[#allocation43_spill] sm:$0xff] %v11110_v56  ;;  %v4014_v56 = vld [vmem:[#allocation2 + $0x19a] sm:$0xff] }
 0xb07   :  { %v11112_v27 = vpop.f32.mrf.mxu1 }
 0xb08   :  { %13554 = vst [vmem:[#allocation52_spill] sm:$0xff] %v11112_v27  ;;  %v4011_v27 = vld [vmem:[#allocation2 + $0x172] sm:$0xff] }
 0xb0a   :  { %5895 = vmatmul.f32.gmra.mxu1 %v3989_v24 }
 0xb0b   :  { %v5825_v57 = vpop.f32.mrf.mxu0 }
 0xb0c   :  { %v11114_v9 = vadd.f32 %v5825_v57, %v5617_v39  ;;  %v3997_v57 = vld [vmem:[#allocation2 + $0xca] sm:$0xff] }
 0xb0e   :  { %13555 = vst [vmem:[#allocation49_spill] sm:$0xff] %v11114_v9  ;;  %v4013_v9 = vld [vmem:[#allocation2 + $0x18a] sm:$0xff] }
 0xb0f   :  { %v11116_v62 = vpop.f32.mrf.mxu1 }
 0xb10   :  { %13556 = vst [vmem:[#allocation58_spill] sm:$0xff] %v11116_v62  ;;  %v4010_v62 = vld [vmem:[#allocation2 + $0x16a] sm:$0xff] }
 0xb12   :  { %5898 = vmatmul.f32.gmra.mxu1 %v3990_v60 }
 0xb13   :  { %v5828_v6 = vpop.f32.mrf.mxu0 }
 0xb14   :  { %v11118_v12 = vadd.f32 %v5828_v6, %v5620_v19  ;;  %v3996_v19 = vld [vmem:[#allocation2 + $0xc2] sm:$0xff]  ;;  %v3998_v6 = vld [vmem:[#allocation2 + $0xda] sm:$0xff] }
 0xb16   :  { %13557 = vst [vmem:[#allocation55_spill] sm:$0xff] %v11118_v12  ;;  %v4012_v12 = vld [vmem:[#allocation2 + $0x182] sm:$0xff] }
 0xb17   :  { %v11120_v28 = vpop.f32.mrf.mxu1 }
 0xb18   :  { %13558 = vst [vmem:[#allocation27_spill] sm:$0xff] %v11120_v28  ;;  %v4009_v28 = vld [vmem:[#allocation2 + $0x15a] sm:$0xff] }
 0xb1a   :  { %5901 = vmatmul.f32.gmra.mxu1 %v3991_v63 }
 0xb1f   :  { %v11122_v44 = vpop.f32.mrf.mxu1 }
 0xb20   :  { %13559 = vst [vmem:[#allocation62_spill] sm:$0xff] %v11122_v44  ;;  %v4008_v44 = vld [vmem:[#allocation2 + $0x152] sm:$0xff] }
 0xb22   :  { %5904 = vmatmul.f32.gmra.mxu1 %v3992_v31  ;;  %v3999_v31 = vld [vmem:[#allocation2 + $0xe2] sm:$0xff] }
 0xb27   :  { %v11124_v53 = vpop.f32.mrf.mxu1 }
 0xb28   :  { %13560 = vst [vmem:[#allocation33_spill] sm:$0xff] %v11124_v53  ;;  %v4007_v53 = vld [vmem:[#allocation2 + $0x142] sm:$0xff] }
 0xb2a   :  { %5907 = vmatmul.f32.gmra.mxu1 %v3993_v34 }
 0xb2f   :  { %v11126_v39 = vpop.f32.mrf.mxu1 }
 0xb30   :  { %13561 = vst [vmem:[#allocation22_spill] sm:$0xff] %v11126_v39  ;;  %v4006_v39 = vld [vmem:[#allocation2 + $0x13a] sm:$0xff] }
 0xb32   :  { %5910 = vmatmul.f32.gmra.mxu1 %v3994_v49  ;;  %v4000_v49 = vld [vmem:[#allocation2 + $0xf2] sm:$0xff] }
 0xb37   :  { %v11128_v43 = vpop.f32.mrf.mxu1 }
 0xb38   :  { %13562 = vst [vmem:[#allocation66_spill] sm:$0xff] %v11128_v43  ;;  %v4005_v43 = vld [vmem:[#allocation2 + $0x12a] sm:$0xff] }
 0xb3a   :  { %5913 = vmatmul.f32.gmra.mxu1 %v3995_v30 }
 0xb3f   :  { %v11130_v1 = vpop.f32.mrf.mxu1 }
 0xb40   :  { %13563 = vst [vmem:[#allocation73_spill] sm:$0xff] %v11130_v1  ;;  %v4001_v1 = vld [vmem:[#allocation2 + $0xfa] sm:$0xff] }
 0xb42   :  { %5916 = vmatmul.f32.gmra.mxu1 %v3996_v19 }
 0xb47   :  { %v11132_v24 = vpop.f32.mrf.mxu1 }
 0xb48   :  { %13564 = vst [vmem:[#allocation42_spill] sm:$0xff] %v11132_v24  ;;  %v4002_v24 = vld [vmem:[#allocation2 + $0x10a] sm:$0xff] }
 0xb4a   :  { %5919 = vmatmul.f32.gmra.mxu1 %v3997_v57 }
 0xb4f   :  { %v11134_v60 = vpop.f32.mrf.mxu1 }
 0xb50   :  { %13565 = vst [vmem:[#allocation32_spill] sm:$0xff] %v11134_v60  ;;  %v4003_v60 = vld [vmem:[#allocation2 + $0x112] sm:$0xff] }
 0xb52   :  { %5922 = vmatmul.f32.gmra.mxu1 %v3998_v6 }
 0xb57   :  { %v11136_v63 = vpop.f32.mrf.mxu1 }
 0xb58   :  { %13566 = vst [vmem:[#allocation69_spill] sm:$0xff] %v11136_v63  ;;  %v4004_v63 = vld [vmem:[#allocation2 + $0x122] sm:$0xff] }
 0xb5a   :  { %5925 = vmatmul.f32.gmra.mxu1 %v3999_v31 }
 0xb5f   :  { %v11138_v34 = vpop.f32.mrf.mxu1 }
 0xb62   :  { %5928 = vmatmul.f32.gmra.mxu1 %v4000_v49 }
 0xb67   :  { %v11140_v30 = vpop.f32.mrf.mxu1 }
 0xb6a   :  { %5931 = vmatmul.f32.gmra.mxu1 %v4001_v1 }
 0xb6f   :  { %v11142_v19 = vpop.f32.mrf.mxu1 }
 0xb72   :  { %5934 = vmatmul.f32.gmra.mxu1 %v4002_v24 }
 0xb77   :  { %v11144_v57 = vpop.f32.mrf.mxu1 }
 0xb7a   :  { %5937 = vmatmul.f32.gmra.mxu1 %v4003_v60 }
 0xb7f   :  { %v11146_v6 = vpop.f32.mrf.mxu1 }
 0xb82   :  { %5940 = vmatmul.f32.gmra.mxu1 %v4004_v63 }
 0xb87   :  { %v11148_v31 = vpop.f32.mrf.mxu1 }
 0xb8a   :  { %5943 = vmatmul.f32.gmra.mxu1 %v4005_v43 }
 0xb8f   :  { %v11150_v49 = vpop.f32.mrf.mxu1 }
 0xb92   :  { %5946 = vmatmul.f32.gmra.mxu1 %v4006_v39 }
 0xb97   :  { %v11152_v1 = vpop.f32.mrf.mxu1 }
 0xb9a   :  { %5949 = vmatmul.f32.gmra.mxu1 %v4007_v53 }
 0xb9f   :  { %v11154_v24 = vpop.f32.mrf.mxu1 }
 0xba2   :  { %5952 = vmatmul.f32.gmra.mxu1 %v4008_v44 }
 0xba7   :  { %v11156_v60 = vpop.f32.mrf.mxu1 }
 0xbaa   :  { %5955 = vmatmul.f32.gmra.mxu1 %v4009_v28 }
 0xbaf   :  { %v11158_v63 = vpop.f32.mrf.mxu1 }
 0xbb2   :  { %5958 = vmatmul.f32.gmra.mxu1 %v4010_v62 }
 0xbb7   :  { %v11160_v43 = vpop.f32.mrf.mxu1 }
 0xbb8   :  { %13567 = vst [vmem:[#allocation24_spill] sm:$0xff] %v11160_v43  ;;  %v4016_v43 = vld [vmem:[#allocation2 + $0x1e2] sm:$0xff] }
 0xbba   :  { %5961 = vmatmul.f32.gmra.mxu1 %v4011_v27 }
 0xbbf   :  { %v11162_v39 = vpop.f32.mrf.mxu1 }
 0xbc0   :  { %13568 = vst [vmem:[#allocation78_spill] sm:$0xff] %v11162_v39  ;;  %v4017_v39 = vld [vmem:[#allocation2 + $0x1ea] sm:$0xff] }
 0xbc2   :  { %5964 = vmatmul.f32.gmra.mxu1 %v4012_v12 }
 0xbc7   :  { %v11164_v53 = vpop.f32.mrf.mxu1 }
 0xbc8   :  { %13569 = vst [vmem:[#allocation60_spill] sm:$0xff] %v11164_v53  ;;  %v4018_v53 = vld [vmem:[#allocation2 + $0x1fa] sm:$0xff] }
 0xbca   :  { %5967 = vmatmul.f32.gmra.mxu1 %v4013_v9 }
 0xbcf   :  { %v11166_v44 = vpop.f32.mrf.mxu1 }
 0xbd0   :  { %13570 = vst [vmem:[#allocation36_spill] sm:$0xff] %v11166_v44  ;;  %v4019_v44 = vld [vmem:[#allocation2 + $0x202] sm:$0xff] }
 0xbd2   :  { %5970 = vmatmul.f32.gmra.mxu1 %v4014_v56 }
 0xbd7   :  { %v11168_v28 = vpop.f32.mrf.mxu1 }
 0xbd8   :  { %13571 = vst [vmem:[#allocation30_spill] sm:$0xff] %v11168_v28  ;;  %v4020_v28 = vld [vmem:[#allocation2 + $0x212] sm:$0xff] }
 0xbda   :  { %5973 = vmatmul.f32.gmra.mxu1 %v4015_v41 }
 0xbdf   :  { %v11170_v62 = vpop.f32.mrf.mxu1 }
 0xbe0   :  { %13572 = vst [vmem:[#allocation26_spill] sm:$0xff] %v11170_v62  ;;  %v4021_v62 = vld [vmem:[#allocation2 + $0x21a] sm:$0xff] }
 0xbe2   :  { %5976 = vmatmul.f32.gmra.mxu1 %v4016_v43 }
 0xbe7   :  { %v11172_v27 = vpop.f32.mrf.mxu1 }
 0xbe8   :  { %13573 = vst [vmem:[#allocation39_spill] sm:$0xff] %v11172_v27  ;;  %v4022_v27 = vld [vmem:[#allocation2 + $0x22a] sm:$0xff] }
 0xbea   :  { %5979 = vmatmul.f32.gmra.mxu1 %v4017_v39 }
 0xbef   :  { %v11174_v12 = vpop.f32.mrf.mxu1 }
 0xbf0   :  { %13574 = vst [vmem:[#allocation104_spill] sm:$0xff] %v11174_v12  ;;  %v4023_v12 = vld [vmem:[#allocation2 + $0x232] sm:$0xff] }
 0xbf2   :  { %5982 = vmatmul.f32.gmra.mxu1 %v4018_v53 }
 0xbf7   :  { %v11176_v9 = vpop.f32.mrf.mxu1 }
 0xbf8   :  { %13575 = vst [vmem:[#allocation105_spill] sm:$0xff] %v11176_v9  ;;  %v4024_v9 = vld [vmem:[#allocation2 + $0x242] sm:$0xff] }
 0xbfa   :  { %5985 = vmatmul.f32.gmra.mxu1 %v4019_v44 }
 0xbff   :  { %v11178_v56 = vpop.f32.mrf.mxu1 }
 0xc00   :  { %13576 = vst [vmem:[#allocation106_spill] sm:$0xff] %v11178_v56  ;;  %v4025_v56 = vld [vmem:[#allocation2 + $0x24a] sm:$0xff] }
 0xc02   :  { %5988 = vmatmul.f32.gmra.mxu1 %v4020_v28 }
 0xc07   :  { %v11180_v41 = vpop.f32.mrf.mxu1 }
 0xc08   :  { %13577 = vst [vmem:[#allocation107_spill] sm:$0xff] %v11180_v41  ;;  %v4026_v41 = vld [vmem:[#allocation2 + $0x25a] sm:$0xff] }
 0xc0a   :  { %5991 = vmatmul.f32.gmra.mxu1 %v4021_v62 }
 0xc0f   :  { %v11182_v43 = vpop.f32.mrf.mxu1 }
 0xc10   :  { %13578 = vst [vmem:[#allocation108_spill] sm:$0xff] %v11182_v43  ;;  %v4027_v43 = vld [vmem:[#allocation2 + $0x262] sm:$0xff] }
 0xc12   :  { %5994 = vmatmul.f32.gmra.mxu1 %v4022_v27 }
 0xc17   :  { %v11184_v39 = vpop.f32.mrf.mxu1 }
 0xc18   :  { %13579 = vst [vmem:[#allocation109_spill] sm:$0xff] %v11184_v39  ;;  %v4028_v39 = vld [vmem:[#allocation2 + $0x272] sm:$0xff] }
 0xc1a   :  { %5997 = vmatmul.f32.gmra.mxu1 %v4023_v12 }
 0xc1f   :  { %v11186_v53 = vpop.f32.mrf.mxu1 }
 0xc20   :  { %13580 = vst [vmem:[#allocation110_spill] sm:$0xff] %v11186_v53  ;;  %v4029_v53 = vld [vmem:[#allocation2 + $0x27a] sm:$0xff] }
 0xc22   :  { %6000 = vmatmul.f32.gmra.mxu1 %v4024_v9 }
 0xc27   :  { %v11188_v44 = vpop.f32.mrf.mxu1 }
 0xc28   :  { %13581 = vst [vmem:[#allocation111_spill] sm:$0xff] %v11188_v44  ;;  %v4030_v44 = vld [vmem:[#allocation2 + $0x28a] sm:$0xff] }
 0xc2a   :  { %6003 = vmatmul.f32.gmra.mxu1 %v4025_v56 }
 0xc2f   :  { %v11190_v28 = vpop.f32.mrf.mxu1 }
 0xc30   :  { %13582 = vst [vmem:[#allocation112_spill] sm:$0xff] %v11190_v28  ;;  %v4031_v28 = vld [vmem:[#allocation2 + $0x292] sm:$0xff] }
 0xc32   :  { %6006 = vmatmul.f32.gmra.mxu1 %v4026_v41 }
 0xc37   :  { %v11192_v62 = vpop.f32.mrf.mxu1 }
 0xc38   :  { %13583 = vst [vmem:[#allocation113_spill] sm:$0xff] %v11192_v62  ;;  %v4032_v62 = vld [vmem:[#allocation2 + $0x2a2] sm:$0xff] }
 0xc3a   :  { %6009 = vmatmul.f32.gmra.mxu1 %v4027_v43 }
 0xc3f   :  { %v11194_v27 = vpop.f32.mrf.mxu1 }
 0xc40   :  { %13584 = vst [vmem:[#allocation114_spill] sm:$0xff] %v11194_v27  ;;  %v4033_v27 = vld [vmem:[#allocation2 + $0x2aa] sm:$0xff] }
 0xc42   :  { %6012 = vmatmul.f32.gmra.mxu1 %v4028_v39 }
 0xc47   :  { %v11196_v12 = vpop.f32.mrf.mxu1 }
 0xc48   :  { %13585 = vst [vmem:[#allocation115_spill] sm:$0xff] %v11196_v12  ;;  %v4034_v12 = vld [vmem:[#allocation2 + $0x2ba] sm:$0xff] }
 0xc4a   :  { %6015 = vmatmul.f32.gmra.mxu1 %v4029_v53 }
 0xc4f   :  { %v11198_v9 = vpop.f32.mrf.mxu1 }
 0xc50   :  { %13586 = vst [vmem:[#allocation116_spill] sm:$0xff] %v11198_v9  ;;  %v4035_v9 = vld [vmem:[#allocation2 + $0x2c2] sm:$0xff] }
 0xc52   :  { %6018 = vmatmul.f32.gmra.mxu1 %v4030_v44 }
 0xc57   :  { %v11200_v56 = vpop.f32.mrf.mxu1 }
 0xc5a   :  { %6021 = vmatmul.f32.gmra.mxu1 %v4031_v28 }
 0xc5f   :  { %v11202_v41 = vpop.f32.mrf.mxu1 }
 0xc62   :  { %6024 = vmatmul.f32.gmra.mxu1 %v4032_v62 }
 0xc67   :  { %v11204_v43 = vpop.f32.mrf.mxu1 }
 0xc6a   :  { %6027 = vmatmul.f32.gmra.mxu1 %v4033_v27 }
 0xc6f   :  { %v11206_v39 = vpop.f32.mrf.mxu1 }
 0xc72   :  { %6030 = vmatmul.f32.gmra.mxu1 %v4034_v12 }
 0xc77   :  { %v11208_v53 = vpop.f32.mrf.mxu1 }
 0xc78   :  { %13587 = vst [vmem:[#allocation117_spill] sm:$0xff] %v11208_v53 }
 0xc7a   :  { %6033 = vmatmul.f32.gmra.mxu1 %v4035_v9 }
 0xc7f   :  { %v11210_v44 = vpop.f32.mrf.mxu1 }
 0xc82   :  { %6036 = vmatmul.f32.gmra.mxu1 %v11016_v54 }
 0xc87   :  { %v11213_v28 = vpop.f32.mrf.mxu1 }
 0xc8a   :  { %6039 = vmatmul.f32.gmra.mxu1 %v11025_v61 }
 0xc8f   :  { %v11216_v62 = vpop.f32.mrf.mxu1 }
 0xc90   :  { %13588 = vst [vmem:[#allocation118_spill] sm:$0xff] %v11216_v62 }
 0xc92   :  { %6042 = vmatmul.f32.gmra.mxu1 %v11034_v58 }
 0xc97   :  { %v11219_v27 = vpop.f32.mrf.mxu1 }
 0xc9a   :  { %6045 = vmatmul.f32.gmra.mxu1 %v11044_v17 }
 0xc9f   :  { %v6001_v12 = vpop.f32.mrf.mxu1 }
 0xca0   :  { %v11223_v53 = vadd.f32 %v6001_v12, %v11054_v45  ;;  %v13598_v12 = vld [vmem:[#allocation84_spill] sm:$0xff] }
 0xca2   :  { %13589 = vst [vmem:[#allocation119_spill] sm:$0xff] %v11223_v53  ;;  %6048 = vmatmul.f32.gmra.mxu1 %v11051_v38 }
 0xca7   :  { %v6004_v9 = vpop.f32.mrf.mxu1 }
 0xca8   :  { %v11227_v54 = vadd.f32 %v6004_v9, %v11061_v32  ;;  %v13599_v9 = vld [vmem:[#allocation24_spill] sm:$0xff] }
 0xcaa   :  { %13590 = vst [vmem:[#allocation120_spill] sm:$0xff] %v11227_v54  ;;  %6051 = vmatmul.f32.gmra.mxu1 %v11058_v26  ;;  %v5676_v26 = vadd.f32 %v10775_v42, %v10765_v40  ;;  %v5688_v42 = vadd.f32 %v10802_v4, %v10792_v35  ;;  %v5694_v35 = vadd.f32 %v10817_v18, %v10804_v3 }
 0xcaf   :  { %v6007_v61 = vpop.f32.mrf.mxu1 }
 0xcb0   :  { %v11231_v62 = vadd.f32 %v6007_v61, %v11068_v21  ;;  %v5673_v21 = vadd.f32 %v10769_v51, %v10756_v0  ;;  %v5685_v0 = vadd.f32 %v10796_v47, %v10783_v23  ;;  %v11280_v47 = vadd.f32 %v11148_v31, %v5688_v42  ;;  %v13600_v61 = vld [vmem:[#allocation83_spill] sm:$0xff] }
 0xcb1   :  { %v5703_v31 = vadd.f32 %v10835_v33, %v10825_v5 }
 0xcb2   :  { %13591 = vst [vmem:[#allocation121_spill] sm:$0xff] %v11231_v62  ;;  %6054 = vmatmul.f32.gmra.mxu1 %v11065_v55  ;;  %v5679_v55 = vadd.f32 %v10781_v13, %v10771_v50  ;;  %v11274_v13 = vadd.f32 %v11146_v6, %v5685_v0  ;;  %v4047_v6 = vld [vmem:[#allocation2 + $0x352] sm:$0xff] }
 0xcb4   :  { %v11260_v40 = vadd.f32 %v11142_v19, %v5679_v55  ;;  %v11295_v19 = vadd.f32 %v11152_v1, %v5694_v35  ;;  %v11316_v1 = vadd.f32 %v11158_v63, %v5703_v31  ;;  %v13603_v63 = vld [vmem:[#allocation85_spill] sm:$0xff]  ;;  %v13617_v31 = vld [vmem:[#allocation94_spill] sm:$0xff] }
 0xcb7   :  { %v6010_v58 = vpop.f32.mrf.mxu1 }
 0xcb8   :  { %v11235_v17 = vadd.f32 %v6010_v58, %v11075_v8  ;;  %v11249_v8 = vadd.f32 %v11140_v30, %v5676_v26 }
 0xcba   :  { %13592 = vst [vmem:[#allocation122_spill] sm:$0xff] %v11235_v17  ;;  %6057 = vmatmul.f32.gmra.mxu1 %v11072_v25 }
 0xcbf   :  { %v6013_v45 = vpop.f32.mrf.mxu1 }
 0xcc0   :  { %v11239_v38 = vadd.f32 %v6013_v45, %v11083_v10  ;;  %v5682_v10 = vadd.f32 %v10790_v59, %v10777_v46 }
 0xcc2   :  { %13593 = vst [vmem:[#allocation123_spill] sm:$0xff] %v11239_v38  ;;  %6060 = vmatmul.f32.gmra.mxu1 %v11079_v16  ;;  %v11257_v16 = vadd.f32 %v11138_v34, %v5673_v21  ;;  %v11268_v50 = vadd.f32 %v11144_v57, %v5682_v10  ;;  %v13605_v10 = vld [vmem:[#allocation60_spill] sm:$0xff] }
 0xcc4   :  { %v6073_v51 = vadd.f32 %v11249_v8, %v11257_v16 }
 0xcc6   :  { %v6074_v46 = vadd.f32 %v6073_v51, %v11260_v40  ;;  %v13607_v51 = vld [vmem:[#allocation37_spill] sm:$0xff] }
 0xcc7   :  { %v6016_v32 = vpop.f32.mrf.mxu1 }
 0xcc8   :  { %v11252_v25 = vadd.f32 %v6016_v32, %v11090_v20  ;;  %v4046_v20 = vld [vmem:[#allocation2 + $0x34a] sm:$0xff]  ;;  %v6075_v23 = vadd.f32 %v6074_v46, %v11268_v50  ;;  %v13608_v46 = vld [vmem:[#allocation87_spill] sm:$0xff] }
 0xcc9   :  { %v13604_v32 = vld [vmem:[#allocation88_spill] sm:$0xff] }
 0xcca   :  { %13594 = vst [vmem:[#allocation124_spill] sm:$0xff] %v11252_v25  ;;  %6063 = vmatmul.f32.gmra.mxu1 %v11087_v52  ;;  %v5691_v52 = vadd.f32 %v10808_v11, %v10798_v29  ;;  %v6076_v4 = vadd.f32 %v6075_v23, %v11274_v13  ;;  %v5697_v29 = vadd.f32 %v10823_v37, %v10810_v36  ;;  %v13610_v23 = vld [vmem:[#allocation36_spill] sm:$0xff] }
 0xccb   :  { %v5715_v21 = vadd.f32 %v13604_v32, %v13603_v63  ;;  %v13626_v63 = vld [vmem:[#allocation98_spill] sm:$0xff] }
 0xccc   :  { %v11289_v30 = vadd.f32 %v11150_v49, %v5691_v52  ;;  %v6077_v11 = vadd.f32 %v6076_v4, %v11280_v47  ;;  %v11301_v3 = vadd.f32 %v11154_v24, %v5697_v29  ;;  %v13597_v24 = vld [vmem:[#allocation74_spill] sm:$0xff]  ;;  %v13612_v4 = vld [vmem:[#allocation89_spill] sm:$0xff]  ;;  %v13613_v29 = vld [vmem:[#allocation92_spill] sm:$0xff] }
 0xccd   :  { %v5709_v5 = vadd.f32 %v13598_v12, %v13597_v24  ;;  %v11343_v35 = vadd.f32 %v13610_v23, %v5715_v21  ;;  %v13631_v23 = vld [vmem:[#allocation105_spill] sm:$0xff] }
 0xcce   :  { %v6078_v57 = vadd.f32 %v6077_v11, %v11289_v30  ;;  %v5721_v11 = vadd.f32 %v13613_v29, %v13612_v4  ;;  %v11380_v29 = vpop.f32.mrf.mxu3 }
 0xccf   :  { %v6019_v59 = vpop.f32.mrf.mxu1  ;;  %13611 = vst [vmem:[#allocation84_spill] sm:$0xff] %v11343_v35 }
 0xcd0   :  { %v11283_v34 = vadd.f32 %v6019_v59, %v11094_v48  ;;  %v5700_v48 = vadd.f32 %v10829_v7, %v10819_v15  ;;  %v6079_v36 = vadd.f32 %v6078_v57, %v11295_v19  ;;  %v5706_v15 = vadd.f32 %v10844_v22, %v10831_v14  ;;  %v13602_v14 = vld [vmem:[#allocation78_spill] sm:$0xff] }
 0xcd1   :  { %v11328_v22 = vadd.f32 %v13602_v14, %v5709_v5  ;;  %v13609_v59 = vld [vmem:[#allocation90_spill] sm:$0xff]  ;;  %v13620_v5 = vld [vmem:[#allocation93_spill] sm:$0xff] }
 0xcd2   :  { %13595 = vst [vmem:[#allocation125_spill] sm:$0xff] %v11283_v34  ;;  %6066 = vmatmul.f32.gmra.mxu1 %v4046_v20  ;;  %v11307_v37 = vadd.f32 %v11156_v60, %v5700_v48  ;;  %v6080_v7 = vadd.f32 %v6079_v36, %v11301_v3  ;;  %v11322_v60 = vadd.f32 %v13599_v9, %v5706_v15  ;;  %v13614_v57 = vld [vmem:[#allocation30_spill] sm:$0xff] }
 0xcd3   :  { %v5718_v20 = vadd.f32 %v13609_v59, %v13608_v46  ;;  %v13630_v46 = vld [vmem:[#allocation100_spill] sm:$0xff] }
 0xcd4   :  { %v6081_v33 = vadd.f32 %v6080_v7, %v11307_v37  ;;  %v13618_v7 = vld [vmem:[#allocation26_spill] sm:$0xff] }
 0xcd5   :  { %v11355_v24 = vadd.f32 %v13618_v7, %v5721_v11  ;;  %v13633_v11 = vld [vmem:[#allocation99_spill] sm:$0xff] }
 0xcd6   :  { %v6082_v45 = vadd.f32 %v6081_v33, %v11316_v1  ;;  %v13621_v33 = vld [vmem:[#allocation96_spill] sm:$0xff] }
 0xcd7   :  { %v6022_v18 = vpop.f32.mrf.mxu1  ;;  %13619 = vst [vmem:[#allocation83_spill] sm:$0xff] %v11355_v24  ;;  %v5727_v9 = vadd.f32 %v13621_v33, %v13620_v5  ;;  %v13638_v5 = vld [vmem:[#allocation53_spill] sm:$0xff] }
 0xcd8   :  { %v11310_v49 = vadd.f32 %v6022_v18, %v11098_v2  ;;  %v13601_v2 = vld [vmem:[#allocation86_spill] sm:$0xff]  ;;  %v6083_v55 = vadd.f32 %v6082_v45, %v11322_v60  ;;  %v11349_v18 = vadd.f32 %v13614_v57, %v5718_v20  ;;  %v11374_v20 = vpop.f32.mrf.mxu2 }
 0xcd9   :  { %v5712_v58 = vadd.f32 %v13601_v2, %v13600_v61  ;;  %v13622_v2 = vld [vmem:[#allocation39_spill] sm:$0xff]  ;;  %v13624_v45 = vld [vmem:[#allocation46_spill] sm:$0xff] }
 0xcda   :  { %13596 = vst [vmem:[#allocation126_spill] sm:$0xff] %v11310_v49  ;;  %6069 = vmatmul.f32.gmra.mxu1 %v4047_v6  ;;  %v6084_v52 = vadd.f32 %v6083_v55, %v11328_v22  ;;  %v13616_v6 = vld [vmem:[#allocation91_spill] sm:$0xff]  ;;  %v13627_v55 = vld [vmem:[#allocation104_spill] sm:$0xff] }
 0xcdb   :  { %v11334_v0 = vadd.f32 %v13605_v10, %v5712_v58  ;;  %13615 = vst [vmem:[#allocation24_spill] sm:$0xff] %v11349_v18  ;;  %v5724_v36 = vadd.f32 %v13617_v31, %v13616_v6  ;;  %v11370_v10 = vadd.f32 %v13627_v55, %v5727_v9  ;;  %v13635_v31 = vld [vmem:[#allocation106_spill] sm:$0xff] }
 0xcdd   :  { %13606 = vst [vmem:[#allocation74_spill] sm:$0xff] %v11334_v0  ;;  %v6085_v48 = vadd.f32 %v6084_v52, %v11334_v0  ;;  %v11361_v58 = vadd.f32 %v13622_v2, %v5724_v36  ;;  %v13720_v0 = vld [vmem:[#allocation62_spill] sm:$0xff] }
 0xcde   :  { %13628 = vst [vmem:[#allocation78_spill] sm:$0xff] %v11370_v10 }
 0xcdf   :  { %v6025_v26 = vpop.f32.mrf.mxu1  ;;  %v6086_v15 = vadd.f32 %v6085_v48, %v11343_v35  ;;  %13623 = vst [vmem:[#allocation86_spill] sm:$0xff] %v11361_v58  ;;  %v13634_v48 = vld [vmem:[#allocation102_spill] sm:$0xff] }
 0xce0   :  { %v11337_v42 = vadd.f32 %v6025_v26, %v13607_v51  ;;  %v13625_v26 = vld [vmem:[#allocation95_spill] sm:$0xff]  ;;  %v13629_v51 = vld [vmem:[#allocation97_spill] sm:$0xff]  ;;  %v5736_v57 = vadd.f32 %v13634_v48, %v13633_v11 }
 0xce1   :  { %v6087_v61 = vadd.f32 %v6086_v15, %v11349_v18  ;;  %v5730_v32 = vadd.f32 %v13626_v63, %v13625_v26  ;;  %v5733_v59 = vadd.f32 %v13630_v46, %v13629_v51  ;;  %v11388_v15 = vpop.f32.mrf.mxu0  ;;  %v13642_v63 = vld [vmem:[#allocation103_spill] sm:$0xff]  ;;  %v13644_v51 = vld [vmem:[#allocation108_spill] sm:$0xff]  ;;  %v13648_v48 = vld [vmem:[#allocation109_spill] sm:$0xff] }
 0xce3   :  { %v6088_v21 = vadd.f32 %v6087_v61, %v11355_v24  ;;  %v11378_v4 = vadd.f32 %v13631_v23, %v5730_v32  ;;  %v11386_v36 = vadd.f32 %v13635_v31, %v5733_v59  ;;  %v13639_v61 = vld [vmem:[#allocation107_spill] sm:$0xff]  ;;  %v13643_v32 = vld [vmem:[#allocation44_spill] sm:$0xff] }
 0xce4   :  { %v11394_v2 = vadd.f32 %v13639_v61, %v5736_v57  ;;  %v13646_v59 = vld [vmem:[#allocation56_spill] sm:$0xff]  ;;  %v13650_v57 = vld [vmem:[#allocation59_spill] sm:$0xff]  ;;  %v13652_v61 = vld [vmem:[#allocation110_spill] sm:$0xff] }
 0xce5   :  { %v6089_v52 = vadd.f32 %v6088_v21, %v11361_v58  ;;  %13632 = vst [vmem:[#allocation85_spill] sm:$0xff] %v11378_v4  ;;  %v5742_v21 = vadd.f32 %v13643_v32, %v13642_v63  ;;  %v13651_v31 = vld [vmem:[#allocation51_spill] sm:$0xff]  ;;  %v13654_v63 = vld [vmem:[#allocation61_spill] sm:$0xff]  ;;  %v13655_v32 = vld [vmem:[#allocation54_spill] sm:$0xff] }
 0xce6   :  { %13636 = vst [vmem:[#allocation88_spill] sm:$0xff] %v11386_v36  ;;  %v13713_v24 = vld [vmem:[#allocation67_spill] sm:$0xff] }
 0xce7   :  { %v6028_v12 = vpop.f32.mrf.mxu1  ;;  %v6090_v6 = vadd.f32 %v6089_v52, %v11370_v10  ;;  %13640 = vst [vmem:[#allocation60_spill] sm:$0xff] %v11394_v2  ;;  %v13647_v52 = vld [vmem:[#allocation47_spill] sm:$0xff]  ;;  %v13669_v10 = vld [vmem:[#allocation114_spill] sm:$0xff] }
 0xce8   :  { %v11364_v14 = vadd.f32 %v6028_v12, %v13624_v45  ;;  %v13637_v12 = vld [vmem:[#allocation101_spill] sm:$0xff]  ;;  %v13641_v45 = vld [vmem:[#allocation43_spill] sm:$0xff]  ;;  %v5745_v23 = vadd.f32 %v13647_v52, %v13646_v59 }
 0xce9   :  { %v5739_v33 = vadd.f32 %v13638_v5, %v13637_v12  ;;  %v6091_v9 = vadd.f32 %v6090_v6, %v11378_v4  ;;  %v11409_v6 = vadd.f32 %v13648_v48, %v5742_v21  ;;  %v11413_v12 = vpop.f32.mrf.mxu2  ;;  %v13656_v21 = vld [vmem:[#allocation111_spill] sm:$0xff]  ;;  %v13658_v52 = vld [vmem:[#allocation49_spill] sm:$0xff] }
 0xceb   :  { %v6092_v55 = vadd.f32 %v6091_v9, %v11386_v36  ;;  %v11403_v46 = vadd.f32 %v13644_v51, %v5739_v33  ;;  %13649 = vst [vmem:[#allocation87_spill] sm:$0xff] %v11409_v6  ;;  %v11417_v9 = vadd.f32 %v13652_v61, %v5745_v23  ;;  %v11419_v33 = vpop.f32.mrf.mxu3  ;;  %v5751_v51 = vadd.f32 %v13655_v32, %v13654_v63  ;;  %v13663_v36 = vld [vmem:[#allocation5_spill] sm:$0xff]  ;;  %v13664_v63 = vld [vmem:[#allocation3_spill] sm:$0xff] }
 0xcec   :  { %v5757_v32 = vadd.f32 %v13664_v63, %v13663_v36 }
 0xced   :  { %13645 = vst [vmem:[#allocation37_spill] sm:$0xff] %v11403_v46  ;;  %v6093_v11 = vadd.f32 %v6092_v55, %v11394_v2 }
 0xcee   :  { %13653 = vst [vmem:[#allocation90_spill] sm:$0xff] %v11417_v9 }
 0xcef   :  { %v6031_v7 = vpop.f32.mrf.mxu1  ;;  %v6094_v5 = vadd.f32 %v6093_v11, %v11403_v46  ;;  %v13659_v11 = vld [vmem:[#allocation63_spill] sm:$0xff]  ;;  %v13661_v46 = vld [vmem:[#allocation112_spill] sm:$0xff] }
 0xcf0   :  { %v11397_v26 = vadd.f32 %v6031_v7, %v13641_v45  ;;  %v5748_v7 = vadd.f32 %v13651_v31, %v13650_v57  ;;  %v11430_v57 = vpop.f32.mrf.mxu0  ;;  %v13660_v31 = vld [vmem:[#allocation57_spill] sm:$0xff]  ;;  %v11436_v2 = vadd.f32 %v13661_v46, %v5751_v51  ;;  %v13672_v46 = vld [vmem:[#allocation8_spill] sm:$0xff] }
 0xcf1   :  { %v6095_v55 = vadd.f32 %v6094_v5, %v11409_v6  ;;  %v5754_v23 = vadd.f32 %v13660_v31, %v13659_v11  ;;  %v11448_v11 = vadd.f32 %v13669_v10, %v5757_v32  ;;  %v13671_v31 = vld [vmem:[#allocation7_spill] sm:$0xff] }
 0xcf2   :  { %v11425_v59 = vadd.f32 %v13656_v21, %v5748_v7  ;;  %13662 = vst [vmem:[#allocation89_spill] sm:$0xff] %v11436_v2  ;;  %v13665_v7 = vld [vmem:[#allocation113_spill] sm:$0xff]  ;;  %v5763_v51 = vadd.f32 %v13672_v46, %v13671_v31  ;;  %v13680_v46 = vld [vmem:[#allocation11_spill] sm:$0xff] }
 0xcf3   :  { %v6096_v61 = vadd.f32 %v6095_v55, %v11417_v9  ;;  %v11442_v21 = vadd.f32 %v13665_v7, %v5754_v23  ;;  %13670 = vst [vmem:[#allocation30_spill] sm:$0xff] %v11448_v11  ;;  %v11452_v9 = vpop.f32.mrf.mxu2  ;;  %v13675_v23 = vld [vmem:[#allocation55_spill] sm:$0xff] }
 0xcf4   :  { %13657 = vst [vmem:[#allocation36_spill] sm:$0xff] %v11425_v59 }
 0xcf5   :  { %v6097_v5 = vadd.f32 %v6096_v61, %v11425_v59  ;;  %13666 = vst [vmem:[#allocation92_spill] sm:$0xff] %v11442_v21  ;;  %v13673_v61 = vld [vmem:[#allocation115_spill] sm:$0xff] }
 0xcf7   :  { %v6034_v45 = vpop.f32.mrf.mxu1  ;;  %v6098_v4 = vadd.f32 %v6097_v5, %v11436_v2  ;;  %v13676_v5 = vld [vmem:[#allocation9_spill] sm:$0xff]  ;;  %v13678_v2 = vld [vmem:[#allocation116_spill] sm:$0xff] }
 0xcf8   :  { %v11428_v48 = vadd.f32 %v6034_v45, %v13658_v52  ;;  %v13667_v45 = vld [vmem:[#allocation6_spill] sm:$0xff]  ;;  %v13668_v52 = vld [vmem:[#allocation4_spill] sm:$0xff]  ;;  %v11467_v59 = vadd.f32 %v13678_v2, %v5763_v51  ;;  %v11469_v31 = vpop.f32.mrf.mxu0  ;;  %v13686_v51 = vld [vmem:[#allocation15_spill] sm:$0xff] }
 0xcf9   :  { %v5760_v6 = vadd.f32 %v13668_v52, %v13667_v45  ;;  %v6099_v36 = vadd.f32 %v6098_v4, %v11442_v21  ;;  %v11461_v45 = vpop.f32.mrf.mxu3  ;;  %v13677_v52 = vld [vmem:[#allocation10_spill] sm:$0xff]  ;;  %v13681_v4 = vld [vmem:[#allocation12_spill] sm:$0xff] }
 0xcfa   :  { %v5766_v10 = vadd.f32 %v13677_v52, %v13676_v5  ;;  %13679 = vst [vmem:[#allocation94_spill] sm:$0xff] %v11467_v59  ;;  %v5769_v21 = vadd.f32 %v13681_v4, %v13680_v46  ;;  %v13687_v52 = vld [vmem:[#allocation16_spill] sm:$0xff] }
 0xcfb   :  { %v11456_v63 = vadd.f32 %v13673_v61, %v5760_v6  ;;  %v6100_v32 = vadd.f32 %v6099_v36, %v11448_v11  ;;  %v13683_v61 = vld [vmem:[#allocation13_spill] sm:$0xff]  ;;  %v5775_v11 = vadd.f32 %v13687_v52, %v13686_v51 }
 0xcfc   :  { %v11481_v36 = vadd.f32 %v11202_v41, %v5769_v21  ;;  %v13694_v52 = vld [vmem:[#allocation117_spill] sm:$0xff] }
 0xcfd   :  { %13674 = vst [vmem:[#allocation91_spill] sm:$0xff] %v11456_v63  ;;  %v6101_v6 = vadd.f32 %v6100_v32, %v11456_v63  ;;  %v11493_v63 = vpop.f32.mrf.mxu2  ;;  %v11497_v41 = vadd.f32 %v11206_v39, %v5775_v11 }
 0xcfe   :  { %13685 = vst [vmem:[#allocation93_spill] sm:$0xff] %v11481_v36 }
 0xcff   :  { %v6037_v55 = vpop.f32.mrf.mxu1  ;;  %v6102_v5 = vadd.f32 %v6101_v6, %v11467_v59  ;;  %13691 = vst [vmem:[#allocation39_spill] sm:$0xff] %v11497_v41  ;;  %v13700_v59 = vld [vmem:[#allocation31_spill] sm:$0xff] }
 0xd00   :  { %v11459_v7 = vadd.f32 %v6037_v55, %v13675_v23  ;;  %v11475_v55 = vadd.f32 %v11200_v56, %v5766_v10  ;;  %v13684_v23 = vld [vmem:[#allocation14_spill] sm:$0xff]  ;;  %v13689_v56 = vld [vmem:[#allocation17_spill] sm:$0xff] }
 0xd01   :  { %v5772_v58 = vadd.f32 %v13684_v23, %v13683_v61  ;;  %v13690_v10 = vld [vmem:[#allocation18_spill] sm:$0xff]  ;;  %v11499_v21 = vpop.f32.mrf.mxu3  ;;  %v13692_v61 = vld [vmem:[#allocation19_spill] sm:$0xff]  ;;  %v13693_v23 = vld [vmem:[#allocation21_spill] sm:$0xff] }
 0xd02   :  { %13682 = vst [vmem:[#allocation26_spill] sm:$0xff] %v11475_v55  ;;  %v6103_v46 = vadd.f32 %v6102_v5, %v11475_v55  ;;  %v5778_v4 = vadd.f32 %v13690_v10, %v13689_v56  ;;  %v5781_v51 = vadd.f32 %v13693_v23, %v13692_v61  ;;  %v13696_v56 = vld [vmem:[#allocation23_spill] sm:$0xff]  ;;  %v13697_v10 = vld [vmem:[#allocation25_spill] sm:$0xff]  ;;  %v13702_v23 = vld [vmem:[#allocation34_spill] sm:$0xff] }
 0xd03   :  { %v11489_v32 = vadd.f32 %v11204_v43, %v5772_v58  ;;  %v11507_v58 = vpop.f32.mrf.mxu0  ;;  %v5784_v55 = vadd.f32 %v13697_v10, %v13696_v56  ;;  %v13704_v10 = vld [vmem:[#allocation118_spill] sm:$0xff] }
 0xd04   :  { %v6104_v6 = vadd.f32 %v6103_v46, %v11481_v36  ;;  %v11505_v43 = vadd.f32 %v13694_v52, %v5778_v4  ;;  %v11513_v39 = vadd.f32 %v11210_v44, %v5781_v51  ;;  %v13699_v36 = vld [vmem:[#allocation28_spill] sm:$0xff] }
 0xd05   :  { %13688 = vst [vmem:[#allocation96_spill] sm:$0xff] %v11489_v32  ;;  %v5787_v61 = vadd.f32 %v13700_v59, %v13699_v36  ;;  %v11521_v4 = vadd.f32 %v11213_v28, %v5784_v55  ;;  %v13703_v52 = vld [vmem:[#allocation40_spill] sm:$0xff]  ;;  %v5425_v44 = vpop.f32.mrf.mxu2 }
 0xd06   :  { %v6105_v5 = vadd.f32 %v6104_v6, %v11489_v32  ;;  %13695 = vst [vmem:[#allocation46_spill] sm:$0xff] %v11505_v43  ;;  %v5790_v32 = vadd.f32 %v13703_v52, %v13702_v23 }
 0xd07   :  { %v11483_v2 = vpop.f32.mrf.mxu1  ;;  %13698 = vst [vmem:[#allocation95_spill] sm:$0xff] %v11513_v39 }
 0xd08   :  { %v6106_v46 = vadd.f32 %v6105_v5, %v11497_v41  ;;  %13701 = vst [vmem:[#allocation98_spill] sm:$0xff] %v11521_v4  ;;  %v11527_v5 = vadd.f32 %v13704_v10, %v5787_v61  ;;  %v11531_v41 = vadd.f32 %v11219_v27, %v5790_v32 }
 0xd09   :  { %v5634_v59 = vpop.f32.mrf.mxu3 }
 0xd0a   :  { %v6107_v6 = vadd.f32 %v6106_v46, %v11505_v43  ;;  %13705 = vst [vmem:[#allocation104_spill] sm:$0xff] %v11527_v5 }
 0xd0b   :  { %13706 = vst [vmem:[#allocation97_spill] sm:$0xff] %v11531_v41  ;;  %v5843_v46 = vpop.f32.mrf.mxu0 }
 0xd0c   :  { %v6108_v56 = vadd.f32 %v6107_v6, %v11513_v39 }
 0xd0d   :  { %v5428_v52 = vpop.f32.mrf.mxu2 }
 0xd0e   :  { %v6109_v51 = vadd.f32 %v6108_v56, %v11521_v4  ;;  %v13707_v4 = vld [vmem:[#allocation64_spill] sm:$0xff] }
 0xd0f   :  { %v11515_v11 = vpop.f32.mrf.mxu1 }
 0xd10   :  { %v6110_v36 = vadd.f32 %v6109_v51, %v11527_v5  ;;  %v13708_v51 = vld [vmem:[#allocation75_spill] sm:$0xff] }
 0xd11   :  { %v5637_v10 = vpop.f32.mrf.mxu3  ;;  %v4996_v5 = vadd.f32 %v13708_v51, %v13707_v4  ;;  %v13716_v4 = vld [vmem:[#allocation29_spill] sm:$0xff] }
 0xd12   :  { %v6111_v55 = vadd.f32 %v6110_v36, %v11531_v41  ;;  %v13709_v36 = vld [vmem:[#allocation68_spill] sm:$0xff]  ;;  %v13710_v41 = vld [vmem:[#allocation45_spill] sm:$0xff] }
 0xd13   :  { %v5846_v27 = vpop.f32.mrf.mxu0 }
 0xd14   :  { %v6112_v23 = vadd.f32 %v6111_v55, %v11223_v53  ;;  %v4999_v55 = vadd.f32 %v13710_v41, %v13709_v36  ;;  %v13711_v53 = vld [vmem:[#allocation52_spill] sm:$0xff]  ;;  %v13717_v41 = vld [vmem:[#allocation27_spill] sm:$0xff] }
 0xd15   :  { %v5431_v35 = vpop.f32.mrf.mxu2 }
 0xd16   :  { %v6113_v6 = vadd.f32 %v6112_v23, %v11227_v54  ;;  %v5205_v23 = vadd.f32 %v13711_v53, %v4996_v5  ;;  %v13719_v5 = vld [vmem:[#allocation72_spill] sm:$0xff] }
 0xd17   :  { %v6046_v28 = vpop.f32.mrf.mxu1 }
 0xd18   :  { %v6114_v61 = vadd.f32 %v6113_v6, %v11231_v62  ;;  %v13712_v62 = vld [vmem:[#allocation71_spill] sm:$0xff] }
 0xd19   :  { %v5002_v18 = vadd.f32 %v13713_v24, %v13712_v62 }
 0xd1a   :  { %v6115_v56 = vadd.f32 %v6114_v61, %v11235_v17  ;;  %v13714_v61 = vld [vmem:[#allocation58_spill] sm:$0xff] }
 0xd1b   :  { %v5208_v17 = vadd.f32 %v13714_v61, %v4999_v55  ;;  %v5211_v36 = vadd.f32 %v13717_v41, %v5002_v18  ;;  %v5849_v24 = vpop.f32.mrf.mxu0 }
 0xd1c   :  { %v6116_v32 = vadd.f32 %v6115_v56, %v11239_v38  ;;  %v13715_v38 = vld [vmem:[#allocation65_spill] sm:$0xff] }
 0xd1d   :  { %v5005_v51 = vadd.f32 %v13716_v4, %v13715_v38  ;;  %v13721_v38 = vld [vmem:[#allocation81_spill] sm:$0xff]  ;;  %v13722_v4 = vld [vmem:[#allocation35_spill] sm:$0xff]  ;;  %v5420_v41 = vadd.f32 %v11452_v9, %v5211_v36 }
 0xd1e   :  { %v6117_v43 = vadd.f32 %v6116_v32, %v11252_v25  ;;  %v5640_v32 = vpop.f32.mrf.mxu3  ;;  %v5414_v25 = vadd.f32 %v11374_v20, %v5205_v23  ;;  %v13723_v20 = vld [vmem:[#allocation33_spill] sm:$0xff] }
 0xd1f   :  { %v6049_v39 = vpop.f32.mrf.mxu1  ;;  %v5214_v62 = vadd.f32 %v13720_v0, %v5005_v51  ;;  %v13724_v51 = vld [vmem:[#allocation70_spill] sm:$0xff] }
 0xd20   :  { %v6118_v54 = vadd.f32 %v6117_v43, %v11283_v34  ;;  %v13718_v43 = vld [vmem:[#allocation20_spill] sm:$0xff]  ;;  %v5623_v55 = vadd.f32 %v11380_v29, %v5414_v25  ;;  %v13726_v29 = vld [vmem:[#allocation22_spill] sm:$0xff] }
 0xd21   :  { %v5008_v34 = vadd.f32 %v13719_v5, %v13718_v43  ;;  %v13725_v43 = vld [vmem:[#allocation77_spill] sm:$0xff]  ;;  %v5629_v5 = vadd.f32 %v11461_v45, %v5420_v41 }
 0xd22   :  { %v6119_v56 = vadd.f32 %v6118_v54, %v11310_v49  ;;  %v5417_v54 = vadd.f32 %v11413_v12, %v5208_v17  ;;  %v5011_v49 = vadd.f32 %v13722_v4, %v13721_v38  ;;  %v5014_v25 = vadd.f32 %v13725_v43, %v13724_v51  ;;  %v13728_v4 = vld [vmem:[#allocation79_spill] sm:$0xff] }
 0xd23   :  { %v5217_v23 = vadd.f32 %v13723_v20, %v5008_v34  ;;  %v5423_v17 = vadd.f32 %v11493_v63, %v5214_v62  ;;  %v5434_v63 = vpop.f32.mrf.mxu2  ;;  %v13729_v20 = vld [vmem:[#allocation48_spill] sm:$0xff] }
 0xd24   :  { %v6120_v53 = vadd.f32 %v6119_v56, %v11337_v42  ;;  %v5626_v18 = vadd.f32 %v11419_v33, %v5417_v54  ;;  %v5832_v56 = vadd.f32 %v11388_v15, %v5623_v55  ;;  %v5220_v12 = vadd.f32 %v13726_v29, %v5011_v49  ;;  %v13727_v54 = vld [vmem:[#allocation66_spill] sm:$0xff] }
 0xd25   :  { %v5632_v9 = vadd.f32 %v11499_v21, %v5423_v17  ;;  %v5426_v36 = vadd.f32 %v5425_v44, %v5217_v23  ;;  %v5838_v55 = vadd.f32 %v11469_v31, %v5629_v5 }
 0xd26   :  { %v6121_v61 = vadd.f32 %v6120_v53, %v11364_v14  ;;  %v5835_v34 = vadd.f32 %v11430_v57, %v5626_v18  ;;  %v11577_v15 = vadd.f32 %v11483_v2, %v5832_v56  ;;  %v5429_v57 = vadd.f32 %v5428_v52, %v5220_v12  ;;  %v5643_v38 = vpop.f32.mrf.mxu3  ;;  %v5852_v56 = vpop.f32.mrf.mxu0  ;;  %v13732_v12 = vld [vmem:[#allocation80_spill] sm:$0xff] }
 0xd27   :  { %v6052_v6 = vpop.f32.mrf.mxu1  ;;  %v5635_v45 = vadd.f32 %v5634_v59, %v5426_v36  ;;  %v5017_v2 = vadd.f32 %v13729_v20, %v13728_v4  ;;  %v5841_v18 = vadd.f32 %v11507_v58, %v5632_v9  ;;  %v11590_v44 = vadd.f32 %v6046_v28, %v5838_v55  ;;  %v13736_v20 = vld [vmem:[#allocation32_spill] sm:$0xff] }
 0xd28   :  { %v6122_v0 = vadd.f32 %v6121_v61, %v11397_v26  ;;  %v5223_v61 = vadd.f32 %v13727_v54, %v5014_v25  ;;  %v11584_v62 = vadd.f32 %v11515_v11, %v5835_v34  ;;  %v5638_v31 = vadd.f32 %v5637_v10, %v5429_v57  ;;  %v13735_v57 = vld [vmem:[#allocation50_spill] sm:$0xff] }
 0xd29   :  { %v5844_v23 = vadd.f32 %v5843_v46, %v5635_v45  ;;  %v11594_v59 = vadd.f32 %v6049_v39, %v5841_v18  ;;  %v13734_v45 = vld [vmem:[#allocation82_spill] sm:$0xff] }
 0xd2a   :  { %v6123_v33 = vadd.f32 %v6122_v0, %v11428_v48  ;;  %v5432_v41 = vadd.f32 %v5431_v35, %v5223_v61  ;;  %v13730_v0 = vld [vmem:[#allocation73_spill] sm:$0xff]  ;;  %v5847_v25 = vadd.f32 %v5846_v27, %v5638_v31  ;;  %v13731_v35 = vld [vmem:[#allocation76_spill] sm:$0xff]  ;;  %v13733_v27 = vld [vmem:[#allocation42_spill] sm:$0xff]  ;;  %v5023_v4 = vadd.f32 %v13735_v57, %v13734_v45 }
 0xd2b   :  { %v5226_v51 = vadd.f32 %v13730_v0, %v5017_v2  ;;  %v11597_v58 = vadd.f32 %v6052_v6, %v5844_v23  ;;  %v5020_v5 = vadd.f32 %v13732_v12, %v13731_v35 }
 0xd2c   :  { %v6124_v49 = vadd.f32 %v6123_v33, %v11459_v7  ;;  %v5641_v43 = vadd.f32 %v5640_v32, %v5432_v41  ;;  %v5437_v33 = vpop.f32.mrf.mxu2  ;;  %v5232_v2 = vadd.f32 %v13736_v20, %v5023_v4 }
 0xd2d   :  { %v5435_v29 = vadd.f32 %v5434_v63, %v5226_v51  ;;  %v5229_v36 = vadd.f32 %v13733_v27, %v5020_v5 }
 0xd2e   :  { %v6125_v21 = vadd.f32 %v6124_v49, %v11577_v15  ;;  %v5850_v28 = vadd.f32 %v5849_v24, %v5641_v43  ;;  %v5646_v32 = vpop.f32.mrf.mxu3  ;;  %v5855_v54 = vpop.f32.mrf.mxu0 }
 0xd2f   :  { %v6055_v53 = vpop.f32.mrf.mxu1  ;;  %v5644_v34 = vadd.f32 %v5643_v38, %v5435_v29 }
 0xd30   :  { %v6126_v11 = vadd.f32 %v6125_v21, %v11584_v62  ;;  %v11600_v46 = vadd.f32 %v6055_v53, %v5847_v25  ;;  %v5438_v53 = vadd.f32 %v5437_v33, %v5229_v36 }
 0xd31   :  { %v5853_v55 = vadd.f32 %v5852_v56, %v5644_v34 }
 0xd32   :  { %v6127_v17 = vadd.f32 %v6126_v11, %v11590_v44  ;;  %v5647_v38 = vadd.f32 %v5646_v32, %v5438_v53  ;;  %v13737_v11 = vld [vmem:[#allocation38_spill] sm:$0xff] }
 0xd34   :  { %v6128_v10 = vadd.f32 %v6127_v17, %v11594_v59  ;;  %v5440_v18 = vpop.f32.mrf.mxu2  ;;  %v5856_v21 = vadd.f32 %v5855_v54, %v5647_v38  ;;  %v13739_v17 = vld [vmem:[#allocation69_spill] sm:$0xff] }
 0xd35   :  { %v5441_v0 = vadd.f32 %v5440_v18, %v5232_v2 }
 0xd36   :  { %v6129_v39 = vadd.f32 %v6128_v10, %v11597_v58  ;;  %v5649_v31 = vpop.f32.mrf.mxu3  ;;  %v5858_v56 = vpop.f32.mrf.mxu0 }
 0xd37   :  { %v6058_v52 = vpop.f32.mrf.mxu1  ;;  %v5650_v25 = vadd.f32 %v5649_v31, %v5441_v0 }
 0xd38   :  { %v6059_v9 = vadd.f32 %v6058_v52, %v5850_v28  ;;  %v6130_v6 = vadd.f32 %v6129_v39, %v11600_v46  ;;  %v13738_v52 = vld [vmem:[#allocation41_spill] sm:$0xff] }
 0xd39   :  { %v5026_v43 = vadd.f32 %v13738_v52, %v13737_v11  ;;  %v5859_v28 = vadd.f32 %v5858_v56, %v5650_v25 }
 0xd3a   :  { %v6131_v61 = vadd.f32 %v6130_v6, %v6059_v9 }
 0xd3b   :  { %v5235_v29 = vadd.f32 %v13739_v17, %v5026_v43 }
 0xd3c   :  { %v5443_v12 = vpop.f32.mrf.mxu2 }
 0xd3d   :  { %v5444_v34 = vadd.f32 %v5443_v12, %v5235_v29 }
 0xd3e   :  { %v5652_v5 = vpop.f32.mrf.mxu3  ;;  %v5861_v39 = vpop.f32.mrf.mxu0 }
 0xd3f   :  { %v6061_v24 = vpop.f32.mrf.mxu1  ;;  %v5653_v32 = vadd.f32 %v5652_v5, %v5444_v34 }
 0xd40   :  { %v6062_v63 = vadd.f32 %v6061_v24, %v5853_v55 }
 0xd41   :  { %v5862_v27 = vadd.f32 %v5861_v39, %v5653_v32  ;;  %v13744_v39 = vld [vmem:[#allocation74_spill] sm:$0xff] }
 0xd42   :  { %v6132_v49 = vadd.f32 %v6131_v61, %v6062_v63 }
 0xd47   :  { %v6064_v23 = vpop.f32.mrf.mxu1 }
 0xd48   :  { %v6065_v41 = vadd.f32 %v6064_v23, %v5856_v21 }
 0xd4a   :  { %v6133_v51 = vadd.f32 %v6132_v49, %v6065_v41 }
 0xd4f   :  { %v6067_v10 = vpop.f32.mrf.mxu1 }
 0xd50   :  { %v6068_v35 = vadd.f32 %v6067_v10, %v5859_v28 }
 0xd52   :  { %v6134_v33 = vadd.f32 %v6133_v51, %v6068_v35 }
 0xd57   :  { %v6070_v36 = vpop.f32.mrf.mxu1 }
 0xd58   :  { %v6071_v55 = vadd.f32 %v6070_v36, %v5862_v27  ;;  %v13745_v36 = vld [vmem:[#allocation84_spill] sm:$0xff] }
 0xd5a   :  { %v6135_v6 = vadd.f32 %v6134_v33, %v6071_v55 }
 0xd5c   :  { %v6136_v54 = vrot.slane %v6135_v6, 4 }
 0xd5e   :  { %v6137_v24 = vadd.f32 %v6136_v54, %v6135_v6  ;;  %v13746_v54 = vld [vmem:[#allocation24_spill] sm:$0xff] }
 0xd60   :  { %v6138_v61 = vrot.slane %v6137_v24, 2 }
 0xd62   :  { %v6139_v53 = vadd.f32 %v6138_v61, %v6137_v24 }
 0xd64   :  { %v6140_v49 = vrot.slane %v6139_v53, 1 }
 0xd66   :  { %v6141_v45 = vadd.f32 %v6140_v49, %v6139_v53  ;;  %v13747_v49 = vld [vmem:[#allocation83_spill] sm:$0xff] }
 0xd68   :  { %v11613_v57 = vmul.f32 0.001953125, %v6141_v45 }
 0xd6a   :  { %v11616_v4 = vsub.f32 %v6059_v9, %v11613_v57  ;;  %v11619_v38 = vsub.f32 %v6062_v63, %v11613_v57  ;;  %v11622_v20 = vsub.f32 %v6065_v41, %v11613_v57  ;;  %v11625_v2 = vsub.f32 %v6068_v35, %v11613_v57 }
 0xd6b   :  { %v11628_v18 = vsub.f32 %v6071_v55, %v11613_v57  ;;  %v11632_v21 = vsub.f32 %v11257_v16, %v11613_v57  ;;  %v11636_v9 = vsub.f32 %v11249_v8, %v11613_v57  ;;  %v11640_v63 = vsub.f32 %v11260_v40, %v11613_v57 }
 0xd6c   :  { %13740 = vst [vmem:[#allocation100_spill] sm:$0xff] %v11616_v4  ;;  %v11648_v41 = vsub.f32 %v11268_v50, %v11613_v57  ;;  %v11652_v16 = vsub.f32 %v11274_v13, %v11613_v57  ;;  %v11658_v40 = vsub.f32 %v11280_v47, %v11613_v57  ;;  %v11664_v50 = vsub.f32 %v11289_v30, %v11613_v57 }
 0xd6d   :  { %13741 = vst [vmem:[#allocation105_spill] sm:$0xff] %v11619_v38  ;;  %v6207_v31 = vmul.f32 %v11632_v21, %v11632_v21  ;;  %v6208_v23 = vmul.f32 %v11636_v9, %v11636_v9  ;;  %v6209_v8 = vmul.f32 %v11640_v63, %v11640_v63  ;;  %v11670_v52 = vsub.f32 %v11295_v19, %v11613_v57 }
 0xd6e   :  { %13742 = vst [vmem:[#allocation99_spill] sm:$0xff] %v11622_v20  ;;  %v6210_v0 = vmul.f32 %v11648_v41, %v11648_v41  ;;  %v6211_v13 = vmul.f32 %v11652_v16, %v11652_v16  ;;  %v6212_v47 = vmul.f32 %v11658_v40, %v11658_v40  ;;  %v11676_v25 = vsub.f32 %v11301_v3, %v11613_v57 }
 0xd6f   :  { %13743 = vst [vmem:[#allocation102_spill] sm:$0xff] %v11625_v2  ;;  %v6271_v56 = vadd.f32 %v6208_v23, %v6207_v31  ;;  %v6213_v30 = vmul.f32 %v11664_v50, %v11664_v50  ;;  %v11682_v29 = vsub.f32 %v11307_v37, %v11613_v57  ;;  %v6214_v19 = vmul.f32 %v11670_v52, %v11670_v52 }
 0xd70   :  { %v11688_v10 = vsub.f32 %v11316_v1, %v11613_v57  ;;  %v6215_v3 = vmul.f32 %v11676_v25, %v11676_v25  ;;  %v11694_v12 = vsub.f32 %v11322_v60, %v11613_v57  ;;  %v11700_v34 = vsub.f32 %v11328_v22, %v11613_v57 }
 0xd71   :  { %v6272_v51 = vadd.f32 %v6271_v56, %v6209_v8  ;;  %v6216_v37 = vmul.f32 %v11682_v29, %v11682_v29  ;;  %v11706_v32 = vsub.f32 %v13744_v39, %v11613_v57  ;;  %v11712_v55 = vsub.f32 %v13745_v36, %v11613_v57  ;;  %v13748_v8 = vld [vmem:[#allocation86_spill] sm:$0xff] }
 0xd72   :  { %v6217_v1 = vmul.f32 %v11688_v10, %v11688_v10  ;;  %v6218_v60 = vmul.f32 %v11694_v12, %v11694_v12  ;;  %v6219_v22 = vmul.f32 %v11700_v34, %v11700_v34  ;;  %v11718_v24 = vsub.f32 %v13746_v54, %v11613_v57  ;;  %v13754_v54 = vld [vmem:[#allocation87_spill] sm:$0xff] }
 0xd73   :  { %v6273_v11 = vadd.f32 %v6272_v51, %v6210_v0  ;;  %v6220_v61 = vmul.f32 %v11706_v32, %v11706_v32  ;;  %v11724_v45 = vsub.f32 %v13747_v49, %v11613_v57  ;;  %v6221_v31 = vmul.f32 %v11712_v55, %v11712_v55 }
 0xd74   :  { %v11730_v56 = vsub.f32 %v13748_v8, %v11613_v57  ;;  %v6222_v0 = vmul.f32 %v11718_v24, %v11718_v24 }
 0xd75   :  { %v6274_v43 = vadd.f32 %v6273_v11, %v6211_v13  ;;  %v13749_v13 = vld [vmem:[#allocation78_spill] sm:$0xff] }
 0xd76   :  { %v11736_v11 = vsub.f32 %v13749_v13, %v11613_v57 }
 0xd77   :  { %v6275_v17 = vadd.f32 %v6274_v43, %v6212_v47  ;;  %v6223_v47 = vmul.f32 %v11724_v45, %v11724_v45 }
 0xd79   :  { %v6276_v28 = vadd.f32 %v6275_v17, %v6213_v30  ;;  %v13750_v30 = vld [vmem:[#allocation85_spill] sm:$0xff] }
 0xd7a   :  { %v11742_v17 = vsub.f32 %v13750_v30, %v11613_v57  ;;  %v13757_v30 = vld [vmem:[#allocation89_spill] sm:$0xff] }
 0xd7b   :  { %v6277_v35 = vadd.f32 %v6276_v28, %v6214_v19  ;;  %v6224_v19 = vmul.f32 %v11730_v56, %v11730_v56 }
 0xd7c   :  { %v6226_v39 = vmul.f32 %v11742_v17, %v11742_v17 }
 0xd7d   :  { %v6278_v5 = vadd.f32 %v6277_v35, %v6215_v3  ;;  %v13751_v3 = vld [vmem:[#allocation88_spill] sm:$0xff] }
 0xd7e   :  { %v11748_v35 = vsub.f32 %v13751_v3, %v11613_v57 }
 0xd7f   :  { %v6279_v33 = vadd.f32 %v6278_v5, %v6216_v37  ;;  %v6225_v37 = vmul.f32 %v11736_v11, %v11736_v11 }
 0xd81   :  { %v6280_v27 = vadd.f32 %v6279_v33, %v6217_v1  ;;  %v13752_v1 = vld [vmem:[#allocation60_spill] sm:$0xff] }
 0xd82   :  { %v11754_v33 = vsub.f32 %v13752_v1, %v11613_v57 }
 0xd83   :  { %v6281_v6 = vadd.f32 %v6280_v27, %v6218_v60  ;;  %v13753_v27 = vld [vmem:[#allocation37_spill] sm:$0xff] }
 0xd84   :  { %v11760_v36 = vsub.f32 %v13753_v27, %v11613_v57 }
 0xd85   :  { %v6282_v53 = vadd.f32 %v6281_v6, %v6219_v22  ;;  %v6227_v22 = vmul.f32 %v11748_v35, %v11748_v35 }
 0xd86   :  { %v6229_v8 = vmul.f32 %v11760_v36, %v11760_v36 }
 0xd87   :  { %v6283_v23 = vadd.f32 %v6282_v53, %v6220_v61  ;;  %v11766_v61 = vsub.f32 %v13754_v54, %v11613_v57  ;;  %v6228_v53 = vmul.f32 %v11754_v33, %v11754_v33  ;;  %v13760_v54 = vld [vmem:[#allocation91_spill] sm:$0xff] }
 0xd89   :  { %v6284_v51 = vadd.f32 %v6283_v23, %v6221_v31  ;;  %v13755_v31 = vld [vmem:[#allocation90_spill] sm:$0xff] }
 0xd8a   :  { %v11772_v23 = vsub.f32 %v13755_v31, %v11613_v57 }
 0xd8b   :  { %v6285_v43 = vadd.f32 %v6284_v51, %v6222_v0  ;;  %v13756_v51 = vld [vmem:[#allocation36_spill] sm:$0xff] }
 0xd8c   :  { %v11778_v13 = vsub.f32 %v13756_v51, %v11613_v57 }
 0xd8d   :  { %v6286_v28 = vadd.f32 %v6285_v43, %v6223_v47  ;;  %v6230_v47 = vmul.f32 %v11766_v61, %v11766_v61 }
 0xd8e   :  { %v6232_v1 = vmul.f32 %v11778_v13, %v11778_v13 }
 0xd8f   :  { %v6287_v5 = vadd.f32 %v6286_v28, %v6224_v19  ;;  %v11784_v19 = vsub.f32 %v13757_v30, %v11613_v57  ;;  %v6231_v28 = vmul.f32 %v11772_v23, %v11772_v23 }
 0xd91   :  { %v6288_v60 = vadd.f32 %v6287_v5, %v6225_v37  ;;  %v13758_v37 = vld [vmem:[#allocation92_spill] sm:$0xff] }
 0xd92   :  { %v11790_v5 = vsub.f32 %v13758_v37, %v11613_v57  ;;  %v13764_v37 = vld [vmem:[#allocation93_spill] sm:$0xff] }
 0xd93   :  { %v6289_v6 = vadd.f32 %v6288_v60, %v6226_v39  ;;  %v13759_v60 = vld [vmem:[#allocation30_spill] sm:$0xff] }
 0xd94   :  { %v11796_v27 = vsub.f32 %v13759_v60, %v11613_v57 }
 0xd95   :  { %v6290_v49 = vadd.f32 %v6289_v6, %v6227_v22  ;;  %v6233_v22 = vmul.f32 %v11784_v19, %v11784_v19 }
 0xd96   :  { %v6235_v51 = vmul.f32 %v11796_v27, %v11796_v27 }
 0xd97   :  { %v6291_v0 = vadd.f32 %v6290_v49, %v6228_v53  ;;  %v11802_v53 = vsub.f32 %v13760_v54, %v11613_v57  ;;  %v6234_v49 = vmul.f32 %v11790_v5, %v11790_v5 }
 0xd99   :  { %v6292_v43 = vadd.f32 %v6291_v0, %v6229_v8  ;;  %v13761_v8 = vld [vmem:[#allocation94_spill] sm:$0xff] }
 0xd9a   :  { %v11808_v0 = vsub.f32 %v13761_v8, %v11613_v57 }
 0xd9b   :  { %v6293_v3 = vadd.f32 %v6292_v43, %v6230_v47  ;;  %v13762_v43 = vld [vmem:[#allocation26_spill] sm:$0xff] }
 0xd9c   :  { %v11814_v30 = vsub.f32 %v13762_v43, %v11613_v57  ;;  %v13770_v43 = vld [vmem:[#allocation46_spill] sm:$0xff] }
 0xd9d   :  { %v6294_v39 = vadd.f32 %v6293_v3, %v6231_v28  ;;  %v6236_v28 = vmul.f32 %v11802_v53, %v11802_v53 }
 0xd9e   :  { %13763 = vst [vmem:[#allocation106_spill] sm:$0xff] %v11814_v30  ;;  %v6238_v54 = vmul.f32 %v11814_v30, %v11814_v30 }
 0xd9f   :  { %v6295_v6 = vadd.f32 %v6294_v39, %v6232_v1  ;;  %v11820_v1 = vsub.f32 %v13764_v37, %v11613_v57  ;;  %v6237_v39 = vmul.f32 %v11808_v0, %v11808_v0  ;;  %v11838_v37 = vsub.f32 %v13770_v43, %v11613_v57  ;;  %v13776_v43 = vld [vmem:[#allocation104_spill] sm:$0xff] }
 0xda1   :  { %v6296_v31 = vadd.f32 %v6295_v6, %v6233_v22  ;;  %13765 = vst [vmem:[#allocation101_spill] sm:$0xff] %v11820_v1  ;;  %v13766_v22 = vld [vmem:[#allocation96_spill] sm:$0xff] }
 0xda2   :  { %v11826_v6 = vsub.f32 %v13766_v22, %v11613_v57  ;;  %13771 = vst [vmem:[#allocation43_spill] sm:$0xff] %v11838_v37  ;;  %v13772_v22 = vld [vmem:[#allocation95_spill] sm:$0xff] }
 0xda3   :  { %v6297_v47 = vadd.f32 %v6296_v31, %v6234_v49  ;;  %v13768_v31 = vld [vmem:[#allocation39_spill] sm:$0xff]  ;;  %v11844_v30 = vsub.f32 %v13772_v22, %v11613_v57  ;;  %v13778_v22 = vld [vmem:[#allocation97_spill] sm:$0xff] }
 0xda4   :  { %13767 = vst [vmem:[#allocation53_spill] sm:$0xff] %v11826_v6  ;;  %v11832_v8 = vsub.f32 %v13768_v31, %v11613_v57  ;;  %v13774_v31 = vld [vmem:[#allocation98_spill] sm:$0xff] }
 0xda5   :  { %v6298_v3 = vadd.f32 %v6297_v47, %v6235_v51  ;;  %v6239_v51 = vmul.f32 %v11820_v1, %v11820_v1  ;;  %13773 = vst [vmem:[#allocation103_spill] sm:$0xff] %v11844_v30  ;;  %v11850_v1 = vsub.f32 %v13774_v31, %v11613_v57  ;;  %v13780_v31 = vld [vmem:[#allocation119_spill] sm:$0xff] }
 0xda6   :  { %13769 = vst [vmem:[#allocation107_spill] sm:$0xff] %v11832_v8 }
 0xda7   :  { %v6299_v60 = vadd.f32 %v6298_v3, %v6236_v28  ;;  %v6240_v28 = vmul.f32 %v11826_v6, %v11826_v6  ;;  %13775 = vst [vmem:[#allocation44_spill] sm:$0xff] %v11850_v1  ;;  %v11856_v6 = vsub.f32 %v13776_v43, %v11613_v57  ;;  %v13782_v43 = vld [vmem:[#allocation120_spill] sm:$0xff] }
 0xda9   :  { %v6300_v49 = vadd.f32 %v6299_v60, %v6237_v39  ;;  %v6241_v39 = vmul.f32 %v11832_v8, %v11832_v8  ;;  %13777 = vst [vmem:[#allocation108_spill] sm:$0xff] %v11856_v6  ;;  %v11862_v8 = vsub.f32 %v13778_v22, %v11613_v57  ;;  %v13784_v22 = vld [vmem:[#allocation121_spill] sm:$0xff] }
 0xdab   :  { %v6301_v47 = vadd.f32 %v6300_v49, %v6238_v54  ;;  %v6242_v54 = vmul.f32 %v11838_v37, %v11838_v37  ;;  %13779 = vst [vmem:[#allocation56_spill] sm:$0xff] %v11862_v8  ;;  %v11868_v37 = vsub.f32 %v13780_v31, %v11613_v57  ;;  %v13786_v31 = vld [vmem:[#allocation122_spill] sm:$0xff] }
 0xdad   :  { %v6302_v3 = vadd.f32 %v6301_v47, %v6239_v51  ;;  %v6243_v51 = vmul.f32 %v11844_v30, %v11844_v30  ;;  %13781 = vst [vmem:[#allocation47_spill] sm:$0xff] %v11868_v37  ;;  %v11874_v30 = vsub.f32 %v13782_v43, %v11613_v57  ;;  %v13787_v43 = vld [vmem:[#allocation123_spill] sm:$0xff] }
 0xdaf   :  { %v6303_v60 = vadd.f32 %v6302_v3, %v6240_v28  ;;  %v6244_v28 = vmul.f32 %v11850_v1, %v11850_v1  ;;  %13783 = vst [vmem:[#allocation109_spill] sm:$0xff] %v11874_v30  ;;  %v11880_v1 = vsub.f32 %v13784_v22, %v11613_v57  ;;  %v13788_v22 = vld [vmem:[#allocation124_spill] sm:$0xff] }
 0xdb1   :  { %v6304_v49 = vadd.f32 %v6303_v60, %v6241_v39  ;;  %v6245_v39 = vmul.f32 %v11856_v6, %v11856_v6  ;;  %13785 = vst [vmem:[#allocation59_spill] sm:$0xff] %v11880_v1  ;;  %v11886_v6 = vsub.f32 %v13786_v31, %v11613_v57  ;;  %v13789_v31 = vld [vmem:[#allocation125_spill] sm:$0xff] }
 0xdb3   :  { %v6305_v47 = vadd.f32 %v6304_v49, %v6242_v54  ;;  %v6246_v54 = vmul.f32 %v11862_v8, %v11862_v8  ;;  %v11892_v8 = vsub.f32 %v13787_v43, %v11613_v57  ;;  %v13790_v43 = vld [vmem:[#allocation126_spill] sm:$0xff] }
 0xdb5   :  { %v6306_v3 = vadd.f32 %v6305_v47, %v6243_v51  ;;  %v6247_v51 = vmul.f32 %v11868_v37, %v11868_v37  ;;  %v11898_v37 = vsub.f32 %v13788_v22, %v11613_v57  ;;  %v11916_v22 = vsub.f32 %v11337_v42, %v11613_v57 }
 0xdb7   :  { %v6307_v60 = vadd.f32 %v6306_v3, %v6244_v28  ;;  %v6248_v28 = vmul.f32 %v11874_v30, %v11874_v30  ;;  %v11904_v30 = vsub.f32 %v13789_v31, %v11613_v57  ;;  %v11922_v31 = vsub.f32 %v11364_v14, %v11613_v57 }
 0xdb8   :  { %v6255_v42 = vmul.f32 %v11916_v22, %v11916_v22 }
 0xdb9   :  { %v6308_v49 = vadd.f32 %v6307_v60, %v6245_v39  ;;  %v6249_v39 = vmul.f32 %v11880_v1, %v11880_v1  ;;  %v11910_v1 = vsub.f32 %v13790_v43, %v11613_v57  ;;  %v11928_v43 = vsub.f32 %v11397_v26, %v11613_v57 }
 0xdba   :  { %v6256_v14 = vmul.f32 %v11922_v31, %v11922_v31 }
 0xdbb   :  { %v6309_v47 = vadd.f32 %v6308_v49, %v6246_v54  ;;  %v6250_v54 = vmul.f32 %v11886_v6, %v11886_v6  ;;  %v6257_v26 = vmul.f32 %v11928_v43, %v11928_v43 }
 0xdbd   :  { %v6310_v3 = vadd.f32 %v6309_v47, %v6247_v51  ;;  %v6251_v51 = vmul.f32 %v11892_v8, %v11892_v8 }
 0xdbf   :  { %v6311_v60 = vadd.f32 %v6310_v3, %v6248_v28  ;;  %v6252_v28 = vmul.f32 %v11898_v37, %v11898_v37 }
 0xdc1   :  { %v6312_v49 = vadd.f32 %v6311_v60, %v6249_v39  ;;  %v6253_v39 = vmul.f32 %v11904_v30, %v11904_v30 }
 0xdc3   :  { %v6313_v47 = vadd.f32 %v6312_v49, %v6250_v54  ;;  %v6254_v54 = vmul.f32 %v11910_v1, %v11910_v1 }
 0xdc5   :  { %v6314_v3 = vadd.f32 %v6313_v47, %v6251_v51  ;;  %v11934_v47 = vsub.f32 %v11428_v48, %v11613_v57 }
 0xdc7   :  { %v6315_v60 = vadd.f32 %v6314_v3, %v6252_v28  ;;  %v11940_v3 = vsub.f32 %v11459_v7, %v11613_v57  ;;  %v6258_v48 = vmul.f32 %v11934_v47, %v11934_v47 }
 0xdc9   :  { %v6316_v49 = vadd.f32 %v6315_v60, %v6253_v39  ;;  %v11946_v60 = vsub.f32 %v11577_v15, %v11613_v57  ;;  %v6259_v7 = vmul.f32 %v11940_v3, %v11940_v3 }
 0xdcb   :  { %v6317_v51 = vadd.f32 %v6316_v49, %v6254_v54  ;;  %v11952_v49 = vsub.f32 %v11584_v62, %v11613_v57  ;;  %v6260_v15 = vmul.f32 %v11946_v60, %v11946_v60 }
 0xdcd   :  { %v6318_v28 = vadd.f32 %v6317_v51, %v6255_v42  ;;  %v11958_v51 = vsub.f32 %v11590_v44, %v11613_v57  ;;  %v6261_v62 = vmul.f32 %v11952_v49, %v11952_v49 }
 0xdcf   :  { %v6319_v39 = vadd.f32 %v6318_v28, %v6256_v14  ;;  %13791 = vst [vmem:[#allocation51_spill] sm:$0xff] %v11958_v51  ;;  %v11964_v28 = vsub.f32 %v11594_v59, %v11613_v57  ;;  %v6262_v44 = vmul.f32 %v11958_v51, %v11958_v51  ;;  %v6266_v51 = vmul.f32 %v11616_v4, %v11616_v4 }
 0xdd1   :  { %v6320_v54 = vadd.f32 %v6319_v39, %v6257_v26  ;;  %v11970_v39 = vsub.f32 %v11597_v58, %v11613_v57  ;;  %v6263_v59 = vmul.f32 %v11964_v28, %v11964_v28 }
 0xdd3   :  { %v6321_v42 = vadd.f32 %v6320_v54, %v6258_v48  ;;  %13792 = vst [vmem:[#allocation110_spill] sm:$0xff] %v11970_v39  ;;  %v11976_v54 = vsub.f32 %v11600_v46, %v11613_v57  ;;  %v6267_v46 = vmul.f32 %v11619_v38, %v11619_v38 }
 0xdd5   :  { %v6322_v14 = vadd.f32 %v6321_v42, %v6259_v7  ;;  %13793 = vst [vmem:[#allocation61_spill] sm:$0xff] %v11976_v54  ;;  %v6264_v42 = vmul.f32 %v11970_v39, %v11970_v39  ;;  %v6265_v58 = vmul.f32 %v11976_v54, %v11976_v54 }
 0xdd7   :  { %v6323_v26 = vadd.f32 %v6322_v14, %v6260_v15 }
 0xdd9   :  { %v6324_v48 = vadd.f32 %v6323_v26, %v6261_v62 }
 0xddb   :  { %v6325_v7 = vadd.f32 %v6324_v48, %v6262_v44  ;;  %v6268_v44 = vmul.f32 %v11622_v20, %v11622_v20 }
 0xddd   :  { %v6326_v15 = vadd.f32 %v6325_v7, %v6263_v59  ;;  %v6269_v59 = vmul.f32 %v11625_v2, %v11625_v2 }
 0xddf   :  { %v6327_v14 = vadd.f32 %v6326_v15, %v6264_v42  ;;  %v6270_v42 = vmul.f32 %v11628_v18, %v11628_v18 }
 0xde1   :  { %v6328_v62 = vadd.f32 %v6327_v14, %v6265_v58 }
 0xde3   :  { %v6329_v26 = vadd.f32 %v6328_v62, %v6266_v51 }
 0xde5   :  { %v6330_v57 = vadd.f32 %v6329_v26, %v6267_v46 }
 0xde7   :  { %v6331_v48 = vadd.f32 %v6330_v57, %v6268_v44 }
 0xde9   :  { %v6332_v7 = vadd.f32 %v6331_v48, %v6269_v59 }
 0xdeb   :  { %v6333_v15 = vadd.f32 %v6332_v7, %v6270_v42 }
 0xded   :  { %v6334_v54 = vrot.slane %v6333_v15, 4 }
 0xdef   :  { %v6335_v4 = vadd.f32 %v6334_v54, %v6333_v15 }
 0xdf1   :  { %v6336_v58 = vrot.slane %v6335_v4, 2 }
 0xdf3   :  { %v6337_v51 = vadd.f32 %v6336_v58, %v6335_v4 }
 0xdf5   :  { %v6338_v14 = vrot.slane %v6337_v51, 1 }
 0xdf7   :  { %v6339_v62 = vadd.f32 %v6338_v14, %v6337_v51 }
 0xdf9   :  { %v6340_v38 = vmul.f32 0.001953125, %v6339_v62 }
 0xdfb   :  { %v6341_v26 = vadd.f32 1e-05, %v6340_v38  ;;  %v12003_v38 = vld [vmem:[%s12822_s5] ss:$0 sm:$0xff] }
 0xdfd   :  { %6851 = vrsqrt.f32 %v6341_v26  ;;  %vm6348_vm4 = vweird.f32 %v6341_v26 }
 0xe03   :  { %v6852_v46 = vpop.eup %6851 }
 0xe04   :  { %v6343_v20 = vmul.f32 %v6852_v46, %v6341_v26  ;;  %vm6349_vm3 = vweird.f32 %v6852_v46  ;;  %v13800_v26 = vld [vmem:[#allocation103_spill] sm:$0xff] }
 0xe05   :  { %vm6350_vm5 = vmor %vm6348_vm4, %vm6349_vm3 }
 0xe06   :  { %v6344_v57 = vmul.f32 %v6852_v46, %v6343_v20 }
 0xe08   :  { %v6345_v44 = vmul.f32 0.5, %v6344_v57  ;;  %v13801_v57 = vld [vmem:[#allocation44_spill] sm:$0xff] }
 0xe0a   :  { %v6346_v39 = vsub.f32 1.5, %v6345_v44 }
 0xe0c   :  { %v6347_v2 = vmul.f32 %v6852_v46, %v6346_v39 }
 0xe0e   :  { %v11994_v48 = vsel %vm6350_vm5, %v6852_v46, %v6347_v2 }
 0xe0f   :  { %v6352_v54 = vmul.f32 %v11994_v48, %v11632_v21  ;;  %v6415_v4 = vmul.f32 %v11994_v48, %v11628_v18  ;;  %v6353_v20 = vmul.f32 %v11994_v48, %v11636_v9  ;;  %v6354_v39 = vmul.f32 %v11994_v48, %v11640_v63 }
 0xe10   :  { %v6355_v2 = vmul.f32 %v11994_v48, %v11648_v41  ;;  %v6356_v21 = vmul.f32 %v11994_v48, %v11652_v16  ;;  %v6357_v18 = vmul.f32 %v11994_v48, %v11658_v40  ;;  %v6358_v59 = vmul.f32 %v11994_v48, %v11664_v50 }
 0xe11   :  { %v12019_v7 = vmul.f32 %v11994_v48, %v11670_v52  ;;  %v12023_v9 = vmul.f32 %v11994_v48, %v11676_v25  ;;  %v12027_v63 = vmul.f32 %v11994_v48, %v11682_v29  ;;  %v12031_v41 = vmul.f32 %v11994_v48, %v11688_v10  ;;  %v12057_v10 = vld [vmem:[%s12823_s6] ss:$0 sm:$0xff] }
 0xe12   :  { %v12035_v16 = vmul.f32 %v11994_v48, %v11694_v12  ;;  %v12039_v40 = vmul.f32 %v11994_v48, %v11700_v34  ;;  %v12043_v50 = vmul.f32 %v11994_v48, %v11706_v32  ;;  %v12047_v52 = vmul.f32 %v11994_v48, %v11712_v55 }
 0xe13   :  { %v12051_v25 = vmul.f32 %v11994_v48, %v11718_v24  ;;  %v6483_v29 = vmul.f32 %v12003_v38, %v6415_v4  ;;  %v12061_v12 = vmul.f32 %v11994_v48, %v11724_v45  ;;  %v12065_v34 = vmul.f32 %v11994_v48, %v11730_v56  ;;  %v13802_v4 = vld [vmem:[#allocation108_spill] sm:$0xff] }
 0xe14   :  { %v12069_v32 = vmul.f32 %v11994_v48, %v11736_v11  ;;  %v12073_v55 = vmul.f32 %v11994_v48, %v11742_v17  ;;  %v12077_v24 = vmul.f32 %v11994_v48, %v11748_v35  ;;  %v12081_v45 = vmul.f32 %v11994_v48, %v11754_v33 }
 0xe15   :  { %v12085_v56 = vmul.f32 %v11994_v48, %v11760_v36  ;;  %v12089_v11 = vmul.f32 %v11994_v48, %v11766_v61  ;;  %v12093_v17 = vmul.f32 %v11994_v48, %v11772_v23  ;;  %v12097_v35 = vmul.f32 %v11994_v48, %v11778_v13 }
 0xe16   :  { %v12101_v33 = vmul.f32 %v11994_v48, %v11784_v19  ;;  %v12105_v36 = vmul.f32 %v11994_v48, %v11790_v5  ;;  %v12109_v61 = vmul.f32 %v11994_v48, %v11796_v27  ;;  %v12113_v23 = vmul.f32 %v11994_v48, %v11802_v53  ;;  %v13795_v19 = vld [vmem:[#allocation106_spill] sm:$0xff]  ;;  %v13796_v5 = vld [vmem:[#allocation101_spill] sm:$0xff]  ;;  %v13798_v53 = vld [vmem:[#allocation107_spill] sm:$0xff] }
 0xe17   :  { %v12117_v13 = vmul.f32 %v11994_v48, %v11808_v0  ;;  %v12120_v42 = vadd.f32 %v12057_v10, %v6483_v29  ;;  %v12124_v15 = vmul.f32 %v11994_v48, %v13795_v19  ;;  %v12128_v58 = vmul.f32 %v11994_v48, %v13796_v5  ;;  %v13797_v27 = vld [vmem:[#allocation53_spill] sm:$0xff]  ;;  %v13799_v0 = vld [vmem:[#allocation43_spill] sm:$0xff]  ;;  %v13803_v19 = vld [vmem:[#allocation56_spill] sm:$0xff] }
 0xe18   :  { %v12132_v51 = vmul.f32 %v11994_v48, %v13797_v27  ;;  %v12136_v14 = vmul.f32 %v11994_v48, %v13798_v53  ;;  %v12140_v62 = vmul.f32 %v11994_v48, %v13799_v0  ;;  %v12144_v46 = vmul.f32 %v11994_v48, %v13800_v26  ;;  %v13804_v27 = vld [vmem:[#allocation47_spill] sm:$0xff]  ;;  %v13805_v0 = vld [vmem:[#allocation109_spill] sm:$0xff] }
 0xe19   :  { %13794 = vst [vmem:[#allocation54_spill] sm:$0xff] %v12120_v42  ;;  %v12148_v44 = vmul.f32 %v11994_v48, %v13801_v57  ;;  %v12152_v29 = vmul.f32 %v11994_v48, %v13802_v4  ;;  %v12156_v5 = vmul.f32 %v11994_v48, %v13803_v19  ;;  %v12160_v53 = vmul.f32 %v11994_v48, %v13804_v27  ;;  %v13806_v42 = vld [vmem:[#allocation59_spill] sm:$0xff] }
 0xe1a   :  { %v12164_v26 = vmul.f32 %v11994_v48, %v13805_v0  ;;  %v12168_v57 = vmul.f32 %v11994_v48, %v13806_v42  ;;  %v12172_v4 = vmul.f32 %v11994_v48, %v11886_v6  ;;  %v12176_v19 = vmul.f32 %v11994_v48, %v11892_v8 }
 0xe1b   :  { %v12180_v27 = vmul.f32 %v11994_v48, %v11898_v37  ;;  %v12184_v0 = vmul.f32 %v11994_v48, %v11904_v30  ;;  %v12188_v42 = vmul.f32 %v11994_v48, %v11910_v1  ;;  %v6421_v6 = vmul.f32 %v12003_v38, %v6353_v20 }
 0xe1c   :  { %13807 = vst [vmem:[#allocation111_spill] sm:$0xff] %v12168_v57  ;;  %v6420_v57 = vmul.f32 %v12003_v38, %v6352_v54  ;;  %v12195_v8 = vmul.f32 %v11994_v48, %v11916_v22  ;;  %v12199_v37 = vmul.f32 %v11994_v48, %v11922_v31  ;;  %v12203_v30 = vmul.f32 %v11994_v48, %v11928_v43 }
 0xe1d   :  { %13808 = vst [vmem:[#allocation49_spill] sm:$0xff] %v12172_v4  ;;  %v6422_v4 = vmul.f32 %v12003_v38, %v6354_v39  ;;  %v6423_v1 = vmul.f32 %v12003_v38, %v6355_v2  ;;  %v12208_v54 = vmul.f32 %v11994_v48, %v11934_v47  ;;  %v12212_v20 = vmul.f32 %v11994_v48, %v11940_v3  ;;  %v13817_v39 = vld [vmem:[#allocation51_spill] sm:$0xff] }
 0xe1e   :  { %13809 = vst [vmem:[#allocation63_spill] sm:$0xff] %v12188_v42  ;;  %v12216_v22 = vmul.f32 %v11994_v48, %v11946_v60  ;;  %v6424_v31 = vmul.f32 %v12003_v38, %v6356_v21  ;;  %v12221_v43 = vmul.f32 %v11994_v48, %v11952_v49  ;;  %v12225_v2 = vmul.f32 %v11994_v48, %v13817_v39  ;;  %v13820_v49 = vld [vmem:[#allocation110_spill] sm:$0xff]  ;;  %v13822_v39 = vld [vmem:[#allocation61_spill] sm:$0xff] }
 0xe1f   :  { %13810 = vst [vmem:[#allocation57_spill] sm:$0xff] %v12195_v8  ;;  %v12229_v47 = vmul.f32 %v11994_v48, %v11964_v28  ;;  %v6425_v3 = vmul.f32 %v12003_v38, %v6357_v18  ;;  %v6488_v60 = vadd.f32 %v12057_v10, %v6420_v57  ;;  %v6489_v21 = vadd.f32 %v12057_v10, %v6421_v6  ;;  %v6553_v57 = vld [vmem:[%s12818_s0 + $0x8] sm:$0xff] }
 0xe20   :  { %13811 = vst [vmem:[#allocation112_spill] sm:$0xff] %v12199_v37  ;;  %v6427_v28 = vmul.f32 %v12003_v38, %v12019_v7  ;;  %v6491_v18 = vadd.f32 %v12057_v10, %v6423_v1  ;;  %v13824_v6 = vld [vmem:[#allocation100_spill] sm:$0xff]  ;;  %v6428_v1 = vmul.f32 %v12003_v38, %v12023_v9  ;;  %v6556_v9 = vld [vmem:[%s12818_s0 + $0x20] sm:$0xff]  ;;  %v13830_v37 = vld [vmem:[#allocation102_spill] sm:$0xff]  ;;  %v6432_v42 = vmul.f32 %v12003_v38, %v12039_v40 }
 0xe21   :  { %13812 = vst [vmem:[#allocation5_spill] sm:$0xff] %v12203_v30  ;;  %v6560_v40 = vld [vmem:[%s12818_s0 + $0x40] sm:$0xff] }
 0xe22   :  { %13813 = vst [vmem:[#allocation3_spill] sm:$0xff] %v12208_v54 }
 0xe23   :  { %13814 = vst [vmem:[#allocation113_spill] sm:$0xff] %v12212_v20  ;;  %v6426_v20 = vmul.f32 %v12003_v38, %v6358_v59  ;;  %v6552_v59 = vld [vmem:[%s12818_s0] sm:$0xff] }
 0xe24   :  { %13815 = vst [vmem:[#allocation6_spill] sm:$0xff] %v12216_v22  ;;  %v6490_v22 = vadd.f32 %v12057_v10, %v6422_v4  ;;  %v6554_v4 = vld [vmem:[%s12818_s0 + $0x10] sm:$0xff] }
 0xe25   :  { %13816 = vst [vmem:[#allocation4_spill] sm:$0xff] %v12221_v43  ;;  %v12238_v43 = vmul.f32 %v11994_v48, %v13820_v49  ;;  %v12258_v49 = vmul.f32 %v11994_v48, %v13824_v6  ;;  %v6429_v6 = vmul.f32 %v12003_v38, %v12027_v63  ;;  %v12288_v63 = vmul.f32 %v11994_v48, %v13830_v37 }
 0xe26   :  { %13818 = vst [vmem:[#allocation114_spill] sm:$0xff] %v12225_v2  ;;  %v12242_v2 = vmul.f32 %v11994_v48, %v13822_v39  ;;  %v13826_v39 = vld [vmem:[#allocation105_spill] sm:$0xff]  ;;  %v6618_v30 = vadd.f32 %v6554_v4, %v6490_v22  ;;  %v6433_v22 = vmul.f32 %v12003_v38, %v12043_v50  ;;  %v6434_v37 = vmul.f32 %v12003_v38, %v12047_v52  ;;  %v6561_v50 = vld [vmem:[%s12818_s0 + $0x48] sm:$0xff] }
 0xe27   :  { %13819 = vst [vmem:[#allocation7_spill] sm:$0xff] %v12229_v47  ;;  %v12262_v7 = vmul.f32 %v11994_v48, %v13826_v39  ;;  %v13828_v47 = vld [vmem:[#allocation99_spill] sm:$0xff]  ;;  %v6430_v39 = vmul.f32 %v12003_v38, %v12031_v41  ;;  %v6431_v41 = vmul.f32 %v12003_v38, %v12035_v16  ;;  %v6435_v52 = vmul.f32 %v12003_v38, %v12051_v25 }
 0xe28   :  { %13821 = vst [vmem:[#allocation8_spill] sm:$0xff] %v12238_v43  ;;  %v6555_v43 = vld [vmem:[%s12818_s0 + $0x18] sm:$0xff]  ;;  %v12272_v54 = vmul.f32 %v11994_v48, %v13828_v47  ;;  %v6616_v47 = vadd.f32 %v6552_v59, %v6488_v60  ;;  %v6496_v60 = vadd.f32 %v12057_v10, %v6428_v1  ;;  %v6562_v1 = vld [vmem:[%s12818_s0 + $0x50] sm:$0xff]  ;;  %v6437_v25 = vmul.f32 %v12003_v38, %v12065_v34  ;;  %v6565_v34 = vld [vmem:[%s12818_s0 + $0x68] sm:$0xff] }
 0xe29   :  { %13823 = vst [vmem:[#allocation115_spill] sm:$0xff] %v12242_v2  ;;  %v6492_v2 = vadd.f32 %v12057_v10, %v6424_v31  ;;  %v6494_v31 = vadd.f32 %v12057_v10, %v6426_v20  ;;  %v6558_v20 = vld [vmem:[%s12818_s0 + $0x30] sm:$0xff]  ;;  %v6619_v8 = vadd.f32 %v6555_v43, %v6491_v18  ;;  %v6559_v48 = vld [vmem:[%s12818_s0 + $0x38] sm:$0xff]  ;;  %v6498_v43 = vadd.f32 %v12057_v10, %v6430_v39 }
 0xe2a   :  { %13825 = vst [vmem:[#allocation55_spill] sm:$0xff] %v12258_v49  ;;  %v6557_v49 = vld [vmem:[%s12818_s0 + $0x28] sm:$0xff]  ;;  %v6680_v59 = vmax.f32 %v6616_v47, 0.0  ;;  %v6499_v4 = vadd.f32 %v12057_v10, %v6431_v41  ;;  %v6438_v47 = vmul.f32 %v12003_v38, %v12069_v32  ;;  %v6502_v41 = vadd.f32 %v12057_v10, %v6434_v37  ;;  %v6566_v32 = vld [vmem:[%s12818_s0 + $0x70] sm:$0xff] }
 0xe2b   :  { %13827 = vst [vmem:[#allocation9_spill] sm:$0xff] %v12262_v7  ;;  %v6493_v7 = vadd.f32 %v12057_v10, %v6425_v3  ;;  %v6495_v3 = vadd.f32 %v12057_v10, %v6427_v28  ;;  %v6620_v16 = vadd.f32 %v6556_v9, %v6492_v2  ;;  %v6622_v18 = vadd.f32 %v6558_v20, %v6494_v31 }
 0xe2c   :  { %13829 = vst [vmem:[#allocation10_spill] sm:$0xff] %v12272_v54  ;;  %v6617_v54 = vadd.f32 %v6553_v57, %v6489_v21  ;;  %v6497_v21 = vadd.f32 %v12057_v10, %v6429_v6  ;;  %v6682_v2 = vmax.f32 %v6618_v30, 0.0  ;;  %v6683_v39 = vmax.f32 %v6619_v8, 0.0  ;;  %v6563_v30 = vld [vmem:[%s12818_s0 + $0x58] sm:$0xff] }
 0xe2d   :  { %v6621_v28 = vadd.f32 %v6557_v49, %v6493_v7  ;;  %v6623_v6 = vadd.f32 %v6559_v48, %v6495_v3  ;;  %v6436_v49 = vmul.f32 %v12003_v38, %v12061_v12  ;;  %v6500_v7 = vadd.f32 %v12057_v10, %v6432_v42  ;;  %6744 = vst [vmem:[%s12824_s7] sm:$0xff] %v6680_v59  ;;  %v6564_v12 = vld [vmem:[%s12818_s0 + $0x60] sm:$0xff] }
 0xe2e   :  { %v6681_v57 = vmax.f32 %v6617_v54, 0.0  ;;  %v6624_v54 = vadd.f32 %v6560_v40, %v6496_v60  ;;  %v6684_v9 = vmax.f32 %v6620_v16, 0.0  ;;  %v6501_v8 = vadd.f32 %v12057_v10, %v6433_v22  ;;  %6746 = vst [vmem:[%s12824_s7 + $0x10] sm:$0xff] %v6682_v2 }
 0xe2f   :  { %v6625_v42 = vadd.f32 %v6561_v50, %v6497_v21  ;;  %v6685_v31 = vmax.f32 %v6621_v28, 0.0  ;;  %v6626_v3 = vadd.f32 %v6562_v1, %v6498_v43  ;;  %v6686_v20 = vmax.f32 %v6622_v18, 0.0  ;;  %6747 = vst [vmem:[%s12824_s7 + $0x18] sm:$0xff] %v6683_v39 }
 0xe30   :  { %6745 = vst [vmem:[%s12824_s7 + $0x8] sm:$0xff] %v6681_v57  ;;  %v6439_v22 = vmul.f32 %v12003_v38, %v12073_v55  ;;  %v6503_v60 = vadd.f32 %v12057_v10, %v6435_v52  ;;  %v6627_v48 = vadd.f32 %v6563_v30, %v6499_v4  ;;  %v6687_v16 = vmax.f32 %v6623_v6, 0.0  ;;  %v6567_v55 = vld [vmem:[%s12818_s0 + $0x78] sm:$0xff] }
 0xe31   :  { %v6440_v37 = vmul.f32 %v12003_v38, %v12077_v24  ;;  %v6504_v21 = vadd.f32 %v12057_v10, %v6436_v49  ;;  %v6628_v43 = vadd.f32 %v6564_v12, %v6500_v7  ;;  %v6688_v40 = vmax.f32 %v6624_v54, 0.0  ;;  %6748 = vst [vmem:[%s12824_s7 + $0x20] sm:$0xff] %v6684_v9  ;;  %v6568_v24 = vld [vmem:[%s12818_s0 + $0x80] sm:$0xff] }
 0xe32   :  { %v6441_v28 = vmul.f32 %v12003_v38, %v12081_v45  ;;  %v6505_v50 = vadd.f32 %v12057_v10, %v6437_v25  ;;  %v6629_v18 = vadd.f32 %v6565_v34, %v6501_v8  ;;  %v6689_v59 = vmax.f32 %v6625_v42, 0.0  ;;  %6749 = vst [vmem:[%s12824_s7 + $0x28] sm:$0xff] %v6685_v31  ;;  %v6569_v45 = vld [vmem:[%s12818_s0 + $0x88] sm:$0xff] }
 0xe33   :  { %v6442_v57 = vmul.f32 %v12003_v38, %v12085_v56  ;;  %v6506_v2 = vadd.f32 %v12057_v10, %v6438_v47  ;;  %v6630_v52 = vadd.f32 %v6566_v32, %v6502_v41  ;;  %v6690_v4 = vmax.f32 %v6626_v3, 0.0  ;;  %6750 = vst [vmem:[%s12824_s7 + $0x30] sm:$0xff] %v6686_v20  ;;  %v6570_v56 = vld [vmem:[%s12818_s0 + $0x90] sm:$0xff] }
 0xe34   :  { %v6443_v1 = vmul.f32 %v12003_v38, %v12089_v11  ;;  %v6507_v6 = vadd.f32 %v12057_v10, %v6439_v22  ;;  %v6631_v39 = vadd.f32 %v6567_v55, %v6503_v60  ;;  %v6691_v49 = vmax.f32 %v6627_v48, 0.0  ;;  %6751 = vst [vmem:[%s12824_s7 + $0x38] sm:$0xff] %v6687_v16  ;;  %v6571_v11 = vld [vmem:[%s12818_s0 + $0x98] sm:$0xff] }
 0xe35   :  { %v6444_v7 = vmul.f32 %v12003_v38, %v12093_v17  ;;  %v6508_v30 = vadd.f32 %v12057_v10, %v6440_v37  ;;  %v6632_v54 = vadd.f32 %v6568_v24, %v6504_v21  ;;  %v6692_v9 = vmax.f32 %v6628_v43, 0.0  ;;  %6752 = vst [vmem:[%s12824_s7 + $0x40] sm:$0xff] %v6688_v40  ;;  %v6572_v17 = vld [vmem:[%s12818_s0 + $0xa0] sm:$0xff] }
 0xe36   :  { %v6445_v25 = vmul.f32 %v12003_v38, %v12097_v35  ;;  %v6509_v8 = vadd.f32 %v12057_v10, %v6441_v28  ;;  %v6633_v12 = vadd.f32 %v6569_v45, %v6505_v50  ;;  %v6693_v42 = vmax.f32 %v6629_v18, 0.0  ;;  %6753 = vst [vmem:[%s12824_s7 + $0x48] sm:$0xff] %v6689_v59  ;;  %v6573_v35 = vld [vmem:[%s12818_s0 + $0xa8] sm:$0xff] }
 0xe37   :  { %v6446_v31 = vmul.f32 %v12003_v38, %v12101_v33  ;;  %v6510_v47 = vadd.f32 %v12057_v10, %v6442_v57  ;;  %v6634_v41 = vadd.f32 %v6570_v56, %v6506_v2  ;;  %v6694_v34 = vmax.f32 %v6630_v52, 0.0  ;;  %6754 = vst [vmem:[%s12824_s7 + $0x50] sm:$0xff] %v6690_v4  ;;  %v6574_v33 = vld [vmem:[%s12818_s0 + $0xb0] sm:$0xff] }
 0xe38   :  { %v6447_v3 = vmul.f32 %v12003_v38, %v12105_v36  ;;  %v6511_v20 = vadd.f32 %v12057_v10, %v6443_v1  ;;  %v6635_v22 = vadd.f32 %v6571_v11, %v6507_v6  ;;  %v6695_v60 = vmax.f32 %v6631_v39, 0.0  ;;  %6755 = vst [vmem:[%s12824_s7 + $0x58] sm:$0xff] %v6691_v49  ;;  %v6575_v36 = vld [vmem:[%s12818_s0 + $0xb8] sm:$0xff] }
 0xe39   :  { %v6448_v32 = vmul.f32 %v12003_v38, %v12109_v61  ;;  %v6512_v48 = vadd.f32 %v12057_v10, %v6444_v7  ;;  %v6636_v16 = vadd.f32 %v6572_v17, %v6508_v30  ;;  %v6696_v37 = vmax.f32 %v6632_v54, 0.0  ;;  %6756 = vst [vmem:[%s12824_s7 + $0x60] sm:$0xff] %v6692_v9  ;;  %v6576_v61 = vld [vmem:[%s12818_s0 + $0xc0] sm:$0xff] }
 0xe3a   :  { %v6449_v21 = vmul.f32 %v12003_v38, %v12113_v23  ;;  %v6513_v55 = vadd.f32 %v12057_v10, %v6445_v25  ;;  %v6637_v43 = vadd.f32 %v6573_v35, %v6509_v8  ;;  %v6697_v40 = vmax.f32 %v6633_v12, 0.0  ;;  %6757 = vst [vmem:[%s12824_s7 + $0x68] sm:$0xff] %v6693_v42  ;;  %v6577_v23 = vld [vmem:[%s12818_s0 + $0xc8] sm:$0xff] }
 0xe3b   :  { %v6450_v28 = vmul.f32 %v12003_v38, %v12117_v13  ;;  %v6514_v50 = vadd.f32 %v12057_v10, %v6446_v31  ;;  %v6638_v24 = vadd.f32 %v6574_v33, %v6510_v47  ;;  %v6698_v18 = vmax.f32 %v6634_v41, 0.0  ;;  %6758 = vst [vmem:[%s12824_s7 + $0x70] sm:$0xff] %v6694_v34  ;;  %v6578_v13 = vld [vmem:[%s12818_s0 + $0xd0] sm:$0xff] }
 0xe3c   :  { %v6451_v59 = vmul.f32 %v12003_v38, %v12124_v15  ;;  %v6515_v57 = vadd.f32 %v12057_v10, %v6447_v3  ;;  %v6639_v2 = vadd.f32 %v6575_v36, %v6511_v20  ;;  %v6699_v45 = vmax.f32 %v6635_v22, 0.0  ;;  %6759 = vst [vmem:[%s12824_s7 + $0x78] sm:$0xff] %v6695_v60  ;;  %v6579_v15 = vld [vmem:[%s12818_s0 + $0xd8] sm:$0xff] }
 0xe3d   :  { %v6452_v52 = vmul.f32 %v12003_v38, %v12128_v58  ;;  %v6516_v4 = vadd.f32 %v12057_v10, %v6448_v32  ;;  %v6640_v1 = vadd.f32 %v6576_v61, %v6512_v48  ;;  %v6700_v6 = vmax.f32 %v6636_v16, 0.0  ;;  %6760 = vst [vmem:[%s12824_s7 + $0x80] sm:$0xff] %v6696_v37  ;;  %v6580_v58 = vld [vmem:[%s12818_s0 + $0xe0] sm:$0xff] }
 0xe3e   :  { %v6453_v56 = vmul.f32 %v12003_v38, %v12132_v51  ;;  %v6517_v39 = vadd.f32 %v12057_v10, %v6449_v21  ;;  %v6641_v49 = vadd.f32 %v6577_v23, %v6513_v55  ;;  %v6701_v7 = vmax.f32 %v6637_v43, 0.0  ;;  %6761 = vst [vmem:[%s12824_s7 + $0x88] sm:$0xff] %v6697_v40  ;;  %v6581_v51 = vld [vmem:[%s12818_s0 + $0xe8] sm:$0xff] }
 0xe3f   :  { %v6454_v30 = vmul.f32 %v12003_v38, %v12136_v14  ;;  %v6518_v11 = vadd.f32 %v12057_v10, %v6450_v28  ;;  %v6642_v54 = vadd.f32 %v6578_v13, %v6514_v50  ;;  %v6702_v9 = vmax.f32 %v6638_v24, 0.0  ;;  %6762 = vst [vmem:[%s12824_s7 + $0x90] sm:$0xff] %v6698_v18  ;;  %v6582_v14 = vld [vmem:[%s12818_s0 + $0xf0] sm:$0xff]  ;;  %v13831_v24 = vld [vmem:[#allocation111_spill] sm:$0xff] }
 0xe40   :  { %v6455_v25 = vmul.f32 %v12003_v38, %v12140_v62  ;;  %v6519_v8 = vadd.f32 %v12057_v10, %v6451_v59  ;;  %v6643_v17 = vadd.f32 %v6579_v15, %v6515_v57  ;;  %v6703_v12 = vmax.f32 %v6639_v2, 0.0  ;;  %6763 = vst [vmem:[%s12824_s7 + $0x98] sm:$0xff] %v6699_v45  ;;  %v6583_v62 = vld [vmem:[%s12818_s0 + $0xf8] sm:$0xff]  ;;  %v13832_v2 = vld [vmem:[#allocation49_spill] sm:$0xff] }
 0xe41   :  { %v6456_v42 = vmul.f32 %v12003_v38, %v12144_v46  ;;  %v6520_v31 = vadd.f32 %v12057_v10, %v6452_v52  ;;  %v6644_v47 = vadd.f32 %v6580_v58, %v6516_v4  ;;  %v6704_v35 = vmax.f32 %v6640_v1, 0.0  ;;  %6764 = vst [vmem:[%s12824_s7 + $0xa0] sm:$0xff] %v6700_v6  ;;  %v6584_v46 = vld [vmem:[%s12818_s0 + $0x100] sm:$0xff]  ;;  %v6590_v4 = vld [vmem:[%s12818_s0 + $0x130] sm:$0xff] }
 0xe42   :  { %v6457_v41 = vmul.f32 %v12003_v38, %v12148_v44  ;;  %v6521_v34 = vadd.f32 %v12057_v10, %v6453_v56  ;;  %v6645_v3 = vadd.f32 %v6581_v51, %v6517_v39  ;;  %v6705_v20 = vmax.f32 %v6641_v49, 0.0  ;;  %6765 = vst [vmem:[%s12824_s7 + $0xa8] sm:$0xff] %v6701_v7  ;;  %v6585_v44 = vld [vmem:[%s12818_s0 + $0x108] sm:$0xff]  ;;  %v6591_v39 = vld [vmem:[%s12818_s0 + $0x138] sm:$0xff] }
 0xe43   :  { %v6458_v33 = vmul.f32 %v12003_v38, %v12152_v29  ;;  %v6522_v22 = vadd.f32 %v12057_v10, %v6454_v30  ;;  %v6646_v60 = vadd.f32 %v6582_v14, %v6518_v11  ;;  %v6706_v32 = vmax.f32 %v6642_v54, 0.0  ;;  %6766 = vst [vmem:[%s12824_s7 + $0xb0] sm:$0xff] %v6702_v9  ;;  %v6586_v29 = vld [vmem:[%s12818_s0 + $0x110] sm:$0xff]  ;;  %v13833_v14 = vld [vmem:[#allocation63_spill] sm:$0xff] }
 0xe44   :  { %v6459_v48 = vmul.f32 %v12003_v38, %v12156_v5  ;;  %v6523_v36 = vadd.f32 %v12057_v10, %v6455_v25  ;;  %v6647_v16 = vadd.f32 %v6583_v62, %v6519_v8  ;;  %v6707_v37 = vmax.f32 %v6643_v17, 0.0  ;;  %6767 = vst [vmem:[%s12824_s7 + $0xb8] sm:$0xff] %v6703_v12  ;;  %v6587_v5 = vld [vmem:[%s12818_s0 + $0x118] sm:$0xff]  ;;  %v13834_v62 = vld [vmem:[#allocation57_spill] sm:$0xff] }
 0xe45   :  { %v6460_v21 = vmul.f32 %v12003_v38, %v12160_v53  ;;  %v6524_v55 = vadd.f32 %v12057_v10, %v6456_v42  ;;  %v6648_v61 = vadd.f32 %v6584_v46, %v6520_v31  ;;  %v6708_v43 = vmax.f32 %v6644_v47, 0.0  ;;  %6768 = vst [vmem:[%s12824_s7 + $0xc0] sm:$0xff] %v6704_v35  ;;  %v6588_v53 = vld [vmem:[%s12818_s0 + $0x120] sm:$0xff] }
 0xe46   :  { %v6461_v40 = vmul.f32 %v12003_v38, %v12164_v26  ;;  %v6525_v28 = vadd.f32 %v12057_v10, %v6457_v41  ;;  %v6649_v50 = vadd.f32 %v6585_v44, %v6521_v34  ;;  %v6709_v23 = vmax.f32 %v6645_v3, 0.0  ;;  %6769 = vst [vmem:[%s12824_s7 + $0xc8] sm:$0xff] %v6705_v20  ;;  %v6589_v26 = vld [vmem:[%s12818_s0 + $0x128] sm:$0xff]  ;;  %v6595_v41 = vld [vmem:[%s12818_s0 + $0x158] sm:$0xff] }
 0xe47   :  { %v6462_v18 = vmul.f32 %v12003_v38, %v13831_v24  ;;  %v6526_v59 = vadd.f32 %v12057_v10, %v6458_v33  ;;  %v6650_v57 = vadd.f32 %v6586_v29, %v6522_v22  ;;  %v6710_v13 = vmax.f32 %v6646_v60, 0.0  ;;  %6770 = vst [vmem:[%s12824_s7 + $0xd0] sm:$0xff] %v6706_v32  ;;  %v13835_v3 = vld [vmem:[#allocation112_spill] sm:$0xff]  ;;  %v6596_v22 = vld [vmem:[%s12818_s0 + $0x160] sm:$0xff]  ;;  %v13836_v32 = vld [vmem:[#allocation5_spill] sm:$0xff] }
 0xe48   :  { %v6463_v45 = vmul.f32 %v12003_v38, %v13832_v2  ;;  %v6527_v52 = vadd.f32 %v12057_v10, %v6459_v48  ;;  %v6651_v15 = vadd.f32 %v6587_v5, %v6523_v36  ;;  %v6711_v1 = vmax.f32 %v6647_v16, 0.0  ;;  %6771 = vst [vmem:[%s12824_s7 + $0xd8] sm:$0xff] %v6707_v37  ;;  %v6597_v29 = vld [vmem:[%s12818_s0 + $0x168] sm:$0xff] }
 0xe49   :  { %v6464_v6 = vmul.f32 %v12003_v38, %v12176_v19  ;;  %v6528_v56 = vadd.f32 %v12057_v10, %v6460_v21  ;;  %v6652_v58 = vadd.f32 %v6588_v53, %v6524_v55  ;;  %v6712_v49 = vmax.f32 %v6648_v61, 0.0  ;;  %6772 = vst [vmem:[%s12824_s7 + $0xe0] sm:$0xff] %v6708_v43  ;;  %v6592_v19 = vld [vmem:[%s12818_s0 + $0x140] sm:$0xff]  ;;  %v6598_v61 = vld [vmem:[%s12818_s0 + $0x170] sm:$0xff] }
 0xe4a   :  { %v6465_v7 = vmul.f32 %v12003_v38, %v12180_v27  ;;  %v6529_v30 = vadd.f32 %v12057_v10, %v6461_v40  ;;  %v6653_v11 = vadd.f32 %v6589_v26, %v6525_v28  ;;  %v6713_v51 = vmax.f32 %v6649_v50, 0.0  ;;  %6773 = vst [vmem:[%s12824_s7 + $0xe8] sm:$0xff] %v6709_v23  ;;  %v6593_v27 = vld [vmem:[%s12818_s0 + $0x148] sm:$0xff]  ;;  %v13837_v21 = vld [vmem:[#allocation3_spill] sm:$0xff]  ;;  %v13838_v28 = vld [vmem:[#allocation113_spill] sm:$0xff] }
 0xe4b   :  { %v6466_v54 = vmul.f32 %v12003_v38, %v12184_v0  ;;  %v6530_v9 = vadd.f32 %v12057_v10, %v6462_v18  ;;  %v6654_v25 = vadd.f32 %v6590_v4, %v6526_v59  ;;  %v6714_v8 = vmax.f32 %v6650_v57, 0.0  ;;  %6774 = vst [vmem:[%s12824_s7 + $0xf0] sm:$0xff] %v6710_v13  ;;  %v6594_v0 = vld [vmem:[%s12818_s0 + $0x150] sm:$0xff]  ;;  %v6599_v23 = vld [vmem:[%s12818_s0 + $0x178] sm:$0xff]  ;;  %v6600_v13 = vld [vmem:[%s12818_s0 + $0x180] sm:$0xff] }
 0xe4c   :  { %v6467_v17 = vmul.f32 %v12003_v38, %v13833_v14  ;;  %v6531_v12 = vadd.f32 %v12057_v10, %v6463_v45  ;;  %v6655_v42 = vadd.f32 %v6591_v39, %v6527_v52  ;;  %v6715_v31 = vmax.f32 %v6651_v15, 0.0  ;;  %6775 = vst [vmem:[%s12824_s7 + $0xf8] sm:$0xff] %v6711_v1  ;;  %v13839_v59 = vld [vmem:[#allocation6_spill] sm:$0xff]  ;;  %v13840_v52 = vld [vmem:[#allocation4_spill] sm:$0xff] }
 0xe4d   :  { %v6468_v47 = vmul.f32 %v12003_v38, %v13834_v62  ;;  %v6532_v35 = vadd.f32 %v12057_v10, %v6464_v6  ;;  %v6656_v34 = vadd.f32 %v6592_v19, %v6528_v56  ;;  %v6716_v46 = vmax.f32 %v6652_v58, 0.0  ;;  %6776 = vst [vmem:[%s12824_s7 + $0x100] sm:$0xff] %v6712_v49  ;;  %v6601_v1 = vld [vmem:[%s12818_s0 + $0x188] sm:$0xff]  ;;  %v13841_v39 = vld [vmem:[#allocation114_spill] sm:$0xff] }
 0xe4e   :  { %v6469_v20 = vmul.f32 %v12003_v38, %v13835_v3  ;;  %v6533_v33 = vadd.f32 %v12057_v10, %v6465_v7  ;;  %v6657_v44 = vadd.f32 %v6593_v27, %v6529_v30  ;;  %v6717_v60 = vmax.f32 %v6653_v11, 0.0  ;;  %6777 = vst [vmem:[%s12824_s7 + $0x108] sm:$0xff] %v6713_v51  ;;  %v6602_v7 = vld [vmem:[%s12818_s0 + $0x190] sm:$0xff]  ;;  %v13842_v11 = vld [vmem:[#allocation7_spill] sm:$0xff] }
 0xe4f   :  { %v6470_v48 = vmul.f32 %v12003_v38, %v13836_v32  ;;  %v6534_v36 = vadd.f32 %v12057_v10, %v6466_v54  ;;  %v6658_v16 = vadd.f32 %v6594_v0, %v6530_v9  ;;  %v6718_v37 = vmax.f32 %v6654_v25, 0.0  ;;  %6778 = vst [vmem:[%s12824_s7 + $0x110] sm:$0xff] %v6714_v8  ;;  %v6603_v9 = vld [vmem:[%s12818_s0 + $0x198] sm:$0xff]  ;;  %v13843_v8 = vld [vmem:[#allocation8_spill] sm:$0xff] }
 0xe50   :  { %v6471_v55 = vmul.f32 %v12003_v38, %v13837_v21  ;;  %v6535_v5 = vadd.f32 %v12057_v10, %v6467_v17  ;;  %v6659_v43 = vadd.f32 %v6595_v41, %v6531_v12  ;;  %v6719_v40 = vmax.f32 %v6655_v42, 0.0  ;;  %6779 = vst [vmem:[%s12824_s7 + $0x118] sm:$0xff] %v6715_v31  ;;  %v6604_v12 = vld [vmem:[%s12818_s0 + $0x1a0] sm:$0xff] }
 0xe51   :  { %v6472_v53 = vmul.f32 %v12003_v38, %v13838_v28  ;;  %v6536_v50 = vadd.f32 %v12057_v10, %v6468_v47  ;;  %v6660_v24 = vadd.f32 %v6596_v22, %v6532_v35  ;;  %v6720_v18 = vmax.f32 %v6656_v34, 0.0  ;;  %6780 = vst [vmem:[%s12824_s7 + $0x120] sm:$0xff] %v6716_v46  ;;  %v13844_v31 = vld [vmem:[#allocation115_spill] sm:$0xff]  ;;  %v6605_v35 = vld [vmem:[%s12818_s0 + $0x1a8] sm:$0xff] }
 0xe52   :  { %v6473_v26 = vmul.f32 %v12003_v38, %v13839_v59  ;;  %v6537_v57 = vadd.f32 %v12057_v10, %v6469_v20  ;;  %v6661_v2 = vadd.f32 %v6597_v29, %v6533_v33  ;;  %v6721_v45 = vmax.f32 %v6657_v44, 0.0  ;;  %6781 = vst [vmem:[%s12824_s7 + $0x128] sm:$0xff] %v6717_v60  ;;  %v13845_v46 = vld [vmem:[#allocation55_spill] sm:$0xff]  ;;  %v6606_v33 = vld [vmem:[%s12818_s0 + $0x1b0] sm:$0xff] }
 0xe53   :  { %v6474_v4 = vmul.f32 %v12003_v38, %v13840_v52  ;;  %v6538_v15 = vadd.f32 %v12057_v10, %v6470_v48  ;;  %v6662_v6 = vadd.f32 %v6598_v61, %v6534_v36  ;;  %v6722_v56 = vmax.f32 %v6658_v16, 0.0  ;;  %6782 = vst [vmem:[%s12824_s7 + $0x130] sm:$0xff] %v6718_v37  ;;  %v13846_v60 = vld [vmem:[#allocation9_spill] sm:$0xff]  ;;  %v6607_v36 = vld [vmem:[%s12818_s0 + $0x1b8] sm:$0xff] }
 0xe54   :  { %v6475_v58 = vmul.f32 %v12003_v38, %v13841_v39  ;;  %v6539_v49 = vadd.f32 %v12057_v10, %v6471_v55  ;;  %v6663_v30 = vadd.f32 %v6599_v23, %v6535_v5  ;;  %v6723_v19 = vmax.f32 %v6659_v43, 0.0  ;;  %6783 = vst [vmem:[%s12824_s7 + $0x138] sm:$0xff] %v6719_v40  ;;  %v13847_v37 = vld [vmem:[#allocation10_spill] sm:$0xff]  ;;  %v6608_v5 = vld [vmem:[%s12818_s0 + $0x1c0] sm:$0xff]  ;;  %v6614_v39 = vld [vmem:[%s12818_s0 + $0x1f0] sm:$0xff] }
 0xe55   :  { %v6476_v51 = vmul.f32 %v12003_v38, %v13842_v11  ;;  %v6540_v54 = vadd.f32 %v12057_v10, %v6472_v53  ;;  %v6664_v27 = vadd.f32 %v6600_v13, %v6536_v50  ;;  %v6724_v25 = vmax.f32 %v6660_v24, 0.0  ;;  %6784 = vst [vmem:[%s12824_s7 + $0x140] sm:$0xff] %v6720_v18  ;;  %v6609_v53 = vld [vmem:[%s12818_s0 + $0x1c8] sm:$0xff]  ;;  %v6610_v18 = vld [vmem:[%s12818_s0 + $0x1d0] sm:$0xff] }
 0xe56   :  { %v6477_v14 = vmul.f32 %v12003_v38, %v13843_v8  ;;  %v6541_v17 = vadd.f32 %v12057_v10, %v6473_v26  ;;  %v6665_v0 = vadd.f32 %v6601_v1, %v6537_v57  ;;  %v6725_v42 = vmax.f32 %v6661_v2, 0.0  ;;  %6785 = vst [vmem:[%s12824_s7 + $0x148] sm:$0xff] %v6721_v45  ;;  %v6611_v26 = vld [vmem:[%s12818_s0 + $0x1d8] sm:$0xff]  ;;  %v6612_v45 = vld [vmem:[%s12818_s0 + $0x1e0] sm:$0xff]  ;;  %v6613_v1 = vld [vmem:[%s12818_s0 + $0x1e8] sm:$0xff] }
 0xe57   :  { %v6478_v62 = vmul.f32 %v12003_v38, %v13844_v31  ;;  %v6542_v47 = vadd.f32 %v12057_v10, %v6474_v4  ;;  %v6666_v41 = vadd.f32 %v6602_v7, %v6538_v15  ;;  %v6726_v34 = vmax.f32 %v6662_v6, 0.0  ;;  %6786 = vst [vmem:[%s12824_s7 + $0x150] sm:$0xff] %v6722_v56 }
 0xe58   :  { %v6479_v3 = vmul.f32 %v12003_v38, %v13845_v46  ;;  %v6543_v20 = vadd.f32 %v12057_v10, %v6475_v58  ;;  %v6667_v22 = vadd.f32 %v6603_v9, %v6539_v49  ;;  %v6727_v44 = vmax.f32 %v6663_v30, 0.0  ;;  %6787 = vst [vmem:[%s12824_s7 + $0x158] sm:$0xff] %v6723_v19  ;;  %v13848_v9 = vld [vmem:[#allocation54_spill] sm:$0xff] }
 0xe59   :  { %v6480_v32 = vmul.f32 %v12003_v38, %v13846_v60  ;;  %v6544_v48 = vadd.f32 %v12057_v10, %v6476_v51  ;;  %v6668_v29 = vadd.f32 %v6604_v12, %v6540_v54  ;;  %v6728_v16 = vmax.f32 %v6664_v27, 0.0  ;;  %6788 = vst [vmem:[%s12824_s7 + $0x160] sm:$0xff] %v6724_v25 }
 0xe5a   :  { %v6481_v21 = vmul.f32 %v12003_v38, %v13847_v37  ;;  %v6545_v55 = vadd.f32 %v12057_v10, %v6477_v14  ;;  %v6669_v61 = vadd.f32 %v6605_v35, %v6541_v17  ;;  %v6729_v43 = vmax.f32 %v6665_v0, 0.0  ;;  %6789 = vst [vmem:[%s12824_s7 + $0x168] sm:$0xff] %v6725_v42 }
 0xe5b   :  { %v6482_v40 = vmul.f32 %v12003_v38, %v12288_v63  ;;  %v6546_v28 = vadd.f32 %v12057_v10, %v6478_v62  ;;  %v6670_v50 = vadd.f32 %v6606_v33, %v6542_v47  ;;  %v6730_v23 = vmax.f32 %v6666_v41, 0.0  ;;  %6790 = vst [vmem:[%s12824_s7 + $0x170] sm:$0xff] %v6726_v34 }
 0xe5c   :  { %v6547_v24 = vadd.f32 %v12057_v10, %v6479_v3  ;;  %v6671_v59 = vadd.f32 %v6607_v36, %v6543_v20  ;;  %v6731_v38 = vmax.f32 %v6667_v22, 0.0  ;;  %6791 = vst [vmem:[%s12824_s7 + $0x178] sm:$0xff] %v6727_v44  ;;  %v6548_v63 = vadd.f32 %v12057_v10, %v6480_v32 }
 0xe5d   :  { %v6672_v57 = vadd.f32 %v6608_v5, %v6544_v48  ;;  %v6732_v13 = vmax.f32 %v6668_v29, 0.0  ;;  %6792 = vst [vmem:[%s12824_s7 + $0x180] sm:$0xff] %v6728_v16  ;;  %v6549_v2 = vadd.f32 %v12057_v10, %v6481_v21  ;;  %v6673_v52 = vadd.f32 %v6609_v53, %v6545_v55 }
 0xe5e   :  { %v6733_v4 = vmax.f32 %v6669_v61, 0.0  ;;  %6793 = vst [vmem:[%s12824_s7 + $0x188] sm:$0xff] %v6729_v43  ;;  %v6550_v15 = vadd.f32 %v12057_v10, %v6482_v40  ;;  %v6674_v6 = vadd.f32 %v6610_v18, %v6546_v28  ;;  %v6734_v56 = vmax.f32 %v6670_v50, 0.0  ;;  %v6615_v10 = vld [vmem:[%s12818_s0 + $0x1f8] sm:$0xff] }
 0xe5f   :  { %6794 = vst [vmem:[%s12824_s7 + $0x190] sm:$0xff] %v6730_v23  ;;  %v6675_v58 = vadd.f32 %v6611_v26, %v6547_v24  ;;  %v6735_v49 = vmax.f32 %v6671_v59, 0.0  ;;  %v6676_v7 = vadd.f32 %v6612_v45, %v6548_v63  ;;  %v6736_v30 = vmax.f32 %v6672_v57, 0.0 }
 0xe60   :  { %6795 = vst [vmem:[%s12824_s7 + $0x198] sm:$0xff] %v6731_v38  ;;  %v6677_v19 = vadd.f32 %v6613_v1, %v6549_v2  ;;  %v6737_v11 = vmax.f32 %v6673_v52, 0.0  ;;  %v6678_v51 = vadd.f32 %v6614_v39, %v6550_v15  ;;  %v6738_v54 = vmax.f32 %v6674_v6, 0.0 }
 0xe61   :  { %6796 = vst [vmem:[%s12824_s7 + $0x1a0] sm:$0xff] %v6732_v13  ;;  %v6679_v27 = vadd.f32 %v6615_v10, %v13848_v9  ;;  %v6739_v25 = vmax.f32 %v6675_v58, 0.0  ;;  %v6740_v8 = vmax.f32 %v6676_v7, 0.0 }
 0xe62   :  { %6797 = vst [vmem:[%s12824_s7 + $0x1a8] sm:$0xff] %v6733_v4  ;;  %v6741_v14 = vmax.f32 %v6677_v19, 0.0  ;;  %v6742_v17 = vmax.f32 %v6678_v51, 0.0 }
 0xe63   :  { %6798 = vst [vmem:[%s12824_s7 + $0x1b0] sm:$0xff] %v6734_v56  ;;  %v6743_v12 = vmax.f32 %v6679_v27, 0.0 }
 0xe64   :  { %6799 = vst [vmem:[%s12824_s7 + $0x1b8] sm:$0xff] %v6735_v49 }
 0xe65   :  { %6800 = vst [vmem:[%s12824_s7 + $0x1c0] sm:$0xff] %v6736_v30 }
 0xe66   :  { %6801 = vst [vmem:[%s12824_s7 + $0x1c8] sm:$0xff] %v6737_v11 }
 0xe67   :  { %6802 = vst [vmem:[%s12824_s7 + $0x1d0] sm:$0xff] %v6738_v54 }
 0xe68   :  { %6803 = vst [vmem:[%s12824_s7 + $0x1d8] sm:$0xff] %v6739_v25 }
 0xe69   :  { %6804 = vst [vmem:[%s12824_s7 + $0x1e0] sm:$0xff] %v6740_v8 }
 0xe6a   :  { %6805 = vst [vmem:[%s12824_s7 + $0x1e8] sm:$0xff] %v6741_v14 }
 0xe6b   :  { %6806 = vst [vmem:[%s12824_s7 + $0x1f0] sm:$0xff] %v6742_v17 }
 0xe6c   :  { %6807 = vst [vmem:[%s12824_s7 + $0x1f8] sm:$0xff] %v6743_v12 }

</bundles_post_ra>
